<compile_context>
chip_gen: v7x
topology: tpu7x:2x2x1
jax: 0.10.0
libtpu: 0.0.40
codegen_flags: <defaults>
</compile_context>

<pallas_src>
import functools
import math

import jax
import jax.numpy as jnp
from jax import lax
from jax.experimental import pallas as pl
from jax.experimental.pallas import tpu as pltpu


# ----------------------------------------------------------------------------
# Raw (PyTorch-shaped) parameter bookkeeping
# ----------------------------------------------------------------------------
def _attn_names(prefix):
    return [prefix + s for s in ("wq_t", "bq", "wk_t", "bk", "wv_t", "bv", "wo_t", "bo")]


PARAM_NAMES = tuple(
    ["w_in_t", "b_in", "pos"]
    + _attn_names("enc_")
    + ["enc_w1_t", "enc_b1", "enc_w2_t", "enc_b2",
       "enc_ln1_g", "enc_ln1_b", "enc_ln2_g", "enc_ln2_b"]
    + _attn_names("dec_sa_")
    + _attn_names("dec_ca_")
    + ["dec_w1_t", "dec_b1", "dec_w2_t", "dec_b2",
       "dec_ln1_g", "dec_ln1_b", "dec_ln2_g", "dec_ln2_b", "dec_ln3_g", "dec_ln3_b"]
    + ["w_out_t", "b_out"]
)


def _param_shapes(d, input_seq_len, output_seq_len):
    dff = 2 * d
    s = {"w_in_t": (1, d), "b_in": (1, d), "pos": (input_seq_len + output_seq_len, d)}
    for pre in ("enc_", "dec_sa_", "dec_ca_"):
        s.update({pre + "wq_t": (d, d), pre + "bq": (1, d),
                  pre + "wk_t": (d, d), pre + "bk": (1, d),
                  pre + "wv_t": (d, d), pre + "bv": (1, d),
                  pre + "wo_t": (d, d), pre + "bo": (1, d)})
    for pre in ("enc_", "dec_"):
        s.update({pre + "w1_t": (d, dff), pre + "b1": (1, dff),
                  pre + "w2_t": (dff, d), pre + "b2": (1, d)})
    for n in ("enc_ln1", "enc_ln2", "dec_ln1", "dec_ln2", "dec_ln3"):
        s.update({n + "_g": (1, d), n + "_b": (1, d)})
    s.update({"w_out_t": (d, 1), "b_out": (1, 1)})
    return s


def init_params(key, d_model, input_seq_len, output_seq_len):
    """Deterministic synthetic parameter init (shapes match the nn.Module)."""
    shapes = _param_shapes(d_model, input_seq_len, output_seq_len)
    keys = jax.random.split(key, len(PARAM_NAMES))
    params = {}
    for name, k in zip(PARAM_NAMES, keys):
        shape = shapes[name]
        if name.endswith("_g"):                       # LayerNorm gamma
            params[name] = jnp.ones(shape, jnp.float32)
        elif "ln" in name and name.endswith("_b"):    # LayerNorm beta
            params[name] = jnp.zeros(shape, jnp.float32)
        else:
            fan_in = max(shape[0], 1)
            params[name] = (jax.random.normal(k, shape, jnp.float32)
                            * (0.5 / math.sqrt(fan_in)))
    return params


# ----------------------------------------------------------------------------
# Packed parameter layout
# ----------------------------------------------------------------------------
ATTN_PREFIXES = ("enc_", "dec_sa_", "dec_ca_")     # index 0, 1, 2 in the stacks

# (name, width-tag) rows of the bias/LayerNorm vector stack.
VEC_SPECS = (
    ("w_in", "d"), ("b_in", "d"),
    ("enc_bqkv", "3d"), ("enc_bo", "d"), ("enc_b1", "dff"), ("enc_b2", "d"),
    ("enc_ln1_g", "d"), ("enc_ln1_b", "d"), ("enc_ln2_g", "d"), ("enc_ln2_b", "d"),
    ("dec_sa_bqkv", "3d"), ("dec_sa_bo", "d"),
    ("dec_ca_bqkv", "3d"), ("dec_ca_bo", "d"),
    ("dec_b1", "dff"), ("dec_b2", "d"),
    ("dec_ln1_g", "d"), ("dec_ln1_b", "d"), ("dec_ln2_g", "d"), ("dec_ln2_b", "d"),
    ("dec_ln3_g", "d"), ("dec_ln3_b", "d"),
    ("w_out", "d"), ("b_out", "1"),
)


def pack_params(params, d_model, n_heads):
    """Pack raw params into stacked arrays. Folds 1/sqrt(hd) into Wq/bq and
    fuses Wq|Wk|Wv (and bq|bk|bv) per attention block."""
    d, dff = d_model, 2 * d_model
    scale = 1.0 / math.sqrt(d // n_heads)

    wqkv, wo = [], []
    for pre in ATTN_PREFIXES:
        wqkv.append(jnp.concatenate(
            [params[pre + "wq_t"] * scale, params[pre + "wk_t"], params[pre + "wv_t"]],
            axis=1))                                           # (d, 3d)
        wo.append(params[pre + "wo_t"])                        # (d, d)
    wqkv = jnp.stack(wqkv)                                     # (3, d, 3d)
    wo = jnp.stack(wo)                                         # (3, d, d)
    w1 = jnp.stack([params["enc_w1_t"], params["dec_w1_t"]])   # (2, d, dff)
    w2 = jnp.stack([params["enc_w2_t"], params["dec_w2_t"]])   # (2, dff, d)

    def raw_vec(name):
        if name == "w_in":
            return params["w_in_t"].reshape(-1)
        if name == "w_out":
            return params["w_out_t"].reshape(-1)
        if name.endswith("bqkv"):
            pre = name[:-4]                                    # "enc_" / "dec_sa_" / "dec_ca_"
            return jnp.concatenate([
                params[pre + "bq"].reshape(-1) * scale,
                params[pre + "bk"].reshape(-1),
                params[pre + "bv"].reshape(-1)])
        return params[name].reshape(-1)

    width = max(3 * d, dff)
    rows = []
    for name, _ in VEC_SPECS:
        v = raw_vec(name).astype(jnp.float32)
        rows.append(jnp.pad(v, (0, width - v.shape[0])))
    vecs = jnp.stack(rows)                                     # (NV, width)
    return wqkv, wo, w1, w2, vecs


# ----------------------------------------------------------------------------
# Pallas kernel
# ----------------------------------------------------------------------------
def _transformer_kernel(n_heads, d_model,
                        src_ref, tgt_ref, pos_ref,
                        wqkv_ref, wo_ref, w1_ref, w2_ref, vec_ref,
                        out_ref):
    d = d_model
    dff = 2 * d
    hd = d // n_heads
    TB, S = src_ref.shape
    T = tgt_ref.shape[1]

    widths = {"d": d, "dff": dff, "3d": 3 * d, "1": 1}
    vidx = {name: i for i, (name, _) in enumerate(VEC_SPECS)}
    vwid = {name: widths[tag] for name, tag in VEC_SPECS}

    def vrow(name):
        # Slice the packed bias/LN row straight out of the ref (no full load).
        return vec_ref[vidx[name], :vwid[name]]

    def recip(v):
        return pl.reciprocal(v, approx=True)

    def mm(x, w):
        shp = x.shape
        y = jnp.dot(x.reshape(-1, shp[-1]), w, preferred_element_type=jnp.float32)
        return y.reshape(shp[:-1] + (w.shape[-1],))

    def linear(x, w, b):
        return mm(x, w) + b

    def layer_norm(x, gname, bname, eps=1e-5):
        mu = jnp.mean(x, axis=-1, keepdims=True)
        xc = x - mu
        var = jnp.mean(xc * xc, axis=-1, keepdims=True)
        return xc * lax.rsqrt(var + eps) * vrow(gname) + vrow(bname)

    def softmax(s):
        m = jnp.max(s, axis=-1, keepdims=True)
        e = jnp.exp(s - m)
        return e * recip(jnp.sum(e, axis=-1, keepdims=True))

    def mha(q_in, kv_in, idx, prefix, mask=None):
        wqkv = wqkv_ref[idx]                       # (d, 3d)  — Q part pre-scaled
        bqkv = vrow(prefix + "bqkv")               # (3d,)
        if q_in is kv_in:                          # self-attention: one fused matmul
            qkv = linear(q_in, wqkv, bqkv)
            q, k, v = qkv[..., :d], qkv[..., d:2 * d], qkv[..., 2 * d:]
        else:                                      # cross-attention: Q and KV separately
            q = linear(q_in, wqkv[:, :d], bqkv[:d])
            kv = linear(kv_in, wqkv[:, d:], bqkv[d:])
            k, v = kv[..., :d], kv[..., d:]
        wo = wo_ref[idx]                           # (d, d)
        o = None
        for h in range(n_heads):                   # static unroll (n_heads == 2)
            sl = slice(h * hd, (h + 1) * hd)
            s = jnp.einsum("bqd,bkd->bqk", q[..., sl], k[..., sl],
                           preferred_element_type=jnp.float32)
            if mask is not None:
                s = s + mask
            a = softmax(s)
            head = jnp.einsum("bqk,bkd->bqd", a, v[..., sl],
                              preferred_element_type=jnp.float32)
            c = mm(head, wo[sl, :])                # per-head Wo block (no concat)
            o = c if o is None else o + c
        return o + vrow(prefix + "bo")

    # ---- input projection (Linear(1, d)) + positional encoding --------------
    w_in = vrow("w_in")                            # (d,)
    b_in = vrow("b_in")                            # (d,)
    x = src_ref[...][..., None] * w_in + b_in + pos_ref[:S, :]     # (TB, S, d)
    y = tgt_ref[...][..., None] * w_in + b_in + pos_ref[:T, :]     # (TB, T, d)

    # Causal mask built in-kernel (no extra HBM input stream).
    rows = lax.broadcasted_iota(jnp.int32, (T, T), 0)
    cols = lax.broadcasted_iota(jnp.int32, (T, T), 1)
    mask = jnp.where(cols <= rows, 0.0, -1e30).astype(jnp.float32)

    # ---- encoder layer (post-norm) -------------------------------------------
    sa = mha(x, x, 0, "enc_")
    x = layer_norm(x + sa, "enc_ln1_g", "enc_ln1_b")
    ff = linear(jnp.maximum(linear(x, w1_ref[0], vrow("enc_b1")), 0.0),
                w2_ref[0], vrow("enc_b2"))
    mem = layer_norm(x + ff, "enc_ln2_g", "enc_ln2_b")

    # ---- decoder layer (post-norm: causal self-attn, cross-attn, FFN) -------
    sa = mha(y, y, 1, "dec_sa_", mask=mask)
    y = layer_norm(y + sa, "dec_ln1_g", "dec_ln1_b")
    ca = mha(y, mem, 2, "dec_ca_")
    y = layer_norm(y + ca, "dec_ln2_g", "dec_ln2_b")
    ff = linear(jnp.maximum(linear(y, w1_ref[1], vrow("dec_b1")), 0.0),
                w2_ref[1], vrow("dec_b2"))
    y = layer_norm(y + ff, "dec_ln3_g", "dec_ln3_b")

    # ---- output projection (Linear(d, 1)); lane-dense (1, TB*T) store -------
    out = jnp.sum(y * vrow("w_out"), axis=-1) + vrow("b_out")       # (TB, T)
    out_ref[...] = out.reshape(1, TB * T).astype(out_ref.dtype)


# ----------------------------------------------------------------------------
# Wrapper
# ----------------------------------------------------------------------------
def _round_up(x, m):
    return ((x + m - 1) // m) * m


def transformer_forward(src, tgt, params, n_heads, *, batch_tile=128):
    """src: (B, S, 1), tgt: (B, T, 1) -> (B, T, 1)."""
    B, S, _ = src.shape
    T = tgt.shape[1]
    d = params["w_in_t"].shape[-1]
    dff = 2 * d

    wqkv, wo, w1, w2, vecs = pack_params(params, d, n_heads)
    pos = params["pos"]

    # Squeeze trailing singleton dim -> contiguous (B, S)/(B, T) DMAs.
    src2 = src[..., 0]
    tgt2 = tgt[..., 0]

    # Batch tile: TB*T multiple of 128 (lane-dense output) and TB multiple of 8.
    tb_unit = math.lcm(8, 128 // math.gcd(128, T))
    tb = max(tb_unit, _round_up(min(batch_tile, max(B, 1)), tb_unit))
    if B > tb_unit:
        # Prefer >= 2 grid steps so v7x megacore can shard batch tiles.
        tb = min(tb, max(tb_unit, _round_up((B + 1) // 2, tb_unit)))
    Bp = _round_up(B, tb)
    if Bp != B:                       # zero-pad batch; padded rows are discarded
        src2 = jnp.pad(src2, ((0, Bp - B), (0, 0)))
        tgt2 = jnp.pad(tgt2, ((0, Bp - B), (0, 0)))
    grid = (Bp // tb,)

    # Advisory cost estimate for XLA's scheduler.
    def attn_flops(lq, lk):
        return (2 * lq * d * 3 * d + 2 * lk * d * 2 * d   # projections (upper bound)
                + 4 * lq * lk * d + 2 * lq * d * d)        # scores+AV + output proj
    per_row = (2 * S * d + 2 * T * d
               + attn_flops(S, S) + 4 * S * d * dff
               + attn_flops(T, T)
               + attn_flops(T, S) + 4 * T * d * dff
               + 2 * T * d)
    param_bytes = 4 * (wqkv.size + wo.size + w1.size + w2.size + vecs.size + pos.size)
    cost = pl.CostEstimate(
        flops=int(Bp * per_row),
        transcendentals=int(Bp * n_heads * (S * S + T * T + T * S)),
        bytes_accessed=int(4 * Bp * (S + 2 * T) + param_bytes))

    kernel = functools.partial(_transformer_kernel, n_heads, d)
    out2 = pl.pallas_call(
        kernel,
        out_shape=jax.ShapeDtypeStruct((Bp // tb, tb * T), jnp.float32),
        grid=grid,
        in_specs=[
            pl.BlockSpec((tb, S), lambda b: (b, 0)),           # src tile (squeezed)
            pl.BlockSpec((tb, T), lambda b: (b, 0)),           # tgt tile (squeezed)
            pl.BlockSpec(pos.shape, lambda b: (0, 0)),         # positional table
            pl.BlockSpec(wqkv.shape, lambda b: (0, 0, 0)),     # fused QKV weights
            pl.BlockSpec(wo.shape, lambda b: (0, 0, 0)),       # attention Wo stack
            pl.BlockSpec(w1.shape, lambda b: (0, 0, 0)),       # FFN w1 stack
            pl.BlockSpec(w2.shape, lambda b: (0, 0, 0)),       # FFN w2 stack
            pl.BlockSpec(vecs.shape, lambda b: (0, 0)),        # bias/LN vector stack
        ],
        out_specs=pl.BlockSpec((1, tb * T), lambda b: (b, 0)), # lane-dense output
        compiler_params=pltpu.CompilerParams(
            dimension_semantics=("parallel",)),
        cost_estimate=cost,
    )(src2, tgt2, pos, wqkv, wo, w1, w2, vecs)

    return out2.reshape(Bp, T)[:B, :, None]


# ----------------------------------------------------------------------------
# Pure-JAX reference (raw params, exact softmax, explicit scale)
# ----------------------------------------------------------------------------
def reference_forward(src, tgt, params, n_heads):
    d = params["w_in_t"].shape[-1]
    S, T = src.shape[1], tgt.shape[1]
    hd = d // n_heads
    scale = 1.0 / math.sqrt(hd)

    def linear(x, w, b):
        return jnp.einsum("...i,ij->...j", x, w) + b.reshape(-1)

    def layer_norm(x, g, b, eps=1e-5):
        mu = jnp.mean(x, axis=-1, keepdims=True)
        var = jnp.mean((x - mu) ** 2, axis=-1, keepdims=True)
        return (x - mu) / jnp.sqrt(var + eps) * g.reshape(-1) + b.reshape(-1)

    def mha(q_in, k_in, v_in, pre, mask=None):
        q = linear(q_in, params[pre + "wq_t"], params[pre + "bq"]) * scale
        k = linear(k_in, params[pre + "wk_t"], params[pre + "bk"])
        v = linear(v_in, params[pre + "wv_t"], params[pre + "bv"])
        heads = []
        for h in range(n_heads):
            sl = slice(h * hd, (h + 1) * hd)
            s = jnp.einsum("bqd,bkd->bqk", q[..., sl], k[..., sl])
            if mask is not None:
                s = s + mask
            a = jax.nn.softmax(s, axis=-1)
            heads.append(jnp.einsum("bqk,bkd->bqd", a, v[..., sl]))
        o = jnp.concatenate(heads, axis=-1)
        return linear(o, params[pre + "wo_t"], params[pre + "bo"])

    pos = params["pos"]
    x = linear(src, params["w_in_t"], params["b_in"]) + pos[None, :S]
    y = linear(tgt, params["w_in_t"], params["b_in"]) + pos[None, :T]

    mask = jnp.where(jnp.arange(T)[None, :] <= jnp.arange(T)[:, None], 0.0, -1e30)

    sa = mha(x, x, x, "enc_")
    x = layer_norm(x + sa, params["enc_ln1_g"], params["enc_ln1_b"])
    ff = linear(jax.nn.relu(linear(x, params["enc_w1_t"], params["enc_b1"])),
                params["enc_w2_t"], params["enc_b2"])
    mem = layer_norm(x + ff, params["enc_ln2_g"], params["enc_ln2_b"])

    sa = mha(y, y, y, "dec_sa_", mask=mask)
    y = layer_norm(y + sa, params["dec_ln1_g"], params["dec_ln1_b"])
    ca = mha(y, mem, mem, "dec_ca_")
    y = layer_norm(y + ca, params["dec_ln2_g"], params["dec_ln2_b"])
    ff = linear(jax.nn.relu(linear(y, params["dec_w1_t"], params["dec_b1"])),
                params["dec_w2_t"], params["dec_b2"])
    y = layer_norm(y + ff, params["dec_ln3_g"], params["dec_ln3_b"])

    return linear(y, params["w_out_t"], params["b_out"])


# ----------------------------------------------------------------------------
if __name__ == "__main__":
    d_model, n_heads = 8, 2
    input_seq_len, output_seq_len = 8, 8
    batch = 2

    key = jax.random.PRNGKey(0)
    kp, ks, kt = jax.random.split(key, 3)
    params = init_params(kp, d_model, input_seq_len, output_seq_len)
    src = jax.random.normal(ks, (batch, input_seq_len, 1), jnp.float32)
    tgt = jax.random.normal(kt, (batch, output_seq_len, 1), jnp.float32)

    out = jax.block_until_ready(transformer_forward(src, tgt, params, n_heads))
    ref = jax.block_until_ready(reference_forward(src, tgt, params, n_heads))

    assert out.shape == (batch, output_seq_len, 1), out.shape
    assert bool(jnp.all(jnp.isfinite(out)))
    max_err = float(jnp.max(jnp.abs(out - ref)))
    assert max_err < 1e-2, f"mismatch vs reference: {max_err}"

    print("KERNEL_OK")
</pallas_src>

<mosaic_0001>
module attributes {stable_mosaic.version = 11 : i64} {
  func.func @_transformer_kernel(%arg0: i32, %arg1: memref<16x8xf32, #tpu.memory_space<vmem>>, %arg2: memref<16x8xf32, #tpu.memory_space<vmem>>, %arg3: memref<16x8xf32, #tpu.memory_space<vmem>>, %arg4: memref<3x8x24xf32, #tpu.memory_space<vmem>>, %arg5: memref<3x8x8xf32, #tpu.memory_space<vmem>>, %arg6: memref<2x8x16xf32, #tpu.memory_space<vmem>>, %arg7: memref<2x16x8xf32, #tpu.memory_space<vmem>>, %arg8: memref<24x24xf32, #tpu.memory_space<vmem>>, %arg9: memref<1x128xf32, #tpu.memory_space<vmem>>) attributes {dimension_semantics = [#tpu.dimension_semantics<parallel>], iteration_bounds = array<i64: 1>, scalar_prefetch = 0 : i64, scratch_operands = 0 : i64, tpu.core_type = #tpu.core_type<tc>, window_params = [{transform_indices = @transform_0, window_bounds = array<i64: 16, 8>}, {transform_indices = @transform_1, window_bounds = array<i64: 16, 8>}, {pipeline_mode = #tpu.pipeline_mode<synchronous>, transform_indices = @transform_2, window_bounds = array<i64: 16, 8>}, {pipeline_mode = #tpu.pipeline_mode<synchronous>, transform_indices = @transform_3, window_bounds = array<i64: 3, 8, 24>}, {pipeline_mode = #tpu.pipeline_mode<synchronous>, transform_indices = @transform_4, window_bounds = array<i64: 3, 8, 8>}, {pipeline_mode = #tpu.pipeline_mode<synchronous>, transform_indices = @transform_5, window_bounds = array<i64: 2, 8, 16>}, {pipeline_mode = #tpu.pipeline_mode<synchronous>, transform_indices = @transform_6, window_bounds = array<i64: 2, 16, 8>}, {pipeline_mode = #tpu.pipeline_mode<synchronous>, transform_indices = @transform_7, window_bounds = array<i64: 24, 24>}, {transform_indices = @transform_8, window_bounds = array<i64: 1, 128>}]} {
    %c0 = arith.constant 0 : index
    %c0_0 = arith.constant 0 : index
    %0 = vector.load %arg8[%c0, %c0_0] : memref<24x24xf32, #tpu.memory_space<vmem>>, vector<1x8xf32>
    %1 = vector.shape_cast %0 : vector<1x8xf32> to vector<8xf32>
    %c1 = arith.constant 1 : index
    %c0_1 = arith.constant 0 : index
    %2 = vector.load %arg8[%c1, %c0_1] : memref<24x24xf32, #tpu.memory_space<vmem>>, vector<1x8xf32>
    %3 = vector.shape_cast %2 : vector<1x8xf32> to vector<8xf32>
    %c0_2 = arith.constant 0 : index
    %c0_3 = arith.constant 0 : index
    %4 = vector.load %arg1[%c0_2, %c0_3] : memref<16x8xf32, #tpu.memory_space<vmem>>, vector<16x8xf32>
    %5 = vector.shape_cast %4 : vector<16x8xf32> to vector<16x8x1xf32>
    %6 = vector.shape_cast %1 : vector<8xf32> to vector<1x1x8xf32>
    %7 = vector.broadcast %5 : vector<16x8x1xf32> to vector<16x8x8xf32>
    %8 = vector.broadcast %6 : vector<1x1x8xf32> to vector<16x8x8xf32>
    %9 = arith.mulf %7, %8 : vector<16x8x8xf32>
    %10 = vector.shape_cast %3 : vector<8xf32> to vector<1x1x8xf32>
    %11 = vector.broadcast %10 : vector<1x1x8xf32> to vector<16x8x8xf32>
    %12 = arith.addf %9, %11 : vector<16x8x8xf32>
    %c0_4 = arith.constant 0 : index
    %c0_5 = arith.constant 0 : index
    %13 = vector.load %arg3[%c0_4, %c0_5] : memref<16x8xf32, #tpu.memory_space<vmem>>, vector<8x8xf32>
    %14 = vector.shape_cast %13 : vector<8x8xf32> to vector<1x8x8xf32>
    %15 = vector.broadcast %14 : vector<1x8x8xf32> to vector<16x8x8xf32>
    %16 = arith.addf %12, %15 : vector<16x8x8xf32>
    %c0_6 = arith.constant 0 : index
    %c0_7 = arith.constant 0 : index
    %17 = vector.load %arg2[%c0_6, %c0_7] : memref<16x8xf32, #tpu.memory_space<vmem>>, vector<16x8xf32>
    %18 = vector.shape_cast %17 : vector<16x8xf32> to vector<16x8x1xf32>
    %19 = vector.shape_cast %1 : vector<8xf32> to vector<1x1x8xf32>
    %20 = vector.broadcast %18 : vector<16x8x1xf32> to vector<16x8x8xf32>
    %21 = vector.broadcast %19 : vector<1x1x8xf32> to vector<16x8x8xf32>
    %22 = arith.mulf %20, %21 : vector<16x8x8xf32>
    %23 = vector.shape_cast %3 : vector<8xf32> to vector<1x1x8xf32>
    %24 = vector.broadcast %23 : vector<1x1x8xf32> to vector<16x8x8xf32>
    %25 = arith.addf %22, %24 : vector<16x8x8xf32>
    %c0_8 = arith.constant 0 : index
    %c0_9 = arith.constant 0 : index
    %26 = vector.load %arg3[%c0_8, %c0_9] : memref<16x8xf32, #tpu.memory_space<vmem>>, vector<8x8xf32>
    %27 = vector.shape_cast %26 : vector<8x8xf32> to vector<1x8x8xf32>
    %28 = vector.broadcast %27 : vector<1x8x8xf32> to vector<16x8x8xf32>
    %29 = arith.addf %25, %28 : vector<16x8x8xf32>
    %30 = tpu.iota {dimensions = array<i32: 0>} : vector<8x8xi32>
    %31 = tpu.iota {dimensions = array<i32: 1>} : vector<8x8xi32>
    %32 = arith.cmpi sle, %31, %30 : vector<8x8xi32>
    %cst = arith.constant 0.000000e+00 : f32
    %cst_10 = arith.constant -1.000000e+30 : f32
    %33 = vector.broadcast %cst : f32 to vector<8x8xf32>
    %34 = vector.broadcast %cst_10 : f32 to vector<8x8xf32>
    %35 = arith.select %32, %33, %34 : vector<8x8xi1>, vector<8x8xf32>
    %c0_11 = arith.constant 0 : index
    %c0_12 = arith.constant 0 : index
    %c0_13 = arith.constant 0 : index
    %36 = vector.load %arg4[%c0_11, %c0_12, %c0_13] : memref<3x8x24xf32, #tpu.memory_space<vmem>>, vector<1x8x24xf32>
    %37 = vector.shape_cast %36 : vector<1x8x24xf32> to vector<8x24xf32>
    %c2 = arith.constant 2 : index
    %c0_14 = arith.constant 0 : index
    %38 = vector.load %arg8[%c2, %c0_14] : memref<24x24xf32, #tpu.memory_space<vmem>>, vector<1x24xf32>
    %39 = vector.shape_cast %38 : vector<1x24xf32> to vector<24xf32>
    %40 = vector.shape_cast %16 : vector<16x8x8xf32> to vector<128x8xf32>
    %cst_15 = arith.constant dense<0.000000e+00> : vector<128x24xf32>
    %41 = tpu.matmul %40, %37, %cst_15 {dimension_numbers = #tpu.dot_dimension_numbers<[1], [0], [0], [1], [0, 0, 1, 1], [], []>} : vector<128x8xf32>, vector<8x24xf32>, vector<128x24xf32> -> vector<128x24xf32>
    %42 = vector.shape_cast %41 : vector<128x24xf32> to vector<16x8x24xf32>
    %43 = vector.shape_cast %39 : vector<24xf32> to vector<1x1x24xf32>
    %44 = vector.broadcast %43 : vector<1x1x24xf32> to vector<16x8x24xf32>
    %45 = arith.addf %42, %44 : vector<16x8x24xf32>
    %46 = vector.extract_strided_slice %45 {offsets = [0, 0, 0], sizes = [16, 8, 8], strides = [1, 1, 1]} : vector<16x8x24xf32> to vector<16x8x8xf32>
    %47 = vector.extract_strided_slice %45 {offsets = [0, 0, 8], sizes = [16, 8, 8], strides = [1, 1, 1]} : vector<16x8x24xf32> to vector<16x8x8xf32>
    %48 = vector.extract_strided_slice %45 {offsets = [0, 0, 16], sizes = [16, 8, 8], strides = [1, 1, 1]} : vector<16x8x24xf32> to vector<16x8x8xf32>
    %c0_16 = arith.constant 0 : index
    %c0_17 = arith.constant 0 : index
    %c0_18 = arith.constant 0 : index
    %49 = vector.load %arg5[%c0_16, %c0_17, %c0_18] : memref<3x8x8xf32, #tpu.memory_space<vmem>>, vector<1x8x8xf32>
    %50 = vector.shape_cast %49 : vector<1x8x8xf32> to vector<8x8xf32>
    %51 = vector.extract_strided_slice %46 {offsets = [0, 0, 0], sizes = [16, 8, 4], strides = [1, 1, 1]} : vector<16x8x8xf32> to vector<16x8x4xf32>
    %52 = vector.extract_strided_slice %47 {offsets = [0, 0, 0], sizes = [16, 8, 4], strides = [1, 1, 1]} : vector<16x8x8xf32> to vector<16x8x4xf32>
    "tpu.trace_start"() <{level = 10 : i32, message = "bqd,bkd->bqk"}> : () -> ()
    %cst_19 = arith.constant dense<0.000000e+00> : vector<16x8x8xf32>
    %53 = tpu.matmul %51, %52, %cst_19 {dimension_numbers = #tpu.dot_dimension_numbers<[2], [2], [1], [1], [0, 0, 0, 1, 1, 1], [0], [0]>} : vector<16x8x4xf32>, vector<16x8x4xf32>, vector<16x8x8xf32> -> vector<16x8x8xf32>
    "tpu.trace_stop"() : () -> ()
    %cst_20 = arith.constant dense<0xFF800000> : vector<16x8xf32>
    %54 = vector.multi_reduction <maximumf>, %53, %cst_20 [2] : vector<16x8x8xf32> to vector<16x8xf32>
    %55 = vector.shape_cast %54 : vector<16x8xf32> to vector<16x8x1xf32>
    %56 = vector.broadcast %55 : vector<16x8x1xf32> to vector<16x8x8xf32>
    %57 = arith.subf %53, %56 : vector<16x8x8xf32>
    %58 = math.exp %57 : vector<16x8x8xf32>
    %cst_21 = arith.constant dense<0.000000e+00> : vector<16x8xf32>
    %59 = vector.multi_reduction <add>, %58, %cst_21 [2] : vector<16x8x8xf32> to vector<16x8xf32>
    %60 = vector.shape_cast %59 : vector<16x8xf32> to vector<16x8x1xf32>
    %61 = tpu.reciprocal %60 {approx = true} : vector<16x8x1xf32> -> vector<16x8x1xf32>
    %62 = vector.broadcast %61 : vector<16x8x1xf32> to vector<16x8x8xf32>
    %63 = arith.mulf %58, %62 : vector<16x8x8xf32>
    %64 = vector.extract_strided_slice %48 {offsets = [0, 0, 0], sizes = [16, 8, 4], strides = [1, 1, 1]} : vector<16x8x8xf32> to vector<16x8x4xf32>
    "tpu.trace_start"() <{level = 10 : i32, message = "bqk,bkd->bqd"}> : () -> ()
    %cst_22 = arith.constant dense<0.000000e+00> : vector<16x8x4xf32>
    %65 = tpu.matmul %63, %64, %cst_22 {dimension_numbers = #tpu.dot_dimension_numbers<[2], [1], [1], [2], [0, 0, 0, 1, 1, 2], [0], [0]>} : vector<16x8x8xf32>, vector<16x8x4xf32>, vector<16x8x4xf32> -> vector<16x8x4xf32>
    "tpu.trace_stop"() : () -> ()
    %66 = vector.extract_strided_slice %50 {offsets = [0, 0], sizes = [4, 8], strides = [1, 1]} : vector<8x8xf32> to vector<4x8xf32>
    %67 = vector.shape_cast %65 : vector<16x8x4xf32> to vector<128x4xf32>
    %cst_23 = arith.constant dense<0.000000e+00> : vector<128x8xf32>
    %68 = tpu.matmul %67, %66, %cst_23 {dimension_numbers = #tpu.dot_dimension_numbers<[1], [0], [0], [1], [0, 0, 1, 1], [], []>} : vector<128x4xf32>, vector<4x8xf32>, vector<128x8xf32> -> vector<128x8xf32>
    %69 = vector.shape_cast %68 : vector<128x8xf32> to vector<16x8x8xf32>
    %70 = vector.extract_strided_slice %46 {offsets = [0, 0, 4], sizes = [16, 8, 4], strides = [1, 1, 1]} : vector<16x8x8xf32> to vector<16x8x4xf32>
    %71 = vector.extract_strided_slice %47 {offsets = [0, 0, 4], sizes = [16, 8, 4], strides = [1, 1, 1]} : vector<16x8x8xf32> to vector<16x8x4xf32>
    "tpu.trace_start"() <{level = 10 : i32, message = "bqd,bkd->bqk"}> : () -> ()
    %cst_24 = arith.constant dense<0.000000e+00> : vector<16x8x8xf32>
    %72 = tpu.matmul %70, %71, %cst_24 {dimension_numbers = #tpu.dot_dimension_numbers<[2], [2], [1], [1], [0, 0, 0, 1, 1, 1], [0], [0]>} : vector<16x8x4xf32>, vector<16x8x4xf32>, vector<16x8x8xf32> -> vector<16x8x8xf32>
    "tpu.trace_stop"() : () -> ()
    %cst_25 = arith.constant dense<0xFF800000> : vector<16x8xf32>
    %73 = vector.multi_reduction <maximumf>, %72, %cst_25 [2] : vector<16x8x8xf32> to vector<16x8xf32>
    %74 = vector.shape_cast %73 : vector<16x8xf32> to vector<16x8x1xf32>
    %75 = vector.broadcast %74 : vector<16x8x1xf32> to vector<16x8x8xf32>
    %76 = arith.subf %72, %75 : vector<16x8x8xf32>
    %77 = math.exp %76 : vector<16x8x8xf32>
    %cst_26 = arith.constant dense<0.000000e+00> : vector<16x8xf32>
    %78 = vector.multi_reduction <add>, %77, %cst_26 [2] : vector<16x8x8xf32> to vector<16x8xf32>
    %79 = vector.shape_cast %78 : vector<16x8xf32> to vector<16x8x1xf32>
    %80 = tpu.reciprocal %79 {approx = true} : vector<16x8x1xf32> -> vector<16x8x1xf32>
    %81 = vector.broadcast %80 : vector<16x8x1xf32> to vector<16x8x8xf32>
    %82 = arith.mulf %77, %81 : vector<16x8x8xf32>
    %83 = vector.extract_strided_slice %48 {offsets = [0, 0, 4], sizes = [16, 8, 4], strides = [1, 1, 1]} : vector<16x8x8xf32> to vector<16x8x4xf32>
    "tpu.trace_start"() <{level = 10 : i32, message = "bqk,bkd->bqd"}> : () -> ()
    %cst_27 = arith.constant dense<0.000000e+00> : vector<16x8x4xf32>
    %84 = tpu.matmul %82, %83, %cst_27 {dimension_numbers = #tpu.dot_dimension_numbers<[2], [1], [1], [2], [0, 0, 0, 1, 1, 2], [0], [0]>} : vector<16x8x8xf32>, vector<16x8x4xf32>, vector<16x8x4xf32> -> vector<16x8x4xf32>
    "tpu.trace_stop"() : () -> ()
    %85 = vector.extract_strided_slice %50 {offsets = [4, 0], sizes = [4, 8], strides = [1, 1]} : vector<8x8xf32> to vector<4x8xf32>
    %86 = vector.shape_cast %84 : vector<16x8x4xf32> to vector<128x4xf32>
    %cst_28 = arith.constant dense<0.000000e+00> : vector<128x8xf32>
    %87 = tpu.matmul %86, %85, %cst_28 {dimension_numbers = #tpu.dot_dimension_numbers<[1], [0], [0], [1], [0, 0, 1, 1], [], []>} : vector<128x4xf32>, vector<4x8xf32>, vector<128x8xf32> -> vector<128x8xf32>
    %88 = vector.shape_cast %87 : vector<128x8xf32> to vector<16x8x8xf32>
    %89 = arith.addf %69, %88 : vector<16x8x8xf32>
    %c3 = arith.constant 3 : index
    %c0_29 = arith.constant 0 : index
    %90 = vector.load %arg8[%c3, %c0_29] : memref<24x24xf32, #tpu.memory_space<vmem>>, vector<1x8xf32>
    %91 = vector.shape_cast %90 : vector<1x8xf32> to vector<8xf32>
    %92 = vector.shape_cast %91 : vector<8xf32> to vector<1x1x8xf32>
    %93 = vector.broadcast %92 : vector<1x1x8xf32> to vector<16x8x8xf32>
    %94 = arith.addf %89, %93 : vector<16x8x8xf32>
    %95 = arith.addf %16, %94 : vector<16x8x8xf32>
    %cst_30 = arith.constant dense<0.000000e+00> : vector<16x8xf32>
    %96 = vector.multi_reduction <add>, %95, %cst_30 [2] : vector<16x8x8xf32> to vector<16x8xf32>
    %97 = vector.shape_cast %96 : vector<16x8xf32> to vector<16x8x1xf32>
    %cst_31 = arith.constant 8.000000e+00 : f32
    %98 = vector.broadcast %cst_31 : f32 to vector<16x8x1xf32>
    %99 = arith.divf %97, %98 : vector<16x8x1xf32>
    %100 = vector.broadcast %99 : vector<16x8x1xf32> to vector<16x8x8xf32>
    %101 = arith.subf %95, %100 : vector<16x8x8xf32>
    %102 = arith.mulf %101, %101 : vector<16x8x8xf32>
    %cst_32 = arith.constant dense<0.000000e+00> : vector<16x8xf32>
    %103 = vector.multi_reduction <add>, %102, %cst_32 [2] : vector<16x8x8xf32> to vector<16x8xf32>
    %104 = vector.shape_cast %103 : vector<16x8xf32> to vector<16x8x1xf32>
    %cst_33 = arith.constant 8.000000e+00 : f32
    %105 = vector.broadcast %cst_33 : f32 to vector<16x8x1xf32>
    %106 = arith.divf %104, %105 : vector<16x8x1xf32>
    %cst_34 = arith.constant 9.99999974E-6 : f32
    %107 = vector.broadcast %cst_34 : f32 to vector<16x8x1xf32>
    %108 = arith.addf %106, %107 : vector<16x8x1xf32>
    %109 = math.rsqrt %108 : vector<16x8x1xf32>
    %110 = vector.broadcast %109 : vector<16x8x1xf32> to vector<16x8x8xf32>
    %111 = arith.mulf %101, %110 : vector<16x8x8xf32>
    %c6 = arith.constant 6 : index
    %c0_35 = arith.constant 0 : index
    %112 = vector.load %arg8[%c6, %c0_35] : memref<24x24xf32, #tpu.memory_space<vmem>>, vector<1x8xf32>
    %113 = vector.shape_cast %112 : vector<1x8xf32> to vector<8xf32>
    %114 = vector.shape_cast %113 : vector<8xf32> to vector<1x1x8xf32>
    %115 = vector.broadcast %114 : vector<1x1x8xf32> to vector<16x8x8xf32>
    %116 = arith.mulf %111, %115 : vector<16x8x8xf32>
    %c7 = arith.constant 7 : index
    %c0_36 = arith.constant 0 : index
    %117 = vector.load %arg8[%c7, %c0_36] : memref<24x24xf32, #tpu.memory_space<vmem>>, vector<1x8xf32>
    %118 = vector.shape_cast %117 : vector<1x8xf32> to vector<8xf32>
    %119 = vector.shape_cast %118 : vector<8xf32> to vector<1x1x8xf32>
    %120 = vector.broadcast %119 : vector<1x1x8xf32> to vector<16x8x8xf32>
    %121 = arith.addf %116, %120 : vector<16x8x8xf32>
    %c0_37 = arith.constant 0 : index
    %c0_38 = arith.constant 0 : index
    %c0_39 = arith.constant 0 : index
    %122 = vector.load %arg6[%c0_37, %c0_38, %c0_39] : memref<2x8x16xf32, #tpu.memory_space<vmem>>, vector<1x8x16xf32>
    %123 = vector.shape_cast %122 : vector<1x8x16xf32> to vector<8x16xf32>
    %c4 = arith.constant 4 : index
    %c0_40 = arith.constant 0 : index
    %124 = vector.load %arg8[%c4, %c0_40] : memref<24x24xf32, #tpu.memory_space<vmem>>, vector<1x16xf32>
    %125 = vector.shape_cast %124 : vector<1x16xf32> to vector<16xf32>
    %126 = vector.shape_cast %121 : vector<16x8x8xf32> to vector<128x8xf32>
    %cst_41 = arith.constant dense<0.000000e+00> : vector<128x16xf32>
    %127 = tpu.matmul %126, %123, %cst_41 {dimension_numbers = #tpu.dot_dimension_numbers<[1], [0], [0], [1], [0, 0, 1, 1], [], []>} : vector<128x8xf32>, vector<8x16xf32>, vector<128x16xf32> -> vector<128x16xf32>
    %128 = vector.shape_cast %127 : vector<128x16xf32> to vector<16x8x16xf32>
    %129 = vector.shape_cast %125 : vector<16xf32> to vector<1x1x16xf32>
    %130 = vector.broadcast %129 : vector<1x1x16xf32> to vector<16x8x16xf32>
    %131 = arith.addf %128, %130 : vector<16x8x16xf32>
    %cst_42 = arith.constant 0.000000e+00 : f32
    %132 = vector.broadcast %cst_42 : f32 to vector<16x8x16xf32>
    %133 = arith.maximumf %131, %132 : vector<16x8x16xf32>
    %c0_43 = arith.constant 0 : index
    %c0_44 = arith.constant 0 : index
    %c0_45 = arith.constant 0 : index
    %134 = vector.load %arg7[%c0_43, %c0_44, %c0_45] : memref<2x16x8xf32, #tpu.memory_space<vmem>>, vector<1x16x8xf32>
    %135 = vector.shape_cast %134 : vector<1x16x8xf32> to vector<16x8xf32>
    %c5 = arith.constant 5 : index
    %c0_46 = arith.constant 0 : index
    %136 = vector.load %arg8[%c5, %c0_46] : memref<24x24xf32, #tpu.memory_space<vmem>>, vector<1x8xf32>
    %137 = vector.shape_cast %136 : vector<1x8xf32> to vector<8xf32>
    %138 = vector.shape_cast %133 : vector<16x8x16xf32> to vector<128x16xf32>
    %cst_47 = arith.constant dense<0.000000e+00> : vector<128x8xf32>
    %139 = tpu.matmul %138, %135, %cst_47 {dimension_numbers = #tpu.dot_dimension_numbers<[1], [0], [0], [1], [0, 0, 1, 1], [], []>} : vector<128x16xf32>, vector<16x8xf32>, vector<128x8xf32> -> vector<128x8xf32>
    %140 = vector.shape_cast %139 : vector<128x8xf32> to vector<16x8x8xf32>
    %141 = vector.shape_cast %137 : vector<8xf32> to vector<1x1x8xf32>
    %142 = vector.broadcast %141 : vector<1x1x8xf32> to vector<16x8x8xf32>
    %143 = arith.addf %140, %142 : vector<16x8x8xf32>
    %144 = arith.addf %121, %143 : vector<16x8x8xf32>
    %cst_48 = arith.constant dense<0.000000e+00> : vector<16x8xf32>
    %145 = vector.multi_reduction <add>, %144, %cst_48 [2] : vector<16x8x8xf32> to vector<16x8xf32>
    %146 = vector.shape_cast %145 : vector<16x8xf32> to vector<16x8x1xf32>
    %cst_49 = arith.constant 8.000000e+00 : f32
    %147 = vector.broadcast %cst_49 : f32 to vector<16x8x1xf32>
    %148 = arith.divf %146, %147 : vector<16x8x1xf32>
    %149 = vector.broadcast %148 : vector<16x8x1xf32> to vector<16x8x8xf32>
    %150 = arith.subf %144, %149 : vector<16x8x8xf32>
    %151 = arith.mulf %150, %150 : vector<16x8x8xf32>
    %cst_50 = arith.constant dense<0.000000e+00> : vector<16x8xf32>
    %152 = vector.multi_reduction <add>, %151, %cst_50 [2] : vector<16x8x8xf32> to vector<16x8xf32>
    %153 = vector.shape_cast %152 : vector<16x8xf32> to vector<16x8x1xf32>
    %cst_51 = arith.constant 8.000000e+00 : f32
    %154 = vector.broadcast %cst_51 : f32 to vector<16x8x1xf32>
    %155 = arith.divf %153, %154 : vector<16x8x1xf32>
    %cst_52 = arith.constant 9.99999974E-6 : f32
    %156 = vector.broadcast %cst_52 : f32 to vector<16x8x1xf32>
    %157 = arith.addf %155, %156 : vector<16x8x1xf32>
    %158 = math.rsqrt %157 : vector<16x8x1xf32>
    %159 = vector.broadcast %158 : vector<16x8x1xf32> to vector<16x8x8xf32>
    %160 = arith.mulf %150, %159 : vector<16x8x8xf32>
    %c8 = arith.constant 8 : index
    %c0_53 = arith.constant 0 : index
    %161 = vector.load %arg8[%c8, %c0_53] : memref<24x24xf32, #tpu.memory_space<vmem>>, vector<1x8xf32>
    %162 = vector.shape_cast %161 : vector<1x8xf32> to vector<8xf32>
    %163 = vector.shape_cast %162 : vector<8xf32> to vector<1x1x8xf32>
    %164 = vector.broadcast %163 : vector<1x1x8xf32> to vector<16x8x8xf32>
    %165 = arith.mulf %160, %164 : vector<16x8x8xf32>
    %c9 = arith.constant 9 : index
    %c0_54 = arith.constant 0 : index
    %166 = vector.load %arg8[%c9, %c0_54] : memref<24x24xf32, #tpu.memory_space<vmem>>, vector<1x8xf32>
    %167 = vector.shape_cast %166 : vector<1x8xf32> to vector<8xf32>
    %168 = vector.shape_cast %167 : vector<8xf32> to vector<1x1x8xf32>
    %169 = vector.broadcast %168 : vector<1x1x8xf32> to vector<16x8x8xf32>
    %170 = arith.addf %165, %169 : vector<16x8x8xf32>
    %c1_55 = arith.constant 1 : index
    %c0_56 = arith.constant 0 : index
    %c0_57 = arith.constant 0 : index
    %171 = vector.load %arg4[%c1_55, %c0_56, %c0_57] : memref<3x8x24xf32, #tpu.memory_space<vmem>>, vector<1x8x24xf32>
    %172 = vector.shape_cast %171 : vector<1x8x24xf32> to vector<8x24xf32>
    %c10 = arith.constant 10 : index
    %c0_58 = arith.constant 0 : index
    %173 = vector.load %arg8[%c10, %c0_58] : memref<24x24xf32, #tpu.memory_space<vmem>>, vector<1x24xf32>
    %174 = vector.shape_cast %173 : vector<1x24xf32> to vector<24xf32>
    %175 = vector.shape_cast %29 : vector<16x8x8xf32> to vector<128x8xf32>
    %cst_59 = arith.constant dense<0.000000e+00> : vector<128x24xf32>
    %176 = tpu.matmul %175, %172, %cst_59 {dimension_numbers = #tpu.dot_dimension_numbers<[1], [0], [0], [1], [0, 0, 1, 1], [], []>} : vector<128x8xf32>, vector<8x24xf32>, vector<128x24xf32> -> vector<128x24xf32>
    %177 = vector.shape_cast %176 : vector<128x24xf32> to vector<16x8x24xf32>
    %178 = vector.shape_cast %174 : vector<24xf32> to vector<1x1x24xf32>
    %179 = vector.broadcast %178 : vector<1x1x24xf32> to vector<16x8x24xf32>
    %180 = arith.addf %177, %179 : vector<16x8x24xf32>
    %181 = vector.extract_strided_slice %180 {offsets = [0, 0, 0], sizes = [16, 8, 8], strides = [1, 1, 1]} : vector<16x8x24xf32> to vector<16x8x8xf32>
    %182 = vector.extract_strided_slice %180 {offsets = [0, 0, 8], sizes = [16, 8, 8], strides = [1, 1, 1]} : vector<16x8x24xf32> to vector<16x8x8xf32>
    %183 = vector.extract_strided_slice %180 {offsets = [0, 0, 16], sizes = [16, 8, 8], strides = [1, 1, 1]} : vector<16x8x24xf32> to vector<16x8x8xf32>
    %c1_60 = arith.constant 1 : index
    %c0_61 = arith.constant 0 : index
    %c0_62 = arith.constant 0 : index
    %184 = vector.load %arg5[%c1_60, %c0_61, %c0_62] : memref<3x8x8xf32, #tpu.memory_space<vmem>>, vector<1x8x8xf32>
    %185 = vector.shape_cast %184 : vector<1x8x8xf32> to vector<8x8xf32>
    %186 = vector.extract_strided_slice %181 {offsets = [0, 0, 0], sizes = [16, 8, 4], strides = [1, 1, 1]} : vector<16x8x8xf32> to vector<16x8x4xf32>
    %187 = vector.extract_strided_slice %182 {offsets = [0, 0, 0], sizes = [16, 8, 4], strides = [1, 1, 1]} : vector<16x8x8xf32> to vector<16x8x4xf32>
    "tpu.trace_start"() <{level = 10 : i32, message = "bqd,bkd->bqk"}> : () -> ()
    %cst_63 = arith.constant dense<0.000000e+00> : vector<16x8x8xf32>
    %188 = tpu.matmul %186, %187, %cst_63 {dimension_numbers = #tpu.dot_dimension_numbers<[2], [2], [1], [1], [0, 0, 0, 1, 1, 1], [0], [0]>} : vector<16x8x4xf32>, vector<16x8x4xf32>, vector<16x8x8xf32> -> vector<16x8x8xf32>
    "tpu.trace_stop"() : () -> ()
    %189 = vector.shape_cast %35 : vector<8x8xf32> to vector<1x8x8xf32>
    %190 = vector.broadcast %189 : vector<1x8x8xf32> to vector<16x8x8xf32>
    %191 = arith.addf %188, %190 : vector<16x8x8xf32>
    %cst_64 = arith.constant dense<0xFF800000> : vector<16x8xf32>
    %192 = vector.multi_reduction <maximumf>, %191, %cst_64 [2] : vector<16x8x8xf32> to vector<16x8xf32>
    %193 = vector.shape_cast %192 : vector<16x8xf32> to vector<16x8x1xf32>
    %194 = vector.broadcast %193 : vector<16x8x1xf32> to vector<16x8x8xf32>
    %195 = arith.subf %191, %194 : vector<16x8x8xf32>
    %196 = math.exp %195 : vector<16x8x8xf32>
    %cst_65 = arith.constant dense<0.000000e+00> : vector<16x8xf32>
    %197 = vector.multi_reduction <add>, %196, %cst_65 [2] : vector<16x8x8xf32> to vector<16x8xf32>
    %198 = vector.shape_cast %197 : vector<16x8xf32> to vector<16x8x1xf32>
    %199 = tpu.reciprocal %198 {approx = true} : vector<16x8x1xf32> -> vector<16x8x1xf32>
    %200 = vector.broadcast %199 : vector<16x8x1xf32> to vector<16x8x8xf32>
    %201 = arith.mulf %196, %200 : vector<16x8x8xf32>
    %202 = vector.extract_strided_slice %183 {offsets = [0, 0, 0], sizes = [16, 8, 4], strides = [1, 1, 1]} : vector<16x8x8xf32> to vector<16x8x4xf32>
    "tpu.trace_start"() <{level = 10 : i32, message = "bqk,bkd->bqd"}> : () -> ()
    %cst_66 = arith.constant dense<0.000000e+00> : vector<16x8x4xf32>
    %203 = tpu.matmul %201, %202, %cst_66 {dimension_numbers = #tpu.dot_dimension_numbers<[2], [1], [1], [2], [0, 0, 0, 1, 1, 2], [0], [0]>} : vector<16x8x8xf32>, vector<16x8x4xf32>, vector<16x8x4xf32> -> vector<16x8x4xf32>
    "tpu.trace_stop"() : () -> ()
    %204 = vector.extract_strided_slice %185 {offsets = [0, 0], sizes = [4, 8], strides = [1, 1]} : vector<8x8xf32> to vector<4x8xf32>
    %205 = vector.shape_cast %203 : vector<16x8x4xf32> to vector<128x4xf32>
    %cst_67 = arith.constant dense<0.000000e+00> : vector<128x8xf32>
    %206 = tpu.matmul %205, %204, %cst_67 {dimension_numbers = #tpu.dot_dimension_numbers<[1], [0], [0], [1], [0, 0, 1, 1], [], []>} : vector<128x4xf32>, vector<4x8xf32>, vector<128x8xf32> -> vector<128x8xf32>
    %207 = vector.shape_cast %206 : vector<128x8xf32> to vector<16x8x8xf32>
    %208 = vector.extract_strided_slice %181 {offsets = [0, 0, 4], sizes = [16, 8, 4], strides = [1, 1, 1]} : vector<16x8x8xf32> to vector<16x8x4xf32>
    %209 = vector.extract_strided_slice %182 {offsets = [0, 0, 4], sizes = [16, 8, 4], strides = [1, 1, 1]} : vector<16x8x8xf32> to vector<16x8x4xf32>
    "tpu.trace_start"() <{level = 10 : i32, message = "bqd,bkd->bqk"}> : () -> ()
    %cst_68 = arith.constant dense<0.000000e+00> : vector<16x8x8xf32>
    %210 = tpu.matmul %208, %209, %cst_68 {dimension_numbers = #tpu.dot_dimension_numbers<[2], [2], [1], [1], [0, 0, 0, 1, 1, 1], [0], [0]>} : vector<16x8x4xf32>, vector<16x8x4xf32>, vector<16x8x8xf32> -> vector<16x8x8xf32>
    "tpu.trace_stop"() : () -> ()
    %211 = vector.shape_cast %35 : vector<8x8xf32> to vector<1x8x8xf32>
    %212 = vector.broadcast %211 : vector<1x8x8xf32> to vector<16x8x8xf32>
    %213 = arith.addf %210, %212 : vector<16x8x8xf32>
    %cst_69 = arith.constant dense<0xFF800000> : vector<16x8xf32>
    %214 = vector.multi_reduction <maximumf>, %213, %cst_69 [2] : vector<16x8x8xf32> to vector<16x8xf32>
    %215 = vector.shape_cast %214 : vector<16x8xf32> to vector<16x8x1xf32>
    %216 = vector.broadcast %215 : vector<16x8x1xf32> to vector<16x8x8xf32>
    %217 = arith.subf %213, %216 : vector<16x8x8xf32>
    %218 = math.exp %217 : vector<16x8x8xf32>
    %cst_70 = arith.constant dense<0.000000e+00> : vector<16x8xf32>
    %219 = vector.multi_reduction <add>, %218, %cst_70 [2] : vector<16x8x8xf32> to vector<16x8xf32>
    %220 = vector.shape_cast %219 : vector<16x8xf32> to vector<16x8x1xf32>
    %221 = tpu.reciprocal %220 {approx = true} : vector<16x8x1xf32> -> vector<16x8x1xf32>
    %222 = vector.broadcast %221 : vector<16x8x1xf32> to vector<16x8x8xf32>
    %223 = arith.mulf %218, %222 : vector<16x8x8xf32>
    %224 = vector.extract_strided_slice %183 {offsets = [0, 0, 4], sizes = [16, 8, 4], strides = [1, 1, 1]} : vector<16x8x8xf32> to vector<16x8x4xf32>
    "tpu.trace_start"() <{level = 10 : i32, message = "bqk,bkd->bqd"}> : () -> ()
    %cst_71 = arith.constant dense<0.000000e+00> : vector<16x8x4xf32>
    %225 = tpu.matmul %223, %224, %cst_71 {dimension_numbers = #tpu.dot_dimension_numbers<[2], [1], [1], [2], [0, 0, 0, 1, 1, 2], [0], [0]>} : vector<16x8x8xf32>, vector<16x8x4xf32>, vector<16x8x4xf32> -> vector<16x8x4xf32>
    "tpu.trace_stop"() : () -> ()
    %226 = vector.extract_strided_slice %185 {offsets = [4, 0], sizes = [4, 8], strides = [1, 1]} : vector<8x8xf32> to vector<4x8xf32>
    %227 = vector.shape_cast %225 : vector<16x8x4xf32> to vector<128x4xf32>
    %cst_72 = arith.constant dense<0.000000e+00> : vector<128x8xf32>
    %228 = tpu.matmul %227, %226, %cst_72 {dimension_numbers = #tpu.dot_dimension_numbers<[1], [0], [0], [1], [0, 0, 1, 1], [], []>} : vector<128x4xf32>, vector<4x8xf32>, vector<128x8xf32> -> vector<128x8xf32>
    %229 = vector.shape_cast %228 : vector<128x8xf32> to vector<16x8x8xf32>
    %230 = arith.addf %207, %229 : vector<16x8x8xf32>
    %c11 = arith.constant 11 : index
    %c0_73 = arith.constant 0 : index
    %231 = vector.load %arg8[%c11, %c0_73] : memref<24x24xf32, #tpu.memory_space<vmem>>, vector<1x8xf32>
    %232 = vector.shape_cast %231 : vector<1x8xf32> to vector<8xf32>
    %233 = vector.shape_cast %232 : vector<8xf32> to vector<1x1x8xf32>
    %234 = vector.broadcast %233 : vector<1x1x8xf32> to vector<16x8x8xf32>
    %235 = arith.addf %230, %234 : vector<16x8x8xf32>
    %236 = arith.addf %29, %235 : vector<16x8x8xf32>
    %cst_74 = arith.constant dense<0.000000e+00> : vector<16x8xf32>
    %237 = vector.multi_reduction <add>, %236, %cst_74 [2] : vector<16x8x8xf32> to vector<16x8xf32>
    %238 = vector.shape_cast %237 : vector<16x8xf32> to vector<16x8x1xf32>
    %cst_75 = arith.constant 8.000000e+00 : f32
    %239 = vector.broadcast %cst_75 : f32 to vector<16x8x1xf32>
    %240 = arith.divf %238, %239 : vector<16x8x1xf32>
    %241 = vector.broadcast %240 : vector<16x8x1xf32> to vector<16x8x8xf32>
    %242 = arith.subf %236, %241 : vector<16x8x8xf32>
    %243 = arith.mulf %242, %242 : vector<16x8x8xf32>
    %cst_76 = arith.constant dense<0.000000e+00> : vector<16x8xf32>
    %244 = vector.multi_reduction <add>, %243, %cst_76 [2] : vector<16x8x8xf32> to vector<16x8xf32>
    %245 = vector.shape_cast %244 : vector<16x8xf32> to vector<16x8x1xf32>
    %cst_77 = arith.constant 8.000000e+00 : f32
    %246 = vector.broadcast %cst_77 : f32 to vector<16x8x1xf32>
    %247 = arith.divf %245, %246 : vector<16x8x1xf32>
    %cst_78 = arith.constant 9.99999974E-6 : f32
    %248 = vector.broadcast %cst_78 : f32 to vector<16x8x1xf32>
    %249 = arith.addf %247, %248 : vector<16x8x1xf32>
    %250 = math.rsqrt %249 : vector<16x8x1xf32>
    %251 = vector.broadcast %250 : vector<16x8x1xf32> to vector<16x8x8xf32>
    %252 = arith.mulf %242, %251 : vector<16x8x8xf32>
    %c16 = arith.constant 16 : index
    %c0_79 = arith.constant 0 : index
    %253 = vector.load %arg8[%c16, %c0_79] : memref<24x24xf32, #tpu.memory_space<vmem>>, vector<1x8xf32>
    %254 = vector.shape_cast %253 : vector<1x8xf32> to vector<8xf32>
    %255 = vector.shape_cast %254 : vector<8xf32> to vector<1x1x8xf32>
    %256 = vector.broadcast %255 : vector<1x1x8xf32> to vector<16x8x8xf32>
    %257 = arith.mulf %252, %256 : vector<16x8x8xf32>
    %c17 = arith.constant 17 : index
    %c0_80 = arith.constant 0 : index
    %258 = vector.load %arg8[%c17, %c0_80] : memref<24x24xf32, #tpu.memory_space<vmem>>, vector<1x8xf32>
    %259 = vector.shape_cast %258 : vector<1x8xf32> to vector<8xf32>
    %260 = vector.shape_cast %259 : vector<8xf32> to vector<1x1x8xf32>
    %261 = vector.broadcast %260 : vector<1x1x8xf32> to vector<16x8x8xf32>
    %262 = arith.addf %257, %261 : vector<16x8x8xf32>
    %c2_81 = arith.constant 2 : index
    %c0_82 = arith.constant 0 : index
    %c0_83 = arith.constant 0 : index
    %263 = vector.load %arg4[%c2_81, %c0_82, %c0_83] : memref<3x8x24xf32, #tpu.memory_space<vmem>>, vector<1x8x24xf32>
    %264 = vector.shape_cast %263 : vector<1x8x24xf32> to vector<8x24xf32>
    %c12 = arith.constant 12 : index
    %c0_84 = arith.constant 0 : index
    %265 = vector.load %arg8[%c12, %c0_84] : memref<24x24xf32, #tpu.memory_space<vmem>>, vector<1x24xf32>
    %266 = vector.shape_cast %265 : vector<1x24xf32> to vector<24xf32>
    %267 = vector.extract_strided_slice %264 {offsets = [0, 0], sizes = [8, 8], strides = [1, 1]} : vector<8x24xf32> to vector<8x8xf32>
    %268 = vector.extract_strided_slice %266 {offsets = [0], sizes = [8], strides = [1]} : vector<24xf32> to vector<8xf32>
    %269 = vector.shape_cast %262 : vector<16x8x8xf32> to vector<128x8xf32>
    %cst_85 = arith.constant dense<0.000000e+00> : vector<128x8xf32>
    %270 = tpu.matmul %269, %267, %cst_85 {dimension_numbers = #tpu.dot_dimension_numbers<[1], [0], [0], [1], [0, 0, 1, 1], [], []>} : vector<128x8xf32>, vector<8x8xf32>, vector<128x8xf32> -> vector<128x8xf32>
    %271 = vector.shape_cast %270 : vector<128x8xf32> to vector<16x8x8xf32>
    %272 = vector.shape_cast %268 : vector<8xf32> to vector<1x1x8xf32>
    %273 = vector.broadcast %272 : vector<1x1x8xf32> to vector<16x8x8xf32>
    %274 = arith.addf %271, %273 : vector<16x8x8xf32>
    %275 = vector.extract_strided_slice %264 {offsets = [0, 8], sizes = [8, 16], strides = [1, 1]} : vector<8x24xf32> to vector<8x16xf32>
    %276 = vector.extract_strided_slice %266 {offsets = [8], sizes = [16], strides = [1]} : vector<24xf32> to vector<16xf32>
    %277 = vector.shape_cast %170 : vector<16x8x8xf32> to vector<128x8xf32>
    %cst_86 = arith.constant dense<0.000000e+00> : vector<128x16xf32>
    %278 = tpu.matmul %277, %275, %cst_86 {dimension_numbers = #tpu.dot_dimension_numbers<[1], [0], [0], [1], [0, 0, 1, 1], [], []>} : vector<128x8xf32>, vector<8x16xf32>, vector<128x16xf32> -> vector<128x16xf32>
    %279 = vector.shape_cast %278 : vector<128x16xf32> to vector<16x8x16xf32>
    %280 = vector.shape_cast %276 : vector<16xf32> to vector<1x1x16xf32>
    %281 = vector.broadcast %280 : vector<1x1x16xf32> to vector<16x8x16xf32>
    %282 = arith.addf %279, %281 : vector<16x8x16xf32>
    %283 = vector.extract_strided_slice %282 {offsets = [0, 0, 0], sizes = [16, 8, 8], strides = [1, 1, 1]} : vector<16x8x16xf32> to vector<16x8x8xf32>
    %284 = vector.extract_strided_slice %282 {offsets = [0, 0, 8], sizes = [16, 8, 8], strides = [1, 1, 1]} : vector<16x8x16xf32> to vector<16x8x8xf32>
    %c2_87 = arith.constant 2 : index
    %c0_88 = arith.constant 0 : index
    %c0_89 = arith.constant 0 : index
    %285 = vector.load %arg5[%c2_87, %c0_88, %c0_89] : memref<3x8x8xf32, #tpu.memory_space<vmem>>, vector<1x8x8xf32>
    %286 = vector.shape_cast %285 : vector<1x8x8xf32> to vector<8x8xf32>
    %287 = vector.extract_strided_slice %274 {offsets = [0, 0, 0], sizes = [16, 8, 4], strides = [1, 1, 1]} : vector<16x8x8xf32> to vector<16x8x4xf32>
    %288 = vector.extract_strided_slice %283 {offsets = [0, 0, 0], sizes = [16, 8, 4], strides = [1, 1, 1]} : vector<16x8x8xf32> to vector<16x8x4xf32>
    "tpu.trace_start"() <{level = 10 : i32, message = "bqd,bkd->bqk"}> : () -> ()
    %cst_90 = arith.constant dense<0.000000e+00> : vector<16x8x8xf32>
    %289 = tpu.matmul %287, %288, %cst_90 {dimension_numbers = #tpu.dot_dimension_numbers<[2], [2], [1], [1], [0, 0, 0, 1, 1, 1], [0], [0]>} : vector<16x8x4xf32>, vector<16x8x4xf32>, vector<16x8x8xf32> -> vector<16x8x8xf32>
    "tpu.trace_stop"() : () -> ()
    %cst_91 = arith.constant dense<0xFF800000> : vector<16x8xf32>
    %290 = vector.multi_reduction <maximumf>, %289, %cst_91 [2] : vector<16x8x8xf32> to vector<16x8xf32>
    %291 = vector.shape_cast %290 : vector<16x8xf32> to vector<16x8x1xf32>
    %292 = vector.broadcast %291 : vector<16x8x1xf32> to vector<16x8x8xf32>
    %293 = arith.subf %289, %292 : vector<16x8x8xf32>
    %294 = math.exp %293 : vector<16x8x8xf32>
    %cst_92 = arith.constant dense<0.000000e+00> : vector<16x8xf32>
    %295 = vector.multi_reduction <add>, %294, %cst_92 [2] : vector<16x8x8xf32> to vector<16x8xf32>
    %296 = vector.shape_cast %295 : vector<16x8xf32> to vector<16x8x1xf32>
    %297 = tpu.reciprocal %296 {approx = true} : vector<16x8x1xf32> -> vector<16x8x1xf32>
    %298 = vector.broadcast %297 : vector<16x8x1xf32> to vector<16x8x8xf32>
    %299 = arith.mulf %294, %298 : vector<16x8x8xf32>
    %300 = vector.extract_strided_slice %284 {offsets = [0, 0, 0], sizes = [16, 8, 4], strides = [1, 1, 1]} : vector<16x8x8xf32> to vector<16x8x4xf32>
    "tpu.trace_start"() <{level = 10 : i32, message = "bqk,bkd->bqd"}> : () -> ()
    %cst_93 = arith.constant dense<0.000000e+00> : vector<16x8x4xf32>
    %301 = tpu.matmul %299, %300, %cst_93 {dimension_numbers = #tpu.dot_dimension_numbers<[2], [1], [1], [2], [0, 0, 0, 1, 1, 2], [0], [0]>} : vector<16x8x8xf32>, vector<16x8x4xf32>, vector<16x8x4xf32> -> vector<16x8x4xf32>
    "tpu.trace_stop"() : () -> ()
    %302 = vector.extract_strided_slice %286 {offsets = [0, 0], sizes = [4, 8], strides = [1, 1]} : vector<8x8xf32> to vector<4x8xf32>
    %303 = vector.shape_cast %301 : vector<16x8x4xf32> to vector<128x4xf32>
    %cst_94 = arith.constant dense<0.000000e+00> : vector<128x8xf32>
    %304 = tpu.matmul %303, %302, %cst_94 {dimension_numbers = #tpu.dot_dimension_numbers<[1], [0], [0], [1], [0, 0, 1, 1], [], []>} : vector<128x4xf32>, vector<4x8xf32>, vector<128x8xf32> -> vector<128x8xf32>
    %305 = vector.shape_cast %304 : vector<128x8xf32> to vector<16x8x8xf32>
    %306 = vector.extract_strided_slice %274 {offsets = [0, 0, 4], sizes = [16, 8, 4], strides = [1, 1, 1]} : vector<16x8x8xf32> to vector<16x8x4xf32>
    %307 = vector.extract_strided_slice %283 {offsets = [0, 0, 4], sizes = [16, 8, 4], strides = [1, 1, 1]} : vector<16x8x8xf32> to vector<16x8x4xf32>
    "tpu.trace_start"() <{level = 10 : i32, message = "bqd,bkd->bqk"}> : () -> ()
    %cst_95 = arith.constant dense<0.000000e+00> : vector<16x8x8xf32>
    %308 = tpu.matmul %306, %307, %cst_95 {dimension_numbers = #tpu.dot_dimension_numbers<[2], [2], [1], [1], [0, 0, 0, 1, 1, 1], [0], [0]>} : vector<16x8x4xf32>, vector<16x8x4xf32>, vector<16x8x8xf32> -> vector<16x8x8xf32>
    "tpu.trace_stop"() : () -> ()
    %cst_96 = arith.constant dense<0xFF800000> : vector<16x8xf32>
    %309 = vector.multi_reduction <maximumf>, %308, %cst_96 [2] : vector<16x8x8xf32> to vector<16x8xf32>
    %310 = vector.shape_cast %309 : vector<16x8xf32> to vector<16x8x1xf32>
    %311 = vector.broadcast %310 : vector<16x8x1xf32> to vector<16x8x8xf32>
    %312 = arith.subf %308, %311 : vector<16x8x8xf32>
    %313 = math.exp %312 : vector<16x8x8xf32>
    %cst_97 = arith.constant dense<0.000000e+00> : vector<16x8xf32>
    %314 = vector.multi_reduction <add>, %313, %cst_97 [2] : vector<16x8x8xf32> to vector<16x8xf32>
    %315 = vector.shape_cast %314 : vector<16x8xf32> to vector<16x8x1xf32>
    %316 = tpu.reciprocal %315 {approx = true} : vector<16x8x1xf32> -> vector<16x8x1xf32>
    %317 = vector.broadcast %316 : vector<16x8x1xf32> to vector<16x8x8xf32>
    %318 = arith.mulf %313, %317 : vector<16x8x8xf32>
    %319 = vector.extract_strided_slice %284 {offsets = [0, 0, 4], sizes = [16, 8, 4], strides = [1, 1, 1]} : vector<16x8x8xf32> to vector<16x8x4xf32>
    "tpu.trace_start"() <{level = 10 : i32, message = "bqk,bkd->bqd"}> : () -> ()
    %cst_98 = arith.constant dense<0.000000e+00> : vector<16x8x4xf32>
    %320 = tpu.matmul %318, %319, %cst_98 {dimension_numbers = #tpu.dot_dimension_numbers<[2], [1], [1], [2], [0, 0, 0, 1, 1, 2], [0], [0]>} : vector<16x8x8xf32>, vector<16x8x4xf32>, vector<16x8x4xf32> -> vector<16x8x4xf32>
    "tpu.trace_stop"() : () -> ()
    %321 = vector.extract_strided_slice %286 {offsets = [4, 0], sizes = [4, 8], strides = [1, 1]} : vector<8x8xf32> to vector<4x8xf32>
    %322 = vector.shape_cast %320 : vector<16x8x4xf32> to vector<128x4xf32>
    %cst_99 = arith.constant dense<0.000000e+00> : vector<128x8xf32>
    %323 = tpu.matmul %322, %321, %cst_99 {dimension_numbers = #tpu.dot_dimension_numbers<[1], [0], [0], [1], [0, 0, 1, 1], [], []>} : vector<128x4xf32>, vector<4x8xf32>, vector<128x8xf32> -> vector<128x8xf32>
    %324 = vector.shape_cast %323 : vector<128x8xf32> to vector<16x8x8xf32>
    %325 = arith.addf %305, %324 : vector<16x8x8xf32>
    %c13 = arith.constant 13 : index
    %c0_100 = arith.constant 0 : index
    %326 = vector.load %arg8[%c13, %c0_100] : memref<24x24xf32, #tpu.memory_space<vmem>>, vector<1x8xf32>
    %327 = vector.shape_cast %326 : vector<1x8xf32> to vector<8xf32>
    %328 = vector.shape_cast %327 : vector<8xf32> to vector<1x1x8xf32>
    %329 = vector.broadcast %328 : vector<1x1x8xf32> to vector<16x8x8xf32>
    %330 = arith.addf %325, %329 : vector<16x8x8xf32>
    %331 = arith.addf %262, %330 : vector<16x8x8xf32>
    %cst_101 = arith.constant dense<0.000000e+00> : vector<16x8xf32>
    %332 = vector.multi_reduction <add>, %331, %cst_101 [2] : vector<16x8x8xf32> to vector<16x8xf32>
    %333 = vector.shape_cast %332 : vector<16x8xf32> to vector<16x8x1xf32>
    %cst_102 = arith.constant 8.000000e+00 : f32
    %334 = vector.broadcast %cst_102 : f32 to vector<16x8x1xf32>
    %335 = arith.divf %333, %334 : vector<16x8x1xf32>
    %336 = vector.broadcast %335 : vector<16x8x1xf32> to vector<16x8x8xf32>
    %337 = arith.subf %331, %336 : vector<16x8x8xf32>
    %338 = arith.mulf %337, %337 : vector<16x8x8xf32>
    %cst_103 = arith.constant dense<0.000000e+00> : vector<16x8xf32>
    %339 = vector.multi_reduction <add>, %338, %cst_103 [2] : vector<16x8x8xf32> to vector<16x8xf32>
    %340 = vector.shape_cast %339 : vector<16x8xf32> to vector<16x8x1xf32>
    %cst_104 = arith.constant 8.000000e+00 : f32
    %341 = vector.broadcast %cst_104 : f32 to vector<16x8x1xf32>
    %342 = arith.divf %340, %341 : vector<16x8x1xf32>
    %cst_105 = arith.constant 9.99999974E-6 : f32
    %343 = vector.broadcast %cst_105 : f32 to vector<16x8x1xf32>
    %344 = arith.addf %342, %343 : vector<16x8x1xf32>
    %345 = math.rsqrt %344 : vector<16x8x1xf32>
    %346 = vector.broadcast %345 : vector<16x8x1xf32> to vector<16x8x8xf32>
    %347 = arith.mulf %337, %346 : vector<16x8x8xf32>
    %c18 = arith.constant 18 : index
    %c0_106 = arith.constant 0 : index
    %348 = vector.load %arg8[%c18, %c0_106] : memref<24x24xf32, #tpu.memory_space<vmem>>, vector<1x8xf32>
    %349 = vector.shape_cast %348 : vector<1x8xf32> to vector<8xf32>
    %350 = vector.shape_cast %349 : vector<8xf32> to vector<1x1x8xf32>
    %351 = vector.broadcast %350 : vector<1x1x8xf32> to vector<16x8x8xf32>
    %352 = arith.mulf %347, %351 : vector<16x8x8xf32>
    %c19 = arith.constant 19 : index
    %c0_107 = arith.constant 0 : index
    %353 = vector.load %arg8[%c19, %c0_107] : memref<24x24xf32, #tpu.memory_space<vmem>>, vector<1x8xf32>
    %354 = vector.shape_cast %353 : vector<1x8xf32> to vector<8xf32>
    %355 = vector.shape_cast %354 : vector<8xf32> to vector<1x1x8xf32>
    %356 = vector.broadcast %355 : vector<1x1x8xf32> to vector<16x8x8xf32>
    %357 = arith.addf %352, %356 : vector<16x8x8xf32>
    %c1_108 = arith.constant 1 : index
    %c0_109 = arith.constant 0 : index
    %c0_110 = arith.constant 0 : index
    %358 = vector.load %arg6[%c1_108, %c0_109, %c0_110] : memref<2x8x16xf32, #tpu.memory_space<vmem>>, vector<1x8x16xf32>
    %359 = vector.shape_cast %358 : vector<1x8x16xf32> to vector<8x16xf32>
    %c14 = arith.constant 14 : index
    %c0_111 = arith.constant 0 : index
    %360 = vector.load %arg8[%c14, %c0_111] : memref<24x24xf32, #tpu.memory_space<vmem>>, vector<1x16xf32>
    %361 = vector.shape_cast %360 : vector<1x16xf32> to vector<16xf32>
    %362 = vector.shape_cast %357 : vector<16x8x8xf32> to vector<128x8xf32>
    %cst_112 = arith.constant dense<0.000000e+00> : vector<128x16xf32>
    %363 = tpu.matmul %362, %359, %cst_112 {dimension_numbers = #tpu.dot_dimension_numbers<[1], [0], [0], [1], [0, 0, 1, 1], [], []>} : vector<128x8xf32>, vector<8x16xf32>, vector<128x16xf32> -> vector<128x16xf32>
    %364 = vector.shape_cast %363 : vector<128x16xf32> to vector<16x8x16xf32>
    %365 = vector.shape_cast %361 : vector<16xf32> to vector<1x1x16xf32>
    %366 = vector.broadcast %365 : vector<1x1x16xf32> to vector<16x8x16xf32>
    %367 = arith.addf %364, %366 : vector<16x8x16xf32>
    %cst_113 = arith.constant 0.000000e+00 : f32
    %368 = vector.broadcast %cst_113 : f32 to vector<16x8x16xf32>
    %369 = arith.maximumf %367, %368 : vector<16x8x16xf32>
    %c1_114 = arith.constant 1 : index
    %c0_115 = arith.constant 0 : index
    %c0_116 = arith.constant 0 : index
    %370 = vector.load %arg7[%c1_114, %c0_115, %c0_116] : memref<2x16x8xf32, #tpu.memory_space<vmem>>, vector<1x16x8xf32>
    %371 = vector.shape_cast %370 : vector<1x16x8xf32> to vector<16x8xf32>
    %c15 = arith.constant 15 : index
    %c0_117 = arith.constant 0 : index
    %372 = vector.load %arg8[%c15, %c0_117] : memref<24x24xf32, #tpu.memory_space<vmem>>, vector<1x8xf32>
    %373 = vector.shape_cast %372 : vector<1x8xf32> to vector<8xf32>
    %374 = vector.shape_cast %369 : vector<16x8x16xf32> to vector<128x16xf32>
    %cst_118 = arith.constant dense<0.000000e+00> : vector<128x8xf32>
    %375 = tpu.matmul %374, %371, %cst_118 {dimension_numbers = #tpu.dot_dimension_numbers<[1], [0], [0], [1], [0, 0, 1, 1], [], []>} : vector<128x16xf32>, vector<16x8xf32>, vector<128x8xf32> -> vector<128x8xf32>
    %376 = vector.shape_cast %375 : vector<128x8xf32> to vector<16x8x8xf32>
    %377 = vector.shape_cast %373 : vector<8xf32> to vector<1x1x8xf32>
    %378 = vector.broadcast %377 : vector<1x1x8xf32> to vector<16x8x8xf32>
    %379 = arith.addf %376, %378 : vector<16x8x8xf32>
    %380 = arith.addf %357, %379 : vector<16x8x8xf32>
    %cst_119 = arith.constant dense<0.000000e+00> : vector<16x8xf32>
    %381 = vector.multi_reduction <add>, %380, %cst_119 [2] : vector<16x8x8xf32> to vector<16x8xf32>
    %382 = vector.shape_cast %381 : vector<16x8xf32> to vector<16x8x1xf32>
    %cst_120 = arith.constant 8.000000e+00 : f32
    %383 = vector.broadcast %cst_120 : f32 to vector<16x8x1xf32>
    %384 = arith.divf %382, %383 : vector<16x8x1xf32>
    %385 = vector.broadcast %384 : vector<16x8x1xf32> to vector<16x8x8xf32>
    %386 = arith.subf %380, %385 : vector<16x8x8xf32>
    %387 = arith.mulf %386, %386 : vector<16x8x8xf32>
    %cst_121 = arith.constant dense<0.000000e+00> : vector<16x8xf32>
    %388 = vector.multi_reduction <add>, %387, %cst_121 [2] : vector<16x8x8xf32> to vector<16x8xf32>
    %389 = vector.shape_cast %388 : vector<16x8xf32> to vector<16x8x1xf32>
    %cst_122 = arith.constant 8.000000e+00 : f32
    %390 = vector.broadcast %cst_122 : f32 to vector<16x8x1xf32>
    %391 = arith.divf %389, %390 : vector<16x8x1xf32>
    %cst_123 = arith.constant 9.99999974E-6 : f32
    %392 = vector.broadcast %cst_123 : f32 to vector<16x8x1xf32>
    %393 = arith.addf %391, %392 : vector<16x8x1xf32>
    %394 = math.rsqrt %393 : vector<16x8x1xf32>
    %395 = vector.broadcast %394 : vector<16x8x1xf32> to vector<16x8x8xf32>
    %396 = arith.mulf %386, %395 : vector<16x8x8xf32>
    %c20 = arith.constant 20 : index
    %c0_124 = arith.constant 0 : index
    %397 = vector.load %arg8[%c20, %c0_124] : memref<24x24xf32, #tpu.memory_space<vmem>>, vector<1x8xf32>
    %398 = vector.shape_cast %397 : vector<1x8xf32> to vector<8xf32>
    %399 = vector.shape_cast %398 : vector<8xf32> to vector<1x1x8xf32>
    %400 = vector.broadcast %399 : vector<1x1x8xf32> to vector<16x8x8xf32>
    %401 = arith.mulf %396, %400 : vector<16x8x8xf32>
    %c21 = arith.constant 21 : index
    %c0_125 = arith.constant 0 : index
    %402 = vector.load %arg8[%c21, %c0_125] : memref<24x24xf32, #tpu.memory_space<vmem>>, vector<1x8xf32>
    %403 = vector.shape_cast %402 : vector<1x8xf32> to vector<8xf32>
    %404 = vector.shape_cast %403 : vector<8xf32> to vector<1x1x8xf32>
    %405 = vector.broadcast %404 : vector<1x1x8xf32> to vector<16x8x8xf32>
    %406 = arith.addf %401, %405 : vector<16x8x8xf32>
    %c22 = arith.constant 22 : index
    %c0_126 = arith.constant 0 : index
    %407 = vector.load %arg8[%c22, %c0_126] : memref<24x24xf32, #tpu.memory_space<vmem>>, vector<1x8xf32>
    %408 = vector.shape_cast %407 : vector<1x8xf32> to vector<8xf32>
    %409 = vector.shape_cast %408 : vector<8xf32> to vector<1x1x8xf32>
    %410 = vector.broadcast %409 : vector<1x1x8xf32> to vector<16x8x8xf32>
    %411 = arith.mulf %406, %410 : vector<16x8x8xf32>
    %cst_127 = arith.constant dense<0.000000e+00> : vector<16x8xf32>
    %412 = vector.multi_reduction <add>, %411, %cst_127 [2] : vector<16x8x8xf32> to vector<16x8xf32>
    %c23 = arith.constant 23 : index
    %c0_128 = arith.constant 0 : index
    %413 = vector.load %arg8[%c23, %c0_128] : memref<24x24xf32, #tpu.memory_space<vmem>>, vector<1x1xf32>
    %414 = vector.shape_cast %413 : vector<1x1xf32> to vector<1xf32>
    %415 = vector.shape_cast %414 : vector<1xf32> to vector<1x1xf32>
    %416 = vector.broadcast %415 : vector<1x1xf32> to vector<16x8xf32>
    %417 = arith.addf %412, %416 : vector<16x8xf32>
    %418 = vector.shape_cast %417 : vector<16x8xf32> to vector<1x128xf32>
    %c0_129 = arith.constant 0 : index
    %c0_130 = arith.constant 0 : index
    %419 = vector.load %arg9[%c0_129, %c0_130] : memref<1x128xf32, #tpu.memory_space<vmem>>, vector<1x128xf32>
    tpu.vector_store %arg9[%c0_129, %c0_130], %418 {strides = array<i32>} : memref<1x128xf32, #tpu.memory_space<vmem>>, vector<1x128xf32>,
    return
  }
  func.func @transform_0(%arg0: i32) -> (i32, i32) {
    %c0_i32 = arith.constant 0 : i32
    %c0_i32_0 = arith.constant 0 : i32
    return %arg0, %c0_i32 : i32, i32
  }
  func.func @transform_1(%arg0: i32) -> (i32, i32) {
    %c0_i32 = arith.constant 0 : i32
    %c0_i32_0 = arith.constant 0 : i32
    return %arg0, %c0_i32 : i32, i32
  }
  func.func @transform_2(%arg0: i32) -> (i32, i32) {
    %c0_i32 = arith.constant 0 : i32
    %c0_i32_0 = arith.constant 0 : i32
    %c0_i32_1 = arith.constant 0 : i32
    return %c0_i32, %c0_i32_0 : i32, i32
  }
  func.func @transform_3(%arg0: i32) -> (i32, i32, i32) {
    %c0_i32 = arith.constant 0 : i32
    %c0_i32_0 = arith.constant 0 : i32
    %c0_i32_1 = arith.constant 0 : i32
    %c0_i32_2 = arith.constant 0 : i32
    return %c0_i32, %c0_i32_0, %c0_i32_1 : i32, i32, i32
  }
  func.func @transform_4(%arg0: i32) -> (i32, i32, i32) {
    %c0_i32 = arith.constant 0 : i32
    %c0_i32_0 = arith.constant 0 : i32
    %c0_i32_1 = arith.constant 0 : i32
    %c0_i32_2 = arith.constant 0 : i32
    return %c0_i32, %c0_i32_0, %c0_i32_1 : i32, i32, i32
  }
  func.func @transform_5(%arg0: i32) -> (i32, i32, i32) {
    %c0_i32 = arith.constant 0 : i32
    %c0_i32_0 = arith.constant 0 : i32
    %c0_i32_1 = arith.constant 0 : i32
    %c0_i32_2 = arith.constant 0 : i32
    return %c0_i32, %c0_i32_0, %c0_i32_1 : i32, i32, i32
  }
  func.func @transform_6(%arg0: i32) -> (i32, i32, i32) {
    %c0_i32 = arith.constant 0 : i32
    %c0_i32_0 = arith.constant 0 : i32
    %c0_i32_1 = arith.constant 0 : i32
    %c0_i32_2 = arith.constant 0 : i32
    return %c0_i32, %c0_i32_0, %c0_i32_1 : i32, i32, i32
  }
  func.func @transform_7(%arg0: i32) -> (i32, i32) {
    %c0_i32 = arith.constant 0 : i32
    %c0_i32_0 = arith.constant 0 : i32
    %c0_i32_1 = arith.constant 0 : i32
    return %c0_i32, %c0_i32_0 : i32, i32
  }
  func.func @transform_8(%arg0: i32) -> (i32, i32) {
    %c0_i32 = arith.constant 0 : i32
    %c0_i32_0 = arith.constant 0 : i32
    return %arg0, %c0_i32 : i32, i32
  }
}

</mosaic_0001>

<bundles_post_ra>
// kernel: tpu_custom_call.1
= control target key start
LH: loop header
LB: loop body
LE: loop exit
PB: predicated region body
PF: predicated region fallthrough
CT: control target
= control target key end

     0   :  { %v28825_v0 = vlaneseq  ;;  %s28816_s0 = inlined_call_operand.vmem [shape: f32[16,8], index: 0, kind: input, shape index: {}]   ;;  %s28817_s1 = inlined_call_operand.vmem [shape: f32[16,8], index: 1, kind: input, shape index: {}]   ;;  %s28818_s2 = inlined_call_operand.vmem [shape: f32[16,8], index: 2, kind: input, shape index: {}]   ;;  %s28819_s3 = inlined_call_operand.vmem [shape: f32[3,8,24], index: 3, kind: input, shape index: {}]   ;;  %s28820_s4 = inlined_call_operand.vmem [shape: f32[3,8,8], index: 4, kind: input, shape index: {}]   ;;  %s28821_s5 = inlined_call_operand.vmem [shape: f32[2,8,16], index: 5, kind: input, shape index: {}]   ;;  %s28822_s6 = inlined_call_operand.vmem [shape: f32[2,16,8], index: 6, kind: input, shape index: {}]   ;;  %s28823_s7 = inlined_call_operand.vmem [shape: f32[24,24], index: 7, kind: input, shape index: {}]   ;;  %s28824_s8 = inlined_call_operand.hbm [shape: f32[1,128], index: 8, kind: output, shape index: {}]  }
   0x1   :  { %13 = vsyncpa [#allocation3], 0  ;;  %v371_v2 = vld [vmem:[%s28819_s3] sm:$0xff]  ;;  %v33_v20 = vld [vmem:[%s28816_s0 + $0x8] sm:$0xff]  ;;  %vm373_vm0 = vcmask 64512   ;;  %vm23907_vm1 = vmmov 0  }
   0x2   :  { %v23961_v1 = vshrl.u32 %v28825_v0, 7  ;;  %v32_v3 = vld [vmem:[%s28816_s0] sm:$0xff]  ;;  %21937 = vmatprep.subr.mxu0 %v371_v2  ;;  %23273 = vmatprep.subr.mxu1 %v371_v2  ;;  %s23908_s18 = smov 120   ;;  %s23909_s19 = smov 112   ;;  %vm591_vm2 = vcmask 31744   ;;  %vm3261_vm3 = vcmask 1043456  }
   0x3   :  { %21938 = vmatpush3.msra.mxu0 %v371_v2  ;;  %23274 = vmatpush3.msra.mxu1 %v371_v2  ;;  %v24015_v29 = vld [vmem:[%s28823_s7] ss:$0 sm:$0xff]  ;;  %v24020_v32 = vld [vmem:[%s28823_s7 + $0x1] ss:$0 sm:$0xff]  ;;  %s23910_s20 = smov 124   ;;  %s23911_s21 = smov 116  }
   0x4   :  { %28897 = vst [vmem:[#allocation5_spill] sm:$0xff] %v23961_v1  ;;  %v23970_v4 = vsub.s32 0, %v23961_v1  ;;  %v23973_v5 = vsub.s32 2, %v23961_v1  ;;  %v23976_v6 = vsub.s32 1, %v23961_v1  ;;  %v23979_v7 = vsub.s32 3, %v23961_v1  ;;  %v24027_v35 = vld [vmem:[%s28818_s2] sm:$0xff] }
   0x5   :  { %v23986_v12 = vsub.s32 4, %v23961_v1  ;;  %v23989_v13 = vsub.s32 5, %v23961_v1  ;;  %v23994_v16 = vsub.s32 6, %v23961_v1  ;;  %v23997_v17 = vsub.s32 7, %v23961_v1  ;;  %s23912_s22 = smov 108   ;;  %s23914_s28 = smov [#allocation2]  }
   0x6   :  { %28898 = vst [vmem:[#allocation6_spill] sm:$0xff] %v23970_v4  ;;  %28899 = vst [vmem:[#allocation7_spill] sm:$0xff] %v23973_v5  ;;  %v37_v8 = vrot.slane %v32_v3, %v23970_v4  ;;  %v51_v9 = vrot.slane %v32_v3, %v23973_v5  ;;  %v44_v10 = vrot.slane %v32_v3, %v23976_v6  ;;  %vm6784_vm4 = vcmask 130048   ;;  %s20757_s29 = sshll.u32 %s23914_s28, 4  ;;  %s20758_s29 = int_to_ptr.vmem [resolvable:$true] %s20757_s29 }
   0x7   :  { %28900 = vst [vmem:[#allocation8_spill] sm:$0xff] %v23976_v6  ;;  %28901 = vst [vmem:[#allocation9_spill] sm:$0xff] %v23979_v7  ;;  %v58_v11 = vrot.slane %v32_v3, %v23979_v7  ;;  %v65_v14 = vrot.slane %v32_v3, %v23986_v12  ;;  %v72_v15 = vrot.slane %v32_v3, %v23989_v13  ;;  %vm20649_vm6 = vcmask 130112   ;;  %p23887_p1 = scmp.lt.s32.totalorder %s20758_s29, %s20758_s29 }
   0x8   :  { %39 = vbcast.lane.b32.xlu0 %v37_v8, 256  ;;  %53 = vbcast.lane.b32.xlu1 %v51_v9, 256  ;;  %28902 = vst [vmem:[#allocation10_spill] sm:$0xff] %v23986_v12  ;;  %28903 = vst [vmem:[#allocation11_spill] sm:$0xff] %v23989_v13  ;;  %v79_v18 = vrot.slane %v32_v3, %v23994_v16  ;;  %v86_v19 = vrot.slane %v32_v3, %v23997_v17  ;;  %vm20656_vm7 = vcmask 195712   ;;  %vm20663_vm8 = vcmask 261312  }
   0x9   :  { %28904 = vst [vmem:[#allocation12_spill] sm:$0xff] %v23994_v16  ;;  %28905 = vst [vmem:[#allocation13_spill] sm:$0xff] %v23997_v17  ;;  %v93_v21 = vrot.slane %v33_v20, %v23970_v4  ;;  %v100_v22 = vrot.slane %v33_v20, %v23976_v6  ;;  %v107_v23 = vrot.slane %v33_v20, %v23973_v5  ;;  %vm20670_vm9 = vcmask 326912  }
   0xa   :  { %v114_v24 = vrot.slane %v33_v20, %v23979_v7  ;;  %v121_v25 = vrot.slane %v33_v20, %v23986_v12  ;;  %v128_v26 = vrot.slane %v33_v20, %v23989_v13  ;;  %v135_v27 = vrot.slane %v33_v20, %v23994_v16 }
   0xb   :  { %v142_v28 = vrot.slane %v33_v20, %v23997_v17  ;;  %vm20677_vm10 = vcmask 392512   ;;  %vm20684_vm11 = vcmask 458112   ;;  %vm20691_vm12 = vcmask 523712  }
   0xc   :  { %46 = vbcast.lane.b32.xlu0 %v44_v10, 256  ;;  %60 = vbcast.lane.b32.xlu1 %v58_v11, 256  ;;  %vm20698_vm13 = vcmask 589312   ;;  %vm20705_vm14 = vcmask 654912   ;;  %vm20712_vm15 = vcmask 720512  }
  0x10   :  { %67 = vbcast.lane.b32.xlu0 %v65_v14, 256  ;;  %74 = vbcast.lane.b32.xlu1 %v72_v15, 256 }
  0x14   :  { %81 = vbcast.lane.b32.xlu0 %v79_v18, 256  ;;  %88 = vbcast.lane.b32.xlu1 %v86_v19, 256 }
  0x18   :  { %95 = vbcast.lane.b32.xlu0 %v93_v21, 256  ;;  %102 = vbcast.lane.b32.xlu1 %v100_v22, 256 }
  0x1c   :  { %109 = vbcast.lane.b32.xlu0 %v107_v23, 256  ;;  %116 = vbcast.lane.b32.xlu1 %v114_v24, 256 }
  0x20   :  { %123 = vbcast.lane.b32.xlu0 %v121_v25, 256  ;;  %130 = vbcast.lane.b32.xlu1 %v128_v26, 256 }
  0x24   :  { %137 = vbcast.lane.b32.xlu0 %v135_v27, 256  ;;  %144 = vbcast.lane.b32.xlu1 %v142_v28, 256 }
  0x7a   :  { %v40_v30 = vpop.permute.xlu0 %39  ;;  %v54_v31 = vpop.permute.xlu1 %53 }
  0x7b   :  { %v150_v33 = vmul.f32 %v24015_v29, %v40_v30  ;;  %v152_v34 = vmul.f32 %v24015_v29, %v54_v31 }
  0x7d   :  { %v170_v36 = vadd.f32 %v24020_v32, %v150_v33  ;;  %v172_v37 = vadd.f32 %v24020_v32, %v152_v34 }
  0x7e   :  { %v47_v38 = vpop.permute.xlu0 %46  ;;  %v61_v39 = vpop.permute.xlu1 %60 }
  0x7f   :  { %v151_v40 = vmul.f32 %v24015_v29, %v47_v38  ;;  %v153_v41 = vmul.f32 %v24015_v29, %v61_v39  ;;  %v24034_v42 = vadd.f32 %v24027_v35, %v170_v36  ;;  %v24041_v45 = vadd.f32 %v24027_v35, %v172_v37 }
  0x81   :  { %v171_v43 = vadd.f32 %v24020_v32, %v151_v40  ;;  %v173_v44 = vadd.f32 %v24020_v32, %v153_v41  ;;  %21939 = vmatprep.mubr.msk.f32.mxu0 %vm373_vm0, %v24034_v42 }
  0x82   :  { %v68_v46 = vpop.permute.xlu0 %67  ;;  %v75_v47 = vpop.permute.xlu1 %74 }
  0x83   :  { %v24044_v48 = vadd.f32 %v24027_v35, %v171_v43  ;;  %v154_v49 = vmul.f32 %v24015_v29, %v68_v46  ;;  %v155_v50 = vmul.f32 %v24015_v29, %v75_v47  ;;  %v24049_v51 = vadd.f32 %v24027_v35, %v173_v44 }
  0x85   :  { %v174_v52 = vadd.f32 %v24020_v32, %v154_v49  ;;  %v175_v53 = vadd.f32 %v24020_v32, %v155_v50  ;;  %21940 = vmatmul.mubr.msk.f32.vlgmr.msra.gmra.mrb[0].mxu0 %vm373_vm0, %v24044_v48 }
  0x86   :  { %21942 = vmatprep.mubr.msk.f32.mxu0 %vm373_vm0, %v24041_v45  ;;  %v82_v54 = vpop.permute.xlu0 %81  ;;  %v89_v55 = vpop.permute.xlu1 %88 }
  0x87   :  { %v24058_v56 = vadd.f32 %v24027_v35, %v174_v52  ;;  %v156_v57 = vmul.f32 %v24015_v29, %v82_v54  ;;  %v157_v58 = vmul.f32 %v24015_v29, %v89_v55  ;;  %v24063_v59 = vadd.f32 %v24027_v35, %v175_v53 }
  0x89   :  { %v176_v60 = vadd.f32 %v24020_v32, %v156_v57  ;;  %v177_v61 = vadd.f32 %v24020_v32, %v157_v58  ;;  %21943 = vmatmul.mubr.msk.f32.gmra.mrb[2].mxu0 %vm373_vm0, %v24049_v51 }
  0x8a   :  { %v96_v62 = vpop.permute.xlu0 %95  ;;  %21945 = vmatprep.mubr.msk.f32.mxu0 %vm373_vm0, %v24058_v56  ;;  %v103_v63 = vpop.permute.xlu1 %102 }
  0x8b   :  { %v24072_v2 = vadd.f32 %v24027_v35, %v176_v60  ;;  %v158_v3 = vmul.f32 %v24015_v29, %v96_v62  ;;  %v159_v8 = vmul.f32 %v24015_v29, %v103_v63  ;;  %v24077_v9 = vadd.f32 %v24027_v35, %v177_v61 }
  0x8d   :  { %v179_v10 = vadd.f32 %v24020_v32, %v159_v8  ;;  %21946 = vmatmul.mubr.msk.f32.gmra.mrb[4].mxu0 %vm373_vm0, %v24063_v59  ;;  %v178_v11 = vadd.f32 %v24020_v32, %v158_v3 }
  0x8e   :  { %21948 = vmatprep.mubr.msk.f32.mxu0 %vm373_vm0, %v24072_v2  ;;  %v110_v14 = vpop.permute.xlu0 %109  ;;  %v117_v15 = vpop.permute.xlu1 %116 }
  0x8f   :  { %v24086_v18 = vadd.f32 %v24027_v35, %v179_v10  ;;  %v160_v19 = vmul.f32 %v24015_v29, %v110_v14  ;;  %v161_v20 = vmul.f32 %v24015_v29, %v117_v15  ;;  %v24091_v21 = vadd.f32 %v24027_v35, %v178_v11 }
  0x91   :  { %v180_v22 = vadd.f32 %v24020_v32, %v160_v19  ;;  %21949 = vmatmul.mubr.msk.f32.gmra.mrb[6].mxu0 %vm373_vm0, %v24077_v9  ;;  %v181_v23 = vadd.f32 %v24020_v32, %v161_v20  ;;  %21951 = vmatprep.mubr.msk.f32.mxu1 %vm373_vm0, %v24091_v21 }
  0x92   :  { %21952 = vmatmul.mubr.msk.f32.vlgmr.msra.gmra.mrb[0].mxu1 %vm373_vm0, %v24086_v18  ;;  %v124_v24 = vpop.permute.xlu0 %123  ;;  %v131_v25 = vpop.permute.xlu1 %130 }
  0x93   :  { %v24102_v26 = vadd.f32 %v24027_v35, %v180_v22  ;;  %v24105_v27 = vadd.f32 %v24027_v35, %v181_v23  ;;  %v162_v28 = vmul.f32 %v24015_v29, %v124_v24  ;;  %v163_v30 = vmul.f32 %v24015_v29, %v131_v25 }
  0x95   :  { %v182_v31 = vadd.f32 %v24020_v32, %v162_v28  ;;  %v183_v33 = vadd.f32 %v24020_v32, %v163_v30  ;;  %21954 = vmatprep.mubr.msk.f32.mxu1 %vm373_vm0, %v24102_v26 }
  0x96   :  { %v138_v34 = vpop.permute.xlu0 %137  ;;  %21955 = vmatmul.mubr.msk.f32.gmra.mrb[2].mxu1 %vm373_vm0, %v24105_v27  ;;  %v145_v36 = vpop.permute.xlu1 %144 }
  0x97   :  { %v24116_v37 = vadd.f32 %v24027_v35, %v182_v31  ;;  %v24119_v38 = vadd.f32 %v24027_v35, %v183_v33  ;;  %v164_v39 = vmul.f32 %v24015_v29, %v138_v34  ;;  %v165_v40 = vmul.f32 %v24015_v29, %v145_v36 }
  0x98   :  { %v28826_v29 = vmov 0.0  }
  0x99   :  { %28906 = vst [vmem:[#allocation14_spill] sm:$0xff] %v24116_v37  ;;  %v184_v41 = vadd.f32 %v24020_v32, %v164_v39  ;;  %v185_v43 = vadd.f32 %v24020_v32, %v165_v40  ;;  %21957 = vmatprep.mubr.msk.f32.mxu1 %vm373_vm0, %v24116_v37  ;;  %21963 = vmatprep.subr.mxu1 %v28826_v29  ;;  %v20783_v32 = vld [vmem:[%s28823_s7 + $0x2] ss:$0 sm:$0xff] }
  0x9a   :  { %21958 = vmatmul.mubr.msk.f32.gmra.mrb[4].mxu1 %vm373_vm0, %v24119_v38  ;;  %22003 = vmatprep.subr.mxu0 %v28826_v29 }
  0x9b   :  { %v24130_v44 = vadd.f32 %v24027_v35, %v184_v41  ;;  %v24133_v46 = vadd.f32 %v24027_v35, %v185_v43  ;;  %22005 = vmatprep.mubr.msk.f32.mxu0 %vm23907_vm1, %v28826_v29 }
  0x9d   :  { %28907 = vst [vmem:[#allocation15_spill] sm:$0xff] %v24130_v44  ;;  %28908 = vst [vmem:[#allocation16_spill] sm:$0xff] %v24133_v46  ;;  %21960 = vmatprep.mubr.msk.f32.mxu1 %vm373_vm0, %v24130_v44 }
  0x9e   :  { %21961 = vmatmul.mubr.msk.f32.gmra.mrb[6].mxu1 %vm373_vm0, %v24133_v46 }
  0x9f   :  { %21965 = vmatprep.mubr.msk.f32.mxu1 %vm23907_vm1, %v28826_v29 }
 0x158   :  { %v21941_v35 = vpop.f32.mrb[0].mxu0 }
 0x159   :  { %v24148_v47 = vadd.f32 %v21941_v35, %v20783_v32  ;;  %v488_v49 = vpop.f32.mrb[1].mxu0 }
 0x15a   :  { %v24150_v50 = vadd.f32 %v20783_v32, %v488_v49 }
 0x15b   :  { %667 = vrot.lane.b32.xlu1 %v24148_v47, %s23908_s18 }
 0x15c   :  { %589 = vrot.lane.b32.xlu0 %v24150_v50, %s23908_s18  ;;  %v21944_v52 = vpop.f32.mrb[2].mxu0 }
 0x15d   :  { %v24156_v53 = vadd.f32 %v21944_v52, %v20783_v32  ;;  %v498_v54 = vpop.f32.mrb[3].mxu0 }
 0x15e   :  { %v24158_v55 = vadd.f32 %v20783_v32, %v498_v54 }
 0x15f   :  { %821 = vrot.lane.b32.xlu1 %v24156_v53, %s23908_s18 }
 0x160   :  { %744 = vrot.lane.b32.xlu0 %v24158_v55, %s23908_s18  ;;  %v21947_v57 = vpop.f32.mrb[4].mxu0 }
 0x161   :  { %v24164_v58 = vadd.f32 %v21947_v57, %v20783_v32  ;;  %v508_v60 = vpop.f32.mrb[5].mxu0 }
 0x162   :  { %v24166_v61 = vadd.f32 %v20783_v32, %v508_v60 }
 0x163   :  { %975 = vrot.lane.b32.xlu1 %v24164_v58, %s23908_s18 }
 0x164   :  { %898 = vrot.lane.b32.xlu0 %v24166_v61, %s23908_s18  ;;  %v21950_v62 = vpop.f32.mrb[6].mxu0 }
 0x165   :  { %v24172_v63 = vadd.f32 %v21950_v62, %v20783_v32  ;;  %v518_v3 = vpop.f32.mrb[7].mxu0  ;;  %v21953_v8 = vpop.f32.mrb[0].mxu1 }
 0x166   :  { %v24174_v10 = vadd.f32 %v20783_v32, %v518_v3  ;;  %v528_v11 = vpop.f32.mrb[1].mxu1  ;;  %v24176_v14 = vadd.f32 %v21953_v8, %v20783_v32 }
 0x167   :  { %1129 = vrot.lane.b32.xlu1 %v24172_v63, %s23908_s18  ;;  %v24180_v15 = vadd.f32 %v20783_v32, %v528_v11 }
 0x168   :  { %1052 = vrot.lane.b32.xlu0 %v24174_v10, %s23908_s18 }
 0x169   :  { %v21956_v19 = vpop.f32.mrb[2].mxu1 }
 0x16a   :  { %v538_v20 = vpop.f32.mrb[3].mxu1  ;;  %v24186_v22 = vadd.f32 %v21956_v19, %v20783_v32 }
 0x16b   :  { %1283 = vrot.lane.b32.xlu1 %v24176_v14, %s23908_s18  ;;  %v24190_v23 = vadd.f32 %v20783_v32, %v538_v20 }
 0x16c   :  { %1206 = vrot.lane.b32.xlu0 %v24180_v15, %s23908_s18 }
 0x16d   :  { %v21959_v24 = vpop.f32.mrb[4].mxu1 }
 0x16e   :  { %v548_v25 = vpop.f32.mrb[5].mxu1  ;;  %v24194_v28 = vadd.f32 %v21959_v24, %v20783_v32 }
 0x16f   :  { %1437 = vrot.lane.b32.xlu1 %v24186_v22, %s23908_s18  ;;  %v24198_v30 = vadd.f32 %v20783_v32, %v548_v25 }
 0x170   :  { %1360 = vrot.lane.b32.xlu0 %v24190_v23, %s23908_s18 }
 0x171   :  { %v21962_v31 = vpop.f32.mrb[6].mxu1 }
 0x172   :  { %v558_v33 = vpop.f32.mrb[7].mxu1  ;;  %v24202_v34 = vadd.f32 %v21962_v31, %v20783_v32 }
 0x173   :  { %1591 = vrot.lane.b32.xlu1 %v24194_v28, %s23908_s18  ;;  %v24206_v36 = vadd.f32 %v20783_v32, %v558_v33 }
 0x174   :  { %1514 = vrot.lane.b32.xlu0 %v24198_v30, %s23908_s18 }
 0x177   :  { %1745 = vrot.lane.b32.xlu1 %v24202_v34, %s23908_s18 }
 0x178   :  { %1668 = vrot.lane.b32.xlu0 %v24206_v36, %s23908_s18 }
 0x17b   :  { %1997 = vrot.lane.b32.xlu1 %v24150_v50, %s23909_s19 }
 0x17c   :  { %2073 = vrot.lane.b32.xlu0 %v24148_v47, %s23909_s19 }
 0x17f   :  { %2149 = vrot.lane.b32.xlu1 %v24158_v55, %s23909_s19 }
 0x180   :  { %2225 = vrot.lane.b32.xlu0 %v24156_v53, %s23909_s19 }
 0x183   :  { %2301 = vrot.lane.b32.xlu1 %v24166_v61, %s23909_s19 }
 0x1cd   :  { %v668_v39 = vpop.permute.xlu1 %667 }
 0x1ce   :  { %v590_v40 = vpop.permute.xlu0 %589 }
 0x1cf   :  { %21964 = vmatpush3.xpose.msk.msra.mxu1 %vm591_vm2, %v590_v40 }
 0x1d0   :  { %21968 = vmatprep.subr.mxu1 %v28826_v29 }
 0x1d1   :  { %v822_v41 = vpop.permute.xlu1 %821 }
 0x1d2   :  { %21966 = vmatmul.mubr.msk.f32.vlgmr.msra.gmra.mrb[8].mxu1 %vm591_vm2, %v24150_v50  ;;  %v745_v43 = vpop.permute.xlu0 %744 }
 0x1d3   :  { %21969 = vmatpush3.xpose.msk.msra.mxu1 %vm591_vm2, %v668_v39  ;;  %21970 = vmatprep.mubr.msk.f32.mxu1 %vm23907_vm1, %v28826_v29 }
 0x1d4   :  { %21973 = vmatprep.subr.mxu1 %v28826_v29 }
 0x1d5   :  { %v976_v32 = vpop.permute.xlu1 %975 }
 0x1d6   :  { %21971 = vmatmul.mubr.msk.f32.vlgmr.msra.gmra.mrb[10].mxu1 %vm591_vm2, %v24148_v47  ;;  %v899_v35 = vpop.permute.xlu0 %898 }
 0x1d7   :  { %21974 = vmatpush3.xpose.msk.msra.mxu1 %vm591_vm2, %v745_v43  ;;  %21975 = vmatprep.mubr.msk.f32.mxu1 %vm23907_vm1, %v28826_v29 }
 0x1d8   :  { %21978 = vmatprep.subr.mxu1 %v28826_v29 }
 0x1d9   :  { %v1130_v49 = vpop.permute.xlu1 %1129 }
 0x1da   :  { %21976 = vmatmul.mubr.msk.f32.vlgmr.msra.gmra.mrb[12].mxu1 %vm591_vm2, %v24158_v55  ;;  %v1053_v52 = vpop.permute.xlu0 %1052 }
 0x1db   :  { %21979 = vmatpush3.xpose.msk.msra.mxu1 %vm591_vm2, %v822_v41  ;;  %21980 = vmatprep.mubr.msk.f32.mxu1 %vm23907_vm1, %v28826_v29 }
 0x1dc   :  { %21983 = vmatprep.subr.mxu1 %v28826_v29 }
 0x1dd   :  { %v1284_v54 = vpop.permute.xlu1 %1283 }
 0x1de   :  { %21981 = vmatmul.mubr.msk.f32.vlgmr.msra.gmra.mrb[14].mxu1 %vm591_vm2, %v24156_v53  ;;  %v1207_v57 = vpop.permute.xlu0 %1206 }
 0x1df   :  { %21984 = vmatpush3.xpose.msk.msra.mxu1 %vm591_vm2, %v899_v35  ;;  %22004 = vmatpush3.xpose.msk.msra.mxu0 %vm591_vm2, %v1207_v57 }
 0x1e0   :  { %21985 = vmatprep.mubr.msk.f32.mxu1 %vm23907_vm1, %v28826_v29  ;;  %21988 = vmatprep.subr.mxu1 %v28826_v29 }
 0x1e1   :  { %v1438_v60 = vpop.permute.xlu1 %1437  ;;  %22013 = vmatprep.subr.mxu0 %v28826_v29 }
 0x1e2   :  { %21986 = vmatmul.mubr.msk.f32.vlgmr.msra.gmra.mrb[16].mxu1 %vm591_vm2, %v24166_v61  ;;  %22006 = vmatmul.mubr.msk.f32.vlgmr.msra.gmra.mrb[8].mxu0 %vm591_vm2, %v24180_v15  ;;  %v1361_v62 = vpop.permute.xlu0 %1360 }
 0x1e3   :  { %21989 = vmatpush3.xpose.msk.msra.mxu1 %vm591_vm2, %v976_v32  ;;  %22014 = vmatpush3.xpose.msk.msra.mxu0 %vm591_vm2, %v1361_v62 }
 0x1e4   :  { %21990 = vmatprep.mubr.msk.f32.mxu1 %vm23907_vm1, %v28826_v29  ;;  %22015 = vmatprep.mubr.msk.f32.mxu0 %vm23907_vm1, %v28826_v29 }
 0x1e5   :  { %v1592_v3 = vpop.permute.xlu1 %1591  ;;  %21993 = vmatprep.subr.mxu1 %v28826_v29  ;;  %22023 = vmatprep.subr.mxu0 %v28826_v29 }
 0x1e6   :  { %21991 = vmatmul.mubr.msk.f32.vlgmr.msra.gmra.mrb[18].mxu1 %vm591_vm2, %v24164_v58  ;;  %22016 = vmatmul.mubr.msk.f32.vlgmr.msra.gmra.mrb[10].mxu0 %vm591_vm2, %v24190_v23  ;;  %v1515_v8 = vpop.permute.xlu0 %1514 }
 0x1e7   :  { %21994 = vmatpush3.xpose.msk.msra.mxu1 %vm591_vm2, %v1053_v52  ;;  %22024 = vmatpush3.xpose.msk.msra.mxu0 %vm591_vm2, %v1515_v8 }
 0x1e8   :  { %21995 = vmatprep.mubr.msk.f32.mxu1 %vm23907_vm1, %v28826_v29  ;;  %22025 = vmatprep.mubr.msk.f32.mxu0 %vm23907_vm1, %v28826_v29 }
 0x1e9   :  { %v1746_v11 = vpop.permute.xlu1 %1745  ;;  %21998 = vmatprep.subr.mxu1 %v28826_v29  ;;  %22033 = vmatprep.subr.mxu0 %v28826_v29 }
 0x1ea   :  { %21996 = vmatmul.mubr.msk.f32.vlgmr.msra.gmra.mrb[20].mxu1 %vm591_vm2, %v24174_v10  ;;  %22026 = vmatmul.mubr.msk.f32.vlgmr.msra.gmra.mrb[12].mxu0 %vm591_vm2, %v24198_v30  ;;  %v1669_v19 = vpop.permute.xlu0 %1668 }
 0x1eb   :  { %21999 = vmatpush3.xpose.msk.msra.mxu1 %vm591_vm2, %v1130_v49  ;;  %22034 = vmatpush3.xpose.msk.msra.mxu0 %vm591_vm2, %v1669_v19 }
 0x1ec   :  { %22000 = vmatprep.mubr.msk.f32.mxu1 %vm23907_vm1, %v28826_v29  ;;  %22035 = vmatprep.mubr.msk.f32.mxu0 %vm23907_vm1, %v28826_v29 }
 0x1ed   :  { %v1998_v20 = vpop.permute.xlu1 %1997  ;;  %22008 = vmatprep.subr.mxu1 %v28826_v29  ;;  %22043 = vmatprep.subr.mxu0 %v28826_v29 }
 0x1ee   :  { %22001 = vmatmul.mubr.msk.f32.vlgmr.msra.gmra.mrb[22].mxu1 %vm591_vm2, %v24172_v63  ;;  %22036 = vmatmul.mubr.msk.f32.vlgmr.msra.gmra.mrb[14].mxu0 %vm591_vm2, %v24206_v36  ;;  %v2074_v24 = vpop.permute.xlu0 %2073 }
 0x1ef   :  { %22009 = vmatpush3.xpose.msk.msra.mxu1 %vm591_vm2, %v1284_v54  ;;  %22044 = vmatpush3.msra.mxu0 %v1998_v20 }
 0x1f0   :  { %22010 = vmatprep.mubr.msk.f32.mxu1 %vm23907_vm1, %v28826_v29  ;;  %22018 = vmatprep.subr.mxu1 %v28826_v29 }
 0x1f1   :  { %22045 = vmatprep.mubr.msk.f32.mxu0 %vm23907_vm1, %v28826_v29  ;;  %22053 = vmatprep.subr.mxu0 %v28826_v29  ;;  %v24399_v1 = vpop.permute.xlu1 %2149 }
 0x1f2   :  { %22011 = vmatmul.mubr.msk.f32.vlgmr.msra.gmra.mrb[24].mxu1 %vm591_vm2, %v24176_v14 }
 0x1f3   :  { %22019 = vmatpush3.xpose.msk.msra.mxu1 %vm591_vm2, %v1438_v60  ;;  %22020 = vmatprep.mubr.msk.f32.mxu1 %vm23907_vm1, %v28826_v29 }
 0x1f4   :  { %22028 = vmatprep.subr.mxu1 %v28826_v29 }
 0x1f5   :  { %v24401_v17 = vpop.permute.xlu1 %2301 }
 0x1f6   :  { %22021 = vmatmul.mubr.msk.f32.vlgmr.msra.gmra.mrb[26].mxu1 %vm591_vm2, %v24186_v22 }
 0x1f7   :  { %22029 = vmatpush3.xpose.msk.msra.mxu1 %vm591_vm2, %v1592_v3  ;;  %22030 = vmatprep.mubr.msk.f32.mxu1 %vm23907_vm1, %v28826_v29 }
 0x1f8   :  { %22038 = vmatprep.subr.mxu1 %v28826_v29 }
 0x1fa   :  { %22031 = vmatmul.mubr.msk.f32.vlgmr.msra.gmra.mrb[28].mxu1 %vm591_vm2, %v24194_v28 }
 0x1fb   :  { %22039 = vmatpush3.xpose.msk.msra.mxu1 %vm591_vm2, %v1746_v11  ;;  %22040 = vmatprep.mubr.msk.f32.mxu1 %vm23907_vm1, %v28826_v29 }
 0x1fc   :  { %22048 = vmatprep.subr.mxu1 %v28826_v29 }
 0x1fe   :  { %22041 = vmatmul.mubr.msk.f32.vlgmr.msra.gmra.mrb[30].mxu1 %vm591_vm2, %v24202_v34 }
 0x1ff   :  { %22049 = vmatpush3.msra.mxu1 %v2074_v24  ;;  %22050 = vmatprep.mubr.msk.f32.mxu1 %vm23907_vm1, %v28826_v29 }
 0x200   :  { %22058 = vmatprep.subr.mxu1 %v28826_v29 }
 0x2a5   :  { %v24320_v25 = vpop.f32.mrb[8].mxu1 }
 0x2a6   :  { %v21967_v31 = vpop.f32.mrb[9].mxu1  ;;  %v1821_v33 = vsel %vm373_vm0, %v24320_v25, -inf }
 0x2a7   :  { %1822 = vmax.xlane.f32.xlu0 %v1821_v33 }
 0x2a9   :  { %v24324_v39 = vpop.f32.mrb[10].mxu1 }
 0x2aa   :  { %v21972_v40 = vpop.f32.mrb[11].mxu1  ;;  %v1824_v31 = vsel %vm373_vm0, %v24324_v39, -inf }
 0x2ad   :  { %v24326_v41 = vpop.f32.mrb[12].mxu1 }
 0x2ae   :  { %v21977_v43 = vpop.f32.mrb[13].mxu1  ;;  %v1827_v32 = vsel %vm373_vm0, %v24326_v41, -inf }
 0x2af   :  { %1828 = vmax.xlane.f32.xlu0 %v1827_v32 }
 0x2b1   :  { %v24330_v35 = vpop.f32.mrb[14].mxu1 }
 0x2b2   :  { %v21982_v49 = vpop.f32.mrb[15].mxu1  ;;  %v1830_v52 = vsel %vm373_vm0, %v24330_v35, -inf }
 0x2b3   :  { %1831 = vmax.xlane.f32.xlu0 %v1830_v52 }
 0x2b5   :  { %v24334_v54 = vpop.f32.mrb[16].mxu1  ;;  %v24336_v57 = vpop.f32.mrb[8].mxu0 }
 0x2b6   :  { %v21987_v60 = vpop.f32.mrb[17].mxu1  ;;  %v22007_v62 = vpop.f32.mrb[9].mxu0  ;;  %v1845_v3 = vsel %vm373_vm0, %v24336_v57, -inf }
 0x2b7   :  { %1846 = vmax.xlane.f32.xlu1 %v1845_v3 }
 0x2b9   :  { %v24340_v8 = vpop.f32.mrb[18].mxu1  ;;  %v24342_v11 = vpop.f32.mrb[10].mxu0 }
 0x2ba   :  { %v21992_v19 = vpop.f32.mrb[19].mxu1  ;;  %v22017_v20 = vpop.f32.mrb[11].mxu0  ;;  %v1836_v24 = vsel %vm373_vm0, %v24340_v8, -inf  ;;  %v1851_v49 = vsel %vm373_vm0, %v24342_v11, -inf }
 0x2bb   :  { %1837 = vmax.xlane.f32.xlu0 %v1836_v24  ;;  %1825 = vmax.xlane.f32.xlu1 %v1824_v31 }
 0x2bd   :  { %v24348_v33 = vpop.f32.mrb[20].mxu1  ;;  %v24350_v40 = vpop.f32.mrb[12].mxu0 }
 0x2be   :  { %v21997_v43 = vpop.f32.mrb[21].mxu1  ;;  %v22027_v32 = vpop.f32.mrb[13].mxu0  ;;  %v1857_v19 = vsel %vm373_vm0, %v24350_v40, -inf }
 0x2bf   :  { %1852 = vmax.xlane.f32.xlu1 %v1851_v49  ;;  %v1833_v49 = vsel %vm373_vm0, %v24334_v54, -inf }
 0x2c1   :  { %v24354_v52 = vpop.f32.mrb[22].mxu1  ;;  %v24356_v60 = vpop.f32.mrb[14].mxu0 }
 0x2c2   :  { %v22002_v62 = vpop.f32.mrb[23].mxu1  ;;  %v22037_v3 = vpop.f32.mrb[15].mxu0  ;;  %v1863_v31 = vsel %vm373_vm0, %v24356_v60, -inf }
 0x2c3   :  { %1858 = vmax.xlane.f32.xlu1 %v1857_v19  ;;  %v1839_v19 = vsel %vm373_vm0, %v24348_v33, -inf }
 0x2c5   :  { %v24360_v20 = vpop.f32.mrb[24].mxu1 }
 0x2c6   :  { %v22012_v24 = vpop.f32.mrb[25].mxu1 }
 0x2c7   :  { %1864 = vmax.xlane.f32.xlu1 %v1863_v31 }
 0x2c9   :  { %v24364_v43 = vpop.f32.mrb[26].mxu1 }
 0x2ca   :  { %v22022_v32 = vpop.f32.mrb[27].mxu1 }
 0x2cb   :  { %1834 = vmax.xlane.f32.xlu1 %v1833_v49  ;;  %v1842_v32 = vsel %vm373_vm0, %v24354_v52, -inf  ;;  %v1848_v49 = vsel %vm373_vm0, %v24360_v20, -inf }
 0x2cd   :  { %v24368_v62 = vpop.f32.mrb[28].mxu1 }
 0x2ce   :  { %v22032_v3 = vpop.f32.mrb[29].mxu1 }
 0x2cf   :  { %1840 = vmax.xlane.f32.xlu1 %v1839_v19  ;;  %v1854_v3 = vsel %vm373_vm0, %v24364_v43, -inf  ;;  %v1860_v19 = vsel %vm373_vm0, %v24368_v62, -inf }
 0x2d1   :  { %2453 = vrot.lane.b32.xlu0 %v24174_v10, %s23909_s19  ;;  %v24374_v24 = vpop.f32.mrb[30].mxu1 }
 0x2d2   :  { %v22042_v31 = vpop.f32.mrb[31].mxu1 }
 0x2d3   :  { %v1866_v31 = vsel %vm373_vm0, %v24374_v24, -inf }
 0x2d5   :  { %2605 = vrot.lane.b32.xlu0 %v24180_v15, %s23909_s19 }
 0x2e0   :  { %2377 = vrot.lane.b32.xlu1 %v24164_v58, %s23909_s19 }
 0x2e4   :  { %2529 = vrot.lane.b32.xlu1 %v24172_v63, %s23909_s19 }
 0x2e8   :  { %2681 = vrot.lane.b32.xlu1 %v24176_v14, %s23909_s19 }
 0x2f4   :  { %1843 = vmax.xlane.f32.xlu0 %v1842_v32  ;;  %v24396_v32 = vpop.permute.xlu0 %2225 }
 0x2f8   :  { %1849 = vmax.xlane.f32.xlu0 %v1848_v49 }
 0x2fc   :  { %1855 = vmax.xlane.f32.xlu0 %v1854_v3 }
 0x300   :  { %1861 = vmax.xlane.f32.xlu0 %v1860_v19 }
 0x304   :  { %1867 = vmax.xlane.f32.xlu0 %v1866_v31 }
 0x31a   :  { %2757 = vrot.lane.b32.xlu0 %v24190_v23, %s23909_s19 }
 0x334   :  { %v1823_v0 = vpop.xlane.xlu0 %1822 }
 0x335   :  { %v1869_v49 = vsub.f32 %v24320_v25, %v1823_v0 }
 0x337   :  { %v1885_v29 = vmul.f32 1.442695, %v1869_v49 }
 0x339   :  { %23334 = vpow2.f32 %v1885_v29 }
 0x33c   :  { %v1829_v3 = vpop.xlane.xlu0 %1828 }
 0x33d   :  { %v1871_v12 = vsub.f32 %v24326_v41, %v1829_v3 }
 0x340   :  { %v1832_v13 = vpop.xlane.xlu0 %1831 }
 0x341   :  { %v1872_v16 = vsub.f32 %v24330_v35, %v1832_v13 }
 0x343   :  { %v24403_v19 = vpop.eup %23334  ;;  %v1891_v6 = vmul.f32 1.442695, %v1872_v16 }
 0x344   :  { %v1847_v7 = vpop.xlane.xlu1 %1846  ;;  %v1917_v31 = vsel %vm373_vm0, %v24403_v19, 0.0 }
 0x345   :  { %v1877_v5 = vsub.f32 %v24336_v57, %v1847_v7  ;;  %1918 = vadd.xlane.f32.xlu1 %v1917_v31  ;;  %v1889_v7 = vmul.f32 1.442695, %v1871_v12 }
 0x347   :  { %v1901_v0 = vmul.f32 1.442695, %v1877_v5 }
 0x348   :  { %v1826_v25 = vpop.xlane.xlu1 %1825  ;;  %v1838_v29 = vpop.xlane.xlu0 %1837 }
 0x349   :  { %23336 = vpow2.f32 %v1901_v0  ;;  %v1870_v49 = vsub.f32 %v24324_v39, %v1826_v25  ;;  %v1874_v44 = vsub.f32 %v24340_v8, %v1838_v29 }
 0x34b   :  { %v1887_v4 = vmul.f32 1.442695, %v1870_v49  ;;  %v1895_v57 = vmul.f32 1.442695, %v1874_v44 }
 0x34c   :  { %v1853_v46 = vpop.xlane.xlu1 %1852 }
 0x34d   :  { %23338 = vpow2.f32 %v1887_v4  ;;  %v1879_v37 = vsub.f32 %v24342_v11, %v1853_v46 }
 0x34e   :  { %23340 = vpow2.f32 %v1891_v6 }
 0x34f   :  { %v1905_v13 = vmul.f32 1.442695, %v1879_v37 }
 0x350   :  { %v1859_v5 = vpop.xlane.xlu1 %1858 }
 0x351   :  { %23342 = vpow2.f32 %v1905_v13  ;;  %v1881_v35 = vsub.f32 %v24350_v40, %v1859_v5 }
 0x352   :  { %23344 = vpow2.f32 %v1889_v7 }
 0x353   :  { %v24414_v39 = vpop.eup %23336  ;;  %23346 = vpow2.f32 %v1895_v57  ;;  %v1909_v16 = vmul.f32 1.442695, %v1881_v35 }
 0x354   :  { %v1865_v41 = vpop.xlane.xlu1 %1864  ;;  %v1941_v8 = vsel %vm373_vm0, %v24414_v39, 0.0 }
 0x355   :  { %v1883_v4 = vsub.f32 %v24356_v60, %v1865_v41  ;;  %1942 = vadd.xlane.f32.xlu1 %v1941_v8  ;;  %23348 = vpow2.f32 %v1909_v16 }
 0x357   :  { %v24419_v12 = vpop.eup %23338  ;;  %v1913_v6 = vmul.f32 1.442695, %v1883_v4 }
 0x358   :  { %v1835_v37 = vpop.xlane.xlu1 %1834  ;;  %v1920_v44 = vsel %vm373_vm0, %v24419_v12, 0.0  ;;  %v24423_v46 = vpop.eup %23340 }
 0x359   :  { %v1873_v11 = vsub.f32 %v24334_v54, %v1835_v37  ;;  %1921 = vadd.xlane.f32.xlu0 %v1920_v44  ;;  %23350 = vpow2.f32 %v1913_v6  ;;  %v1926_v25 = vsel %vm373_vm0, %v24423_v46, 0.0  ;;  %v24457_v6 = vpop.permute.xlu0 %2453 }
 0x35b   :  { %v24426_v40 = vpop.eup %23342  ;;  %v1893_v3 = vmul.f32 1.442695, %v1873_v11 }
 0x35c   :  { %v24428_v31 = vpop.eup %23344  ;;  %v1841_v60 = vpop.xlane.xlu1 %1840  ;;  %v1947_v0 = vsel %vm373_vm0, %v24426_v40, 0.0 }
 0x35d   :  { %v24434_v29 = vpop.eup %23346  ;;  %v1875_v49 = vsub.f32 %v24348_v33, %v1841_v60  ;;  %1948 = vadd.xlane.f32.xlu1 %v1947_v0  ;;  %1927 = vadd.xlane.f32.xlu0 %v1926_v25  ;;  %23352 = vpow2.f32 %v1893_v3  ;;  %v1923_v7 = vsel %vm373_vm0, %v24428_v31, 0.0  ;;  %v24461_v37 = vpop.permute.xlu0 %2605 }
 0x35e   :  { %v1932_v57 = vsel %vm373_vm0, %v24434_v29, 0.0 }
 0x35f   :  { %v1897_v54 = vmul.f32 1.442695, %v1875_v49  ;;  %v24441_v13 = vpop.eup %23348 }
 0x360   :  { %v1953_v5 = vsel %vm373_vm0, %v24441_v13, 0.0 }
 0x361   :  { %1924 = vadd.xlane.f32.xlu1 %v1923_v7  ;;  %1933 = vadd.xlane.f32.xlu0 %v1932_v57  ;;  %23354 = vpow2.f32 %v1897_v54 }
 0x363   :  { %v24445_v35 = vpop.eup %23350 }
 0x364   :  { %v1959_v33 = vsel %vm373_vm0, %v24445_v35, 0.0 }
 0x365   :  { %1954 = vadd.xlane.f32.xlu1 %v1953_v5 }
 0x367   :  { %v24449_v16 = vpop.eup %23352 }
 0x368   :  { %v1929_v41 = vsel %vm373_vm0, %v24449_v16, 0.0 }
 0x369   :  { %1960 = vadd.xlane.f32.xlu1 %v1959_v33 }
 0x36b   :  { %v24453_v8 = vpop.eup %23354 }
 0x36c   :  { %v1935_v4 = vsel %vm373_vm0, %v24453_v8, 0.0 }
 0x36d   :  { %1930 = vadd.xlane.f32.xlu1 %v1929_v41 }
 0x371   :  { %1936 = vadd.xlane.f32.xlu1 %v1935_v4 }
 0x377   :  { %2909 = vrot.lane.b32.xlu0 %v24198_v30, %s23909_s19 }
 0x381   :  { %v1844_v44 = vpop.xlane.xlu0 %1843 }
 0x382   :  { %v1876_v11 = vsub.f32 %v24354_v52, %v1844_v44  ;;  %2833 = vrot.lane.b32.xlu1 %v24186_v22, %s23909_s19 }
 0x384   :  { %v1899_v3 = vmul.f32 1.442695, %v1876_v11 }
 0x385   :  { %v1850_v60 = vpop.xlane.xlu0 %1849 }
 0x386   :  { %v1878_v0 = vsub.f32 %v24360_v20, %v1850_v60  ;;  %2985 = vrot.lane.b32.xlu1 %v24194_v28, %s23909_s19  ;;  %23356 = vpow2.f32 %v1899_v3 }
 0x388   :  { %v1903_v25 = vmul.f32 1.442695, %v1878_v0 }
 0x389   :  { %v1856_v49 = vpop.xlane.xlu0 %1855 }
 0x38a   :  { %v1880_v54 = vsub.f32 %v24364_v43, %v1856_v49  ;;  %3137 = vrot.lane.b32.xlu1 %v24202_v34, %s23909_s19  ;;  %23358 = vpow2.f32 %v1903_v25  ;;  %v2378_v49 = vpop.permute.xlu1 %2377 }
 0x38c   :  { %v1907_v52 = vmul.f32 1.442695, %v1880_v54 }
 0x38d   :  { %v1862_v7 = vpop.xlane.xlu0 %1861 }
 0x38e   :  { %v1882_v57 = vsub.f32 %v24368_v62, %v1862_v7  ;;  %3410 = vrot.lane.b32.xlu1 %v24150_v50, %s23910_s20  ;;  %23360 = vpow2.f32 %v1907_v52  ;;  %v2530_v54 = vpop.permute.xlu1 %2529 }
 0x390   :  { %v1911_v20 = vmul.f32 1.442695, %v1882_v57  ;;  %v24475_v33 = vpop.eup %23356 }
 0x391   :  { %v1868_v5 = vpop.xlane.xlu0 %1867  ;;  %v1938_v4 = vsel %vm373_vm0, %v24475_v33, 0.0 }
 0x392   :  { %v1884_v41 = vsub.f32 %v24374_v24, %v1868_v5  ;;  %3488 = vrot.lane.b32.xlu1 %v24148_v47, %s23910_s20  ;;  %23362 = vpow2.f32 %v1911_v20  ;;  %v24536_v52 = vpop.permute.xlu1 %2681 }
 0x394   :  { %v1915_v43 = vmul.f32 1.442695, %v1884_v41  ;;  %v24482_v62 = vpop.eup %23358 }
 0x395   :  { %v1944_v44 = vsel %vm373_vm0, %v24482_v62, 0.0  ;;  %v24557_v20 = vpop.permute.xlu0 %2757 }
 0x396   :  { %3566 = vrot.lane.b32.xlu1 %v24158_v55, %s23910_s20  ;;  %1939 = vadd.xlane.f32.xlu0 %v1938_v4  ;;  %23364 = vpow2.f32 %v1915_v43 }
 0x398   :  { %v24488_v11 = vpop.eup %23360 }
 0x399   :  { %v1950_v24 = vsel %vm373_vm0, %v24488_v11, 0.0 }
 0x39a   :  { %3644 = vrot.lane.b32.xlu1 %v24156_v53, %s23910_s20  ;;  %1945 = vadd.xlane.f32.xlu0 %v1944_v44 }
 0x39c   :  { %v24494_v3 = vpop.eup %23362 }
 0x39d   :  { %v1956_v60 = vsel %vm373_vm0, %v24494_v3, 0.0 }
 0x39e   :  { %3722 = vrot.lane.b32.xlu1 %v24166_v61, %s23910_s20  ;;  %1951 = vadd.xlane.f32.xlu0 %v1950_v24 }
 0x3a0   :  { %v24500_v0 = vpop.eup %23364 }
 0x3a1   :  { %v1962_v25 = vsel %vm373_vm0, %v24500_v0, 0.0 }
 0x3a2   :  { %3800 = vrot.lane.b32.xlu1 %v24164_v58, %s23910_s20  ;;  %1957 = vadd.xlane.f32.xlu0 %v1956_v60 }
 0x3a6   :  { %3878 = vrot.lane.b32.xlu1 %v24174_v10, %s23910_s20  ;;  %1963 = vadd.xlane.f32.xlu0 %v1962_v25 }
 0x3aa   :  { %3956 = vrot.lane.b32.xlu1 %v24172_v63, %s23910_s20 }
 0x3ae   :  { %4114 = vrot.lane.b32.xlu1 %v24176_v14, %s23911_s21 }
 0x3b2   :  { %4112 = vrot.lane.b32.xlu1 %v24176_v14, %s23910_s20 }
 0x3b6   :  { %4270 = vrot.lane.b32.xlu1 %v24186_v22, %s23911_s21 }
 0x3ba   :  { %4268 = vrot.lane.b32.xlu1 %v24186_v22, %s23910_s20 }
 0x3bc   :  { %3061 = vrot.lane.b32.xlu0 %v24206_v36, %s23909_s19 }
 0x3be   :  { %4426 = vrot.lane.b32.xlu1 %v24194_v28, %s23911_s21 }
 0x3c0   :  { %3412 = vrot.lane.b32.xlu0 %v24150_v50, %s23911_s21 }
 0x3c2   :  { %4424 = vrot.lane.b32.xlu1 %v24194_v28, %s23910_s20 }
 0x3c4   :  { %3490 = vrot.lane.b32.xlu0 %v24148_v47, %s23911_s21 }
 0x3c6   :  { %4582 = vrot.lane.b32.xlu1 %v24202_v34, %s23911_s21 }
 0x3c8   :  { %3568 = vrot.lane.b32.xlu0 %v24158_v55, %s23911_s21 }
 0x3ca   :  { %4580 = vrot.lane.b32.xlu1 %v24202_v34, %s23910_s20 }
 0x3cc   :  { %3646 = vrot.lane.b32.xlu0 %v24156_v53, %s23911_s21 }
 0x3ce   :  { %4834 = vrot.lane.b32.xlu1 %v24150_v50, %s23912_s22 }
 0x3d0   :  { %3724 = vrot.lane.b32.xlu0 %v24166_v61, %s23911_s21 }
 0x3d2   :  { %v1919_v7 = vpop.xlane.xlu1 %1918  ;;  %4986 = vrot.lane.b32.xlu1 %v24158_v55, %s23912_s22  ;;  %v28909_v55 = vmov 0.0  }
 0x3d3   :  { %23366 = vrcp.f32 %v1919_v7 }
 0x3d4   :  { %3802 = vrot.lane.b32.xlu0 %v24164_v58, %s23911_s21 }
 0x3d8   :  { %3880 = vrot.lane.b32.xlu0 %v24174_v10, %s23911_s21 }
 0x3dc   :  { %3958 = vrot.lane.b32.xlu0 %v24172_v63, %s23911_s21 }
 0x3dd   :  { %v23367_v57 = vpop.eup %23366 }
 0x3de   :  { %v1981_v50 = vmul.f32 %v23367_v57, %v24403_v19 }
 0x3e0   :  { %22046 = vmatmul.mubr.msk.f32.vlgmr.msra.gmra.mrb[16].mxu0 %vm373_vm0, %v1981_v50  ;;  %4036 = vrot.lane.b32.xlu0 %v24180_v15, %s23911_s21 }
 0x3e1   :  { %22054 = vmatpush3.msra.mxu0 %v24399_v1  ;;  %22055 = vmatprep.mubr.msk.f32.mxu0 %vm23907_vm1, %v28909_v55 }
 0x3e2   :  { %22063 = vmatprep.subr.mxu0 %v28909_v55  ;;  %v1943_v5 = vpop.xlane.xlu1 %1942 }
 0x3e4   :  { %4034 = vrot.lane.b32.xlu0 %v24180_v15, %s23910_s20 }
 0x3e6   :  { %v1922_v41 = vpop.xlane.xlu0 %1921 }
 0x3e7   :  { %23368 = vrcp.f32 %v1922_v41 }
 0x3e8   :  { %4192 = vrot.lane.b32.xlu0 %v24190_v23, %s23911_s21 }
 0x3ea   :  { %v1949_v19 = vpop.xlane.xlu1 %1948  ;;  %v1928_v43 = vpop.xlane.xlu0 %1927 }
 0x3eb   :  { %23370 = vrcp.f32 %v1928_v43 }
 0x3ec   :  { %4190 = vrot.lane.b32.xlu0 %v24190_v23, %s23910_s20 }
 0x3ee   :  { %v1925_v1 = vpop.xlane.xlu1 %1924  ;;  %v1934_v4 = vpop.xlane.xlu0 %1933 }
 0x3ef   :  { %23372 = vrcp.f32 %v1925_v1 }
 0x3f0   :  { %23374 = vrcp.f32 %v1934_v4  ;;  %4348 = vrot.lane.b32.xlu0 %v24198_v30, %s23911_s21 }
 0x3f1   :  { %v23369_v44 = vpop.eup %23368 }
 0x3f2   :  { %v1955_v24 = vpop.xlane.xlu1 %1954  ;;  %v1982_v60 = vmul.f32 %v23369_v44, %v24419_v12  ;;  %v2910_v1 = vpop.permute.xlu0 %2909 }
 0x3f4   :  { %4346 = vrot.lane.b32.xlu0 %v24198_v30, %s23910_s20  ;;  %22051 = vmatmul.mubr.msk.f32.vlgmr.msra.gmra.mrb[32].mxu1 %vm373_vm0, %v1982_v60 }
 0x3f5   :  { %22059 = vmatpush3.msra.mxu1 %v24396_v32  ;;  %22060 = vmatprep.mubr.msk.f32.mxu1 %vm23907_vm1, %v28909_v55  ;;  %v23371_v25 = vpop.eup %23370 }
 0x3f6   :  { %v24575_v7 = vpop.xlane.xlu1 %1960  ;;  %22068 = vmatprep.subr.mxu1 %v28909_v55  ;;  %v1984_v57 = vmul.f32 %v23371_v25, %v24423_v46 }
 0x3f8   :  { %4504 = vrot.lane.b32.xlu0 %v24206_v36, %s23911_s21  ;;  %22061 = vmatmul.mubr.msk.f32.vlgmr.msra.gmra.mrb[34].mxu1 %vm373_vm0, %v1984_v57 }
 0x3f9   :  { %v23373_v12 = vpop.eup %23372  ;;  %22069 = vmatpush3.msra.mxu1 %v2378_v49  ;;  %22070 = vmatprep.mubr.msk.f32.mxu1 %vm23907_vm1, %v28909_v55 }
 0x3fa   :  { %v23375_v50 = vpop.eup %23374  ;;  %v1931_v41 = vpop.xlane.xlu1 %1930  ;;  %v1983_v32 = vmul.f32 %v23373_v12, %v24428_v31  ;;  %22078 = vmatprep.subr.mxu1 %v28909_v55 }
 0x3fb   :  { %23376 = vrcp.f32 %v1931_v41  ;;  %v1986_v43 = vmul.f32 %v23375_v50, %v24434_v29 }
 0x3fc   :  { %22056 = vmatmul.mubr.msk.f32.vlgmr.msra.gmra.mrb[18].mxu0 %vm373_vm0, %v1983_v32  ;;  %4502 = vrot.lane.b32.xlu0 %v24206_v36, %s23910_s20 }
 0x3fd   :  { %22064 = vmatpush3.msra.mxu0 %v24401_v17  ;;  %22071 = vmatmul.mubr.msk.f32.vlgmr.msra.gmra.mrb[36].mxu1 %vm373_vm0, %v1986_v43 }
 0x3fe   :  { %22079 = vmatpush3.msra.mxu1 %v2530_v54  ;;  %v1937_v46 = vpop.xlane.xlu1 %1936  ;;  %22065 = vmatprep.mubr.msk.f32.mxu0 %vm23907_vm1, %v28909_v55 }
 0x3ff   :  { %23378 = vrcp.f32 %v1937_v46  ;;  %22073 = vmatprep.subr.mxu0 %v28909_v55  ;;  %22080 = vmatprep.mubr.msk.f32.mxu1 %vm23907_vm1, %v28909_v55 }
 0x400   :  { %4910 = vrot.lane.b32.xlu0 %v24148_v47, %s23912_s22  ;;  %22088 = vmatprep.subr.mxu1 %v28909_v55  ;;  %23380 = vrcp.f32 %v1943_v5 }
 0x401   :  { %23382 = vrcp.f32 %v1949_v19 }
 0x402   :  { %v2834_v29 = vpop.permute.xlu1 %2833  ;;  %23384 = vrcp.f32 %v1955_v24 }
 0x405   :  { %v23377_v17 = vpop.eup %23376 }
 0x406   :  { %v1985_v31 = vmul.f32 %v23377_v17, %v24449_v16  ;;  %v2986_v5 = vpop.permute.xlu1 %2985 }
 0x408   :  { %22066 = vmatmul.mubr.msk.f32.vlgmr.msra.gmra.mrb[20].mxu0 %vm373_vm0, %v1985_v31 }
 0x409   :  { %v23379_v49 = vpop.eup %23378  ;;  %22074 = vmatpush3.msra.mxu0 %v24457_v6  ;;  %22075 = vmatprep.mubr.msk.f32.mxu0 %vm23907_vm1, %v28909_v55 }
 0x40a   :  { %22083 = vmatprep.subr.mxu0 %v28909_v55  ;;  %v1987_v47 = vmul.f32 %v23379_v49, %v24453_v8  ;;  %v23381_v54 = vpop.eup %23380  ;;  %v3138_v19 = vpop.permute.xlu1 %3137 }
 0x40b   :  { %v1989_v16 = vmul.f32 %v23381_v54, %v24414_v39  ;;  %v23383_v6 = vpop.eup %23382 }
 0x40c   :  { %22076 = vmatmul.mubr.msk.f32.vlgmr.msra.gmra.mrb[22].mxu0 %vm373_vm0, %v1987_v47  ;;  %v1991_v8 = vmul.f32 %v23383_v6, %v24426_v40 }
 0x40d   :  { %22084 = vmatpush3.msra.mxu0 %v24461_v37  ;;  %22085 = vmatprep.mubr.msk.f32.mxu0 %vm23907_vm1, %v28909_v55  ;;  %v23385_v37 = vpop.eup %23384 }
 0x40e   :  { %22093 = vmatprep.subr.mxu0 %v28909_v55  ;;  %v1993_v39 = vmul.f32 %v23385_v37, %v24441_v13 }
 0x410   :  { %22086 = vmatmul.mubr.msk.f32.vlgmr.msra.gmra.mrb[24].mxu0 %vm373_vm0, %v1989_v16 }
 0x411   :  { %22094 = vmatpush3.msra.mxu0 %v24557_v20  ;;  %22095 = vmatprep.mubr.msk.f32.mxu0 %vm23907_vm1, %v28909_v55  ;;  %v24625_v20 = vpop.permute.xlu1 %3410 }
 0x412   :  { %22103 = vmatprep.subr.mxu0 %v28909_v55 }
 0x414   :  { %22096 = vmatmul.mubr.msk.f32.vlgmr.msra.gmra.mrb[26].mxu0 %vm373_vm0, %v1991_v8 }
 0x415   :  { %22104 = vmatpush3.msra.mxu0 %v2910_v1  ;;  %22105 = vmatprep.mubr.msk.f32.mxu0 %vm23907_vm1, %v28909_v55  ;;  %v24629_v40 = vpop.permute.xlu1 %3488 }
 0x416   :  { %22113 = vmatprep.subr.mxu0 %v28909_v55 }
 0x418   :  { %22106 = vmatmul.mubr.msk.f32.vlgmr.msra.gmra.mrb[28].mxu0 %vm373_vm0, %v1993_v39 }
 0x419   :  { %22115 = vmatprep.mubr.msk.f32.mxu0 %vm23907_vm1, %v28909_v55  ;;  %v24631_v44 = vpop.permute.xlu1 %3566 }
 0x41d   :  { %v24634_v13 = vpop.permute.xlu1 %3644 }
 0x421   :  { %v24637_v50 = vpop.permute.xlu1 %3722 }
 0x423   :  { %v1940_v4 = vpop.xlane.xlu0 %1939 }
 0x424   :  { %23386 = vrcp.f32 %v1940_v4 }
 0x425   :  { %v24648_v46 = vpop.permute.xlu1 %3800 }
 0x427   :  { %v1946_v24 = vpop.xlane.xlu0 %1945 }
 0x428   :  { %23388 = vrcp.f32 %v1946_v24 }
 0x429   :  { %23390 = vrcp.f32 %v24575_v7 }
 0x42b   :  { %v1952_v60 = vpop.xlane.xlu0 %1951 }
 0x42c   :  { %23392 = vrcp.f32 %v1952_v60 }
 0x42e   :  { %v23387_v25 = vpop.eup %23386 }
 0x42f   :  { %v1958_v57 = vpop.xlane.xlu0 %1957  ;;  %v1988_v12 = vmul.f32 %v23387_v25, %v24475_v33 }
 0x430   :  { %23394 = vrcp.f32 %v1958_v57 }
 0x431   :  { %22081 = vmatmul.mubr.msk.f32.vlgmr.msra.gmra.mrb[38].mxu1 %vm373_vm0, %v1988_v12 }
 0x432   :  { %v23389_v41 = vpop.eup %23388  ;;  %22089 = vmatpush3.msra.mxu1 %v24536_v52  ;;  %22090 = vmatprep.mubr.msk.f32.mxu1 %vm23907_vm1, %v28909_v55 }
 0x433   :  { %v1964_v7 = vpop.xlane.xlu0 %1963  ;;  %22098 = vmatprep.subr.mxu1 %v28909_v55  ;;  %v1990_v32 = vmul.f32 %v23389_v41, %v24482_v62  ;;  %v23391_v43 = vpop.eup %23390  ;;  %v24656_v62 = vld [vmem:[%s28820_s4] sm:$0xff] }
 0x434   :  { %23396 = vrcp.f32 %v1964_v7  ;;  %v1995_v31 = vmul.f32 %v23391_v43, %v24445_v35 }
 0x435   :  { %22091 = vmatmul.mubr.msk.f32.vlgmr.msra.gmra.mrb[40].mxu1 %vm373_vm0, %v1990_v32 }
 0x436   :  { %v23393_v33 = vpop.eup %23392  ;;  %22099 = vmatpush3.msra.mxu1 %v2834_v29  ;;  %22100 = vmatprep.mubr.msk.f32.mxu1 %vm23907_vm1, %v28909_v55 }
 0x437   :  { %v3062_v52 = vpop.permute.xlu0 %3061  ;;  %22108 = vmatprep.subr.mxu1 %v28909_v55  ;;  %v1992_v17 = vmul.f32 %v23393_v33, %v24488_v11  ;;  %v3879_v11 = vpop.permute.xlu1 %3878 }
 0x438   :  { %22114 = vmatpush3.msra.mxu0 %v3062_v52 }
 0x439   :  { %22101 = vmatmul.mubr.msk.f32.vlgmr.msra.gmra.mrb[42].mxu1 %vm373_vm0, %v1992_v17  ;;  %22116 = vmatmul.mubr.msk.f32.vlgmr.msra.gmra.mrb[30].mxu0 %vm373_vm0, %v1995_v31 }
 0x43a   :  { %v23395_v29 = vpop.eup %23394  ;;  %22109 = vmatpush3.msra.mxu1 %v2986_v5  ;;  %22110 = vmatprep.mubr.msk.f32.mxu1 %vm23907_vm1, %v28909_v55 }
 0x43b   :  { %v3413_v49 = vpop.permute.xlu0 %3412  ;;  %22118 = vmatprep.subr.mxu1 %v28909_v55  ;;  %v1994_v35 = vmul.f32 %v23395_v29, %v24494_v3  ;;  %22123 = vmatprep.subr.msk.mxu0 %vm3261_vm3, %v24656_v62  ;;  %v3957_v3 = vpop.permute.xlu1 %3956 }
 0x43c   :  { %22124 = vmatpush3.msk.msra.mxu0 %vm3261_vm3, %v24656_v62 }
 0x43d   :  { %22111 = vmatmul.mubr.msk.f32.vlgmr.msra.gmra.mrb[44].mxu1 %vm373_vm0, %v1994_v35  ;;  %22189 = vmatprep.subr.mxu0 %v28909_v55 }
 0x43e   :  { %v23397_v47 = vpop.eup %23396  ;;  %22119 = vmatpush3.msra.mxu1 %v3138_v19  ;;  %22120 = vmatprep.mubr.msk.f32.mxu1 %vm23907_vm1, %v28909_v55 }
 0x43f   :  { %v3491_v54 = vpop.permute.xlu0 %3490  ;;  %v1996_v5 = vmul.f32 %v23397_v47, %v24500_v0  ;;  %22149 = vmatprep.subr.mxu1 %v28909_v55  ;;  %v4115_v8 = vpop.permute.xlu1 %4114 }
 0x441   :  { %22121 = vmatmul.mubr.msk.f32.vlgmr.msra.gmra.mrb[46].mxu1 %vm373_vm0, %v1996_v5 }
 0x442   :  { %22151 = vmatprep.mubr.msk.f32.mxu1 %vm23907_vm1, %v28909_v55 }
 0x443   :  { %v3569_v16 = vpop.permute.xlu0 %3568  ;;  %v4113_v37 = vpop.permute.xlu1 %4112 }
 0x445   :  { %22150 = vmatpush3.xpose.msk.msra.mxu1 %vm591_vm2, %v3413_v49 }
 0x446   :  { %22154 = vmatprep.subr.mxu1 %v28909_v55 }
 0x447   :  { %v3647_v6 = vpop.permute.xlu0 %3646  ;;  %v4271_v39 = vpop.permute.xlu1 %4270 }
 0x448   :  { %22152 = vmatmul.mubr.msk.f32.vlgmr.msra.gmra.mrb[48].mxu1 %vm591_vm2, %v24625_v20 }
 0x449   :  { %22155 = vmatpush3.xpose.msk.msra.mxu1 %vm591_vm2, %v3491_v54  ;;  %22156 = vmatprep.mubr.msk.f32.mxu1 %vm23907_vm1, %v28909_v55 }
 0x44a   :  { %22159 = vmatprep.subr.mxu1 %v28909_v55 }
 0x44b   :  { %v3725_v0 = vpop.permute.xlu0 %3724 }
 0x44c   :  { %22157 = vmatmul.mubr.msk.f32.vlgmr.msra.gmra.mrb[50].mxu1 %vm591_vm2, %v24629_v40  ;;  %v4269_v40 = vpop.permute.xlu1 %4268 }
 0x44d   :  { %22160 = vmatpush3.xpose.msk.msra.mxu1 %vm591_vm2, %v3569_v16  ;;  %22161 = vmatprep.mubr.msk.f32.mxu1 %vm23907_vm1, %v28909_v55 }
 0x44e   :  { %22164 = vmatprep.subr.mxu1 %v28909_v55 }
 0x44f   :  { %v3803_v19 = vpop.permute.xlu0 %3802 }
 0x450   :  { %22162 = vmatmul.mubr.msk.f32.vlgmr.msra.gmra.mrb[52].mxu1 %vm591_vm2, %v24631_v44  ;;  %v4427_v24 = vpop.permute.xlu1 %4426 }
 0x451   :  { %22165 = vmatpush3.xpose.msk.msra.mxu1 %vm591_vm2, %v3647_v6  ;;  %22166 = vmatprep.mubr.msk.f32.mxu1 %vm23907_vm1, %v28909_v55 }
 0x452   :  { %22169 = vmatprep.subr.mxu1 %v28909_v55 }
 0x453   :  { %v3881_v1 = vpop.permute.xlu0 %3880 }
 0x454   :  { %22167 = vmatmul.mubr.msk.f32.vlgmr.msra.gmra.mrb[54].mxu1 %vm591_vm2, %v24634_v13  ;;  %v4425_v60 = vpop.permute.xlu1 %4424 }
 0x455   :  { %22170 = vmatpush3.xpose.msk.msra.mxu1 %vm591_vm2, %v3725_v0  ;;  %22171 = vmatprep.mubr.msk.f32.mxu1 %vm23907_vm1, %v28909_v55 }
 0x456   :  { %22174 = vmatprep.subr.mxu1 %v28909_v55 }
 0x457   :  { %v3959_v20 = vpop.permute.xlu0 %3958 }
 0x458   :  { %22172 = vmatmul.mubr.msk.f32.vlgmr.msra.gmra.mrb[56].mxu1 %vm591_vm2, %v24637_v50  ;;  %v4583_v12 = vpop.permute.xlu1 %4582 }
 0x459   :  { %22175 = vmatpush3.xpose.msk.msra.mxu1 %vm591_vm2, %v3803_v19  ;;  %22176 = vmatprep.mubr.msk.f32.mxu1 %vm23907_vm1, %v28909_v55 }
 0x45a   :  { %22179 = vmatprep.subr.mxu1 %v28909_v55 }
 0x45b   :  { %v4037_v4 = vpop.permute.xlu0 %4036 }
 0x45c   :  { %22177 = vmatmul.mubr.msk.f32.vlgmr.msra.gmra.mrb[58].mxu1 %vm591_vm2, %v24648_v46  ;;  %v4581_v41 = vpop.permute.xlu1 %4580 }
 0x45d   :  { %22180 = vmatpush3.xpose.msk.msra.mxu1 %vm591_vm2, %v3881_v1  ;;  %22181 = vmatprep.mubr.msk.f32.mxu1 %vm23907_vm1, %v28909_v55 }
 0x45e   :  { %22184 = vmatprep.subr.mxu1 %v28909_v55 }
 0x45f   :  { %v24715_v44 = vpop.permute.xlu0 %4034 }
 0x460   :  { %22182 = vmatmul.mubr.msk.f32.vlgmr.msra.gmra.mrb[60].mxu1 %vm591_vm2, %v3879_v11 }
 0x461   :  { %22185 = vmatpush3.xpose.msk.msra.mxu1 %vm591_vm2, %v3959_v20  ;;  %22186 = vmatprep.mubr.msk.f32.mxu1 %vm23907_vm1, %v28909_v55 }
 0x462   :  { %22194 = vmatprep.subr.mxu1 %v28909_v55 }
 0x463   :  { %v24722_v13 = vpop.permute.xlu0 %4192 }
 0x464   :  { %22187 = vmatmul.mubr.msk.f32.vlgmr.msra.gmra.mrb[62].mxu1 %vm591_vm2, %v3957_v3 }
 0x465   :  { %22195 = vmatpush3.xpose.msk.msra.mxu1 %vm591_vm2, %v4115_v8  ;;  %22196 = vmatprep.mubr.msk.f32.mxu1 %vm23907_vm1, %v28909_v55 }
 0x466   :  { %22204 = vmatprep.subr.mxu1 %v28909_v55 }
 0x467   :  { %v24729_v25 = vpop.permute.xlu0 %4190 }
 0x468   :  { %22197 = vmatmul.mubr.msk.f32.vlgmr.msra.gmra.mrb[64].mxu1 %vm591_vm2, %v4113_v37 }
 0x469   :  { %22205 = vmatpush3.xpose.msk.msra.mxu1 %vm591_vm2, %v4271_v39  ;;  %22206 = vmatprep.mubr.msk.f32.mxu1 %vm23907_vm1, %v28909_v55 }
 0x46a   :  { %22214 = vmatprep.subr.mxu1 %v28909_v55 }
 0x46b   :  { %v24736_v57 = vpop.permute.xlu0 %4348 }
 0x46c   :  { %22207 = vmatmul.mubr.msk.f32.vlgmr.msra.gmra.mrb[66].mxu1 %vm591_vm2, %v4269_v40 }
 0x46d   :  { %22215 = vmatpush3.xpose.msk.msra.mxu1 %vm591_vm2, %v4427_v24  ;;  %22216 = vmatprep.mubr.msk.f32.mxu1 %vm23907_vm1, %v28909_v55 }
 0x46e   :  { %22224 = vmatprep.subr.mxu1 %v28909_v55 }
 0x46f   :  { %v24743_v50 = vpop.permute.xlu0 %4346 }
 0x470   :  { %22217 = vmatmul.mubr.msk.f32.vlgmr.msra.gmra.mrb[68].mxu1 %vm591_vm2, %v4425_v60 }
 0x471   :  { %22225 = vmatpush3.xpose.msk.msra.mxu1 %vm591_vm2, %v4583_v12  ;;  %22226 = vmatprep.mubr.msk.f32.mxu1 %vm23907_vm1, %v28909_v55 }
 0x472   :  { %22234 = vmatprep.subr.mxu1 %v28909_v55 }
 0x473   :  { %v24750_v7 = vpop.permute.xlu0 %4504 }
 0x474   :  { %22227 = vmatmul.mubr.msk.f32.vlgmr.msra.gmra.mrb[70].mxu1 %vm591_vm2, %v4581_v41 }
 0x475   :  { %22236 = vmatprep.mubr.msk.f32.mxu1 %vm23907_vm1, %v28909_v55 }
 0x477   :  { %v24755_v32 = vpop.permute.xlu0 %4502 }
 0x47b   :  { %v4911_v43 = vpop.permute.xlu0 %4910 }
 0x47c   :  { %22235 = vmatpush3.msra.mxu1 %v4911_v43 }
 0x47d   :  { %22244 = vmatprep.subr.mxu1 %v28909_v55 }
 0x4b3   :  { %v2069_v33 = vpop.f32.mrb[16].mxu0 }
 0x4b4   :  { %v22047_v46 = vpop.f32.mrb[17].mxu0  ;;  %22125 = vmatprep.mubr.msk.f32.mxu0 %vm591_vm2, %v2069_v33 }
 0x4c7   :  { %v2145_v52 = vpop.f32.mrb[32].mxu1 }
 0x4c8   :  { %v22052_v17 = vpop.f32.mrb[33].mxu1  ;;  %22126 = vmatmul.mubr.msk.f32.vlgmr.msra.gmra.mrb[32].mxu0 %vm591_vm2, %v2145_v52 }
 0x4c9   :  { %22190 = vmatpush3.xpose.msk.msra.mxu0 %vm591_vm2, %v4037_v4 }
 0x4ca   :  { %22199 = vmatprep.subr.mxu0 %v28909_v55 }
 0x4cb   :  { %v2297_v31 = vpop.f32.mrb[34].mxu1 }
 0x4cc   :  { %v22062_v29 = vpop.f32.mrb[35].mxu1 }
 0x4cf   :  { %v2221_v49 = vpop.f32.mrb[18].mxu0 }
 0x4d0   :  { %v2449_v35 = vpop.f32.mrb[36].mxu1  ;;  %v22057_v11 = vpop.f32.mrb[19].mxu0  ;;  %22128 = vmatprep.mubr.msk.f32.mxu0 %vm591_vm2, %v2221_v49 }
 0x4d1   :  { %v22072_v47 = vpop.f32.mrb[37].mxu1  ;;  %22129 = vmatmul.mubr.msk.f32.gmra.mrb[34].mxu0 %vm591_vm2, %v2297_v31  ;;  %v4835_v11 = vpop.permute.xlu1 %4834 }
 0x4db   :  { %v2373_v54 = vpop.f32.mrb[20].mxu0 }
 0x4dc   :  { %v22067_v5 = vpop.f32.mrb[21].mxu0  ;;  %22131 = vmatprep.mubr.msk.f32.mxu0 %vm591_vm2, %v2373_v54 }
 0x4dd   :  { %22132 = vmatmul.mubr.msk.f32.gmra.mrb[36].mxu0 %vm591_vm2, %v2449_v35 }
 0x4df   :  { %v2525_v3 = vpop.f32.mrb[22].mxu0 }
 0x4e0   :  { %v22077_v16 = vpop.f32.mrb[23].mxu0  ;;  %22134 = vmatprep.mubr.msk.f32.mxu0 %vm591_vm2, %v2525_v3 }
 0x4e3   :  { %v2677_v6 = vpop.f32.mrb[24].mxu0 }
 0x4e4   :  { %v22087_v8 = vpop.f32.mrb[25].mxu0 }
 0x4e7   :  { %v2829_v0 = vpop.f32.mrb[26].mxu0 }
 0x4e8   :  { %v22097_v37 = vpop.f32.mrb[27].mxu0 }
 0x4eb   :  { %v2981_v19 = vpop.f32.mrb[28].mxu0 }
 0x4ec   :  { %v22107_v1 = vpop.f32.mrb[29].mxu0 }
 0x504   :  { %v2601_v39 = vpop.f32.mrb[38].mxu1 }
 0x505   :  { %v22082_v20 = vpop.f32.mrb[39].mxu1  ;;  %22135 = vmatmul.mubr.msk.f32.gmra.mrb[38].mxu0 %vm591_vm2, %v2601_v39 }
 0x506   :  { %22137 = vmatprep.mubr.msk.f32.mxu0 %vm591_vm2, %v2677_v6 }
 0x508   :  { %v2753_v40 = vpop.f32.mrb[40].mxu1 }
 0x509   :  { %v22092_v4 = vpop.f32.mrb[41].mxu1  ;;  %22138 = vmatmul.mubr.msk.f32.gmra.mrb[40].mxu0 %vm591_vm2, %v2753_v40 }
 0x50a   :  { %22140 = vmatprep.mubr.msk.f32.mxu0 %vm591_vm2, %v2829_v0 }
 0x50c   :  { %v2905_v24 = vpop.f32.mrb[42].mxu1  ;;  %v3133_v60 = vpop.f32.mrb[30].mxu0 }
 0x50d   :  { %v22102_v12 = vpop.f32.mrb[43].mxu1  ;;  %v22117_v41 = vpop.f32.mrb[31].mxu0  ;;  %22141 = vmatmul.mubr.msk.f32.gmra.mrb[42].mxu0 %vm591_vm2, %v2905_v24 }
 0x50e   :  { %22143 = vmatprep.mubr.msk.f32.mxu0 %vm591_vm2, %v2981_v19 }
 0x510   :  { %v3057_v43 = vpop.f32.mrb[44].mxu1 }
 0x511   :  { %v22112_v33 = vpop.f32.mrb[45].mxu1  ;;  %22144 = vmatmul.mubr.msk.f32.gmra.mrb[44].mxu0 %vm591_vm2, %v3057_v43 }
 0x512   :  { %22146 = vmatprep.mubr.msk.f32.mxu0 %vm591_vm2, %v3133_v60 }
 0x514   :  { %v3209_v46 = vpop.f32.mrb[46].mxu1 }
 0x515   :  { %v22122_v52 = vpop.f32.mrb[47].mxu1  ;;  %22147 = vmatmul.mubr.msk.f32.gmra.mrb[46].mxu0 %vm591_vm2, %v3209_v46 }
 0x516   :  { %22191 = vmatprep.mubr.msk.f32.mxu0 %vm23907_vm1, %v28909_v55 }
 0x519   :  { %22192 = vmatmul.mubr.msk.f32.vlgmr.msra.gmra.mrb[48].mxu0 %vm591_vm2, %v24715_v44 }
 0x51a   :  { %22200 = vmatpush3.xpose.msk.msra.mxu0 %vm591_vm2, %v24722_v13  ;;  %22201 = vmatprep.mubr.msk.f32.mxu0 %vm23907_vm1, %v28909_v55 }
 0x51b   :  { %v24784_v17 = vpop.f32.mrb[48].mxu1  ;;  %22209 = vmatprep.subr.mxu0 %v28909_v55 }
 0x51c   :  { %v22153_v31 = vpop.f32.mrb[49].mxu1  ;;  %v4658_v29 = vsel %vm373_vm0, %v24784_v17, -inf }
 0x51d   :  { %4659 = vmax.xlane.f32.xlu0 %v4658_v29  ;;  %22202 = vmatmul.mubr.msk.f32.vlgmr.msra.gmra.mrb[50].mxu0 %vm591_vm2, %v24729_v25  ;;  %v24844_v29 = vpop.permute.xlu1 %4986 }
 0x51e   :  { %22210 = vmatpush3.xpose.msk.msra.mxu0 %vm591_vm2, %v24736_v57  ;;  %22211 = vmatprep.mubr.msk.f32.mxu0 %vm23907_vm1, %v28909_v55 }
 0x51f   :  { %v24795_v44 = vpop.f32.mrb[50].mxu1  ;;  %22219 = vmatprep.subr.mxu0 %v28909_v55 }
 0x520   :  { %v22158_v13 = vpop.f32.mrb[51].mxu1  ;;  %v4661_v49 = vsel %vm373_vm0, %v24795_v44, -inf }
 0x521   :  { %4662 = vmax.xlane.f32.xlu1 %v4661_v49  ;;  %22212 = vmatmul.mubr.msk.f32.vlgmr.msra.gmra.mrb[52].mxu0 %vm591_vm2, %v24743_v50 }
 0x522   :  { %22220 = vmatpush3.xpose.msk.msra.mxu0 %vm591_vm2, %v24750_v7  ;;  %22221 = vmatprep.mubr.msk.f32.mxu0 %vm23907_vm1, %v28909_v55 }
 0x523   :  { %v3640_v25 = vpop.f32.mrb[52].mxu1  ;;  %22229 = vmatprep.subr.mxu0 %v28909_v55 }
 0x524   :  { %v22163_v57 = vpop.f32.mrb[53].mxu1  ;;  %v4664_v35 = vsel %vm373_vm0, %v3640_v25, -inf }
 0x525   :  { %4665 = vmax.xlane.f32.xlu0 %v4664_v35  ;;  %22222 = vmatmul.mubr.msk.f32.vlgmr.msra.gmra.mrb[54].mxu0 %vm591_vm2, %v24755_v32 }
 0x526   :  { %22230 = vmatpush3.msra.mxu0 %v4835_v11  ;;  %22231 = vmatprep.mubr.msk.f32.mxu0 %vm23907_vm1, %v28909_v55 }
 0x527   :  { %v3718_v50 = vpop.f32.mrb[54].mxu1  ;;  %22239 = vmatprep.subr.mxu0 %v28909_v55 }
 0x528   :  { %v22168_v7 = vpop.f32.mrb[55].mxu1  ;;  %v4667_v47 = vsel %vm373_vm0, %v3718_v50, -inf }
 0x529   :  { %4668 = vmax.xlane.f32.xlu0 %v4667_v47 }
 0x52b   :  { %v3796_v54 = vpop.f32.mrb[56].mxu1 }
 0x52c   :  { %v22173_v5 = vpop.f32.mrb[57].mxu1  ;;  %v4670_v3 = vsel %vm373_vm0, %v3796_v54, -inf }
 0x52d   :  { %4671 = vmax.xlane.f32.xlu1 %v4670_v3 }
 0x52f   :  { %v3874_v16 = vpop.f32.mrb[58].mxu1 }
 0x530   :  { %v22178_v6 = vpop.f32.mrb[59].mxu1  ;;  %v4673_v32 = vsel %vm373_vm0, %v3874_v16, -inf }
 0x531   :  { %4674 = vmax.xlane.f32.xlu0 %v4673_v32 }
 0x533   :  { %v24816_v8 = vpop.f32.mrb[60].mxu1 }
 0x534   :  { %v22183_v0 = vpop.f32.mrb[61].mxu1  ;;  %v4676_v37 = vsel %vm373_vm0, %v24816_v8, -inf }
 0x535   :  { %4677 = vmax.xlane.f32.xlu1 %v4676_v37 }
 0x537   :  { %v24820_v19 = vpop.f32.mrb[62].mxu1 }
 0x538   :  { %v22188_v1 = vpop.f32.mrb[63].mxu1  ;;  %v4679_v39 = vsel %vm373_vm0, %v24820_v19, -inf }
 0x539   :  { %4680 = vmax.xlane.f32.xlu0 %v4679_v39 }
 0x53b   :  { %v24824_v20 = vpop.f32.mrb[64].mxu1 }
 0x53c   :  { %v22198_v40 = vpop.f32.mrb[65].mxu1  ;;  %v4685_v4 = vsel %vm373_vm0, %v24824_v20, -inf }
 0x53d   :  { %4686 = vmax.xlane.f32.xlu0 %v4685_v4 }
 0x53f   :  { %v24828_v24 = vpop.f32.mrb[66].mxu1 }
 0x540   :  { %v22208_v60 = vpop.f32.mrb[67].mxu1  ;;  %v4691_v12 = vsel %vm373_vm0, %v24828_v24, -inf }
 0x541   :  { %4692 = vmax.xlane.f32.xlu0 %v4691_v12 }
 0x543   :  { %v24832_v41 = vpop.f32.mrb[68].mxu1 }
 0x544   :  { %v22218_v43 = vpop.f32.mrb[69].mxu1  ;;  %v4697_v33 = vsel %vm373_vm0, %v24832_v41, -inf }
 0x545   :  { %4698 = vmax.xlane.f32.xlu0 %v4697_v33 }
 0x546   :  { %5138 = vrot.lane.b32.xlu1 %v24166_v61, %s23912_s22 }
 0x547   :  { %v24838_v46 = vpop.f32.mrb[70].mxu1 }
 0x548   :  { %v22228_v52 = vpop.f32.mrb[71].mxu1  ;;  %v4703_v31 = vsel %vm373_vm0, %v24838_v46, -inf }
 0x549   :  { %4704 = vmax.xlane.f32.xlu0 %v4703_v31 }
 0x55f   :  { %5062 = vrot.lane.b32.xlu0 %v24156_v53, %s23912_s22 }
 0x5aa   :  { %v4660_v13 = vpop.xlane.xlu0 %4659 }
 0x5ab   :  { %v4706_v49 = vsub.f32 %v24784_v17, %v4660_v13 }
 0x5ad   :  { %v4722_v57 = vmul.f32 1.442695, %v4706_v49 }
 0x5ae   :  { %v4663_v35 = vpop.xlane.xlu1 %4662 }
 0x5af   :  { %23398 = vpow2.f32 %v4722_v57  ;;  %v4707_v61 = vsub.f32 %v24795_v44, %v4663_v35 }
 0x5b1   :  { %v4724_v11 = vmul.f32 1.442695, %v4707_v61 }
 0x5b2   :  { %v4666_v7 = vpop.xlane.xlu0 %4665 }
 0x5b3   :  { %23400 = vpow2.f32 %v4724_v11  ;;  %v4708_v47 = vsub.f32 %v3640_v25, %v4666_v7 }
 0x5b5   :  { %v4726_v5 = vmul.f32 1.442695, %v4708_v47 }
 0x5b6   :  { %v4669_v3 = vpop.xlane.xlu0 %4668 }
 0x5b7   :  { %23402 = vpow2.f32 %v4726_v5  ;;  %v4709_v6 = vsub.f32 %v3718_v50, %v4669_v3 }
 0x5b9   :  { %v24848_v32 = vpop.eup %23398  ;;  %v4728_v53 = vmul.f32 1.442695, %v4709_v6 }
 0x5ba   :  { %v4672_v0 = vpop.xlane.xlu1 %4671  ;;  %v4754_v17 = vsel %vm373_vm0, %v24848_v32, 0.0 }
 0x5bb   :  { %23404 = vpow2.f32 %v4728_v53  ;;  %v4710_v37 = vsub.f32 %v3796_v54, %v4672_v0  ;;  %4755 = vadd.xlane.f32.xlu1 %v4754_v17 }
 0x5bd   :  { %v24852_v1 = vpop.eup %23400  ;;  %v4730_v44 = vmul.f32 1.442695, %v4710_v37 }
 0x5be   :  { %v4675_v39 = vpop.xlane.xlu0 %4674  ;;  %v4757_v25 = vsel %vm373_vm0, %v24852_v1, 0.0 }
 0x5bf   :  { %23406 = vpow2.f32 %v4730_v44  ;;  %v4711_v40 = vsub.f32 %v3874_v16, %v4675_v39  ;;  %4758 = vadd.xlane.f32.xlu0 %v4757_v25 }
 0x5c1   :  { %v24856_v50 = vpop.eup %23402  ;;  %v4732_v4 = vmul.f32 1.442695, %v4711_v40 }
 0x5c2   :  { %v4678_v60 = vpop.xlane.xlu1 %4677  ;;  %v4760_v12 = vsel %vm373_vm0, %v24856_v50, 0.0 }
 0x5c3   :  { %23408 = vpow2.f32 %v4732_v4  ;;  %v4712_v54 = vsub.f32 %v24816_v8, %v4678_v60  ;;  %4761 = vadd.xlane.f32.xlu1 %v4760_v12 }
 0x5c5   :  { %v24861_v43 = vpop.eup %23404  ;;  %v4734_v33 = vmul.f32 1.442695, %v4712_v54 }
 0x5c6   :  { %v4681_v52 = vpop.xlane.xlu0 %4680  ;;  %v4763_v31 = vsel %vm373_vm0, %v24861_v43, 0.0 }
 0x5c7   :  { %23410 = vpow2.f32 %v4734_v33  ;;  %v4713_v16 = vsub.f32 %v24820_v19, %v4681_v52  ;;  %4764 = vadd.xlane.f32.xlu0 %v4763_v31 }
 0x5c9   :  { %v24866_v13 = vpop.eup %23406  ;;  %v4736_v49 = vmul.f32 1.442695, %v4713_v16 }
 0x5ca   :  { %v4687_v57 = vpop.xlane.xlu0 %4686  ;;  %v4766_v35 = vsel %vm373_vm0, %v24866_v13, 0.0 }
 0x5cb   :  { %23412 = vpow2.f32 %v4736_v49  ;;  %v4715_v8 = vsub.f32 %v24824_v20, %v4687_v57  ;;  %4767 = vadd.xlane.f32.xlu1 %v4766_v35 }
 0x5cd   :  { %v24871_v61 = vpop.eup %23408  ;;  %v4740_v11 = vmul.f32 1.442695, %v4715_v8 }
 0x5ce   :  { %v4693_v7 = vpop.xlane.xlu0 %4692  ;;  %v4769_v47 = vsel %vm373_vm0, %v24871_v61, 0.0 }
 0x5cf   :  { %23414 = vpow2.f32 %v4740_v11  ;;  %v4717_v19 = vsub.f32 %v24828_v24, %v4693_v7  ;;  %4770 = vadd.xlane.f32.xlu0 %v4769_v47 }
 0x5d1   :  { %v24876_v5 = vpop.eup %23410  ;;  %v4744_v3 = vmul.f32 1.442695, %v4717_v19 }
 0x5d2   :  { %v4699_v6 = vpop.xlane.xlu0 %4698  ;;  %v4772_v53 = vsel %vm373_vm0, %v24876_v5, 0.0 }
 0x5d3   :  { %23416 = vpow2.f32 %v4744_v3  ;;  %v4719_v20 = vsub.f32 %v24832_v41, %v4699_v6  ;;  %4773 = vadd.xlane.f32.xlu1 %v4772_v53 }
 0x5d5   :  { %v24881_v0 = vpop.eup %23412  ;;  %v4748_v17 = vmul.f32 1.442695, %v4719_v20 }
 0x5d6   :  { %v4705_v37 = vpop.xlane.xlu0 %4704  ;;  %v4775_v44 = vsel %vm373_vm0, %v24881_v0, 0.0 }
 0x5d7   :  { %23418 = vpow2.f32 %v4748_v17  ;;  %v4721_v24 = vsub.f32 %v24838_v46, %v4705_v37  ;;  %4776 = vadd.xlane.f32.xlu0 %v4775_v44 }
 0x5d9   :  { %v24886_v39 = vpop.eup %23414  ;;  %v4752_v25 = vmul.f32 1.442695, %v4721_v24 }
 0x5da   :  { %v4781_v40 = vsel %vm373_vm0, %v24886_v39, 0.0 }
 0x5db   :  { %23420 = vpow2.f32 %v4752_v25  ;;  %4782 = vadd.xlane.f32.xlu0 %v4781_v40 }
 0x5dd   :  { %v24890_v41 = vpop.eup %23416 }
 0x5de   :  { %v4787_v4 = vsel %vm373_vm0, %v24890_v41, 0.0 }
 0x5df   :  { %4788 = vadd.xlane.f32.xlu0 %v4787_v4 }
 0x5e1   :  { %v24894_v60 = vpop.eup %23418 }
 0x5e2   :  { %v4793_v46 = vsel %vm373_vm0, %v24894_v60, 0.0 }
 0x5e3   :  { %4794 = vadd.xlane.f32.xlu0 %v4793_v46 }
 0x5e5   :  { %v24898_v12 = vpop.eup %23420 }
 0x5e6   :  { %v4799_v54 = vsel %vm373_vm0, %v24898_v12, 0.0 }
 0x5e7   :  { %4800 = vadd.xlane.f32.xlu0 %v4799_v54 }
 0x5ec   :  { %v24902_v33 = vpop.f32.mrb[48].mxu0 }
 0x5ed   :  { %v22193_v52 = vpop.f32.mrb[49].mxu0  ;;  %v4682_v31 = vsel %vm373_vm0, %v24902_v33, -inf }
 0x5ee   :  { %4683 = vmax.xlane.f32.xlu1 %v4682_v31 }
 0x5f0   :  { %v24906_v16 = vpop.f32.mrb[50].mxu0 }
 0x5f1   :  { %v22203_v49 = vpop.f32.mrb[51].mxu0  ;;  %v4688_v57 = vsel %vm373_vm0, %v24906_v16, -inf }
 0x5f2   :  { %4689 = vmax.xlane.f32.xlu1 %v4688_v57 }
 0x5f4   :  { %v24910_v35 = vpop.f32.mrb[52].mxu0 }
 0x5f5   :  { %v22213_v8 = vpop.f32.mrb[53].mxu0  ;;  %v4694_v11 = vsel %vm373_vm0, %v24910_v35, -inf }
 0x5f6   :  { %4695 = vmax.xlane.f32.xlu1 %v4694_v11 }
 0x5f8   :  { %v24914_v7 = vpop.f32.mrb[54].mxu0 }
 0x5f9   :  { %v22223_v47 = vpop.f32.mrb[55].mxu0  ;;  %v4700_v19 = vsel %vm373_vm0, %v24914_v7, -inf }
 0x5fa   :  { %4701 = vmax.xlane.f32.xlu1 %v4700_v19 }
 0x5fd   :  { %5290 = vrot.lane.b32.xlu0 %v24174_v10, %s23912_s22  ;;  %v5139_v10 = vpop.permute.xlu1 %5138 }
 0x601   :  { %5442 = vrot.lane.b32.xlu0 %v24180_v15, %s23912_s22  ;;  %v5063_v15 = vpop.permute.xlu0 %5062 }
 0x605   :  { %5594 = vrot.lane.b32.xlu0 %v24190_v23, %s23912_s22 }
 0x609   :  { %5746 = vrot.lane.b32.xlu0 %v24198_v30, %s23912_s22 }
 0x60b   :  { %5214 = vrot.lane.b32.xlu1 %v24164_v58, %s23912_s22 }
 0x60d   :  { %5898 = vrot.lane.b32.xlu0 %v24206_v36, %s23912_s22 }
 0x60f   :  { %5366 = vrot.lane.b32.xlu1 %v24172_v63, %s23912_s22 }
 0x613   :  { %5518 = vrot.lane.b32.xlu1 %v24176_v14, %s23912_s22 }
 0x617   :  { %5670 = vrot.lane.b32.xlu1 %v24186_v22, %s23912_s22 }
 0x61b   :  { %5822 = vrot.lane.b32.xlu1 %v24194_v28, %s23912_s22 }
 0x648   :  { %v4756_v23 = vpop.xlane.xlu1 %4755 }
 0x649   :  { %23422 = vrcp.f32 %v4756_v23 }
 0x64c   :  { %v4759_v58 = vpop.xlane.xlu0 %4758 }
 0x64d   :  { %23424 = vrcp.f32 %v4759_v58 }
 0x650   :  { %v4762_v30 = vpop.xlane.xlu1 %4761 }
 0x651   :  { %23426 = vrcp.f32 %v4762_v30 }
 0x653   :  { %v23423_v36 = vpop.eup %23422 }
 0x654   :  { %v4765_v3 = vpop.xlane.xlu0 %4764  ;;  %v4818_v63 = vmul.f32 %v23423_v36, %v24848_v32 }
 0x655   :  { %23428 = vrcp.f32 %v4765_v3 }
 0x656   :  { %22232 = vmatmul.mubr.msk.f32.vlgmr.msra.gmra.mrb[56].mxu0 %vm373_vm0, %v4818_v63 }
 0x657   :  { %v23425_v14 = vpop.eup %23424  ;;  %22240 = vmatpush3.msra.mxu0 %v24844_v29  ;;  %22241 = vmatprep.mubr.msk.f32.mxu0 %vm23907_vm1, %v28909_v55 }
 0x658   :  { %v4768_v22 = vpop.xlane.xlu1 %4767  ;;  %v4819_v28 = vmul.f32 %v23425_v14, %v24852_v1  ;;  %22249 = vmatprep.subr.mxu0 %v28909_v55 }
 0x659   :  { %23430 = vrcp.f32 %v4768_v22 }
 0x65a   :  { %22237 = vmatmul.mubr.msk.f32.vlgmr.msra.gmra.mrb[72].mxu1 %vm373_vm0, %v4819_v28 }
 0x65b   :  { %v23427_v6 = vpop.eup %23426  ;;  %22245 = vmatpush3.msra.mxu1 %v5063_v15  ;;  %22246 = vmatprep.mubr.msk.f32.mxu1 %vm23907_vm1, %v28909_v55 }
 0x65c   :  { %v4820_v32 = vmul.f32 %v23427_v6, %v24856_v50  ;;  %22254 = vmatprep.subr.mxu1 %v28909_v55  ;;  %v4771_v1 = vpop.xlane.xlu0 %4770 }
 0x65e   :  { %22242 = vmatmul.mubr.msk.f32.vlgmr.msra.gmra.mrb[58].mxu0 %vm373_vm0, %v4820_v32 }
 0x65f   :  { %v23429_v29 = vpop.eup %23428  ;;  %22250 = vmatpush3.msra.mxu0 %v5139_v10  ;;  %22251 = vmatprep.mubr.msk.f32.mxu0 %vm23907_vm1, %v28909_v55 }
 0x660   :  { %v4821_v53 = vmul.f32 %v23429_v29, %v24861_v43  ;;  %22259 = vmatprep.subr.mxu0 %v28909_v55  ;;  %v4774_v37 = vpop.xlane.xlu1 %4773 }
 0x661   :  { %23432 = vrcp.f32 %v4774_v37 }
 0x662   :  { %22247 = vmatmul.mubr.msk.f32.vlgmr.msra.gmra.mrb[74].mxu1 %vm373_vm0, %v4821_v53  ;;  %23434 = vrcp.f32 %v4771_v1 }
 0x663   :  { %v23431_v20 = vpop.eup %23430  ;;  %22256 = vmatprep.mubr.msk.f32.mxu1 %vm23907_vm1, %v28909_v55 }
 0x664   :  { %v4777_v50 = vpop.xlane.xlu0 %4776  ;;  %v4822_v17 = vmul.f32 %v23431_v20, %v24866_v13 }
 0x666   :  { %22252 = vmatmul.mubr.msk.f32.vlgmr.msra.gmra.mrb[60].mxu0 %vm373_vm0, %v4822_v17 }
 0x667   :  { %22261 = vmatprep.mubr.msk.f32.mxu0 %vm23907_vm1, %v28909_v55 }
 0x668   :  { %v4783_v44 = vpop.xlane.xlu0 %4782 }
 0x66b   :  { %v23433_v40 = vpop.eup %23432 }
 0x66c   :  { %v4789_v43 = vpop.xlane.xlu0 %4788  ;;  %v4824_v46 = vmul.f32 %v23433_v40, %v24876_v5 }
 0x670   :  { %v4795_v24 = vpop.xlane.xlu0 %4794 }
 0x674   :  { %v24962_v25 = vpop.xlane.xlu0 %4800 }
 0x678   :  { %v5291_v4 = vpop.permute.xlu0 %5290 }
 0x679   :  { %22260 = vmatpush3.msra.mxu0 %v5291_v4 }
 0x67a   :  { %22262 = vmatmul.mubr.msk.f32.vlgmr.msra.gmra.mrb[62].mxu0 %vm373_vm0, %v4824_v46  ;;  %22269 = vmatprep.subr.mxu0 %v28909_v55 }
 0x67b   :  { %v4684_v13 = vpop.xlane.xlu1 %4683  ;;  %22271 = vmatprep.mubr.msk.f32.mxu0 %vm23907_vm1, %v28909_v55 }
 0x67c   :  { %v4714_v54 = vsub.f32 %v24902_v33, %v4684_v13  ;;  %v5443_v52 = vpop.permute.xlu0 %5442  ;;  %v23435_v33 = vpop.eup %23434 }
 0x67d   :  { %22270 = vmatpush3.msra.mxu0 %v5443_v52 }
 0x67e   :  { %v4738_v31 = vmul.f32 1.442695, %v4714_v54  ;;  %22279 = vmatprep.subr.mxu0 %v28909_v55 }
 0x67f   :  { %v4690_v49 = vpop.xlane.xlu1 %4689 }
 0x680   :  { %23436 = vpow2.f32 %v4738_v31  ;;  %v4716_v5 = vsub.f32 %v24906_v16, %v4690_v49  ;;  %v4823_v16 = vmul.f32 %v23435_v33, %v24871_v61  ;;  %v6050_v49 = vrot.slane %v24656_v62, 4 }
 0x681   :  { %23438 = vrcp.f32 %v4777_v50 }
 0x682   :  { %v4742_v57 = vmul.f32 1.442695, %v4716_v5 }
 0x683   :  { %v4696_v8 = vpop.xlane.xlu1 %4695 }
 0x684   :  { %23440 = vpow2.f32 %v4742_v57  ;;  %v4718_v11 = vsub.f32 %v24910_v35, %v4696_v8 }
 0x685   :  { %23442 = vrcp.f32 %v4783_v44  ;;  %v5595_v44 = vpop.permute.xlu0 %5594 }
 0x686   :  { %v4746_v47 = vmul.f32 1.442695, %v4718_v11 }
 0x687   :  { %v4702_v19 = vpop.xlane.xlu1 %4701 }
 0x688   :  { %23444 = vpow2.f32 %v4746_v47  ;;  %v4720_v10 = vsub.f32 %v24914_v7, %v4702_v19 }
 0x689   :  { %23446 = vrcp.f32 %v4789_v43  ;;  %v5747_v46 = vpop.permute.xlu0 %5746 }
 0x68a   :  { %v23437_v15 = vpop.eup %23436  ;;  %v4750_v23 = vmul.f32 1.442695, %v4720_v10 }
 0x68b   :  { %v5215_v58 = vpop.permute.xlu1 %5214  ;;  %v4778_v30 = vsel %vm373_vm0, %v23437_v15, 0.0  ;;  %v23439_v36 = vpop.eup %23438 }
 0x68c   :  { %23448 = vpow2.f32 %v4750_v23  ;;  %4779 = vadd.xlane.f32.xlu1 %v4778_v30  ;;  %22255 = vmatpush3.msra.mxu1 %v5215_v58  ;;  %v4825_v63 = vmul.f32 %v23439_v36, %v24881_v0 }
 0x68d   :  { %22257 = vmatmul.mubr.msk.f32.vlgmr.msra.gmra.mrb[76].mxu1 %vm373_vm0, %v4823_v16  ;;  %22264 = vmatprep.subr.mxu1 %v28909_v55  ;;  %23450 = vrcp.f32 %v4795_v24  ;;  %v5899_v11 = vpop.permute.xlu0 %5898 }
 0x68e   :  { %v23441_v35 = vpop.eup %23440  ;;  %22266 = vmatprep.mubr.msk.f32.mxu1 %vm23907_vm1, %v28909_v55 }
 0x68f   :  { %v5367_v7 = vpop.permute.xlu1 %5366  ;;  %v4784_v3 = vsel %vm373_vm0, %v23441_v35, 0.0  ;;  %v23443_v14 = vpop.eup %23442 }
 0x690   :  { %4785 = vadd.xlane.f32.xlu1 %v4784_v3  ;;  %22265 = vmatpush3.msra.mxu1 %v5367_v7  ;;  %v4827_v6 = vmul.f32 %v23443_v14, %v24886_v39 }
 0x691   :  { %22267 = vmatmul.mubr.msk.f32.vlgmr.msra.gmra.mrb[78].mxu1 %vm373_vm0, %v4825_v63  ;;  %22274 = vmatprep.subr.mxu1 %v28909_v55 }
 0x692   :  { %v23445_v61 = vpop.eup %23444  ;;  %22276 = vmatprep.mubr.msk.f32.mxu1 %vm23907_vm1, %v28909_v55 }
 0x693   :  { %v5519_v22 = vpop.permute.xlu1 %5518  ;;  %v4790_v28 = vsel %vm373_vm0, %v23445_v61, 0.0  ;;  %v23447_v32 = vpop.eup %23446 }
 0x694   :  { %4791 = vadd.xlane.f32.xlu1 %v4790_v28  ;;  %22275 = vmatpush3.msra.mxu1 %v5519_v22  ;;  %v4829_v53 = vmul.f32 %v23447_v32, %v24890_v41 }
 0x695   :  { %22277 = vmatmul.mubr.msk.f32.vlgmr.msra.gmra.mrb[80].mxu1 %vm373_vm0, %v4827_v6  ;;  %22284 = vmatprep.subr.mxu1 %v28909_v55 }
 0x696   :  { %v23449_v0 = vpop.eup %23448  ;;  %22286 = vmatprep.mubr.msk.f32.mxu1 %vm23907_vm1, %v28909_v55 }
 0x697   :  { %v5671_v29 = vpop.permute.xlu1 %5670  ;;  %v4796_v1 = vsel %vm373_vm0, %v23449_v0, 0.0  ;;  %v23451_v20 = vpop.eup %23450 }
 0x698   :  { %4797 = vadd.xlane.f32.xlu1 %v4796_v1  ;;  %22285 = vmatpush3.msra.mxu1 %v5671_v29  ;;  %v4831_v50 = vmul.f32 %v23451_v20, %v24894_v60 }
 0x699   :  { %22287 = vmatmul.mubr.msk.f32.vlgmr.msra.gmra.mrb[82].mxu1 %vm373_vm0, %v4829_v53  ;;  %22294 = vmatprep.subr.mxu1 %v28909_v55 }
 0x69a   :  { %22296 = vmatprep.mubr.msk.f32.mxu1 %vm23907_vm1, %v28909_v55 }
 0x69b   :  { %v5823_v39 = vpop.permute.xlu1 %5822 }
 0x69c   :  { %22295 = vmatpush3.msra.mxu1 %v5823_v39 }
 0x69d   :  { %22297 = vmatmul.mubr.msk.f32.vlgmr.msra.gmra.mrb[84].mxu1 %vm373_vm0, %v4831_v50  ;;  %22304 = vmatprep.subr.mxu1 %v28909_v55 }
 0x69e   :  { %22306 = vmatprep.mubr.msk.f32.mxu1 %vm23907_vm1, %v28909_v55 }
 0x6a9   :  { %5974 = vrot.lane.b32.xlu1 %v24202_v34, %s23912_s22 }
 0x719   :  { %v4780_v41 = vpop.xlane.xlu1 %4779 }
 0x71a   :  { %23452 = vrcp.f32 %v4780_v41 }
 0x71b   :  { %23454 = vrcp.f32 %v24962_v25 }
 0x71d   :  { %v4786_v17 = vpop.xlane.xlu1 %4785 }
 0x71e   :  { %23456 = vrcp.f32 %v4786_v17  ;;  %v25042_v17 = vld [vmem:[%s28823_s7 + $0x3] ss:$0 sm:$0xff] }
 0x721   :  { %v4792_v37 = vpop.xlane.xlu1 %4791 }
 0x722   :  { %23458 = vrcp.f32 %v4792_v37 }
 0x724   :  { %v23453_v60 = vpop.eup %23452 }
 0x725   :  { %v4798_v43 = vpop.xlane.xlu1 %4797  ;;  %v4826_v24 = vmul.f32 %v23453_v60, %v23437_v15  ;;  %v23455_v40 = vpop.eup %23454 }
 0x726   :  { %23460 = vrcp.f32 %v4798_v43  ;;  %v4833_v54 = vmul.f32 %v23455_v40, %v24898_v12 }
 0x727   :  { %22272 = vmatmul.mubr.msk.f32.vlgmr.msra.gmra.mrb[64].mxu0 %vm373_vm0, %v4826_v24 }
 0x728   :  { %v23457_v4 = vpop.eup %23456  ;;  %22280 = vmatpush3.msra.mxu0 %v5595_v44  ;;  %22281 = vmatprep.mubr.msk.f32.mxu0 %vm23907_vm1, %v28909_v55 }
 0x729   :  { %v4906_v34 = vpop.f32.mrb[56].mxu0  ;;  %v5975_v25 = vpop.permute.xlu1 %5974  ;;  %22289 = vmatprep.subr.mxu0 %v28909_v55  ;;  %v4828_v13 = vmul.f32 %v23457_v4, %v23441_v35 }
 0x72a   :  { %v22233_v52 = vpop.f32.mrb[57].mxu0  ;;  %22305 = vmatpush3.msra.mxu1 %v5975_v25 }
 0x72b   :  { %22282 = vmatmul.mubr.msk.f32.vlgmr.msra.gmra.mrb[66].mxu0 %vm373_vm0, %v4828_v13  ;;  %22307 = vmatmul.mubr.msk.f32.vlgmr.msra.gmra.mrb[86].mxu1 %vm373_vm0, %v4833_v54 }
 0x72c   :  { %v23459_v31 = vpop.eup %23458  ;;  %22290 = vmatpush3.msra.mxu0 %v5747_v46  ;;  %22291 = vmatprep.mubr.msk.f32.mxu0 %vm23907_vm1, %v28909_v55 }
 0x72d   :  { %v4982_v5 = vpop.f32.mrb[72].mxu1  ;;  %22299 = vmatprep.subr.mxu0 %v28909_v55  ;;  %v4830_v57 = vmul.f32 %v23459_v31, %v23445_v61 }
 0x72e   :  { %v22238_v8 = vpop.f32.mrb[73].mxu1 }
 0x72f   :  { %22292 = vmatmul.mubr.msk.f32.vlgmr.msra.gmra.mrb[68].mxu0 %vm373_vm0, %v4830_v57 }
 0x730   :  { %v23461_v12 = vpop.eup %23460  ;;  %22300 = vmatpush3.msra.mxu0 %v5899_v11  ;;  %22301 = vmatprep.mubr.msk.f32.mxu0 %vm23907_vm1, %v28909_v55 }
 0x731   :  { %v5058_v47 = vpop.f32.mrb[58].mxu0  ;;  %v4832_v19 = vmul.f32 %v23461_v12, %v23449_v0  ;;  %22309 = vmatprep.subr.msk.mxu0 %vm3261_vm3, %v6050_v49 }
 0x732   :  { %v22243_v33 = vpop.f32.mrb[59].mxu0 }
 0x733   :  { %22302 = vmatmul.mubr.msk.f32.vlgmr.msra.gmra.mrb[70].mxu0 %vm373_vm0, %v4832_v19 }
 0x734   :  { %22311 = vmatprep.mubr.msk.f32.mxu0 %vm591_vm2, %v4906_v34  ;;  %22310 = vmatpush3.msk.msra.mxu0 %vm3261_vm3, %v6050_v49 }
 0x735   :  { %v5134_v62 = vpop.f32.mrb[74].mxu1 }
 0x736   :  { %v22248_v10 = vpop.f32.mrb[75].mxu1 }
 0x737   :  { %22312 = vmatmul.mubr.msk.f32.vlgmr.msra.gmra.mrb[32].mxu0 %vm591_vm2, %v4982_v5 }
 0x738   :  { %22314 = vmatprep.mubr.msk.f32.mxu0 %vm591_vm2, %v5058_v47 }
 0x739   :  { %v5210_v15 = vpop.f32.mrb[60].mxu0 }
 0x73a   :  { %v22253_v23 = vpop.f32.mrb[61].mxu0 }
 0x73b   :  { %22315 = vmatmul.mubr.msk.f32.gmra.mrb[34].mxu0 %vm591_vm2, %v5134_v62 }
 0x73c   :  { %22317 = vmatprep.mubr.msk.f32.mxu0 %vm591_vm2, %v5210_v15 }
 0x74d   :  { %v5362_v58 = vpop.f32.mrb[62].mxu0 }
 0x74e   :  { %v22263_v30 = vpop.f32.mrb[63].mxu0 }
 0x760   :  { %v5286_v16 = vpop.f32.mrb[76].mxu1 }
 0x761   :  { %v22258_v36 = vpop.f32.mrb[77].mxu1  ;;  %22318 = vmatmul.mubr.msk.f32.gmra.mrb[36].mxu0 %vm591_vm2, %v5286_v16 }
 0x762   :  { %22320 = vmatprep.mubr.msk.f32.mxu0 %vm591_vm2, %v5362_v58 }
 0x764   :  { %v5438_v35 = vpop.f32.mrb[78].mxu1 }
 0x765   :  { %v22268_v7 = vpop.f32.mrb[79].mxu1  ;;  %22321 = vmatmul.mubr.msk.f32.gmra.mrb[38].mxu0 %vm591_vm2, %v5438_v35 }
 0x768   :  { %v5590_v3 = vpop.f32.mrb[80].mxu1 }
 0x769   :  { %v22278_v63 = vpop.f32.mrb[81].mxu1 }
 0x76c   :  { %v5742_v14 = vpop.f32.mrb[82].mxu1 }
 0x76d   :  { %v22288_v61 = vpop.f32.mrb[83].mxu1 }
 0x770   :  { %v5894_v22 = vpop.f32.mrb[84].mxu1 }
 0x771   :  { %v22298_v28 = vpop.f32.mrb[85].mxu1 }
 0x7fa   :  { %v5514_v6 = vpop.f32.mrb[64].mxu0 }
 0x7fb   :  { %v22273_v32 = vpop.f32.mrb[65].mxu0  ;;  %22323 = vmatprep.mubr.msk.f32.mxu0 %vm591_vm2, %v5514_v6 }
 0x7fc   :  { %22324 = vmatmul.mubr.msk.f32.gmra.mrb[40].mxu0 %vm591_vm2, %v5590_v3 }
 0x7fe   :  { %v5666_v0 = vpop.f32.mrb[66].mxu0  ;;  %v6046_v29 = vpop.f32.mrb[86].mxu1 }
 0x7ff   :  { %v22283_v1 = vpop.f32.mrb[67].mxu0  ;;  %v22308_v53 = vpop.f32.mrb[87].mxu1  ;;  %22326 = vmatprep.mubr.msk.f32.mxu0 %vm591_vm2, %v5666_v0 }
 0x800   :  { %22327 = vmatmul.mubr.msk.f32.gmra.mrb[42].mxu0 %vm591_vm2, %v5742_v14 }
 0x802   :  { %v5818_v20 = vpop.f32.mrb[68].mxu0 }
 0x803   :  { %v22293_v39 = vpop.f32.mrb[69].mxu0  ;;  %22329 = vmatprep.mubr.msk.f32.mxu0 %vm591_vm2, %v5818_v20 }
 0x804   :  { %22330 = vmatmul.mubr.msk.f32.gmra.mrb[44].mxu0 %vm591_vm2, %v5894_v22 }
 0x806   :  { %v5970_v50 = vpop.f32.mrb[70].mxu0 }
 0x807   :  { %v22303_v41 = vpop.f32.mrb[71].mxu0  ;;  %22332 = vmatprep.mubr.msk.f32.mxu0 %vm591_vm2, %v5970_v50 }
 0x808   :  { %22333 = vmatmul.mubr.msk.f32.gmra.mrb[46].mxu0 %vm591_vm2, %v6046_v29 }
 0x80a   :  { %v22313_v37 = vpop.f32.mrb[32].mxu0 }
 0x80b   :  { %v6268_v44 = vadd.f32 %v22313_v37, %v25042_v17  ;;  %v6167_v60 = vpop.f32.mrb[33].mxu0  ;;  %v28910_v37 = vld [vmem:[#allocation14_spill] sm:$0xff] }
 0x80c   :  { %v6267_v43 = vadd.f32 %v25042_v17, %v6167_v60 }
 0x80d   :  { %v25047_v24 = vadd.f32 %v6268_v44, %v24044_v48 }
 0x80e   :  { %v6283_v40 = vadd.f32 %v6267_v43, %v24034_v42  ;;  %v22316_v4 = vpop.f32.mrb[34].mxu0 }
 0x80f   :  { %v6177_v46 = vpop.f32.mrb[35].mxu0  ;;  %v6302_v34 = vsel %vm373_vm0, %v25047_v24, 0.0  ;;  %v6270_v25 = vadd.f32 %v22316_v4, %v25042_v17 }
 0x810   :  { %v6269_v13 = vadd.f32 %v25042_v17, %v6177_v46  ;;  %6303 = vadd.xlane.f32.xlu1 %v6302_v34  ;;  %v6299_v54 = vsel %vm373_vm0, %v6283_v40, 0.0 }
 0x811   :  { %6300 = vadd.xlane.f32.xlu0 %v6299_v54  ;;  %v25059_v48 = vadd.f32 %v6270_v25, %v24049_v51 }
 0x812   :  { %v25056_v52 = vadd.f32 %v6269_v13, %v24041_v45 }
 0x813   :  { %v6308_v31 = vsel %vm373_vm0, %v25059_v48, 0.0 }
 0x814   :  { %v6305_v42 = vsel %vm373_vm0, %v25056_v52, 0.0 }
 0x815   :  { %6306 = vadd.xlane.f32.xlu0 %v6305_v42 }
 0x819   :  { %6309 = vadd.xlane.f32.xlu0 %v6308_v31 }
 0x834   :  { %v22319_v49 = vpop.f32.mrb[36].mxu0 }
 0x835   :  { %v6272_v5 = vadd.f32 %v22319_v49, %v25042_v17  ;;  %v6187_v57 = vpop.f32.mrb[37].mxu0 }
 0x836   :  { %v6271_v8 = vadd.f32 %v25042_v17, %v6187_v57 }
 0x837   :  { %v25068_v45 = vadd.f32 %v6272_v5, %v24063_v59 }
 0x838   :  { %v25071_v51 = vadd.f32 %v6271_v8, %v24058_v56  ;;  %v22322_v11 = vpop.f32.mrb[38].mxu0 }
 0x839   :  { %v6274_v12 = vadd.f32 %v22322_v11, %v25042_v17  ;;  %v6197_v47 = vpop.f32.mrb[39].mxu0  ;;  %v6314_v19 = vsel %vm373_vm0, %v25068_v45, 0.0 }
 0x83a   :  { %v6273_v33 = vadd.f32 %v25042_v17, %v6197_v47  ;;  %6315 = vadd.xlane.f32.xlu0 %v6314_v19  ;;  %v6311_v62 = vsel %vm373_vm0, %v25071_v51, 0.0  ;;  %v28912_v47 = vld [vmem:[#allocation15_spill] sm:$0xff] }
 0x83b   :  { %v25080_v10 = vadd.f32 %v6274_v12, %v24077_v9  ;;  %6312 = vadd.xlane.f32.xlu1 %v6311_v62 }
 0x83c   :  { %v25083_v56 = vadd.f32 %v6273_v33, %v24072_v2 }
 0x83d   :  { %v6320_v59 = vsel %vm373_vm0, %v25080_v10, 0.0 }
 0x83e   :  { %6321 = vadd.xlane.f32.xlu0 %v6320_v59  ;;  %v6317_v15 = vsel %vm373_vm0, %v25083_v56, 0.0 }
 0x83f   :  { %6318 = vadd.xlane.f32.xlu1 %v6317_v15 }
 0x89d   :  { %v6304_v61 = vpop.xlane.xlu1 %6303 }
 0x89e   :  { %v6301_v23 = vpop.xlane.xlu0 %6300  ;;  %v6349_v29 = vmul.f32 0.125, %v6304_v61 }
 0x89f   :  { %v6348_v22 = vmul.f32 0.125, %v6301_v23 }
 0x8a0   :  { %v25124_v43 = vsub.f32 %v25047_v24, %v6349_v29  ;;  %v28911_v24 = vld [vmem:[#allocation16_spill] sm:$0xff] }
 0x8a1   :  { %v25112_v39 = vsub.f32 %v6283_v40, %v6348_v22 }
 0x8a2   :  { %v6307_v36 = vpop.xlane.xlu0 %6306 }
 0x8a3   :  { %v6350_v13 = vmul.f32 0.125, %v6307_v36  ;;  %v6380_v42 = vmul.f32 %v25112_v39, %v25112_v39 }
 0x8a5   :  { %v25145_v8 = vsub.f32 %v25056_v52, %v6350_v13  ;;  %v6396_v33 = vsel %vm373_vm0, %v6380_v42, 0.0 }
 0x8c8   :  { %v6313_v4 = vpop.xlane.xlu1 %6312 }
 0x8c9   :  { %v6352_v11 = vmul.f32 0.125, %v6313_v4 }
 0x8cb   :  { %v25158_v23 = vsub.f32 %v25071_v51, %v6352_v11 }
 0x8cf   :  { %v22325_v58 = vpop.f32.mrb[40].mxu0 }
 0x8d0   :  { %v6276_v30 = vadd.f32 %v22325_v58, %v25042_v17  ;;  %v6207_v16 = vpop.f32.mrb[41].mxu0 }
 0x8d1   :  { %v6275_v9 = vadd.f32 %v25042_v17, %v6207_v16  ;;  %v6382_v16 = vmul.f32 %v25145_v8, %v25145_v8 }
 0x8d2   :  { %v25092_v35 = vadd.f32 %v6276_v30, %v24086_v18 }
 0x8d3   :  { %v25095_v2 = vadd.f32 %v6275_v9, %v24091_v21  ;;  %v22328_v7 = vpop.f32.mrb[42].mxu0  ;;  %v6310_v21 = vpop.xlane.xlu0 %6309 }
 0x8d4   :  { %v6278_v3 = vadd.f32 %v22328_v7, %v25042_v17  ;;  %v6217_v63 = vpop.f32.mrb[43].mxu0  ;;  %v6326_v14 = vsel %vm373_vm0, %v25092_v35, 0.0  ;;  %v6351_v40 = vmul.f32 0.125, %v6310_v21  ;;  %v6402_v7 = vsel %vm373_vm0, %v6382_v16, 0.0 }
 0x8d5   :  { %v6277_v28 = vadd.f32 %v25042_v17, %v6217_v63  ;;  %6327 = vadd.xlane.f32.xlu0 %v6326_v14  ;;  %v6323_v6 = vsel %vm373_vm0, %v25095_v2, 0.0 }
 0x8d6   :  { %v25104_v18 = vadd.f32 %v6278_v3, %v24105_v27  ;;  %6324 = vadd.xlane.f32.xlu1 %v6323_v6  ;;  %v25138_v49 = vsub.f32 %v25059_v48, %v6351_v40  ;;  %v6319_v48 = vpop.xlane.xlu1 %6318  ;;  %v6384_v3 = vmul.f32 %v25158_v23, %v25158_v23 }
 0x8d7   :  { %v25107_v32 = vadd.f32 %v6277_v28, %v24102_v26  ;;  %v22331_v0 = vpop.f32.mrb[44].mxu0  ;;  %v6316_v26 = vpop.xlane.xlu0 %6315  ;;  %v6354_v58 = vmul.f32 0.125, %v6319_v48  ;;  %v6550_v28 = vld [vmem:[%s28821_s5] sm:$0xff] }
 0x8d8   :  { %v6280_v1 = vadd.f32 %v22331_v0, %v25042_v17  ;;  %v6227_v53 = vpop.f32.mrb[45].mxu0  ;;  %v6332_v20 = vsel %vm373_vm0, %v25104_v18, 0.0  ;;  %v6353_v5 = vmul.f32 0.125, %v6316_v26  ;;  %v6383_v52 = vmul.f32 %v25138_v49, %v25138_v49  ;;  %22335 = vmatprep.subr.mxu1 %v6550_v28 }
 0x8d9   :  { %v6279_v50 = vadd.f32 %v25042_v17, %v6227_v53  ;;  %6333 = vadd.xlane.f32.xlu0 %v6332_v20  ;;  %v6329_v27 = vsel %vm373_vm0, %v25107_v32, 0.0  ;;  %v25171_v51 = vsub.f32 %v25083_v56, %v6354_v58  ;;  %v6408_v14 = vsel %vm373_vm0, %v6384_v3, 0.0  ;;  %22336 = vmatpush3.msra.mxu1 %v6550_v28  ;;  %v25234_v28 = vld [vmem:[%s28817_s1] sm:$0xff] }
 0x8da   :  { %v25118_v41 = vadd.f32 %v6280_v1, %v24119_v38  ;;  %6330 = vadd.xlane.f32.xlu1 %v6329_v27  ;;  %v25152_v62 = vsub.f32 %v25068_v45, %v6353_v5  ;;  %v6405_v36 = vsel %vm373_vm0, %v6383_v52, 0.0 }
 0x8db   :  { %v25121_v44 = vadd.f32 %v6279_v50, %v28910_v37  ;;  %v22334_v60 = vpop.f32.mrb[46].mxu0  ;;  %v6322_v12 = vpop.xlane.xlu0 %6321  ;;  %v6386_v61 = vmul.f32 %v25171_v51, %v25171_v51 }
 0x8dc   :  { %v6282_v46 = vadd.f32 %v22334_v60, %v25042_v17  ;;  %v6237_v34 = vpop.f32.mrb[47].mxu0  ;;  %v6338_v25 = vsel %vm373_vm0, %v25118_v41, 0.0  ;;  %v6355_v59 = vmul.f32 0.125, %v6322_v12  ;;  %v6385_v9 = vmul.f32 %v25152_v62, %v25152_v62 }
 0x8dd   :  { %v6281_v38 = vadd.f32 %v25042_v17, %v6237_v34  ;;  %6339 = vadd.xlane.f32.xlu0 %v6338_v25  ;;  %v6335_v54 = vsel %vm373_vm0, %v25121_v44, 0.0  ;;  %v6381_v17 = vmul.f32 %v25124_v43, %v25124_v43  ;;  %v6414_v22 = vsel %vm373_vm0, %v6386_v61, 0.0 }
 0x8de   :  { %v25135_v31 = vadd.f32 %v6282_v46, %v28911_v24  ;;  %6336 = vadd.xlane.f32.xlu1 %v6335_v54  ;;  %v25165_v45 = vsub.f32 %v25080_v10, %v6355_v59  ;;  %v6411_v63 = vsel %vm373_vm0, %v6385_v9, 0.0 }
 0x8df   :  { %v25148_v19 = vadd.f32 %v6281_v38, %v28912_v47  ;;  %v6399_v15 = vsel %vm373_vm0, %v6381_v17, 0.0 }
 0x8e0   :  { %v6344_v57 = vsel %vm373_vm0, %v25135_v31, 0.0  ;;  %v6387_v10 = vmul.f32 %v25165_v45, %v25165_v45 }
 0x8e1   :  { %6345 = vadd.xlane.f32.xlu0 %v6344_v57  ;;  %v6341_v30 = vsel %vm373_vm0, %v25148_v19, 0.0 }
 0x8e2   :  { %6397 = vadd.xlane.f32.xlu1 %v6396_v33  ;;  %v6417_v56 = vsel %vm373_vm0, %v6387_v10, 0.0 }
 0x8e5   :  { %6400 = vadd.xlane.f32.xlu0 %v6399_v15 }
 0x8e6   :  { %6342 = vadd.xlane.f32.xlu1 %v6341_v30 }
 0x8e9   :  { %6406 = vadd.xlane.f32.xlu0 %v6405_v36 }
 0x8ea   :  { %6403 = vadd.xlane.f32.xlu1 %v6402_v7 }
 0x8ed   :  { %6412 = vadd.xlane.f32.xlu0 %v6411_v63 }
 0x8ee   :  { %6409 = vadd.xlane.f32.xlu1 %v6408_v14 }
 0x8f1   :  { %6418 = vadd.xlane.f32.xlu0 %v6417_v56 }
 0x8f2   :  { %6415 = vadd.xlane.f32.xlu1 %v6414_v22 }
 0x962   :  { %v6328_v6 = vpop.xlane.xlu0 %6327 }
 0x963   :  { %v6357_v21 = vmul.f32 0.125, %v6328_v6  ;;  %v6325_v0 = vpop.xlane.xlu1 %6324 }
 0x964   :  { %v6356_v29 = vmul.f32 0.125, %v6325_v0 }
 0x965   :  { %v25188_v1 = vsub.f32 %v25092_v35, %v6357_v21 }
 0x966   :  { %v25191_v53 = vsub.f32 %v25095_v2, %v6356_v29  ;;  %v6334_v20 = vpop.xlane.xlu0 %6333  ;;  %v25239_v29 = vld [vmem:[%s28823_s7 + $0x6] ss:$0 sm:$0xff] }
 0x967   :  { %v6359_v50 = vmul.f32 0.125, %v6334_v20  ;;  %v6331_v27 = vpop.xlane.xlu1 %6330  ;;  %v6389_v26 = vmul.f32 %v25188_v1, %v25188_v1 }
 0x968   :  { %v6358_v37 = vmul.f32 0.125, %v6331_v27  ;;  %v6388_v60 = vmul.f32 %v25191_v53, %v25191_v53 }
 0x969   :  { %v25198_v40 = vsub.f32 %v25104_v18, %v6359_v50  ;;  %v6423_v4 = vsel %vm373_vm0, %v6389_v26, 0.0 }
 0x96a   :  { %v25202_v35 = vsub.f32 %v25107_v32, %v6358_v37  ;;  %v6340_v2 = vpop.xlane.xlu0 %6339  ;;  %6424 = vadd.xlane.f32.xlu0 %v6423_v4  ;;  %v6420_v46 = vsel %vm373_vm0, %v6388_v60, 0.0  ;;  %v28913_v37 = vld [vmem:[#allocation6_spill] sm:$0xff]  ;;  %v25247_v4 = vld [vmem:[%s28823_s7 + $0x7] ss:$0 sm:$0xff] }
 0x96b   :  { %v6361_v34 = vmul.f32 0.125, %v6340_v2  ;;  %v6337_v25 = vpop.xlane.xlu1 %6336  ;;  %6421 = vadd.xlane.f32.xlu1 %v6420_v46  ;;  %v6391_v13 = vmul.f32 %v25198_v40, %v25198_v40  ;;  %v208_v60 = vrot.slane %v25234_v28, %v28913_v37 }
 0x96c   :  { %v6360_v38 = vmul.f32 0.125, %v6337_v25  ;;  %v6390_v18 = vmul.f32 %v25202_v35, %v25202_v35 }
 0x96d   :  { %v25210_v54 = vsub.f32 %v25118_v41, %v6361_v34  ;;  %v6429_v32 = vsel %vm373_vm0, %v6391_v13, 0.0 }
 0x96e   :  { %v25214_v42 = vsub.f32 %v25121_v44, %v6360_v38  ;;  %6430 = vadd.xlane.f32.xlu0 %v6429_v32  ;;  %v6346_v24 = vpop.xlane.xlu0 %6345  ;;  %v6426_v5 = vsel %vm373_vm0, %v6390_v18, 0.0 }
 0x96f   :  { %v6363_v57 = vmul.f32 0.125, %v6346_v24  ;;  %v6398_v17 = vpop.xlane.xlu1 %6397  ;;  %6427 = vadd.xlane.f32.xlu1 %v6426_v5  ;;  %v6393_v11 = vmul.f32 %v25210_v54, %v25210_v54 }
 0x970   :  { %v6444_v12 = vmul.f32 0.125, %v6398_v17  ;;  %v6392_v41 = vmul.f32 %v25214_v42, %v25214_v42  ;;  %v28915_v17 = vld [vmem:[#allocation8_spill] sm:$0xff] }
 0x971   :  { %v25222_v47 = vsub.f32 %v25135_v31, %v6363_v57  ;;  %v6435_v44 = vsel %vm373_vm0, %v6393_v11, 0.0  ;;  %v215_v11 = vrot.slane %v25234_v28, %v28915_v17 }
 0x972   :  { %v6460_v33 = vadd.f32 1e-05, %v6444_v12  ;;  %6436 = vadd.xlane.f32.xlu0 %v6435_v44  ;;  %v6401_v48 = vpop.xlane.xlu0 %6400  ;;  %v6432_v59 = vsel %vm373_vm0, %v6392_v41, 0.0 }
 0x973   :  { %v6445_v15 = vmul.f32 0.125, %v6401_v48  ;;  %6433 = vadd.xlane.f32.xlu1 %v6432_v59  ;;  %v25226_v52 = vpop.xlane.xlu1 %6342  ;;  %v6395_v58 = vmul.f32 %v25222_v47, %v25222_v47 }
 0x974   :  { %23462 = vrsqrt.f32 %v6460_v33 }
 0x975   :  { %v6461_v30 = vadd.f32 1e-05, %v6445_v15  ;;  %v6441_v16 = vsel %vm373_vm0, %v6395_v58, 0.0  ;;  %v28917_v15 = vld [vmem:[#allocation10_spill] sm:$0xff] }
 0x976   :  { %6442 = vadd.xlane.f32.xlu0 %v6441_v16  ;;  %v6407_v31 = vpop.xlane.xlu0 %6406  ;;  %v236_v58 = vrot.slane %v25234_v28, %v28917_v15 }
 0x977   :  { %23464 = vrsqrt.f32 %v6461_v30  ;;  %v6447_v36 = vmul.f32 0.125, %v6407_v31  ;;  %v6404_v9 = vpop.xlane.xlu1 %6403 }
 0x978   :  { %v6446_v7 = vmul.f32 0.125, %v6404_v9 }
 0x979   :  { %v6463_v3 = vadd.f32 1e-05, %v6447_v36 }
 0x97a   :  { %v6462_v63 = vadd.f32 1e-05, %v6446_v7  ;;  %v6413_v10 = vpop.xlane.xlu0 %6412 }
 0x97b   :  { %23466 = vrsqrt.f32 %v6463_v3  ;;  %v6449_v14 = vmul.f32 0.125, %v6413_v10  ;;  %v6410_v61 = vpop.xlane.xlu1 %6409  ;;  %v28919_v3 = vld [vmem:[#allocation12_spill] sm:$0xff] }
 0x97c   :  { %23468 = vrsqrt.f32 %v6462_v63  ;;  %v6448_v56 = vmul.f32 0.125, %v6410_v61  ;;  %v250_v63 = vrot.slane %v25234_v28, %v28919_v3 }
 0x97d   :  { %v6465_v22 = vadd.f32 1e-05, %v6449_v14 }
 0x97e   :  { %v23463_v6 = vpop.eup %23462  ;;  %v6464_v21 = vadd.f32 1e-05, %v6448_v56  ;;  %v6419_v0 = vpop.xlane.xlu0 %6418  ;;  %v28922_v56 = vld [vmem:[#allocation7_spill] sm:$0xff] }
 0x97f   :  { %23470 = vrsqrt.f32 %v6465_v22  ;;  %v6451_v20 = vmul.f32 0.125, %v6419_v0  ;;  %v6416_v50 = vpop.xlane.xlu1 %6415  ;;  %v6492_v27 = vmul.f32 %v23463_v6, %v25112_v39  ;;  %v6362_v6 = vmul.f32 0.125, %v25226_v52  ;;  %v28923_v52 = vld [vmem:[#allocation9_spill] sm:$0xff] }
 0x980   :  { %23472 = vrsqrt.f32 %v6464_v21  ;;  %v6450_v26 = vmul.f32 0.125, %v6416_v50 }
 0x981   :  { %v23465_v2 = vpop.eup %23464  ;;  %v6467_v46 = vadd.f32 1e-05, %v6451_v20  ;;  %v6513_v34 = vmul.f32 %v25239_v29, %v6492_v27  ;;  %v25318_v0 = vsub.f32 %v25148_v19, %v6362_v6  ;;  %v28924_v19 = vld [vmem:[#allocation11_spill] sm:$0xff] }
 0x982   :  { %v6493_v25 = vmul.f32 %v23465_v2, %v25124_v43  ;;  %v6466_v13 = vadd.f32 1e-05, %v6450_v26  ;;  %v222_v26 = vrot.slane %v25234_v28, %v28922_v56  ;;  %v28925_v2 = vld [vmem:[#allocation13_spill] sm:$0xff] }
 0x983   :  { %23474 = vrsqrt.f32 %v6467_v46  ;;  %v25252_v39 = vadd.f32 %v25247_v4, %v6513_v34  ;;  %v6394_v50 = vmul.f32 %v25318_v0, %v25318_v0  ;;  %v257_v46 = vrot.slane %v25234_v28, %v28925_v2 }
 0x984   :  { %23476 = vrsqrt.f32 %v6466_v13  ;;  %210 = vbcast.lane.b32.xlu1 %v208_v60, 256  ;;  %v6514_v38 = vmul.f32 %v25239_v29, %v6493_v25  ;;  %v243_v60 = vrot.slane %v25234_v28, %v28924_v19 }
 0x985   :  { %28914 = vst [vmem:[#allocation14_spill] sm:$0xff] %v25252_v39  ;;  %v23467_v18 = vpop.eup %23466  ;;  %22337 = vmatprep.mubr.msk.f32.mxu1 %vm373_vm0, %v25252_v39  ;;  %v6438_v27 = vsel %vm373_vm0, %v6394_v50, 0.0 }
 0x986   :  { %v23469_v32 = vpop.eup %23468  ;;  %v25258_v24 = vadd.f32 %v25247_v4, %v6514_v38  ;;  %v6495_v5 = vmul.f32 %v23467_v18, %v25138_v49  ;;  %v20953_v38 = vld [vmem:[%s28819_s3 + $0x8] sm:$0xff]  ;;  %v6781_v18 = vld [vmem:[%s28822_s6] sm:$0xff] }
 0x987   :  { %v6494_v43 = vmul.f32 %v23469_v32, %v25145_v8  ;;  %22389 = vmatprep.subr.mxu1 %v20953_v38  ;;  %v6782_v32 = vld [vmem:[%s28822_s6 + $0x8] sm:$0xff] }
 0x988   :  { %22338 = vmatmul.mubr.msk.f32.vlgmr.msra.gmra.mrb[88].mxu1 %vm373_vm0, %v25258_v24  ;;  %v6516_v57 = vmul.f32 %v25239_v29, %v6495_v5  ;;  %v23265_v5 = vpack.c.bf16 %v6782_v32, %v6781_v18 }
 0x989   :  { %v23471_v12 = vpop.eup %23470  ;;  %v6515_v41 = vmul.f32 %v25239_v29, %v6494_v43  ;;  %22390 = vmatpush3.msra.mxu1 %v20953_v38 }
 0x98a   :  { %v23473_v44 = vpop.eup %23472  ;;  %v6497_v33 = vmul.f32 %v23471_v12, %v25152_v62  ;;  %v25274_v8 = vadd.f32 %v25247_v4, %v6516_v57  ;;  %22420 = vmatprep.subr.mxu1 %v28909_v55  ;;  %23266 = vmatprep.subr.bf16.mxu0 %v23265_v5 }
 0x98b   :  { %v25270_v48 = vadd.f32 %v25247_v4, %v6515_v41  ;;  %v6496_v49 = vmul.f32 %v23473_v44, %v25158_v23  ;;  %23268 = vmatpush3.bf16.msra.mxu0 %v23265_v5 }
 0x98c   :  { %v6518_v59 = vmul.f32 %v25239_v29, %v6497_v33  ;;  %217 = vbcast.lane.b32.xlu0 %v215_v11, 256  ;;  %22415 = vmatprep.subr.mxu0 %v28909_v55 }
 0x98d   :  { %28916 = vst [vmem:[#allocation16_spill] sm:$0xff] %v25270_v48  ;;  %v23475_v30 = vpop.eup %23474  ;;  %22340 = vmatprep.mubr.msk.f32.mxu1 %vm373_vm0, %v25270_v48  ;;  %v6517_v62 = vmul.f32 %v25239_v29, %v6496_v49 }
 0x98e   :  { %v23477_v16 = vpop.eup %23476  ;;  %22341 = vmatmul.mubr.msk.f32.gmra.mrb[90].mxu1 %vm373_vm0, %v25274_v8  ;;  %v6499_v23 = vmul.f32 %v23475_v30, %v25165_v45  ;;  %v25290_v9 = vadd.f32 %v25247_v4, %v6518_v59  ;;  %v204_v45 = vld [vmem:[%s28817_s1 + $0x8] sm:$0xff] }
 0x98f   :  { %v25286_v31 = vadd.f32 %v25247_v4, %v6517_v62  ;;  %v6498_v36 = vmul.f32 %v23477_v16, %v25171_v51  ;;  %v264_v61 = vrot.slane %v204_v45, %v28913_v37  ;;  %v278_v22 = vrot.slane %v204_v45, %v28922_v56 }
 0x990   :  { %v6520_v7 = vmul.f32 %v25239_v29, %v6499_v23  ;;  %238 = vbcast.lane.b32.xlu0 %v236_v58, 256  ;;  %v292_v21 = vrot.slane %v204_v45, %v28917_v15  ;;  %v306_v20 = vrot.slane %v204_v45, %v28919_v3  ;;  %v229_v37 = vrot.slane %v25234_v28, %v28923_v52 }
 0x991   :  { %28918 = vst [vmem:[#allocation15_spill] sm:$0xff] %v25286_v31  ;;  %22343 = vmatprep.mubr.msk.f32.mxu1 %vm373_vm0, %v25286_v31  ;;  %v6519_v10 = vmul.f32 %v25239_v29, %v6498_v36  ;;  %v271_v34 = vrot.slane %v204_v45, %v28915_v17  ;;  %v285_v25 = vrot.slane %v204_v45, %v28923_v52 }
 0x992   :  { %22344 = vmatmul.mubr.msk.f32.gmra.mrb[92].mxu1 %vm373_vm0, %v25290_v9  ;;  %v25307_v14 = vadd.f32 %v25247_v4, %v6520_v7  ;;  %v299_v13 = vrot.slane %v204_v45, %v28924_v19  ;;  %v313_v28 = vrot.slane %v204_v45, %v28925_v2 }
 0x993   :  { %v25304_v51 = vadd.f32 %v25247_v4, %v6519_v10 }
 0x994   :  { %28921 = vst [vmem:[#allocation8_spill] sm:$0xff] %v25307_v14  ;;  %252 = vbcast.lane.b32.xlu0 %v250_v63, 256 }
 0x995   :  { %28920 = vst [vmem:[#allocation6_spill] sm:$0xff] %v25304_v51  ;;  %22346 = vmatprep.mubr.msk.f32.mxu1 %vm373_vm0, %v25304_v51 }
 0x996   :  { %22347 = vmatmul.mubr.msk.f32.gmra.mrb[94].mxu1 %vm373_vm0, %v25307_v14 }
 0x998   :  { %266 = vbcast.lane.b32.xlu0 %v264_v61, 256 }
 0x99c   :  { %280 = vbcast.lane.b32.xlu0 %v278_v22, 256 }
 0x9a0   :  { %294 = vbcast.lane.b32.xlu0 %v292_v21, 256 }
 0x9a4   :  { %308 = vbcast.lane.b32.xlu0 %v306_v20, 256 }
 0x9a8   :  { %6439 = vadd.xlane.f32.xlu1 %v6438_v27 }
 0x9b9   :  { %224 = vbcast.lane.b32.xlu1 %v222_v26, 256 }
 0x9bd   :  { %231 = vbcast.lane.b32.xlu1 %v229_v37, 256 }
 0x9c1   :  { %245 = vbcast.lane.b32.xlu1 %v243_v60, 256 }
 0x9c5   :  { %259 = vbcast.lane.b32.xlu1 %v257_v46, 256 }
 0x9c9   :  { %273 = vbcast.lane.b32.xlu1 %v271_v34, 256 }
 0x9cd   :  { %287 = vbcast.lane.b32.xlu1 %v285_v25, 256 }
 0x9d1   :  { %301 = vbcast.lane.b32.xlu1 %v299_v13, 256 }
 0x9d5   :  { %315 = vbcast.lane.b32.xlu1 %v313_v28, 256 }
 0x9f7   :  { %v6425_v43 = vpop.xlane.xlu0 %6424 }
 0x9f8   :  { %v6453_v57 = vmul.f32 0.125, %v6425_v43  ;;  %v6422_v17 = vpop.xlane.xlu1 %6421 }
 0x9f9   :  { %v6452_v11 = vmul.f32 0.125, %v6422_v17 }
 0x9fa   :  { %v6469_v12 = vadd.f32 1e-05, %v6453_v57 }
 0x9fb   :  { %v6468_v41 = vadd.f32 1e-05, %v6452_v11  ;;  %v6431_v44 = vpop.xlane.xlu0 %6430 }
 0x9fc   :  { %23478 = vrsqrt.f32 %v6469_v12  ;;  %v6455_v33 = vmul.f32 0.125, %v6431_v44  ;;  %v6428_v49 = vpop.xlane.xlu1 %6427  ;;  %v25393_v44 = vld [vmem:[%s28823_s7] ss:$0 sm:$0xff] }
 0x9fd   :  { %23480 = vrsqrt.f32 %v6468_v41  ;;  %v6454_v59 = vmul.f32 0.125, %v6428_v49 }
 0x9fe   :  { %v6471_v15 = vadd.f32 1e-05, %v6455_v33 }
 0x9ff   :  { %v6470_v58 = vadd.f32 1e-05, %v6454_v59  ;;  %v6437_v30 = vpop.xlane.xlu0 %6436 }
 0xa00   :  { %23482 = vrsqrt.f32 %v6471_v15  ;;  %v6457_v62 = vmul.f32 0.125, %v6437_v30  ;;  %v6434_v16 = vpop.xlane.xlu1 %6433 }
 0xa01   :  { %23484 = vrsqrt.f32 %v6470_v58  ;;  %v6456_v23 = vmul.f32 0.125, %v6434_v16 }
 0xa02   :  { %v6473_v36 = vadd.f32 1e-05, %v6457_v62 }
 0xa03   :  { %v6472_v7 = vadd.f32 1e-05, %v6456_v23 }
 0xa04   :  { %23486 = vrsqrt.f32 %v6473_v36  ;;  %v211_v13 = vpop.permute.xlu1 %210 }
 0xa05   :  { %23488 = vrsqrt.f32 %v6472_v7  ;;  %v317_v33 = vmul.f32 %v25393_v44, %v211_v13 }
 0xa06   :  { %v23479_v3 = vpop.eup %23478 }
 0xa07   :  { %v23481_v63 = vpop.eup %23480  ;;  %v6501_v10 = vmul.f32 %v23479_v3, %v25188_v1 }
 0xa08   :  { %v6500_v45 = vmul.f32 %v23481_v63, %v25191_v53 }
 0xa09   :  { %v6522_v61 = vmul.f32 %v25239_v29, %v6501_v10 }
 0xa0a   :  { %v23483_v56 = vpop.eup %23482  ;;  %v6521_v22 = vmul.f32 %v25239_v29, %v6500_v45 }
 0xa0b   :  { %v23485_v6 = vpop.eup %23484  ;;  %v6503_v21 = vmul.f32 %v23483_v56, %v25198_v40  ;;  %v25357_v27 = vadd.f32 %v25247_v4, %v6522_v61  ;;  %v25420_v61 = vld [vmem:[%s28818_s2] sm:$0xff]  ;;  %s23882_s2 = scalar_lea.vmem %s20758_s29, 16 }
 0xa0c   :  { %v25353_v20 = vadd.f32 %v25247_v4, %v6521_v22  ;;  %v6502_v50 = vmul.f32 %v23485_v6, %v25202_v35  ;;  %p23883_p0 = scmp.ne.s32.totalorder %s20758_s29, %s23882_s2 }
 0xa0d   :  { %28927 = vst [vmem:[#allocation12_spill] sm:$0xff] %v25357_v27  ;;  %v6524_v1 = vmul.f32 %v25239_v29, %v6503_v21 }
 0xa0e   :  { %28926 = vst [vmem:[#allocation10_spill] sm:$0xff] %v25353_v20  ;;  %v23487_v26 = vpop.eup %23486  ;;  %22349 = vmatprep.mubr.msk.f32.mxu1 %vm373_vm0, %v25353_v20  ;;  %v6523_v53 = vmul.f32 %v25239_v29, %v6502_v50 }
 0xa0f   :  { %v23489_v52 = vpop.eup %23488  ;;  %22350 = vmatmul.mubr.msk.f32.gmra.mrb[96].mxu1 %vm373_vm0, %v25357_v27  ;;  %v6505_v40 = vmul.f32 %v23487_v26, %v25210_v54  ;;  %v25371_v19 = vadd.f32 %v25247_v4, %v6524_v1 }
 0xa10   :  { %v25367_v37 = vadd.f32 %v25247_v4, %v6523_v53  ;;  %v6504_v35 = vmul.f32 %v23489_v52, %v25214_v42  ;;  %v6443_v42 = vpop.xlane.xlu0 %6442 }
 0xa11   :  { %28929 = vst [vmem:[#allocation9_spill] sm:$0xff] %v25371_v19  ;;  %v6526_v60 = vmul.f32 %v25239_v29, %v6505_v40  ;;  %v6459_v34 = vmul.f32 0.125, %v6443_v42 }
 0xa12   :  { %28928 = vst [vmem:[#allocation7_spill] sm:$0xff] %v25367_v37  ;;  %22352 = vmatprep.mubr.msk.f32.mxu1 %vm373_vm0, %v25367_v37  ;;  %v6525_v2 = vmul.f32 %v25239_v29, %v6504_v35 }
 0xa13   :  { %22353 = vmatmul.mubr.msk.f32.gmra.mrb[98].mxu1 %vm373_vm0, %v25371_v19  ;;  %v25383_v46 = vadd.f32 %v25247_v4, %v6526_v60  ;;  %v6475_v25 = vadd.f32 1e-05, %v6459_v34 }
 0xa14   :  { %v25380_v54 = vadd.f32 %v25247_v4, %v6525_v2  ;;  %v218_v32 = vpop.permute.xlu0 %217 }
 0xa15   :  { %28931 = vst [vmem:[#allocation13_spill] sm:$0xff] %v25383_v46  ;;  %23490 = vrsqrt.f32 %v6475_v25  ;;  %v318_v59 = vmul.f32 %v25393_v44, %v218_v32 }
 0xa16   :  { %28930 = vst [vmem:[#allocation11_spill] sm:$0xff] %v25380_v54  ;;  %22355 = vmatprep.mubr.msk.f32.mxu1 %vm373_vm0, %v25380_v54 }
 0xa17   :  { %22356 = vmatmul.mubr.msk.f32.gmra.mrb[100].mxu1 %vm373_vm0, %v25383_v46 }
 0xa18   :  { %v239_v43 = vpop.permute.xlu0 %238 }
 0xa19   :  { %v321_v10 = vmul.f32 %v25393_v44, %v239_v43 }
 0xa1c   :  { %v253_v41 = vpop.permute.xlu0 %252 }
 0xa1d   :  { %v323_v1 = vmul.f32 %v25393_v44, %v253_v41 }
 0xa1f   :  { %v23491_v17 = vpop.eup %23490 }
 0xa20   :  { %v6507_v12 = vmul.f32 %v23491_v17, %v25222_v47  ;;  %v25403_v47 = vld [vmem:[%s28823_s7 + $0x1] ss:$0 sm:$0xff]  ;;  %v267_v3 = vpop.permute.xlu0 %266 }
 0xa21   :  { %v333_v16 = vadd.f32 %v25403_v47, %v317_v33  ;;  %v334_v36 = vadd.f32 %v25403_v47, %v318_v59  ;;  %v337_v50 = vadd.f32 %v25403_v47, %v321_v10  ;;  %v339_v60 = vadd.f32 %v25403_v47, %v323_v1 }
 0xa22   :  { %v6528_v62 = vmul.f32 %v25239_v29, %v6507_v12  ;;  %v325_v2 = vmul.f32 %v25393_v44, %v267_v3  ;;  %v25482_v12 = vld [vmem:[%s28823_s7 + $0x4] ss:$0 sm:$0xff] }
 0xa23   :  { %v25428_v22 = vadd.f32 %v25420_v61, %v334_v36  ;;  %v25449_v35 = vadd.f32 %v25420_v61, %v337_v50 }
 0xa24   :  { %v25415_v45 = vadd.f32 %v25247_v4, %v6528_v62  ;;  %v281_v26 = vpop.permute.xlu0 %280 }
 0xa25   :  { %28935 = vst [vmem:[#allocation20_spill] sm:$0xff] %v25428_v22  ;;  %28938 = vst [vmem:[#allocation23_spill] sm:$0xff] %v25449_v35  ;;  %v327_v32 = vmul.f32 %v25393_v44, %v281_v26 }
 0xa26   :  { %28933 = vst [vmem:[#allocation18_spill] sm:$0xff] %v25415_v45 }
 0xa27   :  { %v343_v41 = vadd.f32 %v25403_v47, %v327_v32 }
 0xa29   :  { %v25498_v36 = vadd.f32 %v25420_v61, %v343_v41 }
 0xa2b   :  { %28944 = vst [vmem:[#allocation29_spill] sm:$0xff] %v25498_v36 }
 0xa35   :  { %v6440_v38 = vpop.xlane.xlu1 %6439 }
 0xa36   :  { %v6458_v28 = vmul.f32 0.125, %v6440_v38  ;;  %v295_v38 = vpop.permute.xlu0 %294 }
 0xa37   :  { %v329_v33 = vmul.f32 %v25393_v44, %v295_v38 }
 0xa38   :  { %v6474_v18 = vadd.f32 1e-05, %v6458_v28  ;;  %v25463_v28 = vadd.f32 %v25420_v61, %v339_v60 }
 0xa39   :  { %v225_v5 = vpop.permute.xlu1 %224 }
 0xa3a   :  { %23492 = vrsqrt.f32 %v6474_v18  ;;  %v319_v15 = vmul.f32 %v25393_v44, %v225_v5  ;;  %28940 = vst [vmem:[#allocation25_spill] sm:$0xff] %v25463_v28  ;;  %v341_v18 = vadd.f32 %v25403_v47, %v325_v2 }
 0xa3c   :  { %v335_v63 = vadd.f32 %v25403_v47, %v319_v15 }
 0xa3d   :  { %v232_v57 = vpop.permute.xlu1 %231 }
 0xa3e   :  { %v320_v7 = vmul.f32 %v25393_v44, %v232_v57  ;;  %v25435_v21 = vadd.f32 %v25420_v61, %v335_v63 }
 0xa40   :  { %28936 = vst [vmem:[#allocation21_spill] sm:$0xff] %v25435_v21 }
 0xa41   :  { %v246_v11 = vpop.permute.xlu1 %245 }
 0xa42   :  { %v322_v6 = vmul.f32 %v25393_v44, %v246_v11  ;;  %v25477_v11 = vadd.f32 %v25420_v61, %v341_v18 }
 0xa44   :  { %v23493_v49 = vpop.eup %23492  ;;  %v338_v52 = vadd.f32 %v25403_v47, %v322_v6  ;;  %28942 = vst [vmem:[#allocation27_spill] sm:$0xff] %v25477_v11 }
 0xa45   :  { %v6506_v58 = vmul.f32 %v23493_v49, %v25318_v0  ;;  %v260_v30 = vpop.permute.xlu1 %259  ;;  %v309_v49 = vpop.permute.xlu0 %308 }
 0xa46   :  { %v324_v40 = vmul.f32 %v25393_v44, %v260_v30  ;;  %v25456_v34 = vadd.f32 %v25420_v61, %v338_v52  ;;  %v331_v3 = vmul.f32 %v25393_v44, %v309_v49 }
 0xa47   :  { %v6527_v23 = vmul.f32 %v25239_v29, %v6506_v58  ;;  %v25423_v29 = vadd.f32 %v25420_v61, %v333_v16 }
 0xa48   :  { %28939 = vst [vmem:[#allocation24_spill] sm:$0xff] %v25456_v34  ;;  %v340_v25 = vadd.f32 %v25403_v47, %v324_v40  ;;  %v347_v52 = vadd.f32 %v25403_v47, %v331_v3 }
 0xa49   :  { %v25411_v0 = vadd.f32 %v25247_v4, %v6527_v23  ;;  %28934 = vst [vmem:[#allocation19_spill] sm:$0xff] %v25423_v29  ;;  %v274_v56 = vpop.permute.xlu1 %273  ;;  %v336_v4 = vadd.f32 %v25403_v47, %v320_v7  ;;  %v345_v7 = vadd.f32 %v25403_v47, %v329_v33 }
 0xa4a   :  { %v326_v13 = vmul.f32 %v25393_v44, %v274_v56  ;;  %v25470_v43 = vadd.f32 %v25420_v61, %v340_v25 }
 0xa4b   :  { %28932 = vst [vmem:[#allocation17_spill] sm:$0xff] %v25411_v0  ;;  %22358 = vmatprep.mubr.msk.f32.mxu1 %vm373_vm0, %v25411_v0  ;;  %v25442_v53 = vadd.f32 %v25420_v61, %v336_v4  ;;  %v25512_v1 = vadd.f32 %v25420_v61, %v345_v7 }
 0xa4c   :  { %22359 = vmatmul.mubr.msk.f32.gmra.mrb[102].mxu1 %vm373_vm0, %v25415_v45  ;;  %28941 = vst [vmem:[#allocation26_spill] sm:$0xff] %v25470_v43  ;;  %v342_v57 = vadd.f32 %v25403_v47, %v326_v13  ;;  %v25528_v13 = vadd.f32 %v25420_v61, %v347_v52 }
 0xa4d   :  { %22391 = vmatprep.mubr.msk.f32.mxu1 %vm373_vm0, %v25423_v29  ;;  %28937 = vst [vmem:[#allocation22_spill] sm:$0xff] %v25442_v53  ;;  %v288_v42 = vpop.permute.xlu1 %287  ;;  %28946 = vst [vmem:[#allocation31_spill] sm:$0xff] %v25512_v1 }
 0xa4e   :  { %v328_v17 = vmul.f32 %v25393_v44, %v288_v42  ;;  %v25489_v15 = vadd.f32 %v25420_v61, %v342_v57  ;;  %28948 = vst [vmem:[#allocation33_spill] sm:$0xff] %v25528_v13 }
 0xa50   :  { %22392 = vmatmul.mubr.msk.f32.vlgmr.msra.gmra.mrb[104].mxu1 %vm373_vm0, %v25428_v22  ;;  %28943 = vst [vmem:[#allocation28_spill] sm:$0xff] %v25489_v15  ;;  %v344_v62 = vadd.f32 %v25403_v47, %v328_v17 }
 0xa51   :  { %22394 = vmatprep.mubr.msk.f32.mxu1 %vm373_vm0, %v25435_v21  ;;  %v302_v5 = vpop.permute.xlu1 %301 }
 0xa52   :  { %v330_v16 = vmul.f32 %v25393_v44, %v302_v5  ;;  %v25505_v4 = vadd.f32 %v25420_v61, %v344_v62 }
 0xa54   :  { %22395 = vmatmul.mubr.msk.f32.gmra.mrb[106].mxu1 %vm373_vm0, %v25442_v53  ;;  %28945 = vst [vmem:[#allocation30_spill] sm:$0xff] %v25505_v4  ;;  %v346_v6 = vadd.f32 %v25403_v47, %v330_v16 }
 0xa55   :  { %22397 = vmatprep.mubr.msk.f32.mxu1 %vm373_vm0, %v25449_v35  ;;  %v316_v63 = vpop.permute.xlu1 %315 }
 0xa56   :  { %v332_v50 = vmul.f32 %v25393_v44, %v316_v63  ;;  %v25522_v44 = vadd.f32 %v25420_v61, %v346_v6 }
 0xa58   :  { %22398 = vmatmul.mubr.msk.f32.gmra.mrb[108].mxu1 %vm373_vm0, %v25456_v34  ;;  %28947 = vst [vmem:[#allocation32_spill] sm:$0xff] %v25522_v44  ;;  %v348_v42 = vadd.f32 %v25403_v47, %v332_v50 }
 0xa59   :  { %22400 = vmatprep.mubr.msk.f32.mxu1 %vm373_vm0, %v25463_v28 }
 0xa5a   :  { %v25536_v17 = vadd.f32 %v25420_v61, %v348_v42 }
 0xa5b   :  { %v22339_v59 = vpop.f32.mrb[88].mxu1 }
 0xa5c   :  { %v6750_v58 = vadd.f32 %v22339_v59, %v25482_v12  ;;  %v6666_v30 = vpop.f32.mrb[89].mxu1  ;;  %22401 = vmatmul.mubr.msk.f32.gmra.mrb[110].mxu1 %vm373_vm0, %v25470_v43  ;;  %28949 = vst [vmem:[#allocation34_spill] sm:$0xff] %v25536_v17 }
 0xa5d   :  { %v6749_v23 = vadd.f32 %v25482_v12, %v6666_v30  ;;  %22403 = vmatprep.mubr.msk.f32.mxu1 %vm373_vm0, %v25477_v11 }
 0xa5e   :  { %v6766_v56 = vmax.f32 %v6750_v58, 0.0 }
 0xa5f   :  { %v6765_v10 = vmax.f32 %v6749_v23, 0.0 }
 0xa60   :  { %22404 = vmatmul.mubr.msk.f32.gmra.mrb[112].mxu1 %vm373_vm0, %v25489_v15 }
 0xa61   :  { %v22342_v26 = vpop.f32.mrb[90].mxu1  ;;  %22365 = vmatprep.mubr.msk.f32.mxu0 %vm6784_vm4, %v6765_v10  ;;  %22406 = vmatprep.mubr.msk.f32.mxu1 %vm373_vm0, %v25498_v36  ;;  %v23913_v36 = vmov -1e+30  }
 0xa62   :  { %v6752_v40 = vadd.f32 %v22342_v26, %v25482_v12  ;;  %v6676_v60 = vpop.f32.mrb[91].mxu1  ;;  %22366 = vmatmul.mubr.msk.f32.vlgmr.msra.gmra.mrb[72].mxu0 %vm6784_vm4, %v6766_v56 }
 0xa63   :  { %v6751_v2 = vadd.f32 %v25482_v12, %v6676_v60 }
 0xa64   :  { %22407 = vmatmul.mubr.msk.f32.gmra.mrb[114].mxu1 %vm373_vm0, %v25505_v4  ;;  %v6768_v18 = vmax.f32 %v6752_v40, 0.0 }
 0xa65   :  { %v6767_v25 = vmax.f32 %v6751_v2, 0.0  ;;  %v22345_v38 = vpop.f32.mrb[92].mxu1  ;;  %22409 = vmatprep.mubr.msk.f32.mxu1 %vm373_vm0, %v25512_v1  ;;  %v28962_v1 = vlaneseq }
 0xa66   :  { %v6754_v32 = vadd.f32 %v22345_v38, %v25482_v12  ;;  %v6686_v5 = vpop.f32.mrb[93].mxu1 }
 0xa67   :  { %v6753_v57 = vadd.f32 %v25482_v12, %v6686_v5  ;;  %22368 = vmatprep.mubr.msk.f32.mxu0 %vm6784_vm4, %v6767_v25 }
 0xa68   :  { %22369 = vmatmul.mubr.msk.f32.gmra.mrb[74].mxu0 %vm6784_vm4, %v6768_v18  ;;  %22410 = vmatmul.mubr.msk.f32.gmra.mrb[116].mxu1 %vm373_vm0, %v25522_v44  ;;  %v6770_v33 = vmax.f32 %v6754_v32, 0.0  ;;  %v25789_v44 = vand.u32 127, %v28962_v1 }
 0xa69   :  { %v6769_v47 = vmax.f32 %v6753_v57, 0.0  ;;  %v22348_v41 = vpop.f32.mrb[94].mxu1  ;;  %22412 = vmatprep.mubr.msk.f32.mxu1 %vm373_vm0, %v25528_v13 }
 0xa6a   :  { %v6756_v49 = vadd.f32 %v22348_v41, %v25482_v12  ;;  %v6696_v59 = vpop.f32.mrb[95].mxu1  ;;  %28963 = vst [vmem:[#allocation47_spill] sm:$0xff] %v25789_v44 }
 0xa6b   :  { %v6755_v58 = vadd.f32 %v25482_v12, %v6696_v59  ;;  %22371 = vmatprep.mubr.msk.f32.mxu0 %vm6784_vm4, %v6769_v47  ;;  %v20970_v47 = vld [vmem:[%s28823_s7 + $0xa] ss:$0 sm:$0xff] }
 0xa6c   :  { %22372 = vmatmul.mubr.msk.f32.gmra.mrb[76].mxu0 %vm6784_vm4, %v6770_v33  ;;  %22413 = vmatmul.mubr.msk.f32.gmra.mrb[118].mxu1 %vm373_vm0, %v25536_v17  ;;  %v6772_v30 = vmax.f32 %v6756_v49, 0.0  ;;  %v28964_v17 = vld [vmem:[#allocation5_spill] sm:$0xff] }
 0xa6d   :  { %v6771_v61 = vmax.f32 %v6755_v58, 0.0  ;;  %22422 = vmatprep.mubr.msk.f32.mxu1 %vm23907_vm1, %v28909_v55  ;;  %vm369_vm5 = vcmp.le.s32.totalorder %v25789_v44, %v28964_v17 }
 0xa6e   :  { %v25793_v4 = vsel %vm369_vm5, 0.0, %v23913_v36 }
 0xa6f   :  { %22374 = vmatprep.mubr.msk.f32.mxu0 %vm6784_vm4, %v6771_v61 }
 0xa70   :  { %22375 = vmatmul.mubr.msk.f32.gmra.mrb[78].mxu0 %vm6784_vm4, %v6772_v30 }
 0xae2   :  { %v22351_v62 = vpop.f32.mrb[96].mxu1 }
 0xae3   :  { %v6758_v16 = vadd.f32 %v22351_v62, %v25482_v12  ;;  %v6706_v23 = vpop.f32.mrb[97].mxu1 }
 0xae4   :  { %v6757_v7 = vadd.f32 %v25482_v12, %v6706_v23 }
 0xae5   :  { %v6774_v10 = vmax.f32 %v6758_v16, 0.0 }
 0xae6   :  { %v6773_v3 = vmax.f32 %v6757_v7, 0.0  ;;  %v22354_v63 = vpop.f32.mrb[98].mxu1 }
 0xae7   :  { %v6760_v56 = vadd.f32 %v22354_v63, %v25482_v12  ;;  %v6716_v6 = vpop.f32.mrb[99].mxu1 }
 0xae8   :  { %v6759_v50 = vadd.f32 %v25482_v12, %v6716_v6  ;;  %22377 = vmatprep.mubr.msk.f32.mxu0 %vm6784_vm4, %v6773_v3 }
 0xae9   :  { %22378 = vmatmul.mubr.msk.f32.gmra.mrb[80].mxu0 %vm6784_vm4, %v6774_v10  ;;  %v6776_v40 = vmax.f32 %v6760_v56, 0.0 }
 0xaea   :  { %v6775_v26 = vmax.f32 %v6759_v50, 0.0  ;;  %v22357_v52 = vpop.f32.mrb[100].mxu1 }
 0xaeb   :  { %v6762_v60 = vadd.f32 %v22357_v52, %v25482_v12  ;;  %v6726_v2 = vpop.f32.mrb[101].mxu1 }
 0xaec   :  { %v6761_v42 = vadd.f32 %v25482_v12, %v6726_v2  ;;  %22380 = vmatprep.mubr.msk.f32.mxu0 %vm6784_vm4, %v6775_v26 }
 0xaed   :  { %22381 = vmatmul.mubr.msk.f32.gmra.mrb[82].mxu0 %vm6784_vm4, %v6776_v40  ;;  %v6778_v38 = vmax.f32 %v6762_v60, 0.0 }
 0xaee   :  { %v6777_v25 = vmax.f32 %v6761_v42, 0.0 }
 0xaf0   :  { %22383 = vmatprep.mubr.msk.f32.mxu0 %vm6784_vm4, %v6777_v25 }
 0xaf1   :  { %22384 = vmatmul.mubr.msk.f32.gmra.mrb[84].mxu0 %vm6784_vm4, %v6778_v38 }
 0xb1f   :  { %v22360_v18 = vpop.f32.mrb[102].mxu1 }
 0xb20   :  { %v6764_v32 = vadd.f32 %v22360_v18, %v25482_v12  ;;  %v6736_v5 = vpop.f32.mrb[103].mxu1 }
 0xb21   :  { %v6763_v57 = vadd.f32 %v25482_v12, %v6736_v5 }
 0xb22   :  { %v6780_v49 = vmax.f32 %v6764_v32, 0.0 }
 0xb23   :  { %v6779_v41 = vmax.f32 %v6763_v57, 0.0  ;;  %v22393_v33 = vpop.f32.mrb[104].mxu1 }
 0xb24   :  { %v25570_v59 = vadd.f32 %v22393_v33, %v20970_v47  ;;  %v7381_v58 = vpop.f32.mrb[105].mxu1 }
 0xb25   :  { %v25572_v61 = vadd.f32 %v20970_v47, %v7381_v58  ;;  %22386 = vmatprep.mubr.msk.f32.mxu0 %vm6784_vm4, %v6779_v41 }
 0xb26   :  { %7560 = vrot.lane.b32.xlu1 %v25570_v59, %s23908_s18  ;;  %22387 = vmatmul.mubr.msk.f32.gmra.mrb[86].mxu0 %vm6784_vm4, %v6780_v49 }
 0xb27   :  { %7483 = vrot.lane.b32.xlu0 %v25572_v61, %s23908_s18  ;;  %v22396_v12 = vpop.f32.mrb[106].mxu1  ;;  %22417 = vmatprep.mubr.msk.f32.mxu0 %vm23907_vm1, %v28909_v55 }
 0xb28   :  { %v25582_v30 = vadd.f32 %v22396_v12, %v20970_v47  ;;  %v7391_v62 = vpop.f32.mrb[107].mxu1 }
 0xb29   :  { %v25584_v16 = vadd.f32 %v20970_v47, %v7391_v62 }
 0xb2a   :  { %7714 = vrot.lane.b32.xlu1 %v25582_v30, %s23908_s18 }
 0xb2b   :  { %7637 = vrot.lane.b32.xlu0 %v25584_v16, %s23908_s18  ;;  %v22399_v23 = vpop.f32.mrb[108].mxu1 }
 0xb2c   :  { %v25590_v7 = vadd.f32 %v22399_v23, %v20970_v47  ;;  %v7401_v3 = vpop.f32.mrb[109].mxu1 }
 0xb2d   :  { %v25592_v63 = vadd.f32 %v20970_v47, %v7401_v3 }
 0xb2e   :  { %7868 = vrot.lane.b32.xlu1 %v25590_v7, %s23908_s18 }
 0xb2f   :  { %7791 = vrot.lane.b32.xlu0 %v25592_v63, %s23908_s18  ;;  %v22402_v10 = vpop.f32.mrb[110].mxu1 }
 0xb30   :  { %v25598_v56 = vadd.f32 %v22402_v10, %v20970_v47  ;;  %v7411_v6 = vpop.f32.mrb[111].mxu1 }
 0xb31   :  { %v25600_v50 = vadd.f32 %v20970_v47, %v7411_v6 }
 0xb32   :  { %8022 = vrot.lane.b32.xlu1 %v25598_v56, %s23908_s18 }
 0xb33   :  { %7945 = vrot.lane.b32.xlu0 %v25600_v50, %s23908_s18  ;;  %v22405_v26 = vpop.f32.mrb[112].mxu1 }
 0xb34   :  { %v25606_v52 = vadd.f32 %v22405_v26, %v20970_v47  ;;  %v7421_v40 = vpop.f32.mrb[113].mxu1 }
 0xb35   :  { %v25608_v60 = vadd.f32 %v20970_v47, %v7421_v40  ;;  %v25610_v2 = vpop.f32.mrb[72].mxu0 }
 0xb36   :  { %v25612_v42 = vpop.f32.mrb[73].mxu0  ;;  %8176 = vrot.lane.b32.xlu1 %v25606_v52, %s23908_s18 }
 0xb37   :  { %8099 = vrot.lane.b32.xlu0 %v25608_v60, %s23908_s18  ;;  %v22408_v25 = vpop.f32.mrb[114].mxu1 }
 0xb38   :  { %v25618_v38 = vadd.f32 %v22408_v25, %v20970_v47  ;;  %v7431_v18 = vpop.f32.mrb[115].mxu1 }
 0xb39   :  { %v25620_v32 = vadd.f32 %v20970_v47, %v7431_v18 }
 0xb3a   :  { %8330 = vrot.lane.b32.xlu1 %v25618_v38, %s23908_s18 }
 0xb3b   :  { %v25624_v5 = vpop.f32.mrb[74].mxu0  ;;  %8253 = vrot.lane.b32.xlu0 %v25620_v32, %s23908_s18  ;;  %v22411_v57 = vpop.f32.mrb[116].mxu1 }
 0xb3c   :  { %v25628_v41 = vadd.f32 %v22411_v57, %v20970_v47  ;;  %v25630_v33 = vpop.f32.mrb[75].mxu0  ;;  %v7441_v49 = vpop.f32.mrb[117].mxu1 }
 0xb3d   :  { %28950 = vst [vmem:[#allocation35_spill] sm:$0xff] %v25630_v33  ;;  %v25632_v58 = vadd.f32 %v20970_v47, %v7441_v49 }
 0xb3e   :  { %8484 = vrot.lane.b32.xlu1 %v25628_v41, %s23908_s18 }
 0xb3f   :  { %v25636_v12 = vpop.f32.mrb[76].mxu0  ;;  %8407 = vrot.lane.b32.xlu0 %v25632_v58, %s23908_s18  ;;  %v22414_v62 = vpop.f32.mrb[118].mxu1 }
 0xb40   :  { %v25640_v23 = vadd.f32 %v22414_v62, %v20970_v47  ;;  %v25642_v3 = vpop.f32.mrb[77].mxu0  ;;  %v7451_v10 = vpop.f32.mrb[119].mxu1 }
 0xb41   :  { %28951 = vst [vmem:[#allocation36_spill] sm:$0xff] %v25642_v3  ;;  %v25644_v6 = vadd.f32 %v20970_v47, %v7451_v10 }
 0xb42   :  { %8638 = vrot.lane.b32.xlu1 %v25640_v23, %s23908_s18 }
 0xb43   :  { %v25648_v26 = vpop.f32.mrb[78].mxu0  ;;  %8561 = vrot.lane.b32.xlu0 %v25644_v6, %s23908_s18 }
 0xb44   :  { %28952 = vst [vmem:[#allocation37_spill] sm:$0xff] %v25648_v26  ;;  %v25652_v40 = vpop.f32.mrb[79].mxu0 }
 0xb45   :  { %28953 = vst [vmem:[#allocation38_spill] sm:$0xff] %v25652_v40 }
 0xb46   :  { %8890 = vrot.lane.b32.xlu1 %v25572_v61, %s23909_s19 }
 0xb47   :  { %8966 = vrot.lane.b32.xlu0 %v25570_v59, %s23909_s19 }
 0xb4a   :  { %9042 = vrot.lane.b32.xlu1 %v25584_v16, %s23909_s19 }
 0xb4b   :  { %9118 = vrot.lane.b32.xlu0 %v25582_v30, %s23909_s19 }
 0xb4e   :  { %9194 = vrot.lane.b32.xlu1 %v25592_v63, %s23909_s19 }
 0xb4f   :  { %9346 = vrot.lane.b32.xlu0 %v25600_v50, %s23909_s19 }
 0xb52   :  { %9270 = vrot.lane.b32.xlu1 %v25590_v7, %s23909_s19 }
 0xb53   :  { %9498 = vrot.lane.b32.xlu0 %v25608_v60, %s23909_s19 }
 0xb56   :  { %9422 = vrot.lane.b32.xlu1 %v25598_v56, %s23909_s19 }
 0xb5a   :  { %9574 = vrot.lane.b32.xlu1 %v25606_v52, %s23909_s19 }
 0xb98   :  { %v7561_v47 = vpop.permute.xlu1 %7560 }
 0xb99   :  { %v7484_v25 = vpop.permute.xlu0 %7483  ;;  %22421 = vmatpush3.xpose.msk.msra.mxu1 %vm591_vm2, %v7561_v47 }
 0xb9a   :  { %22416 = vmatpush3.xpose.msk.msra.mxu0 %vm591_vm2, %v7484_v25  ;;  %22430 = vmatprep.subr.mxu1 %v28909_v55 }
 0xb9b   :  { %22425 = vmatprep.subr.mxu0 %v28909_v55 }
 0xb9c   :  { %22423 = vmatmul.mubr.msk.f32.vlgmr.msra.gmra.mrb[120].mxu1 %vm591_vm2, %v25570_v59  ;;  %v7715_v18 = vpop.permute.xlu1 %7714 }
 0xb9d   :  { %22418 = vmatmul.mubr.msk.f32.vlgmr.msra.gmra.mrb[88].mxu0 %vm591_vm2, %v25572_v61  ;;  %v7638_v57 = vpop.permute.xlu0 %7637  ;;  %22431 = vmatpush3.xpose.msk.msra.mxu1 %vm591_vm2, %v7715_v18 }
 0xb9e   :  { %22426 = vmatpush3.xpose.msk.msra.mxu0 %vm591_vm2, %v7638_v57  ;;  %22432 = vmatprep.mubr.msk.f32.mxu1 %vm23907_vm1, %v28909_v55 }
 0xb9f   :  { %22427 = vmatprep.mubr.msk.f32.mxu0 %vm23907_vm1, %v28909_v55  ;;  %22440 = vmatprep.subr.mxu1 %v28909_v55 }
 0xba0   :  { %22433 = vmatmul.mubr.msk.f32.vlgmr.msra.gmra.mrb[122].mxu1 %vm591_vm2, %v25582_v30  ;;  %v7869_v49 = vpop.permute.xlu1 %7868  ;;  %22435 = vmatprep.subr.mxu0 %v28909_v55 }
 0xba1   :  { %22428 = vmatmul.mubr.msk.f32.vlgmr.msra.gmra.mrb[90].mxu0 %vm591_vm2, %v25584_v16  ;;  %v7792_v62 = vpop.permute.xlu0 %7791  ;;  %22441 = vmatpush3.xpose.msk.msra.mxu1 %vm591_vm2, %v7869_v49 }
 0xba2   :  { %22436 = vmatpush3.xpose.msk.msra.mxu0 %vm591_vm2, %v7792_v62  ;;  %22442 = vmatprep.mubr.msk.f32.mxu1 %vm23907_vm1, %v28909_v55 }
 0xba3   :  { %22437 = vmatprep.mubr.msk.f32.mxu0 %vm23907_vm1, %v28909_v55  ;;  %22450 = vmatprep.subr.mxu1 %v28909_v55 }
 0xba4   :  { %22443 = vmatmul.mubr.msk.f32.vlgmr.msra.gmra.mrb[124].mxu1 %vm591_vm2, %v25590_v7  ;;  %v8023_v10 = vpop.permute.xlu1 %8022  ;;  %22445 = vmatprep.subr.mxu0 %v28909_v55 }
 0xba5   :  { %22438 = vmatmul.mubr.msk.f32.vlgmr.msra.gmra.mrb[92].mxu0 %vm591_vm2, %v25592_v63  ;;  %v7946_v47 = vpop.permute.xlu0 %7945  ;;  %22451 = vmatpush3.xpose.msk.msra.mxu1 %vm591_vm2, %v8023_v10 }
 0xba6   :  { %22446 = vmatpush3.xpose.msk.msra.mxu0 %vm591_vm2, %v7946_v47  ;;  %22452 = vmatprep.mubr.msk.f32.mxu1 %vm23907_vm1, %v28909_v55 }
 0xba7   :  { %22447 = vmatprep.mubr.msk.f32.mxu0 %vm23907_vm1, %v28909_v55  ;;  %22460 = vmatprep.subr.mxu1 %v28909_v55 }
 0xba8   :  { %22453 = vmatmul.mubr.msk.f32.vlgmr.msra.gmra.mrb[126].mxu1 %vm591_vm2, %v25598_v56  ;;  %v8177_v25 = vpop.permute.xlu1 %8176  ;;  %22455 = vmatprep.subr.mxu0 %v28909_v55 }
 0xba9   :  { %22448 = vmatmul.mubr.msk.f32.vlgmr.msra.gmra.mrb[94].mxu0 %vm591_vm2, %v25600_v50  ;;  %v8100_v18 = vpop.permute.xlu0 %8099  ;;  %22461 = vmatpush3.xpose.msk.msra.mxu1 %vm591_vm2, %v8177_v25 }
 0xbaa   :  { %22456 = vmatpush3.xpose.msk.msra.mxu0 %vm591_vm2, %v8100_v18  ;;  %22462 = vmatprep.mubr.msk.f32.mxu1 %vm23907_vm1, %v28909_v55 }
 0xbab   :  { %22457 = vmatprep.mubr.msk.f32.mxu0 %vm23907_vm1, %v28909_v55  ;;  %22470 = vmatprep.subr.mxu1 %v28909_v55 }
 0xbac   :  { %22463 = vmatmul.mubr.msk.f32.vlgmr.msra.gmra.mrb[128].mxu1 %vm591_vm2, %v25606_v52  ;;  %v8331_v57 = vpop.permute.xlu1 %8330  ;;  %22465 = vmatprep.subr.mxu0 %v28909_v55 }
 0xbad   :  { %22458 = vmatmul.mubr.msk.f32.vlgmr.msra.gmra.mrb[96].mxu0 %vm591_vm2, %v25608_v60  ;;  %v8254_v49 = vpop.permute.xlu0 %8253  ;;  %22471 = vmatpush3.xpose.msk.msra.mxu1 %vm591_vm2, %v8331_v57 }
 0xbae   :  { %22466 = vmatpush3.xpose.msk.msra.mxu0 %vm591_vm2, %v8254_v49  ;;  %22472 = vmatprep.mubr.msk.f32.mxu1 %vm23907_vm1, %v28909_v55 }
 0xbaf   :  { %22467 = vmatprep.mubr.msk.f32.mxu0 %vm23907_vm1, %v28909_v55  ;;  %22480 = vmatprep.subr.mxu1 %v28909_v55 }
 0xbb0   :  { %22473 = vmatmul.mubr.msk.f32.vlgmr.msra.gmra.mrb[130].mxu1 %vm591_vm2, %v25618_v38  ;;  %v8485_v62 = vpop.permute.xlu1 %8484  ;;  %22475 = vmatprep.subr.mxu0 %v28909_v55 }
 0xbb1   :  { %22468 = vmatmul.mubr.msk.f32.vlgmr.msra.gmra.mrb[98].mxu0 %vm591_vm2, %v25620_v32  ;;  %v8408_v10 = vpop.permute.xlu0 %8407  ;;  %22481 = vmatpush3.xpose.msk.msra.mxu1 %vm591_vm2, %v8485_v62 }
 0xbb2   :  { %22476 = vmatpush3.xpose.msk.msra.mxu0 %vm591_vm2, %v8408_v10  ;;  %22482 = vmatprep.mubr.msk.f32.mxu1 %vm23907_vm1, %v28909_v55 }
 0xbb3   :  { %22477 = vmatprep.mubr.msk.f32.mxu0 %vm23907_vm1, %v28909_v55  ;;  %22490 = vmatprep.subr.mxu1 %v28909_v55 }
 0xbb4   :  { %22483 = vmatmul.mubr.msk.f32.vlgmr.msra.gmra.mrb[132].mxu1 %vm591_vm2, %v25628_v41  ;;  %v8639_v47 = vpop.permute.xlu1 %8638  ;;  %22485 = vmatprep.subr.mxu0 %v28909_v55 }
 0xbb5   :  { %22478 = vmatmul.mubr.msk.f32.vlgmr.msra.gmra.mrb[100].mxu0 %vm591_vm2, %v25632_v58  ;;  %v8562_v25 = vpop.permute.xlu0 %8561  ;;  %22491 = vmatpush3.xpose.msk.msra.mxu1 %vm591_vm2, %v8639_v47 }
 0xbb6   :  { %22486 = vmatpush3.xpose.msk.msra.mxu0 %vm591_vm2, %v8562_v25  ;;  %22492 = vmatprep.mubr.msk.f32.mxu1 %vm23907_vm1, %v28909_v55 }
 0xbb7   :  { %22487 = vmatprep.mubr.msk.f32.mxu0 %vm23907_vm1, %v28909_v55  ;;  %22495 = vmatprep.subr.mxu0 %v28909_v55 }
 0xbb8   :  { %22493 = vmatmul.mubr.msk.f32.vlgmr.msra.gmra.mrb[134].mxu1 %vm591_vm2, %v25640_v23  ;;  %v8891_v18 = vpop.permute.xlu1 %8890  ;;  %22500 = vmatprep.subr.mxu1 %v28909_v55 }
 0xbb9   :  { %22488 = vmatmul.mubr.msk.f32.vlgmr.msra.gmra.mrb[102].mxu0 %vm591_vm2, %v25644_v6  ;;  %v8967_v57 = vpop.permute.xlu0 %8966  ;;  %22502 = vmatprep.mubr.msk.f32.mxu1 %vm23907_vm1, %v28909_v55 }
 0xbba   :  { %22496 = vmatpush3.msra.mxu0 %v8891_v18  ;;  %22501 = vmatpush3.msra.mxu1 %v8967_v57 }
 0xbbb   :  { %22510 = vmatprep.subr.mxu1 %v28909_v55  ;;  %22497 = vmatprep.mubr.msk.f32.mxu0 %vm23907_vm1, %v28909_v55 }
 0xbbc   :  { %v25771_v49 = vpop.f32.mrb[80].mxu0  ;;  %22505 = vmatprep.subr.mxu0 %v28909_v55 }
 0xbbd   :  { %28954 = vst [vmem:[#allocation39_spill] sm:$0xff] %v25771_v49  ;;  %v25774_v62 = vpop.f32.mrb[81].mxu0 }
 0xbbe   :  { %28955 = vst [vmem:[#allocation40_spill] sm:$0xff] %v25774_v62 }
 0xbc0   :  { %v25776_v10 = vpop.f32.mrb[82].mxu0 }
 0xbc1   :  { %28956 = vst [vmem:[#allocation41_spill] sm:$0xff] %v25776_v10  ;;  %v25778_v47 = vpop.f32.mrb[83].mxu0 }
 0xbc2   :  { %28957 = vst [vmem:[#allocation42_spill] sm:$0xff] %v25778_v47 }
 0xbc4   :  { %v25780_v25 = vpop.f32.mrb[84].mxu0 }
 0xbc5   :  { %28958 = vst [vmem:[#allocation43_spill] sm:$0xff] %v25780_v25  ;;  %v25782_v13 = vpop.f32.mrb[85].mxu0 }
 0xbc6   :  { %28959 = vst [vmem:[#allocation44_spill] sm:$0xff] %v25782_v13 }
 0xbf9   :  { %v25784_v18 = vpop.f32.mrb[86].mxu0 }
 0xbfa   :  { %28960 = vst [vmem:[#allocation45_spill] sm:$0xff] %v25784_v18  ;;  %v25786_v57 = vpop.f32.mrb[87].mxu0 }
 0xbfb   :  { %28961 = vst [vmem:[#allocation46_spill] sm:$0xff] %v25786_v57 }
 0xc6f   :  { %v7632_v11 = vpop.f32.mrb[120].mxu1 }
 0xc70   :  { %v25796_v15 = vadd.f32 %v7632_v11, %v25793_v4  ;;  %v7555_v43 = vpop.f32.mrb[88].mxu0  ;;  %v22424_v28 = vpop.f32.mrb[121].mxu1 }
 0xc71   :  { %v25799_v45 = vadd.f32 %v7555_v43, %v25793_v4  ;;  %v22419_v35 = vpop.f32.mrb[89].mxu0 }
 0xc72   :  { %v8717_v1 = vsel %vm373_vm0, %v25796_v15, -inf }
 0xc73   :  { %8718 = vmax.xlane.f32.xlu1 %v8717_v1  ;;  %v7786_v34 = vpop.f32.mrb[122].mxu1  ;;  %v8714_v17 = vsel %vm373_vm0, %v25799_v45, -inf }
 0xc74   :  { %v25806_v36 = vadd.f32 %v7786_v34, %v25793_v4  ;;  %v7709_v44 = vpop.f32.mrb[90].mxu0  ;;  %8715 = vmax.xlane.f32.xlu0 %v8714_v17  ;;  %v22434_v11 = vpop.f32.mrb[123].mxu1 }
 0xc75   :  { %v22429_v18 = vpop.f32.mrb[91].mxu0  ;;  %v25811_v35 = vadd.f32 %v7709_v44, %v25793_v4 }
 0xc76   :  { %v8723_v28 = vsel %vm373_vm0, %v25806_v36, -inf }
 0xc77   :  { %v7940_v43 = vpop.f32.mrb[124].mxu1  ;;  %v8720_v11 = vsel %vm373_vm0, %v25811_v35, -inf }
 0xc78   :  { %v7863_v0 = vpop.f32.mrb[92].mxu0  ;;  %8724 = vmax.xlane.f32.xlu0 %v8723_v28  ;;  %v22444_v1 = vpop.f32.mrb[125].mxu1  ;;  %v25817_v34 = vadd.f32 %v7940_v43, %v25793_v4 }
 0xc79   :  { %v25814_v21 = vadd.f32 %v7863_v0, %v25793_v4  ;;  %v22439_v53 = vpop.f32.mrb[93].mxu0 }
 0xc7a   :  { %v8729_v29 = vsel %vm373_vm0, %v25817_v34, -inf }
 0xc7b   :  { %v8094_v17 = vpop.f32.mrb[126].mxu1  ;;  %v8726_v18 = vsel %vm373_vm0, %v25814_v21, -inf }
 0xc7c   :  { %v8017_v44 = vpop.f32.mrb[94].mxu0  ;;  %8727 = vmax.xlane.f32.xlu1 %v8726_v18  ;;  %8721 = vmax.xlane.f32.xlu0 %v8720_v11  ;;  %v22454_v57 = vpop.f32.mrb[127].mxu1  ;;  %v25827_v53 = vadd.f32 %v8094_v17, %v25793_v4 }
 0xc7d   :  { %v25824_v28 = vadd.f32 %v8017_v44, %v25793_v4  ;;  %v22449_v0 = vpop.f32.mrb[95].mxu0 }
 0xc7e   :  { %v8735_v46 = vsel %vm373_vm0, %v25827_v53, -inf }
 0xc7f   :  { %v8248_v43 = vpop.f32.mrb[128].mxu1  ;;  %v8732_v1 = vsel %vm373_vm0, %v25824_v28, -inf }
 0xc80   :  { %v8171_v22 = vpop.f32.mrb[96].mxu0  ;;  %8733 = vmax.xlane.f32.xlu1 %v8732_v1  ;;  %8730 = vmax.xlane.f32.xlu0 %v8729_v29  ;;  %v22464_v18 = vpop.f32.mrb[129].mxu1  ;;  %v25837_v44 = vadd.f32 %v8248_v43, %v25793_v4 }
 0xc81   :  { %v25834_v57 = vadd.f32 %v8171_v22, %v25793_v4  ;;  %v22459_v11 = vpop.f32.mrb[97].mxu0 }
 0xc82   :  { %v8741_v25 = vsel %vm373_vm0, %v25837_v44, -inf }
 0xc83   :  { %v8402_v17 = vpop.f32.mrb[130].mxu1  ;;  %v8738_v0 = vsel %vm373_vm0, %v25834_v57, -inf }
 0xc84   :  { %v8325_v54 = vpop.f32.mrb[98].mxu0  ;;  %8739 = vmax.xlane.f32.xlu1 %v8738_v0  ;;  %8736 = vmax.xlane.f32.xlu0 %v8735_v46  ;;  %v22474_v1 = vpop.f32.mrb[131].mxu1  ;;  %v25847_v18 = vadd.f32 %v8402_v17, %v25793_v4 }
 0xc85   :  { %v25844_v29 = vadd.f32 %v8325_v54, %v25793_v4  ;;  %v22469_v22 = vpop.f32.mrb[99].mxu0 }
 0xc86   :  { %v8747_v13 = vsel %vm373_vm0, %v25847_v18, -inf }
 0xc87   :  { %v8556_v43 = vpop.f32.mrb[132].mxu1  ;;  %v8744_v11 = vsel %vm373_vm0, %v25844_v29, -inf }
 0xc88   :  { %v8479_v20 = vpop.f32.mrb[100].mxu0  ;;  %8745 = vmax.xlane.f32.xlu1 %v8744_v11  ;;  %8742 = vmax.xlane.f32.xlu0 %v8741_v25  ;;  %v22484_v0 = vpop.f32.mrb[133].mxu1  ;;  %v25857_v1 = vadd.f32 %v8556_v43, %v25793_v4 }
 0xc89   :  { %v25854_v46 = vadd.f32 %v8479_v20, %v25793_v4  ;;  %v22479_v54 = vpop.f32.mrb[101].mxu0 }
 0xc8a   :  { %v8753_v20 = vsel %vm373_vm0, %v25857_v1, -inf }
 0xc8b   :  { %v8710_v17 = vpop.f32.mrb[134].mxu1  ;;  %v8750_v22 = vsel %vm373_vm0, %v25854_v46, -inf }
 0xc8c   :  { %v8633_v19 = vpop.f32.mrb[102].mxu0  ;;  %8751 = vmax.xlane.f32.xlu1 %v8750_v22  ;;  %8748 = vmax.xlane.f32.xlu0 %v8747_v13  ;;  %v22494_v11 = vpop.f32.mrb[135].mxu1  ;;  %v25864_v0 = vadd.f32 %v8710_v17, %v25793_v4 }
 0xc8d   :  { %v22489_v25 = vpop.f32.mrb[103].mxu0  ;;  %v25877_v13 = vadd.f32 %v8633_v19, %v25793_v4  ;;  %v25883_v17 = vpop.permute.xlu1 %9042 }
 0xc8e   :  { %v8759_v43 = vsel %vm373_vm0, %v25864_v0, -inf  ;;  %v25889_v25 = vpop.permute.xlu0 %9118 }
 0xc8f   :  { %v8756_v54 = vsel %vm373_vm0, %v25877_v13, -inf }
 0xc90   :  { %8754 = vmax.xlane.f32.xlu0 %v8753_v20 }
 0xc91   :  { %v25885_v22 = vpop.permute.xlu1 %9194 }
 0xc94   :  { %8760 = vmax.xlane.f32.xlu0 %v8759_v43  ;;  %v25893_v43 = vpop.permute.xlu0 %9346 }
 0xc95   :  { %v25887_v11 = vpop.permute.xlu1 %9270 }
 0xc98   :  { %v25897_v62 = vpop.permute.xlu0 %9498 }
 0xc99   :  { %v25891_v20 = vpop.permute.xlu1 %9422 }
 0xc9d   :  { %9726 = vrot.lane.b32.xlu1 %v25618_v38, %s23909_s19  ;;  %v25895_v19 = vpop.permute.xlu1 %9574 }
 0xcaa   :  { %9650 = vrot.lane.b32.xlu0 %v25620_v32, %s23909_s19 }
 0xcae   :  { %9802 = vrot.lane.b32.xlu0 %v25632_v58, %s23909_s19 }
 0xcc1   :  { %8757 = vmax.xlane.f32.xlu1 %v8756_v54 }
 0xcd2   :  { %9878 = vrot.lane.b32.xlu1 %v25628_v41, %s23909_s19 }
 0xd00   :  { %v8719_v54 = vpop.xlane.xlu1 %8718 }
 0xd01   :  { %v8763_v51 = vsub.f32 %v25796_v15, %v8719_v54  ;;  %v8716_v37 = vpop.xlane.xlu0 %8715 }
 0xd02   :  { %v8762_v10 = vsub.f32 %v25799_v45, %v8716_v37 }
 0xd03   :  { %v8780_v40 = vmul.f32 1.442695, %v8763_v51 }
 0xd04   :  { %v8778_v31 = vmul.f32 1.442695, %v8762_v10 }
 0xd05   :  { %23494 = vpow2.f32 %v8780_v40  ;;  %v8725_v47 = vpop.xlane.xlu0 %8724 }
 0xd06   :  { %23496 = vpow2.f32 %v8778_v31  ;;  %v8765_v27 = vsub.f32 %v25806_v36, %v8725_v47 }
 0xd08   :  { %v8784_v48 = vmul.f32 1.442695, %v8765_v27 }
 0xd09   :  { %v8722_v3 = vpop.xlane.xlu0 %8721  ;;  %v8728_v49 = vpop.xlane.xlu1 %8727 }
 0xd0a   :  { %23498 = vpow2.f32 %v8784_v48  ;;  %v8764_v14 = vsub.f32 %v25811_v35, %v8722_v3  ;;  %v8766_v33 = vsub.f32 %v25814_v21, %v8728_v49 }
 0xd0c   :  { %v8782_v39 = vmul.f32 1.442695, %v8764_v14  ;;  %v8786_v15 = vmul.f32 1.442695, %v8766_v33 }
 0xd0d   :  { %v8731_v54 = vpop.xlane.xlu0 %8730  ;;  %v8734_v26 = vpop.xlane.xlu1 %8733 }
 0xd0e   :  { %23500 = vpow2.f32 %v8782_v39  ;;  %v8767_v51 = vsub.f32 %v25817_v34, %v8731_v54  ;;  %v8768_v37 = vsub.f32 %v25824_v28, %v8734_v26 }
 0xd0f   :  { %v25906_v31 = vpop.eup %23494  ;;  %23502 = vpow2.f32 %v8786_v15 }
 0xd10   :  { %v25908_v45 = vpop.eup %23496  ;;  %v8788_v27 = vmul.f32 1.442695, %v8767_v51  ;;  %v8790_v48 = vmul.f32 1.442695, %v8768_v37  ;;  %v8813_v3 = vsel %vm373_vm0, %v25906_v31, 0.0 }
 0xd11   :  { %v8737_v21 = vpop.xlane.xlu0 %8736  ;;  %8814 = vadd.xlane.f32.xlu0 %v8813_v3  ;;  %v8740_v14 = vpop.xlane.xlu1 %8739  ;;  %v8810_v39 = vsel %vm373_vm0, %v25908_v45, 0.0 }
 0xd12   :  { %23504 = vpow2.f32 %v8788_v27  ;;  %v8769_v33 = vsub.f32 %v25827_v53, %v8737_v21  ;;  %v8770_v26 = vsub.f32 %v25834_v57, %v8740_v14  ;;  %8811 = vadd.xlane.f32.xlu1 %v8810_v39 }
 0xd13   :  { %23506 = vpow2.f32 %v8790_v48 }
 0xd14   :  { %v25916_v40 = vpop.eup %23498  ;;  %v8792_v49 = vmul.f32 1.442695, %v8769_v33  ;;  %v8794_v10 = vmul.f32 1.442695, %v8770_v26 }
 0xd15   :  { %v8743_v47 = vpop.xlane.xlu0 %8742  ;;  %v8746_v36 = vpop.xlane.xlu1 %8745  ;;  %v8819_v35 = vsel %vm373_vm0, %v25916_v40, 0.0 }
 0xd16   :  { %23508 = vpow2.f32 %v8792_v49  ;;  %v8771_v34 = vsub.f32 %v25837_v44, %v8743_v47  ;;  %v8772_v28 = vsub.f32 %v25844_v29, %v8746_v36  ;;  %8820 = vadd.xlane.f32.xlu0 %v8819_v35 }
 0xd17   :  { %23510 = vpow2.f32 %v8794_v10 }
 0xd18   :  { %v25922_v53 = vpop.eup %23500  ;;  %v8796_v57 = vmul.f32 1.442695, %v8771_v34  ;;  %v8798_v15 = vmul.f32 1.442695, %v8772_v28 }
 0xd19   :  { %v8749_v54 = vpop.xlane.xlu0 %8748  ;;  %v8752_v51 = vpop.xlane.xlu1 %8751  ;;  %v8816_v37 = vsel %vm373_vm0, %v25922_v53, 0.0 }
 0xd1a   :  { %v25926_v27 = vpop.eup %23502  ;;  %23512 = vpow2.f32 %v8796_v57  ;;  %v8773_v48 = vsub.f32 %v25847_v18, %v8749_v54  ;;  %v8774_v44 = vsub.f32 %v25854_v46, %v8752_v51  ;;  %8817 = vadd.xlane.f32.xlu1 %v8816_v37 }
 0xd1b   :  { %23514 = vpow2.f32 %v8798_v15  ;;  %v8822_v33 = vsel %vm373_vm0, %v25926_v27, 0.0 }
 0xd1c   :  { %v25930_v29 = vpop.eup %23504  ;;  %v8800_v3 = vmul.f32 1.442695, %v8773_v48  ;;  %v8802_v21 = vmul.f32 1.442695, %v8774_v44 }
 0xd1d   :  { %v8755_v14 = vpop.xlane.xlu0 %8754  ;;  %v8825_v39 = vsel %vm373_vm0, %v25930_v29, 0.0  ;;  %v25936_v26 = vpop.eup %23506 }
 0xd1e   :  { %23516 = vpow2.f32 %v8800_v3  ;;  %v8775_v18 = vsub.f32 %v25857_v1, %v8755_v14  ;;  %8826 = vadd.xlane.f32.xlu0 %v8825_v39  ;;  %8823 = vadd.xlane.f32.xlu1 %v8822_v33  ;;  %v8828_v36 = vsel %vm373_vm0, %v25936_v26, 0.0  ;;  %v25976_v33 = vpop.permute.xlu1 %9726 }
 0xd1f   :  { %23518 = vpow2.f32 %v8802_v21 }
 0xd20   :  { %v25939_v46 = vpop.eup %23508  ;;  %v8804_v49 = vmul.f32 1.442695, %v8775_v18 }
 0xd21   :  { %v8761_v10 = vpop.xlane.xlu0 %8760  ;;  %v8831_v47 = vsel %vm373_vm0, %v25939_v46, 0.0  ;;  %v25945_v35 = vpop.eup %23510 }
 0xd22   :  { %23520 = vpow2.f32 %v8804_v49  ;;  %v8777_v34 = vsub.f32 %v25864_v0, %v8761_v10  ;;  %8832 = vadd.xlane.f32.xlu0 %v8831_v47  ;;  %8829 = vadd.xlane.f32.xlu1 %v8828_v36  ;;  %v8834_v15 = vsel %vm373_vm0, %v25945_v35, 0.0 }
 0xd24   :  { %v25948_v1 = vpop.eup %23512  ;;  %v8808_v28 = vmul.f32 1.442695, %v8777_v34 }
 0xd25   :  { %v8837_v57 = vsel %vm373_vm0, %v25948_v1, 0.0  ;;  %v25954_v54 = vpop.eup %23514 }
 0xd26   :  { %23522 = vpow2.f32 %v8808_v28  ;;  %8838 = vadd.xlane.f32.xlu0 %v8837_v57  ;;  %8835 = vadd.xlane.f32.xlu1 %v8834_v15  ;;  %v8840_v37 = vsel %vm373_vm0, %v25954_v54, 0.0 }
 0xd28   :  { %v25956_v51 = vpop.eup %23516 }
 0xd29   :  { %v8843_v0 = vsel %vm373_vm0, %v25956_v51, 0.0  ;;  %v25962_v48 = vpop.eup %23518 }
 0xd2a   :  { %8844 = vadd.xlane.f32.xlu0 %v8843_v0  ;;  %8841 = vadd.xlane.f32.xlu1 %v8840_v37  ;;  %v8846_v21 = vsel %vm373_vm0, %v25962_v48, 0.0 }
 0xd2c   :  { %v25964_v44 = vpop.eup %23520 }
 0xd2d   :  { %v8849_v3 = vsel %vm373_vm0, %v25964_v44, 0.0 }
 0xd2e   :  { %8850 = vadd.xlane.f32.xlu0 %v8849_v3  ;;  %8847 = vadd.xlane.f32.xlu1 %v8846_v21 }
 0xd30   :  { %v25970_v14 = vpop.eup %23522 }
 0xd31   :  { %v8855_v39 = vsel %vm373_vm0, %v25970_v14, 0.0 }
 0xd32   :  { %8856 = vadd.xlane.f32.xlu0 %v8855_v39 }
 0xd48   :  { %9954 = vrot.lane.b32.xlu0 %v25644_v6, %s23909_s19 }
 0xd4c   :  { %10304 = vrot.lane.b32.xlu0 %v25572_v61, %s23911_s21 }
 0xd4e   :  { %v8758_v18 = vpop.xlane.xlu1 %8757 }
 0xd4f   :  { %v8776_v49 = vsub.f32 %v25877_v13, %v8758_v18  ;;  %v26035_v13 = vpop.permute.xlu0 %9650 }
 0xd50   :  { %10382 = vrot.lane.b32.xlu0 %v25570_v59, %s23911_s21 }
 0xd51   :  { %v8806_v10 = vmul.f32 1.442695, %v8776_v49 }
 0xd52   :  { %v26043_v28 = vpop.permute.xlu1 %9878 }
 0xd53   :  { %23524 = vpow2.f32 %v8806_v10  ;;  %v26041_v34 = vpop.permute.xlu0 %9802 }
 0xd54   :  { %10460 = vrot.lane.b32.xlu0 %v25584_v16, %s23911_s21 }
 0xd58   :  { %10538 = vrot.lane.b32.xlu0 %v25582_v30, %s23911_s21 }
 0xd5c   :  { %10616 = vrot.lane.b32.xlu0 %v25592_v63, %s23911_s21 }
 0xd5d   :  { %v25989_v47 = vpop.eup %23524 }
 0xd5e   :  { %v8852_v36 = vsel %vm373_vm0, %v25989_v47, 0.0 }
 0xd5f   :  { %8853 = vadd.xlane.f32.xlu1 %v8852_v36 }
 0xd60   :  { %10694 = vrot.lane.b32.xlu0 %v25590_v7, %s23911_s21 }
 0xd64   :  { %10772 = vrot.lane.b32.xlu0 %v25600_v50, %s23911_s21 }
 0xd68   :  { %10850 = vrot.lane.b32.xlu0 %v25598_v56, %s23911_s21 }
 0xd6c   :  { %10928 = vrot.lane.b32.xlu0 %v25608_v60, %s23911_s21 }
 0xd70   :  { %10926 = vrot.lane.b32.xlu0 %v25608_v60, %s23910_s20  ;;  %10030 = vrot.lane.b32.xlu1 %v25640_v23, %s23909_s19 }
 0xd74   :  { %11084 = vrot.lane.b32.xlu0 %v25620_v32, %s23911_s21  ;;  %10302 = vrot.lane.b32.xlu1 %v25572_v61, %s23910_s20 }
 0xd78   :  { %11082 = vrot.lane.b32.xlu0 %v25620_v32, %s23910_s20  ;;  %10380 = vrot.lane.b32.xlu1 %v25570_v59, %s23910_s20 }
 0xd7c   :  { %11240 = vrot.lane.b32.xlu0 %v25632_v58, %s23911_s21  ;;  %10458 = vrot.lane.b32.xlu1 %v25584_v16, %s23910_s20 }
 0xd80   :  { %11238 = vrot.lane.b32.xlu0 %v25632_v58, %s23910_s20  ;;  %10536 = vrot.lane.b32.xlu1 %v25582_v30, %s23910_s20 }
 0xd84   :  { %11396 = vrot.lane.b32.xlu0 %v25644_v6, %s23911_s21  ;;  %10614 = vrot.lane.b32.xlu1 %v25592_v63, %s23910_s20 }
 0xd88   :  { %11394 = vrot.lane.b32.xlu0 %v25644_v6, %s23910_s20  ;;  %10692 = vrot.lane.b32.xlu1 %v25590_v7, %s23910_s20 }
 0xd8c   :  { %11802 = vrot.lane.b32.xlu0 %v25570_v59, %s23912_s22  ;;  %10770 = vrot.lane.b32.xlu1 %v25600_v50, %s23910_s20 }
 0xd90   :  { %10848 = vrot.lane.b32.xlu1 %v25598_v56, %s23910_s20 }
 0xd94   :  { %11006 = vrot.lane.b32.xlu1 %v25606_v52, %s23911_s21 }
 0xd98   :  { %11004 = vrot.lane.b32.xlu1 %v25606_v52, %s23910_s20 }
 0xd9c   :  { %11162 = vrot.lane.b32.xlu1 %v25618_v38, %s23911_s21 }
 0xd9e   :  { %v8815_v59 = vpop.xlane.xlu0 %8814 }
 0xd9f   :  { %23526 = vrcp.f32 %v8815_v59  ;;  %v8812_v57 = vpop.xlane.xlu1 %8811 }
 0xda0   :  { %23528 = vrcp.f32 %v8812_v57  ;;  %11160 = vrot.lane.b32.xlu1 %v25618_v38, %s23910_s20 }
 0xda3   :  { %v8821_v15 = vpop.xlane.xlu0 %8820 }
 0xda4   :  { %23530 = vrcp.f32 %v8821_v15  ;;  %11318 = vrot.lane.b32.xlu1 %v25628_v41, %s23911_s21 }
 0xda7   :  { %v8818_v0 = vpop.xlane.xlu1 %8817 }
 0xda8   :  { %23532 = vrcp.f32 %v8818_v0  ;;  %11316 = vrot.lane.b32.xlu1 %v25628_v41, %s23910_s20 }
 0xda9   :  { %v23527_v37 = vpop.eup %23526 }
 0xdaa   :  { %v23529_v3 = vpop.eup %23528  ;;  %v8875_v21 = vmul.f32 %v23527_v37, %v25906_v31 }
 0xdab   :  { %v8827_v39 = vpop.xlane.xlu0 %8826  ;;  %v8824_v18 = vpop.xlane.xlu1 %8823  ;;  %v8874_v49 = vmul.f32 %v23529_v3, %v25908_v45 }
 0xdac   :  { %23534 = vrcp.f32 %v8827_v39  ;;  %22503 = vmatmul.mubr.msk.f32.vlgmr.msra.gmra.mrb[136].mxu1 %vm373_vm0, %v8875_v21  ;;  %11474 = vrot.lane.b32.xlu1 %v25640_v23, %s23911_s21 }
 0xdad   :  { %23536 = vrcp.f32 %v8824_v18  ;;  %22511 = vmatpush3.msra.mxu1 %v25889_v25  ;;  %22498 = vmatmul.mubr.msk.f32.vlgmr.msra.gmra.mrb[104].mxu0 %vm373_vm0, %v8874_v49 }
 0xdae   :  { %v23531_v10 = vpop.eup %23530  ;;  %22506 = vmatpush3.msra.mxu0 %v25883_v17  ;;  %22512 = vmatprep.mubr.msk.f32.mxu1 %vm23907_vm1, %v28909_v55 }
 0xdaf   :  { %v8833_v31 = vpop.xlane.xlu0 %8832  ;;  %v8830_v36 = vpop.xlane.xlu1 %8829  ;;  %22520 = vmatprep.subr.mxu1 %v28909_v55  ;;  %v8877_v45 = vmul.f32 %v23531_v10, %v25916_v40  ;;  %22507 = vmatprep.mubr.msk.f32.mxu0 %vm23907_vm1, %v28909_v55 }
 0xdb0   :  { %23538 = vrcp.f32 %v8833_v31  ;;  %11472 = vrot.lane.b32.xlu1 %v25640_v23, %s23910_s20  ;;  %22515 = vmatprep.subr.mxu0 %v28909_v55 }
 0xdb1   :  { %23540 = vrcp.f32 %v8830_v36  ;;  %22513 = vmatmul.mubr.msk.f32.vlgmr.msra.gmra.mrb[138].mxu1 %vm373_vm0, %v8877_v45 }
 0xdb2   :  { %v23533_v17 = vpop.eup %23532  ;;  %22521 = vmatpush3.msra.mxu1 %v25887_v11  ;;  %22522 = vmatprep.mubr.msk.f32.mxu1 %vm23907_vm1, %v28909_v55 }
 0xdb3   :  { %v8839_v25 = vpop.xlane.xlu0 %8838  ;;  %v8836_v40 = vpop.xlane.xlu1 %8835  ;;  %v8876_v59 = vmul.f32 %v23533_v17, %v25922_v53  ;;  %22530 = vmatprep.subr.mxu1 %v28909_v55 }
 0xdb4   :  { %23542 = vrcp.f32 %v8839_v25  ;;  %11726 = vrot.lane.b32.xlu1 %v25572_v61, %s23912_s22 }
 0xdb5   :  { %23544 = vrcp.f32 %v8836_v40  ;;  %22508 = vmatmul.mubr.msk.f32.vlgmr.msra.gmra.mrb[106].mxu0 %vm373_vm0, %v8876_v59 }
 0xdb6   :  { %v23535_v57 = vpop.eup %23534  ;;  %22516 = vmatpush3.msra.mxu0 %v25885_v22  ;;  %22517 = vmatprep.mubr.msk.f32.mxu0 %vm23907_vm1, %v28909_v55 }
 0xdb7   :  { %v23537_v11 = vpop.eup %23536  ;;  %v8845_v15 = vpop.xlane.xlu0 %8844  ;;  %22525 = vmatprep.subr.mxu0 %v28909_v55  ;;  %v8879_v53 = vmul.f32 %v23535_v57, %v25930_v29 }
 0xdb8   :  { %v8842_v0 = vpop.xlane.xlu1 %8841  ;;  %23546 = vrcp.f32 %v8845_v15  ;;  %v8878_v37 = vmul.f32 %v23537_v11, %v25926_v27 }
 0xdb9   :  { %23548 = vrcp.f32 %v8842_v0  ;;  %22523 = vmatmul.mubr.msk.f32.vlgmr.msra.gmra.mrb[140].mxu1 %vm373_vm0, %v8879_v53 }
 0xdba   :  { %v23539_v61 = vpop.eup %23538  ;;  %22518 = vmatmul.mubr.msk.f32.vlgmr.msra.gmra.mrb[108].mxu0 %vm373_vm0, %v8878_v37  ;;  %22531 = vmatpush3.msra.mxu1 %v25891_v20 }
 0xdbb   :  { %v23541_v22 = vpop.eup %23540  ;;  %22526 = vmatpush3.msra.mxu0 %v25893_v43  ;;  %v8851_v3 = vpop.xlane.xlu0 %8850  ;;  %22527 = vmatprep.mubr.msk.f32.mxu0 %vm23907_vm1, %v28909_v55  ;;  %v8881_v29 = vmul.f32 %v23539_v61, %v25939_v46 }
 0xdbc   :  { %v8848_v21 = vpop.xlane.xlu1 %8847  ;;  %23550 = vrcp.f32 %v8851_v3  ;;  %22532 = vmatprep.mubr.msk.f32.mxu1 %vm23907_vm1, %v28909_v55  ;;  %22535 = vmatprep.subr.mxu0 %v28909_v55  ;;  %v8880_v27 = vmul.f32 %v23541_v22, %v25936_v26 }
 0xdbd   :  { %23552 = vrcp.f32 %v8848_v21  ;;  %22540 = vmatprep.subr.mxu1 %v28909_v55  ;;  %22533 = vmatmul.mubr.msk.f32.vlgmr.msra.gmra.mrb[142].mxu1 %vm373_vm0, %v8881_v29 }
 0xdbe   :  { %v23543_v20 = vpop.eup %23542  ;;  %22528 = vmatmul.mubr.msk.f32.vlgmr.msra.gmra.mrb[110].mxu0 %vm373_vm0, %v8880_v27  ;;  %22541 = vmatpush3.msra.mxu1 %v25895_v19 }
 0xdbf   :  { %v23545_v43 = vpop.eup %23544  ;;  %22536 = vmatpush3.msra.mxu0 %v25897_v62  ;;  %22537 = vmatprep.mubr.msk.f32.mxu0 %vm23907_vm1, %v28909_v55  ;;  %v8883_v46 = vmul.f32 %v23543_v20, %v25948_v1  ;;  %v8857_v39 = vpop.xlane.xlu0 %8856 }
 0xdc0   :  { %22542 = vmatprep.mubr.msk.f32.mxu1 %vm23907_vm1, %v28909_v55  ;;  %22545 = vmatprep.subr.mxu0 %v28909_v55  ;;  %v8882_v26 = vmul.f32 %v23545_v43, %v25945_v35  ;;  %23554 = vrcp.f32 %v8857_v39 }
 0xdc1   :  { %22550 = vmatprep.subr.mxu1 %v28909_v55  ;;  %22543 = vmatmul.mubr.msk.f32.vlgmr.msra.gmra.mrb[144].mxu1 %vm373_vm0, %v8883_v46 }
 0xdc2   :  { %v23547_v19 = vpop.eup %23546  ;;  %22538 = vmatmul.mubr.msk.f32.vlgmr.msra.gmra.mrb[112].mxu0 %vm373_vm0, %v8882_v26  ;;  %22551 = vmatpush3.msra.mxu1 %v25976_v33 }
 0xdc3   :  { %v23549_v62 = vpop.eup %23548  ;;  %22546 = vmatpush3.msra.mxu0 %v26035_v13  ;;  %22547 = vmatprep.mubr.msk.f32.mxu0 %vm23907_vm1, %v28909_v55  ;;  %v8885_v1 = vmul.f32 %v23547_v19, %v25956_v51 }
 0xdc4   :  { %22552 = vmatprep.mubr.msk.f32.mxu1 %vm23907_vm1, %v28909_v55  ;;  %22555 = vmatprep.subr.mxu0 %v28909_v55  ;;  %v8884_v35 = vmul.f32 %v23549_v62, %v25954_v54 }
 0xdc5   :  { %22560 = vmatprep.subr.mxu1 %v28909_v55  ;;  %22553 = vmatmul.mubr.msk.f32.vlgmr.msra.gmra.mrb[146].mxu1 %vm373_vm0, %v8885_v1 }
 0xdc6   :  { %v23551_v33 = vpop.eup %23550  ;;  %22548 = vmatmul.mubr.msk.f32.vlgmr.msra.gmra.mrb[114].mxu0 %vm373_vm0, %v8884_v35  ;;  %22561 = vmatpush3.msra.mxu1 %v26043_v28  ;;  %v9955_v28 = vpop.permute.xlu0 %9954 }
 0xdc7   :  { %v23553_v13 = vpop.eup %23552  ;;  %22556 = vmatpush3.msra.mxu0 %v26041_v34  ;;  %22557 = vmatprep.mubr.msk.f32.mxu0 %vm23907_vm1, %v28909_v55  ;;  %v8887_v51 = vmul.f32 %v23551_v33, %v25964_v44  ;;  %v20971_v34 = vld [vmem:[%s28820_s4 + $0x8] sm:$0xff] }
 0xdc8   :  { %22562 = vmatprep.mubr.msk.f32.mxu1 %vm23907_vm1, %v28909_v55  ;;  %22565 = vmatprep.subr.mxu0 %v28909_v55  ;;  %v8886_v54 = vmul.f32 %v23553_v13, %v25962_v48 }
 0xdc9   :  { %22563 = vmatmul.mubr.msk.f32.vlgmr.msra.gmra.mrb[148].mxu1 %vm373_vm0, %v8887_v51  ;;  %22570 = vmatprep.subr.mxu1 %v28909_v55 }
 0xdca   :  { %22558 = vmatmul.mubr.msk.f32.vlgmr.msra.gmra.mrb[116].mxu0 %vm373_vm0, %v8886_v54  ;;  %22572 = vmatprep.mubr.msk.f32.mxu1 %vm23907_vm1, %v28909_v55  ;;  %v10305_v48 = vpop.permute.xlu0 %10304  ;;  %v23555_v36 = vpop.eup %23554 }
 0xdcb   :  { %22566 = vmatpush3.msra.mxu0 %v9955_v28  ;;  %22567 = vmatprep.mubr.msk.f32.mxu0 %vm23907_vm1, %v28909_v55  ;;  %v8889_v25 = vmul.f32 %v23555_v36, %v25970_v14 }
 0xdcc   :  { %22575 = vmatprep.subr.msk.mxu0 %vm3261_vm3, %v20971_v34 }
 0xdce   :  { %v10383_v44 = vpop.permute.xlu0 %10382 }
 0xdd2   :  { %v10461_v18 = vpop.permute.xlu0 %10460 }
 0xdd6   :  { %v10539_v49 = vpop.permute.xlu0 %10538 }
 0xdda   :  { %v10617_v10 = vpop.permute.xlu0 %10616 }
 0xdde   :  { %v10695_v45 = vpop.permute.xlu0 %10694 }
 0xde2   :  { %v10773_v59 = vpop.permute.xlu0 %10772 }
 0xde6   :  { %v10851_v14 = vpop.permute.xlu0 %10850 }
 0xdea   :  { %v26163_v53 = vpop.permute.xlu0 %10928 }
 0xdec   :  { %v8854_v31 = vpop.xlane.xlu1 %8853 }
 0xded   :  { %23556 = vrcp.f32 %v8854_v31 }
 0xdee   :  { %v26171_v61 = vpop.permute.xlu0 %10926 }
 0xdf0   :  { %v10031_v17 = vpop.permute.xlu1 %10030 }
 0xdf1   :  { %22571 = vmatpush3.msra.mxu1 %v10031_v17 }
 0xdf2   :  { %22573 = vmatmul.mubr.msk.f32.vlgmr.msra.gmra.mrb[150].mxu1 %vm373_vm0, %v8889_v25  ;;  %22601 = vmatprep.subr.mxu1 %v28909_v55  ;;  %v26182_v21 = vpop.permute.xlu0 %11084 }
 0xdf3   :  { %22603 = vmatprep.mubr.msk.f32.mxu1 %vm23907_vm1, %v28909_v55 }
 0xdf4   :  { %v10303_v40 = vpop.permute.xlu1 %10302 }
 0xdf6   :  { %v26190_v27 = vpop.permute.xlu0 %11082 }
 0xdf7   :  { %v23557_v57 = vpop.eup %23556 }
 0xdf8   :  { %22602 = vmatpush3.xpose.msk.msra.mxu1 %vm591_vm2, %v10305_v48  ;;  %v10381_v11 = vpop.permute.xlu1 %10380  ;;  %v8888_v15 = vmul.f32 %v23557_v57, %v25989_v47 }
 0xdf9   :  { %22606 = vmatprep.subr.mxu1 %v28909_v55 }
 0xdfa   :  { %22568 = vmatmul.mubr.msk.f32.vlgmr.msra.gmra.mrb[118].mxu0 %vm373_vm0, %v8888_v15  ;;  %v26201_v46 = vpop.permute.xlu0 %11240 }
 0xdfb   :  { %22604 = vmatmul.mubr.msk.f32.vlgmr.msra.gmra.mrb[152].mxu1 %vm591_vm2, %v10303_v40  ;;  %22576 = vmatpush3.msk.msra.mxu0 %vm3261_vm3, %v20971_v34 }
 0xdfc   :  { %22607 = vmatpush3.xpose.msk.msra.mxu1 %vm591_vm2, %v10383_v44  ;;  %v10459_v0 = vpop.permute.xlu1 %10458  ;;  %22608 = vmatprep.mubr.msk.f32.mxu1 %vm23907_vm1, %v28909_v55 }
 0xdfd   :  { %22611 = vmatprep.subr.mxu1 %v28909_v55  ;;  %22641 = vmatprep.subr.mxu0 %v28909_v55 }
 0xdfe   :  { %v26209_v19 = vpop.permute.xlu0 %11238 }
 0xdff   :  { %22609 = vmatmul.mubr.msk.f32.vlgmr.msra.gmra.mrb[154].mxu1 %vm591_vm2, %v10381_v11 }
 0xe00   :  { %22612 = vmatpush3.xpose.msk.msra.mxu1 %vm591_vm2, %v10461_v18  ;;  %v10537_v47 = vpop.permute.xlu1 %10536  ;;  %22613 = vmatprep.mubr.msk.f32.mxu1 %vm23907_vm1, %v28909_v55 }
 0xe01   :  { %22616 = vmatprep.subr.mxu1 %v28909_v55 }
 0xe02   :  { %v26214_v39 = vpop.permute.xlu0 %11396 }
 0xe03   :  { %22614 = vmatmul.mubr.msk.f32.vlgmr.msra.gmra.mrb[156].mxu1 %vm591_vm2, %v10459_v0 }
 0xe04   :  { %22617 = vmatpush3.xpose.msk.msra.mxu1 %vm591_vm2, %v10539_v49  ;;  %v10615_v37 = vpop.permute.xlu1 %10614  ;;  %22618 = vmatprep.mubr.msk.f32.mxu1 %vm23907_vm1, %v28909_v55 }
 0xe05   :  { %22621 = vmatprep.subr.mxu1 %v28909_v55 }
 0xe06   :  { %v26221_v33 = vpop.permute.xlu0 %11394 }
 0xe07   :  { %22619 = vmatmul.mubr.msk.f32.vlgmr.msra.gmra.mrb[158].mxu1 %vm591_vm2, %v10537_v47 }
 0xe08   :  { %22622 = vmatpush3.xpose.msk.msra.mxu1 %vm591_vm2, %v10617_v10  ;;  %v10693_v22 = vpop.permute.xlu1 %10692  ;;  %22623 = vmatprep.mubr.msk.f32.mxu1 %vm23907_vm1, %v28909_v55 }
 0xe09   :  { %22626 = vmatprep.subr.mxu1 %v28909_v55 }
 0xe0a   :  { %v11803_v54 = vpop.permute.xlu0 %11802 }
 0xe0b   :  { %22624 = vmatmul.mubr.msk.f32.vlgmr.msra.gmra.mrb[160].mxu1 %vm591_vm2, %v10615_v37 }
 0xe0c   :  { %22627 = vmatpush3.xpose.msk.msra.mxu1 %vm591_vm2, %v10695_v45  ;;  %v10771_v3 = vpop.permute.xlu1 %10770  ;;  %22628 = vmatprep.mubr.msk.f32.mxu1 %vm23907_vm1, %v28909_v55 }
 0xe0d   :  { %22631 = vmatprep.subr.mxu1 %v28909_v55 }
 0xe0f   :  { %22629 = vmatmul.mubr.msk.f32.vlgmr.msra.gmra.mrb[162].mxu1 %vm591_vm2, %v10693_v22 }
 0xe10   :  { %22632 = vmatpush3.xpose.msk.msra.mxu1 %vm591_vm2, %v10773_v59  ;;  %v10849_v29 = vpop.permute.xlu1 %10848  ;;  %22633 = vmatprep.mubr.msk.f32.mxu1 %vm23907_vm1, %v28909_v55 }
 0xe11   :  { %22636 = vmatprep.subr.mxu1 %v28909_v55 }
 0xe13   :  { %22634 = vmatmul.mubr.msk.f32.vlgmr.msra.gmra.mrb[164].mxu1 %vm591_vm2, %v10771_v3 }
 0xe14   :  { %22637 = vmatpush3.xpose.msk.msra.mxu1 %vm591_vm2, %v10851_v14  ;;  %v11007_v20 = vpop.permute.xlu1 %11006  ;;  %22638 = vmatprep.mubr.msk.f32.mxu1 %vm23907_vm1, %v28909_v55 }
 0xe15   :  { %22646 = vmatprep.subr.mxu1 %v28909_v55 }
 0xe17   :  { %22639 = vmatmul.mubr.msk.f32.vlgmr.msra.gmra.mrb[166].mxu1 %vm591_vm2, %v10849_v29 }
 0xe18   :  { %22647 = vmatpush3.xpose.msk.msra.mxu1 %vm591_vm2, %v11007_v20  ;;  %v11005_v43 = vpop.permute.xlu1 %11004  ;;  %22648 = vmatprep.mubr.msk.f32.mxu1 %vm23907_vm1, %v28909_v55 }
 0xe19   :  { %22656 = vmatprep.subr.mxu1 %v28909_v55 }
 0xe1b   :  { %22649 = vmatmul.mubr.msk.f32.vlgmr.msra.gmra.mrb[168].mxu1 %vm591_vm2, %v11005_v43 }
 0xe1c   :  { %v11163_v26 = vpop.permute.xlu1 %11162  ;;  %22658 = vmatprep.mubr.msk.f32.mxu1 %vm23907_vm1, %v28909_v55 }
 0xe1d   :  { %22657 = vmatpush3.xpose.msk.msra.mxu1 %vm591_vm2, %v11163_v26 }
 0xe1e   :  { %22666 = vmatprep.subr.mxu1 %v28909_v55 }
 0xe20   :  { %v11161_v62 = vpop.permute.xlu1 %11160 }
 0xe21   :  { %22659 = vmatmul.mubr.msk.f32.vlgmr.msra.gmra.mrb[170].mxu1 %vm591_vm2, %v11161_v62 }
 0xe22   :  { %22668 = vmatprep.mubr.msk.f32.mxu1 %vm23907_vm1, %v28909_v55 }
 0xe24   :  { %v11319_v1 = vpop.permute.xlu1 %11318 }
 0xe25   :  { %22667 = vmatpush3.xpose.msk.msra.mxu1 %vm591_vm2, %v11319_v1 }
 0xe26   :  { %22676 = vmatprep.subr.mxu1 %v28909_v55 }
 0xe28   :  { %v11317_v35 = vpop.permute.xlu1 %11316 }
 0xe29   :  { %22669 = vmatmul.mubr.msk.f32.vlgmr.msra.gmra.mrb[172].mxu1 %vm591_vm2, %v11317_v35 }
 0xe2a   :  { %22678 = vmatprep.mubr.msk.f32.mxu1 %vm23907_vm1, %v28909_v55 }
 0xe2c   :  { %v11475_v13 = vpop.permute.xlu1 %11474 }
 0xe2d   :  { %22677 = vmatpush3.xpose.msk.msra.mxu1 %vm591_vm2, %v11475_v13 }
 0xe2e   :  { %22686 = vmatprep.subr.mxu1 %v28909_v55 }
 0xe30   :  { %v11473_v51 = vpop.permute.xlu1 %11472 }
 0xe31   :  { %22679 = vmatmul.mubr.msk.f32.vlgmr.msra.gmra.mrb[174].mxu1 %vm591_vm2, %v11473_v51 }
 0xe32   :  { %22687 = vmatpush3.msra.mxu1 %v11803_v54  ;;  %22688 = vmatprep.mubr.msk.f32.mxu1 %vm23907_vm1, %v28909_v55 }
 0xe33   :  { %22696 = vmatprep.subr.mxu1 %v28909_v55 }
 0xe7f   :  { %v9038_v34 = vpop.f32.mrb[136].mxu1 }
 0xe80   :  { %v8962_v28 = vpop.f32.mrb[104].mxu0  ;;  %v22504_v48 = vpop.f32.mrb[137].mxu1 }
 0xe81   :  { %v22499_v44 = vpop.f32.mrb[105].mxu0  ;;  %22577 = vmatprep.mubr.msk.f32.mxu0 %vm591_vm2, %v8962_v28 }
 0xe82   :  { %22578 = vmatmul.mubr.msk.f32.vlgmr.msra.gmra.mrb[120].mxu0 %vm591_vm2, %v9038_v34 }
 0xe83   :  { %22642 = vmatpush3.xpose.msk.msra.mxu0 %vm591_vm2, %v26163_v53 }
 0xe84   :  { %v9190_v18 = vpop.f32.mrb[138].mxu1  ;;  %22651 = vmatprep.subr.mxu0 %v28909_v55 }
 0xe85   :  { %v22514_v49 = vpop.f32.mrb[139].mxu1 }
 0xe88   :  { %v9114_v10 = vpop.f32.mrb[106].mxu0 }
 0xe89   :  { %v22509_v31 = vpop.f32.mrb[107].mxu0  ;;  %22580 = vmatprep.mubr.msk.f32.mxu0 %vm591_vm2, %v9114_v10 }
 0xe8a   :  { %22581 = vmatmul.mubr.msk.f32.gmra.mrb[122].mxu0 %vm591_vm2, %v9190_v18 }
 0xe8c   :  { %v9342_v36 = vpop.f32.mrb[140].mxu1 }
 0xe8d   :  { %v9266_v45 = vpop.f32.mrb[108].mxu0  ;;  %v22524_v17 = vpop.f32.mrb[141].mxu1 }
 0xe8e   :  { %v22519_v25 = vpop.f32.mrb[109].mxu0  ;;  %22583 = vmatprep.mubr.msk.f32.mxu0 %vm591_vm2, %v9266_v45 }
 0xe8f   :  { %22584 = vmatmul.mubr.msk.f32.gmra.mrb[124].mxu0 %vm591_vm2, %v9342_v36  ;;  %v11727_v25 = vpop.permute.xlu1 %11726 }
 0xe90   :  { %v9494_v40 = vpop.f32.mrb[142].mxu1 }
 0xe91   :  { %v9418_v59 = vpop.f32.mrb[110].mxu0  ;;  %v22534_v57 = vpop.f32.mrb[143].mxu1 }
 0xe92   :  { %v22529_v11 = vpop.f32.mrb[111].mxu0  ;;  %22586 = vmatprep.mubr.msk.f32.mxu0 %vm591_vm2, %v9418_v59 }
 0xe93   :  { %22587 = vmatmul.mubr.msk.f32.gmra.mrb[126].mxu0 %vm591_vm2, %v9494_v40 }
 0xe94   :  { %v9646_v15 = vpop.f32.mrb[144].mxu1 }
 0xe95   :  { %v9570_v14 = vpop.f32.mrb[112].mxu0  ;;  %v22544_v0 = vpop.f32.mrb[145].mxu1 }
 0xe96   :  { %v22539_v47 = vpop.f32.mrb[113].mxu0  ;;  %22589 = vmatprep.mubr.msk.f32.mxu0 %vm591_vm2, %v9570_v14 }
 0xe97   :  { %22590 = vmatmul.mubr.msk.f32.gmra.mrb[128].mxu0 %vm591_vm2, %v9646_v15 }
 0xe98   :  { %v9798_v53 = vpop.f32.mrb[146].mxu1 }
 0xe99   :  { %v9722_v37 = vpop.f32.mrb[114].mxu0  ;;  %v22554_v22 = vpop.f32.mrb[147].mxu1 }
 0xe9a   :  { %v22549_v3 = vpop.f32.mrb[115].mxu0  ;;  %22592 = vmatprep.mubr.msk.f32.mxu0 %vm591_vm2, %v9722_v37 }
 0xe9b   :  { %22593 = vmatmul.mubr.msk.f32.gmra.mrb[130].mxu0 %vm591_vm2, %v9798_v53 }
 0xe9c   :  { %v9950_v29 = vpop.f32.mrb[148].mxu1 }
 0xe9d   :  { %v9874_v20 = vpop.f32.mrb[116].mxu0  ;;  %v22564_v43 = vpop.f32.mrb[149].mxu1 }
 0xe9e   :  { %v22559_v26 = vpop.f32.mrb[117].mxu0  ;;  %22595 = vmatprep.mubr.msk.f32.mxu0 %vm591_vm2, %v9874_v20 }
 0xe9f   :  { %22596 = vmatmul.mubr.msk.f32.gmra.mrb[132].mxu0 %vm591_vm2, %v9950_v29 }
 0xec5   :  { %v10102_v62 = vpop.f32.mrb[150].mxu1 }
 0xec6   :  { %v22574_v1 = vpop.f32.mrb[151].mxu1 }
 0xecd   :  { %v10026_v35 = vpop.f32.mrb[118].mxu0 }
 0xece   :  { %v22569_v13 = vpop.f32.mrb[119].mxu0  ;;  %22598 = vmatprep.mubr.msk.f32.mxu0 %vm591_vm2, %v10026_v35  ;;  %v10376_v51 = vpop.f32.mrb[152].mxu1 }
 0xecf   :  { %v26248_v54 = vadd.f32 %v10376_v51, %v25793_v4  ;;  %22599 = vmatmul.mubr.msk.f32.gmra.mrb[134].mxu0 %vm591_vm2, %v10102_v62  ;;  %v22605_v34 = vpop.f32.mrb[153].mxu1 }
 0xed0   :  { %22643 = vmatprep.mubr.msk.f32.mxu0 %vm23907_vm1, %v28909_v55 }
 0xed1   :  { %v11550_v28 = vsel %vm373_vm0, %v26248_v54, -inf }
 0xed2   :  { %11551 = vmax.xlane.f32.xlu0 %v11550_v28  ;;  %v10454_v48 = vpop.f32.mrb[154].mxu1 }
 0xed3   :  { %v26256_v44 = vadd.f32 %v10454_v48, %v25793_v4  ;;  %v22610_v18 = vpop.f32.mrb[155].mxu1  ;;  %22644 = vmatmul.mubr.msk.f32.vlgmr.msra.gmra.mrb[136].mxu0 %vm591_vm2, %v26171_v61 }
 0xed4   :  { %22652 = vmatpush3.xpose.msk.msra.mxu0 %vm591_vm2, %v26182_v21  ;;  %22653 = vmatprep.mubr.msk.f32.mxu0 %vm23907_vm1, %v28909_v55 }
 0xed5   :  { %22661 = vmatprep.subr.mxu0 %v28909_v55  ;;  %v11553_v49 = vsel %vm373_vm0, %v26256_v44, -inf }
 0xed6   :  { %11554 = vmax.xlane.f32.xlu1 %v11553_v49  ;;  %v10532_v10 = vpop.f32.mrb[156].mxu1 }
 0xed7   :  { %v26268_v31 = vadd.f32 %v10532_v10, %v25793_v4  ;;  %v22615_v36 = vpop.f32.mrb[157].mxu1  ;;  %22654 = vmatmul.mubr.msk.f32.vlgmr.msra.gmra.mrb[138].mxu0 %vm591_vm2, %v26190_v27 }
 0xed8   :  { %22662 = vmatpush3.xpose.msk.msra.mxu0 %vm591_vm2, %v26201_v46  ;;  %22663 = vmatprep.mubr.msk.f32.mxu0 %vm23907_vm1, %v28909_v55 }
 0xed9   :  { %22671 = vmatprep.subr.mxu0 %v28909_v55  ;;  %v11556_v61 = vsel %vm373_vm0, %v26268_v31, -inf }
 0xeda   :  { %11557 = vmax.xlane.f32.xlu0 %v11556_v61  ;;  %v10610_v21 = vpop.f32.mrb[158].mxu1 }
 0xedb   :  { %v26280_v45 = vadd.f32 %v10610_v21, %v25793_v4  ;;  %v22620_v17 = vpop.f32.mrb[159].mxu1  ;;  %22664 = vmatmul.mubr.msk.f32.vlgmr.msra.gmra.mrb[140].mxu0 %vm591_vm2, %v26209_v19 }
 0xedc   :  { %22672 = vmatpush3.xpose.msk.msra.mxu0 %vm591_vm2, %v26214_v39  ;;  %22673 = vmatprep.mubr.msk.f32.mxu0 %vm23907_vm1, %v28909_v55 }
 0xedd   :  { %22681 = vmatprep.subr.mxu0 %v28909_v55  ;;  %v11559_v27 = vsel %vm373_vm0, %v26280_v45, -inf }
 0xede   :  { %11560 = vmax.xlane.f32.xlu0 %v11559_v27  ;;  %v10688_v46 = vpop.f32.mrb[160].mxu1 }
 0xedf   :  { %v26292_v40 = vadd.f32 %v10688_v46, %v25793_v4  ;;  %v22625_v59 = vpop.f32.mrb[161].mxu1  ;;  %22674 = vmatmul.mubr.msk.f32.vlgmr.msra.gmra.mrb[142].mxu0 %vm591_vm2, %v26221_v33 }
 0xee0   :  { %22682 = vmatpush3.msra.mxu0 %v11727_v25  ;;  %22683 = vmatprep.mubr.msk.f32.mxu0 %vm23907_vm1, %v28909_v55 }
 0xee1   :  { %v11562_v19 = vsel %vm373_vm0, %v26292_v40, -inf  ;;  %22691 = vmatprep.subr.mxu0 %v28909_v55 }
 0xee2   :  { %11563 = vmax.xlane.f32.xlu1 %v11562_v19  ;;  %v10766_v39 = vpop.f32.mrb[162].mxu1 }
 0xee3   :  { %v26302_v57 = vadd.f32 %v10766_v39, %v25793_v4  ;;  %v22630_v11 = vpop.f32.mrb[163].mxu1 }
 0xee5   :  { %v11565_v15 = vsel %vm373_vm0, %v26302_v57, -inf }
 0xee6   :  { %11566 = vmax.xlane.f32.xlu0 %v11565_v15  ;;  %v10844_v33 = vpop.f32.mrb[164].mxu1 }
 0xee7   :  { %v26307_v14 = vadd.f32 %v10844_v33, %v25793_v4  ;;  %v22635_v0 = vpop.f32.mrb[165].mxu1 }
 0xee9   :  { %v11568_v47 = vsel %vm373_vm0, %v26307_v14, -inf }
 0xeea   :  { %11569 = vmax.xlane.f32.xlu1 %v11568_v47  ;;  %v10922_v53 = vpop.f32.mrb[166].mxu1 }
 0xeeb   :  { %v26312_v37 = vadd.f32 %v10922_v53, %v25793_v4  ;;  %v22640_v22 = vpop.f32.mrb[167].mxu1 }
 0xeed   :  { %v11571_v3 = vsel %vm373_vm0, %v26312_v37, -inf }
 0xeee   :  { %11572 = vmax.xlane.f32.xlu0 %v11571_v3  ;;  %v11078_v29 = vpop.f32.mrb[168].mxu1 }
 0xeef   :  { %v26317_v20 = vadd.f32 %v11078_v29, %v25793_v4  ;;  %v22650_v43 = vpop.f32.mrb[169].mxu1 }
 0xef1   :  { %v11577_v26 = vsel %vm373_vm0, %v26317_v20, -inf }
 0xef2   :  { %11578 = vmax.xlane.f32.xlu0 %v11577_v26 }
 0xef4   :  { %v11234_v62 = vpop.f32.mrb[170].mxu1 }
 0xef5   :  { %v26322_v1 = vadd.f32 %v11234_v62, %v25793_v4  ;;  %v22660_v35 = vpop.f32.mrb[171].mxu1 }
 0xef7   :  { %v11583_v13 = vsel %vm373_vm0, %v26322_v1, -inf }
 0xef8   :  { %11584 = vmax.xlane.f32.xlu0 %v11583_v13 }
 0xefc   :  { %v11390_v51 = vpop.f32.mrb[172].mxu1 }
 0xefd   :  { %v26327_v34 = vadd.f32 %v11390_v51, %v25793_v4  ;;  %v22670_v28 = vpop.f32.mrb[173].mxu1 }
 0xeff   :  { %v11589_v48 = vsel %vm373_vm0, %v26327_v34, -inf }
 0xf00   :  { %11590 = vmax.xlane.f32.xlu0 %v11589_v48 }
 0xf04   :  { %v11546_v18 = vpop.f32.mrb[174].mxu1 }
 0xf05   :  { %v26332_v49 = vadd.f32 %v11546_v18, %v25793_v4  ;;  %v22680_v10 = vpop.f32.mrb[175].mxu1 }
 0xf07   :  { %v11595_v36 = vsel %vm373_vm0, %v26332_v49, -inf }
 0xf08   :  { %11596 = vmax.xlane.f32.xlu0 %v11595_v36 }
 0xf5f   :  { %v11552_v61 = vpop.xlane.xlu0 %11551 }
 0xf60   :  { %v11598_v21 = vsub.f32 %v26248_v54, %v11552_v61 }
 0xf62   :  { %v11614_v17 = vmul.f32 1.442695, %v11598_v21 }
 0xf63   :  { %v11555_v27 = vpop.xlane.xlu1 %11554 }
 0xf64   :  { %23558 = vpow2.f32 %v11614_v17  ;;  %v11599_v46 = vsub.f32 %v26256_v44, %v11555_v27 }
 0xf66   :  { %v11616_v25 = vmul.f32 1.442695, %v11599_v46 }
 0xf67   :  { %v11558_v59 = vpop.xlane.xlu0 %11557 }
 0xf68   :  { %23560 = vpow2.f32 %v11616_v25  ;;  %v11600_v19 = vsub.f32 %v26268_v31, %v11558_v59 }
 0xf6a   :  { %v11618_v39 = vmul.f32 1.442695, %v11600_v19 }
 0xf6b   :  { %v11561_v11 = vpop.xlane.xlu0 %11560 }
 0xf6c   :  { %23562 = vpow2.f32 %v11618_v39  ;;  %v11601_v15 = vsub.f32 %v26280_v45, %v11561_v11 }
 0xf6e   :  { %v26340_v33 = vpop.eup %23558  ;;  %v11620_v0 = vmul.f32 1.442695, %v11601_v15 }
 0xf6f   :  { %v11564_v47 = vpop.xlane.xlu1 %11563  ;;  %v11646_v54 = vsel %vm373_vm0, %v26340_v33, 0.0 }
 0xf70   :  { %23564 = vpow2.f32 %v11620_v0  ;;  %v11602_v44 = vsub.f32 %v26292_v40, %v11564_v47  ;;  %11647 = vadd.xlane.f32.xlu1 %v11646_v54 }
 0xf72   :  { %v26345_v53 = vpop.eup %23560  ;;  %v11622_v22 = vmul.f32 1.442695, %v11602_v44 }
 0xf73   :  { %v11567_v31 = vpop.xlane.xlu0 %11566  ;;  %v11649_v3 = vsel %vm373_vm0, %v26345_v53, 0.0 }
 0xf74   :  { %23566 = vpow2.f32 %v11622_v22  ;;  %v11603_v45 = vsub.f32 %v26302_v57, %v11567_v31  ;;  %11650 = vadd.xlane.f32.xlu0 %v11649_v3 }
 0xf76   :  { %v26350_v29 = vpop.eup %23562  ;;  %v11624_v43 = vmul.f32 1.442695, %v11603_v45 }
 0xf77   :  { %v11570_v26 = vpop.xlane.xlu1 %11569  ;;  %v11652_v62 = vsel %vm373_vm0, %v26350_v29, 0.0 }
 0xf78   :  { %23568 = vpow2.f32 %v11624_v43  ;;  %v11604_v40 = vsub.f32 %v26307_v14, %v11570_v26  ;;  %11653 = vadd.xlane.f32.xlu1 %v11652_v62 }
 0xf7a   :  { %v26355_v35 = vpop.eup %23564  ;;  %v11626_v13 = vmul.f32 1.442695, %v11604_v40 }
 0xf7b   :  { %v11573_v51 = vpop.xlane.xlu0 %11572  ;;  %v11655_v28 = vsel %vm373_vm0, %v26355_v35, 0.0 }
 0xf7c   :  { %23570 = vpow2.f32 %v11626_v13  ;;  %v11605_v57 = vsub.f32 %v26312_v37, %v11573_v51  ;;  %11656 = vadd.xlane.f32.xlu0 %v11655_v28 }
 0xf7e   :  { %v26360_v48 = vpop.eup %23566  ;;  %v11628_v18 = vmul.f32 1.442695, %v11605_v57 }
 0xf7f   :  { %v11579_v10 = vpop.xlane.xlu0 %11578  ;;  %v11658_v36 = vsel %vm373_vm0, %v26360_v48, 0.0 }
 0xf80   :  { %23572 = vpow2.f32 %v11628_v18  ;;  %v11607_v14 = vsub.f32 %v26317_v20, %v11579_v10  ;;  %11659 = vadd.xlane.f32.xlu1 %v11658_v36 }
 0xf82   :  { %v26365_v61 = vpop.eup %23568  ;;  %v11632_v21 = vmul.f32 1.442695, %v11607_v14 }
 0xf83   :  { %v11661_v17 = vsel %vm373_vm0, %v26365_v61, 0.0 }
 0xf84   :  { %23574 = vpow2.f32 %v11632_v21  ;;  %11662 = vadd.xlane.f32.xlu0 %v11661_v17 }
 0xf86   :  { %v26369_v37 = vpop.eup %23570 }
 0xf87   :  { %v11664_v27 = vsel %vm373_vm0, %v26369_v37, 0.0 }
 0xf88   :  { %11665 = vadd.xlane.f32.xlu1 %v11664_v27 }
 0xf8a   :  { %v26373_v46 = vpop.eup %23572 }
 0xf8b   :  { %v11667_v20 = vsel %vm373_vm0, %v26373_v46, 0.0 }
 0xf8c   :  { %11668 = vadd.xlane.f32.xlu0 %v11667_v20 }
 0xf8e   :  { %v26377_v25 = vpop.eup %23574 }
 0xf8f   :  { %v11673_v59 = vsel %vm373_vm0, %v26377_v25, 0.0 }
 0xf90   :  { %11674 = vadd.xlane.f32.xlu0 %v11673_v59 }
 0xfa6   :  { %v11000_v19 = vpop.f32.mrb[136].mxu0  ;;  %11954 = vrot.lane.b32.xlu0 %v25582_v30, %s23912_s22 }
 0xfa7   :  { %v26384_v39 = vadd.f32 %v11000_v19, %v25793_v4  ;;  %v22645_v11 = vpop.f32.mrb[137].mxu0 }
 0xfa9   :  { %v11574_v15 = vsel %vm373_vm0, %v26384_v39, -inf }
 0xfaa   :  { %v11156_v0 = vpop.f32.mrb[138].mxu0  ;;  %12106 = vrot.lane.b32.xlu0 %v25590_v7, %s23912_s22  ;;  %11575 = vmax.xlane.f32.xlu1 %v11574_v15 }
 0xfab   :  { %v26391_v47 = vadd.f32 %v11156_v0, %v25793_v4  ;;  %v22655_v54 = vpop.f32.mrb[139].mxu0 }
 0xfad   :  { %v11580_v44 = vsel %vm373_vm0, %v26391_v47, -inf }
 0xfae   :  { %v11312_v30 = vpop.f32.mrb[140].mxu0  ;;  %12182 = vrot.lane.b32.xlu0 %v25600_v50, %s23912_s22  ;;  %11581 = vmax.xlane.f32.xlu1 %v11580_v44 }
 0xfaf   :  { %v26398_v22 = vadd.f32 %v11312_v30, %v25793_v4  ;;  %v22665_v31 = vpop.f32.mrb[141].mxu0 }
 0xfb1   :  { %v11586_v7 = vsel %vm373_vm0, %v26398_v22, -inf }
 0xfb2   :  { %v11468_v3 = vpop.f32.mrb[142].mxu0  ;;  %12258 = vrot.lane.b32.xlu0 %v25598_v56, %s23912_s22  ;;  %11587 = vmax.xlane.f32.xlu1 %v11586_v7 }
 0xfb3   :  { %v26405_v45 = vadd.f32 %v11468_v3, %v25793_v4  ;;  %v22675_v43 = vpop.f32.mrb[143].mxu0  ;;  %v11585_v4 = vpop.xlane.xlu0 %11584 }
 0xfb4   :  { %v11609_v56 = vsub.f32 %v26322_v1, %v11585_v4 }
 0xfb5   :  { %v11592_v50 = vsel %vm373_vm0, %v26405_v45, -inf }
 0xfb6   :  { %12334 = vrot.lane.b32.xlu0 %v25608_v60, %s23912_s22  ;;  %11593 = vmax.xlane.f32.xlu1 %v11592_v50 }
 0xfb7   :  { %v11591_v60 = vpop.xlane.xlu0 %11590 }
 0xfb8   :  { %v11611_v26 = vsub.f32 %v26327_v34, %v11591_v60 }
 0xfba   :  { %12410 = vrot.lane.b32.xlu0 %v25606_v52, %s23912_s22  ;;  %v11636_v52 = vmul.f32 1.442695, %v11609_v56 }
 0xfbc   :  { %23576 = vpow2.f32 %v11636_v52 }
 0xfbe   :  { %12486 = vrot.lane.b32.xlu0 %v25620_v32, %s23912_s22  ;;  %v11640_v32 = vmul.f32 1.442695, %v11611_v26 }
 0xfc0   :  { %23578 = vpow2.f32 %v11640_v32 }
 0xfc2   :  { %12562 = vrot.lane.b32.xlu0 %v25618_v38, %s23912_s22 }
 0xfc6   :  { %12638 = vrot.lane.b32.xlu0 %v25632_v58, %s23912_s22  ;;  %v26425_v38 = vpop.eup %23576 }
 0xfc7   :  { %11878 = vrot.lane.b32.xlu1 %v25584_v16, %s23912_s22  ;;  %v11679_v58 = vsel %vm373_vm0, %v26425_v38, 0.0 }
 0xfca   :  { %12790 = vrot.lane.b32.xlu0 %v25644_v6, %s23912_s22  ;;  %v26429_v62 = vpop.eup %23578  ;;  %v11597_v6 = vpop.xlane.xlu0 %11596 }
 0xfcb   :  { %v11685_v16 = vsel %vm373_vm0, %v26429_v62, 0.0  ;;  %v11613_v57 = vsub.f32 %v26332_v49, %v11597_v6 }
 0xfcd   :  { %v11644_v18 = vmul.f32 1.442695, %v11613_v57  ;;  %v26507_v57 = vld [vmem:[%s28823_s7 + $0x5] ss:$0 sm:$0xff] }
 0xfeb   :  { %11680 = vadd.xlane.f32.xlu1 %v11679_v58 }
 0xfef   :  { %11686 = vadd.xlane.f32.xlu1 %v11685_v16 }
 0xffd   :  { %v11648_v1 = vpop.xlane.xlu1 %11647 }
 0xffe   :  { %23580 = vrcp.f32 %v11648_v1 }
0x1000   :  { %12030 = vrot.lane.b32.xlu1 %v25592_v63, %s23912_s22 }
0x1001   :  { %v11651_v34 = vpop.xlane.xlu0 %11650 }
0x1002   :  { %23582 = vrcp.f32 %v11651_v34 }
0x1005   :  { %v11654_v11 = vpop.xlane.xlu1 %11653 }
0x1008   :  { %v23581_v40 = vpop.eup %23580 }
0x1009   :  { %v11710_v13 = vmul.f32 %v23581_v40, %v26340_v33  ;;  %v11657_v63 = vpop.xlane.xlu0 %11656 }
0x100a   :  { %23584 = vrcp.f32 %v11657_v63  ;;  %v6983_v63 = vadd.f32 %v25610_v2, %v26507_v57 }
0x100b   :  { %22684 = vmatmul.mubr.msk.f32.vlgmr.msra.gmra.mrb[144].mxu0 %vm373_vm0, %v11710_v13  ;;  %23586 = vpow2.f32 %v11644_v18 }
0x100c   :  { %v23583_v51 = vpop.eup %23582  ;;  %22693 = vmatprep.mubr.msk.f32.mxu0 %vm23907_vm1, %v28909_v55  ;;  %v26512_v18 = vadd.f32 %v6983_v63, %v25258_v24  ;;  %v6982_v24 = vadd.f32 %v26507_v57, %v25612_v42 }
0x100d   :  { %v11711_v28 = vmul.f32 %v23583_v51, %v26345_v53  ;;  %v11660_v54 = vpop.xlane.xlu1 %11659 }
0x100e   :  { %v7017_v2 = vsel %vm373_vm0, %v26512_v18, 0.0 }
0x100f   :  { %22689 = vmatmul.mubr.msk.f32.vlgmr.msra.gmra.mrb[176].mxu1 %vm373_vm0, %v11711_v28 }
0x1010   :  { %22698 = vmatprep.mubr.msk.f32.mxu1 %vm23907_vm1, %v28909_v55 }
0x1011   :  { %v11663_v10 = vpop.xlane.xlu0 %11662 }
0x1012   :  { %23588 = vrcp.f32 %v11663_v10  ;;  %v6985_v10 = vadd.f32 %v25624_v5, %v26507_v57 }
0x1014   :  { %v23585_v14 = vpop.eup %23584 }
0x1015   :  { %v26444_v21 = vpop.eup %23586  ;;  %v11713_v49 = vmul.f32 %v23585_v14, %v26355_v35  ;;  %v11666_v30 = vpop.xlane.xlu1 %11665 }
0x1016   :  { %v11691_v27 = vsel %vm373_vm0, %v26444_v21, 0.0 }
0x1019   :  { %v11669_v33 = vpop.xlane.xlu0 %11668 }
0x101a   :  { %23590 = vrcp.f32 %v11669_v33  ;;  %v26519_v33 = vadd.f32 %v6985_v10, %v25274_v8  ;;  %v28981_v10 = vld [vmem:[#allocation44_spill] sm:$0xff] }
0x101c   :  { %v23589_v17 = vpop.eup %23588  ;;  %v7023_v8 = vsel %vm373_vm0, %v26519_v33, 0.0 }
0x101d   :  { %v11675_v36 = vpop.xlane.xlu0 %11674  ;;  %v11715_v59 = vmul.f32 %v23589_v17, %v26365_v61 }
0x101e   :  { %23592 = vrcp.f32 %v11675_v36 }
0x101f   :  { %23594 = vrcp.f32 %v11654_v11 }
0x1021   :  { %v11955_v53 = vpop.permute.xlu0 %11954 }
0x1022   :  { %22697 = vmatpush3.msra.mxu1 %v11955_v53  ;;  %v28965_v53 = vld [vmem:[#allocation37_spill] sm:$0xff] }
0x1023   :  { %22699 = vmatmul.mubr.msk.f32.vlgmr.msra.gmra.mrb[178].mxu1 %vm373_vm0, %v11713_v49  ;;  %22706 = vmatprep.subr.mxu1 %v28909_v55  ;;  %v6989_v49 = vadd.f32 %v28965_v53, %v26507_v57  ;;  %v28983_v53 = vld [vmem:[#allocation43_spill] sm:$0xff] }
0x1024   :  { %11692 = vadd.xlane.f32.xlu1 %v11691_v27  ;;  %22708 = vmatprep.mubr.msk.f32.mxu1 %vm23907_vm1, %v28909_v55  ;;  %v23591_v19 = vpop.eup %23590 }
0x1025   :  { %v12107_v20 = vpop.permute.xlu0 %12106  ;;  %v11717_v0 = vmul.f32 %v23591_v19, %v26373_v46 }
0x1026   :  { %22707 = vmatpush3.msra.mxu1 %v12107_v20  ;;  %v28966_v20 = vld [vmem:[#allocation14_spill] sm:$0xff] }
0x1027   :  { %22709 = vmatmul.mubr.msk.f32.vlgmr.msra.gmra.mrb[180].mxu1 %vm373_vm0, %v11715_v59  ;;  %22716 = vmatprep.subr.mxu1 %v28909_v55  ;;  %v28967_v59 = vld [vmem:[#allocation35_spill] sm:$0xff] }
0x1028   :  { %22718 = vmatprep.mubr.msk.f32.mxu1 %vm23907_vm1, %v28909_v55  ;;  %v23593_v44 = vpop.eup %23592  ;;  %v6984_v19 = vadd.f32 %v26507_v57, %v28967_v59 }
0x1029   :  { %v26458_v35 = vpop.permute.xlu0 %12182  ;;  %v11719_v7 = vmul.f32 %v23593_v44, %v26377_v25  ;;  %v23595_v58 = vpop.eup %23594 }
0x102a   :  { %v11712_v40 = vmul.f32 %v23595_v58, %v26350_v29 }
0x102d   :  { %v12259_v15 = vpop.permute.xlu0 %12258 }
0x102e   :  { %22717 = vmatpush3.msra.mxu1 %v12259_v15 }
0x102f   :  { %22719 = vmatmul.mubr.msk.f32.vlgmr.msra.gmra.mrb[182].mxu1 %vm373_vm0, %v11717_v0  ;;  %22726 = vmatprep.subr.mxu1 %v28909_v55  ;;  %v28969_v0 = vld [vmem:[#allocation39_spill] sm:$0xff] }
0x1030   :  { %22728 = vmatprep.mubr.msk.f32.mxu1 %vm23907_vm1, %v28909_v55 }
0x1031   :  { %v26465_v61 = vpop.permute.xlu0 %12334 }
0x1035   :  { %v12411_v31 = vpop.permute.xlu0 %12410 }
0x1036   :  { %22727 = vmatpush3.msra.mxu1 %v12411_v31 }
0x1037   :  { %22729 = vmatmul.mubr.msk.f32.vlgmr.msra.gmra.mrb[184].mxu1 %vm373_vm0, %v11719_v7  ;;  %v11576_v46 = vpop.xlane.xlu1 %11575  ;;  %22736 = vmatprep.subr.mxu1 %v28909_v55 }
0x1038   :  { %v11606_v3 = vsub.f32 %v26384_v39, %v11576_v46  ;;  %22738 = vmatprep.mubr.msk.f32.mxu1 %vm23907_vm1, %v28909_v55  ;;  %v28971_v46 = vld [vmem:[#allocation16_spill] sm:$0xff] }
0x1039   :  { %v26473_v43 = vpop.permute.xlu0 %12486 }
0x103a   :  { %v11630_v50 = vmul.f32 1.442695, %v11606_v3 }
0x103b   :  { %v11582_v4 = vpop.xlane.xlu1 %11581 }
0x103c   :  { %23596 = vpow2.f32 %v11630_v50  ;;  %v11608_v56 = vsub.f32 %v26391_v47, %v11582_v4  ;;  %v28973_v50 = vld [vmem:[#allocation42_spill] sm:$0xff] }
0x103d   :  { %v12563_v25 = vpop.permute.xlu0 %12562  ;;  %v6992_v4 = vadd.f32 %v26507_v57, %v28973_v50 }
0x103e   :  { %v11634_v60 = vmul.f32 1.442695, %v11608_v56  ;;  %22737 = vmatpush3.msra.mxu1 %v12563_v25 }
0x103f   :  { %v11588_v52 = vpop.xlane.xlu1 %11587  ;;  %22746 = vmatprep.subr.mxu1 %v28909_v55 }
0x1040   :  { %23598 = vpow2.f32 %v11634_v60  ;;  %v11610_v39 = vsub.f32 %v26398_v22, %v11588_v52  ;;  %v28975_v60 = vld [vmem:[#allocation38_spill] sm:$0xff] }
0x1041   :  { %v6988_v52 = vadd.f32 %v26507_v57, %v28975_v60 }
0x1042   :  { %v11638_v26 = vmul.f32 1.442695, %v11610_v39  ;;  %v28976_v39 = vld [vmem:[#allocation41_spill] sm:$0xff] }
0x1043   :  { %v11594_v32 = vpop.xlane.xlu1 %11593 }
0x1044   :  { %23600 = vpow2.f32 %v11638_v26  ;;  %v11612_v16 = vsub.f32 %v26405_v45, %v11594_v32  ;;  %v6993_v26 = vadd.f32 %v28976_v39, %v26507_v57  ;;  %v28977_v32 = vld [vmem:[#allocation7_spill] sm:$0xff] }
0x1045   :  { %v26585_v58 = vadd.f32 %v6992_v4, %v28977_v32 }
0x1046   :  { %v26479_v6 = vpop.eup %23596  ;;  %v11642_v1 = vmul.f32 1.442695, %v11612_v16 }
0x1047   :  { %v11879_v34 = vpop.permute.xlu1 %11878  ;;  %v11670_v47 = vsel %vm373_vm0, %v26479_v6, 0.0 }
0x1048   :  { %23602 = vpow2.f32 %v11642_v1  ;;  %11671 = vadd.xlane.f32.xlu1 %v11670_v47  ;;  %22692 = vmatpush3.msra.mxu0 %v11879_v34  ;;  %v28978_v34 = vld [vmem:[#allocation6_spill] sm:$0xff] }
0x1049   :  { %22694 = vmatmul.mubr.msk.f32.vlgmr.msra.gmra.mrb[146].mxu0 %vm373_vm0, %v11712_v40  ;;  %22701 = vmatprep.subr.mxu0 %v28909_v55  ;;  %23604 = vrcp.f32 %v11660_v54  ;;  %v6991_v54 = vadd.f32 %v28969_v0, %v26507_v57  ;;  %v26592_v47 = vadd.f32 %v6988_v52, %v28978_v34 }
0x104a   :  { %v26486_v22 = vpop.eup %23598  ;;  %22703 = vmatprep.mubr.msk.f32.mxu0 %vm23907_vm1, %v28909_v55  ;;  %23606 = vrcp.f32 %v11666_v30 }
0x104b   :  { %v11676_v45 = vsel %vm373_vm0, %v26486_v22, 0.0 }
0x104c   :  { %11677 = vadd.xlane.f32.xlu0 %v11676_v45  ;;  %v28979_v45 = vld [vmem:[#allocation40_spill] sm:$0xff] }
0x104e   :  { %v26492_v13 = vpop.eup %23600 }
0x104f   :  { %v11682_v29 = vsel %vm373_vm0, %v26492_v13, 0.0 }
0x1050   :  { %11683 = vadd.xlane.f32.xlu0 %v11682_v29  ;;  %v6990_v29 = vadd.f32 %v26507_v57, %v28979_v45 }
0x1052   :  { %v26496_v51 = vpop.eup %23602 }
0x1053   :  { %v11688_v28 = vsel %vm373_vm0, %v26496_v51, 0.0  ;;  %v23605_v14 = vpop.eup %23604 }
0x1054   :  { %11689 = vadd.xlane.f32.xlu0 %v11688_v28  ;;  %v11714_v17 = vmul.f32 %v23605_v14, %v26360_v48  ;;  %v23607_v27 = vpop.eup %23606  ;;  %v28968_v48 = vld [vmem:[#allocation8_spill] sm:$0xff]  ;;  %v28980_v28 = vld [vmem:[#allocation9_spill] sm:$0xff]  ;;  %v28982_v14 = vld [vmem:[#allocation10_spill] sm:$0xff] }
0x1055   :  { %v26548_v15 = vadd.f32 %v6989_v49, %v28968_v48  ;;  %v11716_v44 = vmul.f32 %v23607_v27, %v26369_v37  ;;  %v26565_v37 = vadd.f32 %v6984_v19, %v28971_v46  ;;  %v26599_v63 = vadd.f32 %v6993_v26, %v28980_v28  ;;  %v28985_v27 = vld [vmem:[#allocation13_spill] sm:$0xff] }
0x1056   :  { %v6995_v49 = vadd.f32 %v28983_v53, %v26507_v57 }
0x1057   :  { %v7035_v56 = vsel %vm373_vm0, %v26548_v15, 0.0  ;;  %v7020_v1 = vsel %vm373_vm0, %v26565_v37, 0.0 }
0x1059   :  { %12714 = vrot.lane.b32.xlu1 %v25628_v41, %s23912_s22 }
0x106a   :  { %12866 = vrot.lane.b32.xlu0 %v25640_v23, %s23912_s22  ;;  %v6987_v23 = vadd.f32 %v25636_v12, %v26507_v57 }
0x106c   :  { %v26528_v5 = vadd.f32 %v6987_v23, %v25290_v9  ;;  %v26538_v9 = vadd.f32 %v6982_v24, %v28966_v20  ;;  %v7044_v23 = vsel %vm373_vm0, %v26585_v58, 0.0  ;;  %v26608_v24 = vadd.f32 %v6990_v29, %v28982_v14 }
0x106e   :  { %v7029_v11 = vsel %vm373_vm0, %v26528_v5, 0.0  ;;  %v7014_v7 = vsel %vm373_vm0, %v26538_v9, 0.0  ;;  %v7038_v59 = vsel %vm373_vm0, %v26608_v24, 0.0 }
0x1078   :  { %v11681_v41 = vpop.xlane.xlu1 %11680 }
0x1079   :  { %23608 = vrcp.f32 %v11681_v41  ;;  %v6994_v41 = vadd.f32 %v26507_v57, %v28981_v10 }
0x107c   :  { %v26521_v36 = vpop.xlane.xlu1 %11686 }
0x107d   :  { %7018 = vadd.xlane.f32.xlu1 %v7017_v2  ;;  %v7032_v2 = vsel %vm373_vm0, %v26592_v47, 0.0  ;;  %23610 = vrcp.f32 %v26521_v36 }
0x1080   :  { %v12031_v12 = vpop.permute.xlu1 %12030 }
0x1081   :  { %7024 = vadd.xlane.f32.xlu1 %v7023_v8  ;;  %22702 = vmatpush3.msra.mxu0 %v12031_v12  ;;  %v28984_v12 = vld [vmem:[#allocation11_spill] sm:$0xff] }
0x1082   :  { %22704 = vmatmul.mubr.msk.f32.vlgmr.msra.gmra.mrb[148].mxu0 %vm373_vm0, %v11714_v17  ;;  %22711 = vmatprep.subr.mxu0 %v28909_v55  ;;  %v26613_v8 = vadd.f32 %v6994_v41, %v28984_v12  ;;  %v7047_v17 = vsel %vm373_vm0, %v26599_v63, 0.0 }
0x1083   :  { %v23609_v42 = vpop.eup %23608  ;;  %22712 = vmatpush3.msra.mxu0 %v26458_v35  ;;  %22713 = vmatprep.mubr.msk.f32.mxu0 %vm23907_vm1, %v28909_v55  ;;  %v28970_v35 = vld [vmem:[#allocation36_spill] sm:$0xff] }
0x1084   :  { %22721 = vmatprep.subr.mxu0 %v28909_v55  ;;  %v11721_v30 = vmul.f32 %v23609_v42, %v26425_v38  ;;  %v6986_v31 = vadd.f32 %v26507_v57, %v28970_v35  ;;  %v28972_v38 = vld [vmem:[#allocation12_spill] sm:$0xff]  ;;  %v26618_v42 = vadd.f32 %v6995_v49, %v28985_v27  ;;  %v7050_v20 = vsel %vm373_vm0, %v26613_v8, 0.0 }
0x1085   :  { %7030 = vadd.xlane.f32.xlu1 %v7029_v11  ;;  %v26568_v3 = vadd.f32 %v6991_v54, %v28972_v38  ;;  %v12639_v11 = vpop.permute.xlu0 %12638 }
0x1086   :  { %22714 = vmatmul.mubr.msk.f32.vlgmr.msra.gmra.mrb[150].mxu0 %vm373_vm0, %v11716_v44  ;;  %22739 = vmatmul.mubr.msk.f32.vlgmr.msra.gmra.mrb[186].mxu1 %vm373_vm0, %v11721_v30  ;;  %v7053_v19 = vsel %vm373_vm0, %v26618_v42, 0.0 }
0x1087   :  { %22722 = vmatpush3.msra.mxu0 %v26465_v61  ;;  %22748 = vmatprep.mubr.msk.f32.mxu1 %vm23907_vm1, %v28909_v55  ;;  %v28974_v61 = vld [vmem:[#allocation15_spill] sm:$0xff]  ;;  %v7041_v16 = vsel %vm373_vm0, %v26568_v3, 0.0  ;;  %v23611_v44 = vpop.eup %23610 }
0x1088   :  { %22723 = vmatprep.mubr.msk.f32.mxu0 %vm23907_vm1, %v28909_v55  ;;  %22731 = vmatprep.subr.mxu0 %v28909_v55  ;;  %v26578_v25 = vadd.f32 %v6986_v31, %v28974_v61  ;;  %v11723_v31 = vmul.f32 %v23611_v44, %v26429_v62 }
0x1089   :  { %7036 = vadd.xlane.f32.xlu1 %v7035_v56  ;;  %7015 = vadd.xlane.f32.xlu0 %v7014_v7  ;;  %v12791_v0 = vpop.permute.xlu0 %12790 }
0x108a   :  { %v7026_v40 = vsel %vm373_vm0, %v26578_v25, 0.0 }
0x108d   :  { %7042 = vadd.xlane.f32.xlu1 %v7041_v16  ;;  %7021 = vadd.xlane.f32.xlu0 %v7020_v1 }
0x1091   :  { %7045 = vadd.xlane.f32.xlu1 %v7044_v23  ;;  %7027 = vadd.xlane.f32.xlu0 %v7026_v40 }
0x1095   :  { %7048 = vadd.xlane.f32.xlu1 %v7047_v17  ;;  %7033 = vadd.xlane.f32.xlu0 %v7032_v2 }
0x1099   :  { %7051 = vadd.xlane.f32.xlu1 %v7050_v20  ;;  %7039 = vadd.xlane.f32.xlu0 %v7038_v59 }
0x109d   :  { %7054 = vadd.xlane.f32.xlu1 %v7053_v19 }
0x10b1   :  { %v11693_v48 = vpop.xlane.xlu1 %11692 }
0x10d5   :  { %v11672_v54 = vpop.xlane.xlu1 %11671 }
0x10d6   :  { %23612 = vrcp.f32 %v11672_v54 }
0x10d7   :  { %23614 = vrcp.f32 %v11693_v48 }
0x10d9   :  { %v11678_v30 = vpop.xlane.xlu0 %11677  ;;  %v12715_v35 = vpop.permute.xlu1 %12714 }
0x10da   :  { %23616 = vrcp.f32 %v11678_v30  ;;  %22747 = vmatpush3.msra.mxu1 %v12715_v35 }
0x10db   :  { %22749 = vmatmul.mubr.msk.f32.vlgmr.msra.gmra.mrb[188].mxu1 %vm373_vm0, %v11723_v31  ;;  %22756 = vmatprep.subr.mxu1 %v28909_v55  ;;  %v26675_v31 = vld [vmem:[%s28823_s7 + $0xb] ss:$0 sm:$0xff] }
0x10dc   :  { %22758 = vmatprep.mubr.msk.f32.mxu1 %vm23907_vm1, %v28909_v55 }
0x10dd   :  { %v11684_v36 = vpop.xlane.xlu0 %11683 }
0x10de   :  { %23618 = vrcp.f32 %v11684_v36  ;;  %v11798_v7 = vpop.f32.mrb[144].mxu0 }
0x10df   :  { %v22685_v46 = vpop.f32.mrb[145].mxu0 }
0x10e0   :  { %v23613_v38 = vpop.eup %23612 }
0x10e1   :  { %v11690_v50 = vpop.xlane.xlu0 %11689  ;;  %v11718_v4 = vmul.f32 %v23613_v38, %v26479_v6  ;;  %v23615_v56 = vpop.eup %23614 }
0x10e2   :  { %23620 = vrcp.f32 %v11690_v50  ;;  %v11874_v62 = vpop.f32.mrb[176].mxu1  ;;  %v11725_v26 = vmul.f32 %v23615_v56, %v26444_v21  ;;  %v28986_v50 = vld [vmem:[#allocation20_spill] sm:$0xff]  ;;  %v28987_v56 = vld [vmem:[#allocation19_spill] sm:$0xff] }
0x10e3   :  { %v22690_v61 = vpop.f32.mrb[177].mxu1  ;;  %22724 = vmatmul.mubr.msk.f32.vlgmr.msra.gmra.mrb[152].mxu0 %vm373_vm0, %v11718_v4 }
0x10e4   :  { %v23617_v60 = vpop.eup %23616  ;;  %22732 = vmatpush3.msra.mxu0 %v26473_v43  ;;  %22733 = vmatprep.mubr.msk.f32.mxu0 %vm23907_vm1, %v28909_v55  ;;  %v23881_v43 = vld [vmem:[%s28820_s4 + $0x8] sm:$0xff] }
0x10e5   :  { %v12867_v52 = vpop.permute.xlu0 %12866  ;;  %22741 = vmatprep.subr.mxu0 %v28909_v55  ;;  %v11720_v39 = vmul.f32 %v23617_v60, %v26486_v22  ;;  %v12942_v32 = vrot.slane %v23881_v43, 4 }
0x10e6   :  { %22757 = vmatpush3.msra.mxu1 %v12867_v52 }
0x10e7   :  { %22734 = vmatmul.mubr.msk.f32.vlgmr.msra.gmra.mrb[154].mxu0 %vm373_vm0, %v11720_v39  ;;  %22759 = vmatmul.mubr.msk.f32.vlgmr.msra.gmra.mrb[190].mxu1 %vm373_vm0, %v11725_v26 }
0x10e8   :  { %v23619_v6 = vpop.eup %23618  ;;  %22742 = vmatpush3.msra.mxu0 %v12639_v11  ;;  %22743 = vmatprep.mubr.msk.f32.mxu0 %vm23907_vm1, %v28909_v55 }
0x10e9   :  { %22751 = vmatprep.subr.mxu0 %v28909_v55  ;;  %v11722_v22 = vmul.f32 %v23619_v6, %v26492_v13  ;;  %v28988_v6 = vld [vmem:[#allocation46_spill] sm:$0xff] }
0x10ea   :  { %v6996_v43 = vadd.f32 %v26507_v57, %v28988_v6 }
0x10eb   :  { %22744 = vmatmul.mubr.msk.f32.vlgmr.msra.gmra.mrb[156].mxu0 %vm373_vm0, %v11722_v22 }
0x10ec   :  { %v23621_v21 = vpop.eup %23620  ;;  %22752 = vmatpush3.msra.mxu0 %v12791_v0  ;;  %22753 = vmatprep.mubr.msk.f32.mxu0 %vm23907_vm1, %v28909_v55 }
0x10ed   :  { %v11724_v16 = vmul.f32 %v23621_v21, %v26496_v51  ;;  %22761 = vmatprep.subr.msk.mxu0 %vm3261_vm3, %v12942_v32 }
0x10ef   :  { %22754 = vmatmul.mubr.msk.f32.vlgmr.msra.gmra.mrb[158].mxu0 %vm373_vm0, %v11724_v16 }
0x10f0   :  { %22763 = vmatprep.mubr.msk.f32.mxu0 %vm591_vm2, %v11798_v7  ;;  %22762 = vmatpush3.msk.msra.mxu0 %vm3261_vm3, %v12942_v32 }
0x10f3   :  { %22764 = vmatmul.mubr.msk.f32.vlgmr.msra.gmra.mrb[120].mxu0 %vm591_vm2, %v11874_v62 }
0x10f6   :  { %v12026_v13 = vpop.f32.mrb[178].mxu1 }
0x10f7   :  { %v22700_v1 = vpop.f32.mrb[179].mxu1 }
0x10fa   :  { %v12178_v34 = vpop.f32.mrb[180].mxu1 }
0x10fb   :  { %v22710_v40 = vpop.f32.mrb[181].mxu1 }
0x1102   :  { %v12330_v45 = vpop.f32.mrb[182].mxu1 }
0x1103   :  { %v22720_v29 = vpop.f32.mrb[183].mxu1 }
0x110a   :  { %v12482_v28 = vpop.f32.mrb[184].mxu1 }
0x110b   :  { %v22730_v10 = vpop.f32.mrb[185].mxu1 }
0x1116   :  { %v7016_v52 = vpop.xlane.xlu0 %7015 }
0x1117   :  { %v7062_v39 = vmul.f32 0.125, %v7016_v52 }
0x1119   :  { %v26690_v21 = vsub.f32 %v26538_v9, %v7062_v39 }
0x111b   :  { %v7094_v9 = vmul.f32 %v26690_v21, %v26690_v21 }
0x111c   :  { %v11950_v41 = vpop.f32.mrb[146].mxu0 }
0x111d   :  { %v22695_v51 = vpop.f32.mrb[147].mxu0  ;;  %22766 = vmatprep.mubr.msk.f32.mxu0 %vm591_vm2, %v11950_v41 }
0x111e   :  { %22767 = vmatmul.mubr.msk.f32.gmra.mrb[122].mxu0 %vm591_vm2, %v12026_v13  ;;  %v28989_v13 = vld [vmem:[#allocation22_spill] sm:$0xff]  ;;  %v7110_v51 = vsel %vm373_vm0, %v7094_v9, 0.0 }
0x1155   :  { %v12102_v23 = vpop.f32.mrb[148].mxu0 }
0x1156   :  { %v22705_v2 = vpop.f32.mrb[149].mxu0  ;;  %22769 = vmatprep.mubr.msk.f32.mxu0 %vm591_vm2, %v12102_v23 }
0x1157   :  { %22770 = vmatmul.mubr.msk.f32.gmra.mrb[124].mxu0 %vm591_vm2, %v12178_v34  ;;  %v28990_v34 = vld [vmem:[#allocation21_spill] sm:$0xff] }
0x1158   :  { %v28992_v2 = vld [vmem:[#allocation45_spill] sm:$0xff] }
0x1159   :  { %v12254_v14 = vpop.f32.mrb[150].mxu0  ;;  %v12634_v53 = vpop.f32.mrb[186].mxu1 }
0x115a   :  { %v22715_v49 = vpop.f32.mrb[151].mxu0  ;;  %v22740_v12 = vpop.f32.mrb[187].mxu1  ;;  %22772 = vmatprep.mubr.msk.f32.mxu0 %vm591_vm2, %v12254_v14  ;;  %v6997_v14 = vadd.f32 %v28992_v2, %v26507_v57 }
0x115b   :  { %22773 = vmatmul.mubr.msk.f32.gmra.mrb[126].mxu0 %vm591_vm2, %v12330_v45  ;;  %v28991_v45 = vld [vmem:[#allocation17_spill] sm:$0xff]  ;;  %v7019_v12 = vpop.xlane.xlu1 %7018 }
0x115c   :  { %v26700_v29 = vadd.f32 %v6996_v43, %v28991_v45 }
0x115e   :  { %v7056_v41 = vsel %vm373_vm0, %v26700_v29, 0.0 }
0x11ae   :  { %v12786_v17 = vpop.f32.mrb[188].mxu1 }
0x11af   :  { %v22750_v27 = vpop.f32.mrb[189].mxu1 }
0x11b0   :  { %v28993_v27 = vld [vmem:[#allocation24_spill] sm:$0xff] }
0x11b6   :  { %v12406_v20 = vpop.f32.mrb[152].mxu0 }
0x11b7   :  { %v22725_v59 = vpop.f32.mrb[153].mxu0  ;;  %22775 = vmatprep.mubr.msk.f32.mxu0 %vm591_vm2, %v12406_v20 }
0x11b8   :  { %22776 = vmatmul.mubr.msk.f32.gmra.mrb[128].mxu0 %vm591_vm2, %v12482_v28  ;;  %v28994_v59 = vld [vmem:[#allocation23_spill] sm:$0xff] }
0x11ba   :  { %v12558_v19 = vpop.f32.mrb[154].mxu0  ;;  %v12938_v11 = vpop.f32.mrb[190].mxu1 }
0x11bb   :  { %v22735_v48 = vpop.f32.mrb[155].mxu0  ;;  %v22760_v0 = vpop.f32.mrb[191].mxu1  ;;  %22778 = vmatprep.mubr.msk.f32.mxu0 %vm591_vm2, %v12558_v19 }
0x11bc   :  { %22779 = vmatmul.mubr.msk.f32.gmra.mrb[130].mxu0 %vm591_vm2, %v12634_v53  ;;  %v28995_v48 = vld [vmem:[#allocation18_spill] sm:$0xff] }
0x11bd   :  { %v26722_v0 = vadd.f32 %v6997_v14, %v28995_v48 }
0x11be   :  { %v12710_v54 = vpop.f32.mrb[156].mxu0 }
0x11bf   :  { %v22745_v44 = vpop.f32.mrb[157].mxu0  ;;  %22781 = vmatprep.mubr.msk.f32.mxu0 %vm591_vm2, %v12710_v54  ;;  %v7063_v54 = vmul.f32 0.125, %v7019_v12 }
0x11c0   :  { %22782 = vmatmul.mubr.msk.f32.gmra.mrb[132].mxu0 %vm591_vm2, %v12786_v17 }
0x11c2   :  { %v12862_v30 = vpop.f32.mrb[158].mxu0 }
0x11c3   :  { %v22755_v35 = vpop.f32.mrb[159].mxu0  ;;  %22784 = vmatprep.mubr.msk.f32.mxu0 %vm591_vm2, %v12862_v30 }
0x11c4   :  { %22785 = vmatmul.mubr.msk.f32.gmra.mrb[134].mxu0 %vm591_vm2, %v12938_v11 }
0x11c6   :  { %v22765_v36 = vpop.f32.mrb[120].mxu0 }
0x11c7   :  { %v13160_v7 = vadd.f32 %v22765_v36, %v26675_v31  ;;  %v13059_v46 = vpop.f32.mrb[121].mxu0 }
0x11c8   :  { %v13159_v38 = vadd.f32 %v26675_v31, %v13059_v46 }
0x11c9   :  { %v13176_v4 = vadd.f32 %v13160_v7, %v28986_v50  ;;  %v28996_v7 = vld [vmem:[#allocation25_spill] sm:$0xff]  ;;  %v28997_v50 = vld [vmem:[#allocation26_spill] sm:$0xff] }
0x11ca   :  { %v26681_v62 = vadd.f32 %v13159_v38, %v28987_v56  ;;  %v26734_v38 = vsub.f32 %v26512_v18, %v7063_v54 }
0x11cb   :  { %v13194_v61 = vsel %vm373_vm0, %v13176_v4, 0.0 }
0x11cc   :  { %13195 = vadd.xlane.f32.xlu0 %v13194_v61  ;;  %v13191_v60 = vsel %vm373_vm0, %v26681_v62, 0.0  ;;  %v7059_v61 = vsel %vm373_vm0, %v26722_v0, 0.0  ;;  %v7095_v39 = vmul.f32 %v26734_v38, %v26734_v38 }
0x11ce   :  { %v7113_v18 = vsel %vm373_vm0, %v7095_v39, 0.0 }
0x11d0   :  { %13192 = vadd.xlane.f32.xlu0 %v13191_v60 }
0x11f1   :  { %v22768_v26 = vpop.f32.mrb[122].mxu0 }
0x11f2   :  { %v13162_v32 = vadd.f32 %v22768_v26, %v26675_v31  ;;  %v13069_v22 = vpop.f32.mrb[123].mxu0  ;;  %v26748_v26 = vpop.xlane.xlu0 %7021 }
0x11f3   :  { %v13161_v16 = vadd.f32 %v26675_v31, %v13069_v22 }
0x11f4   :  { %v26694_v1 = vadd.f32 %v13162_v32, %v28989_v13 }
0x11f5   :  { %v26697_v40 = vadd.f32 %v13161_v16, %v28990_v34 }
0x11f6   :  { %v13200_v28 = vsel %vm373_vm0, %v26694_v1, 0.0  ;;  %v26750_v6 = vpop.xlane.xlu0 %7027 }
0x11f7   :  { %13201 = vadd.xlane.f32.xlu1 %v13200_v28  ;;  %v13197_v10 = vsel %vm373_vm0, %v26697_v40, 0.0 }
0x11f8   :  { %13198 = vadd.xlane.f32.xlu0 %v13197_v10 }
0x11fa   :  { %v26752_v43 = vpop.xlane.xlu0 %7033 }
0x11fb   :  { %7057 = vadd.xlane.f32.xlu1 %v7056_v41 }
0x11fc   :  { %7111 = vadd.xlane.f32.xlu0 %v7110_v51  ;;  %v26769_v51 = vld [vmem:[%s28819_s3 + $0x10] sm:$0xff] }
0x11fd   :  { %22787 = vmatprep.subr.mxu1 %v26769_v51 }
0x11fe   :  { %v26754_v32 = vpop.xlane.xlu0 %7039  ;;  %22788 = vmatpush3.msra.mxu1 %v26769_v51 }
0x11ff   :  { %22839 = vmatprep.subr.mxu1 %v28909_v55 }
0x122a   :  { %v22771_v23 = vpop.f32.mrb[124].mxu0 }
0x122b   :  { %v13164_v53 = vadd.f32 %v22771_v23, %v26675_v31  ;;  %v13079_v49 = vpop.f32.mrb[125].mxu0 }
0x122c   :  { %v13163_v17 = vadd.f32 %v26675_v31, %v13079_v49 }
0x122d   :  { %v26716_v20 = vadd.f32 %v13164_v53, %v28993_v27 }
0x122e   :  { %v26719_v19 = vadd.f32 %v13163_v17, %v28994_v59  ;;  %v22774_v11 = vpop.f32.mrb[126].mxu0 }
0x122f   :  { %v13166_v44 = vadd.f32 %v22774_v11, %v26675_v31  ;;  %v13089_v57 = vpop.f32.mrb[127].mxu0  ;;  %v13206_v30 = vsel %vm373_vm0, %v26716_v20, 0.0 }
0x1230   :  { %v13165_v35 = vadd.f32 %v26675_v31, %v13089_v57  ;;  %13207 = vadd.xlane.f32.xlu1 %v13206_v30  ;;  %v13203_v36 = vsel %vm373_vm0, %v26719_v19, 0.0  ;;  %v28998_v30 = vld [vmem:[#allocation28_spill] sm:$0xff] }
0x1231   :  { %13204 = vadd.xlane.f32.xlu0 %v13203_v36  ;;  %v26737_v56 = vadd.f32 %v13166_v44, %v28997_v50  ;;  %v28999_v50 = vld [vmem:[#allocation27_spill] sm:$0xff] }
0x1232   :  { %v26731_v46 = vadd.f32 %v13165_v35, %v28996_v7 }
0x1233   :  { %v13212_v52 = vsel %vm373_vm0, %v26737_v56, 0.0 }
0x1234   :  { %7060 = vadd.xlane.f32.xlu1 %v7059_v61  ;;  %v13209_v60 = vsel %vm373_vm0, %v26731_v46, 0.0 }
0x1235   :  { %13210 = vadd.xlane.f32.xlu0 %v13209_v60 }
0x1238   :  { %13213 = vadd.xlane.f32.xlu1 %v13212_v52 }
0x123c   :  { %7114 = vadd.xlane.f32.xlu1 %v7113_v18 }
0x1259   :  { %v13196_v22 = vpop.xlane.xlu0 %13195 }
0x125a   :  { %v13240_v16 = vmul.f32 0.125, %v13196_v22 }
0x125c   :  { %v26756_v13 = vsub.f32 %v13176_v4, %v13240_v16 }
0x125d   :  { %v13193_v34 = vpop.xlane.xlu0 %13192 }
0x125e   :  { %v13239_v45 = vmul.f32 0.125, %v13193_v34  ;;  %v13272_v28 = vmul.f32 %v26756_v13, %v26756_v13  ;;  %v29000_v34 = vld [vmem:[#allocation30_spill] sm:$0xff] }
0x1260   :  { %v26761_v10 = vsub.f32 %v26681_v62, %v13239_v45  ;;  %v13290_v9 = vsel %vm373_vm0, %v13272_v28, 0.0  ;;  %v7025_v62 = vpop.xlane.xlu1 %7024 }
0x1261   :  { %13291 = vadd.xlane.f32.xlu1 %v13290_v9  ;;  %v7065_v18 = vmul.f32 0.125, %v7025_v62 }
0x1262   :  { %v13271_v41 = vmul.f32 %v26761_v10, %v26761_v10 }
0x1264   :  { %v13287_v4 = vsel %vm373_vm0, %v13271_v41, 0.0  ;;  %v7031_v23 = vpop.xlane.xlu1 %7030 }
0x1265   :  { %13288 = vadd.xlane.f32.xlu0 %v13287_v4  ;;  %v26807_v4 = vsub.f32 %v26519_v33, %v7065_v18 }
0x1268   :  { %v26775_v2 = vpop.xlane.xlu1 %7036 }
0x126c   :  { %v26777_v14 = vpop.xlane.xlu1 %7042 }
0x1270   :  { %v26779_v53 = vpop.xlane.xlu1 %7045 }
0x1274   :  { %v26781_v49 = vpop.xlane.xlu1 %7048 }
0x1278   :  { %v26785_v27 = vpop.xlane.xlu1 %7051 }
0x127c   :  { %v26792_v7 = vpop.xlane.xlu1 %7054 }
0x1284   :  { %v13202_v16 = vpop.xlane.xlu1 %13201 }
0x1285   :  { %v26783_v12 = vpop.xlane.xlu0 %13198 }
0x1289   :  { %v7112_v17 = vpop.xlane.xlu0 %7111 }
0x128a   :  { %v7158_v59 = vmul.f32 0.125, %v7112_v17  ;;  %v13242_v17 = vmul.f32 0.125, %v13202_v16  ;;  %v7097_v16 = vmul.f32 %v26807_v4, %v26807_v4 }
0x128b   :  { %v22777_v11 = vpop.f32.mrb[128].mxu0 }
0x128c   :  { %v7174_v48 = vadd.f32 1e-05, %v7158_v59  ;;  %v13168_v54 = vadd.f32 %v22777_v11, %v26675_v31  ;;  %v13099_v44 = vpop.f32.mrb[129].mxu0  ;;  %v26831_v18 = vsub.f32 %v26694_v1, %v13242_v17  ;;  %v7064_v17 = vmul.f32 0.125, %v26748_v26 }
0x128d   :  { %v13167_v57 = vadd.f32 %v26675_v31, %v13099_v44 }
0x128e   :  { %23622 = vrsqrt.f32 %v7174_v48  ;;  %v26790_v35 = vadd.f32 %v13168_v54, %v28998_v30  ;;  %v29001_v48 = vld [vmem:[#allocation29_spill] sm:$0xff] }
0x128f   :  { %v22780_v36 = vpop.f32.mrb[130].mxu0  ;;  %v26795_v61 = vadd.f32 %v13167_v57, %v28999_v50  ;;  %v29002_v50 = vld [vmem:[#allocation34_spill] sm:$0xff] }
0x1290   :  { %v13170_v60 = vadd.f32 %v22780_v36, %v26675_v31  ;;  %v13109_v52 = vpop.f32.mrb[131].mxu0  ;;  %v13218_v39 = vsel %vm373_vm0, %v26790_v35, 0.0  ;;  %v26819_v36 = vld [vmem:[%s28823_s7 + $0x8] ss:$0 sm:$0xff] }
0x1291   :  { %13219 = vadd.xlane.f32.xlu0 %v13218_v39  ;;  %v13169_v28 = vadd.f32 %v26675_v31, %v13109_v52  ;;  %v13215_v41 = vsel %vm373_vm0, %v26795_v61, 0.0  ;;  %v26828_v52 = vld [vmem:[%s28823_s7 + $0x9] ss:$0 sm:$0xff]  ;;  %v7067_v39 = vmul.f32 0.125, %v7031_v23 }
0x1292   :  { %v26801_v45 = vadd.f32 %v13170_v60, %v29000_v34  ;;  %v29003_v34 = vld [vmem:[#allocation32_spill] sm:$0xff] }
0x1293   :  { %v22783_v22 = vpop.f32.mrb[132].mxu0  ;;  %v26810_v62 = vadd.f32 %v13169_v28, %v29001_v48  ;;  %v26846_v23 = vsub.f32 %v26528_v5, %v7067_v39  ;;  %v26860_v5 = vsub.f32 %v26565_v37, %v7064_v17  ;;  %v7066_v37 = vmul.f32 0.125, %v26750_v6  ;;  %v7058_v17 = vpop.xlane.xlu1 %7057 }
0x1294   :  { %v13119_v9 = vpop.f32.mrb[133].mxu0  ;;  %v13172_v54 = vadd.f32 %v22783_v22, %v26675_v31  ;;  %v13224_v30 = vsel %vm373_vm0, %v26801_v45, 0.0 }
0x1295   :  { %13216 = vadd.xlane.f32.xlu0 %v13215_v41  ;;  %v13221_v41 = vsel %vm373_vm0, %v26810_v62, 0.0  ;;  %v7099_v26 = vmul.f32 %v26846_v23, %v26846_v23 }
0x1296   :  { %v26837_v28 = vadd.f32 %v13172_v54, %v29003_v34  ;;  %v7096_v34 = vmul.f32 %v26860_v5, %v26860_v5 }
0x1297   :  { %v22786_v59 = vpop.f32.mrb[134].mxu0 }
0x1298   :  { %v23623_v11 = vpop.eup %23622  ;;  %v13174_v44 = vadd.f32 %v22786_v59, %v26675_v31  ;;  %v13129_v57 = vpop.f32.mrb[135].mxu0 }
0x1299   :  { %13225 = vadd.xlane.f32.xlu0 %v13224_v30  ;;  %v7206_v33 = vmul.f32 %v23623_v11, %v26690_v21  ;;  %v13171_v21 = vadd.f32 %v26675_v31, %v13119_v9  ;;  %v7119_v11 = vsel %vm373_vm0, %v7097_v16, 0.0  ;;  %v29004_v9 = vld [vmem:[#allocation31_spill] sm:$0xff]  ;;  %v13173_v54 = vadd.f32 %v26675_v31, %v13129_v57 }
0x129a   :  { %v26823_v60 = vadd.f32 %v13174_v44, %v29002_v50  ;;  %v13230_v44 = vsel %vm373_vm0, %v26837_v28, 0.0  ;;  %v13274_v30 = vmul.f32 %v26831_v18, %v26831_v18  ;;  %v29005_v50 = vld [vmem:[#allocation33_spill] sm:$0xff] }
0x129b   :  { %v7227_v22 = vmul.f32 %v26819_v36, %v7206_v33  ;;  %v26852_v48 = vadd.f32 %v13171_v21, %v29004_v9  ;;  %v13241_v33 = vmul.f32 0.125, %v26783_v12  ;;  %v26866_v39 = vadd.f32 %v13173_v54, %v29005_v50 }
0x129c   :  { %v13236_v59 = vsel %vm373_vm0, %v26823_v60, 0.0  ;;  %v13296_v57 = vsel %vm373_vm0, %v13274_v30, 0.0  ;;  %v26881_v21 = vsub.f32 %v26578_v25, %v7066_v37  ;;  %v7068_v25 = vmul.f32 0.125, %v26752_v43 }
0x129d   :  { %13222 = vadd.xlane.f32.xlu0 %v13221_v41  ;;  %13237 = vadd.xlane.f32.xlu1 %v13236_v59  ;;  %v7248_v1 = vadd.f32 %v26828_v52, %v7227_v22  ;;  %v13227_v31 = vsel %vm373_vm0, %v26852_v48, 0.0  ;;  %v7125_v22 = vsel %vm373_vm0, %v7099_v26, 0.0  ;;  %v26874_v16 = vsub.f32 %v26697_v40, %v13241_v33 }
0x129e   :  { %v13233_v12 = vsel %vm373_vm0, %v26866_v39, 0.0  ;;  %v7116_v41 = vsel %vm373_vm0, %v7096_v34, 0.0  ;;  %v7098_v6 = vmul.f32 %v26881_v21, %v26881_v21  ;;  %v26899_v50 = vsub.f32 %v26592_v47, %v7068_v25 }
0x129f   :  { %22815 = vmatprep.mubr.msk.f32.mxu0 %vm373_vm0, %v7248_v1  ;;  %v13273_v59 = vmul.f32 %v26874_v16, %v26874_v16 }
0x12a0   :  { %v7122_v1 = vsel %vm373_vm0, %v7098_v6, 0.0 }
0x12a1   :  { %13231 = vadd.xlane.f32.xlu0 %v13230_v44  ;;  %7120 = vadd.xlane.f32.xlu1 %v7119_v11  ;;  %v13293_v40 = vsel %vm373_vm0, %v13273_v59, 0.0  ;;  %v7069_v11 = vmul.f32 0.125, %v26775_v2  ;;  %v7100_v59 = vmul.f32 %v26899_v50, %v26899_v50 }
0x12a3   :  { %v26893_v26 = vsub.f32 %v26548_v15, %v7069_v11  ;;  %v7071_v15 = vmul.f32 0.125, %v26777_v14  ;;  %v7128_v11 = vsel %vm373_vm0, %v7100_v59, 0.0 }
0x12a5   :  { %13228 = vadd.xlane.f32.xlu0 %v13227_v31  ;;  %13297 = vadd.xlane.f32.xlu1 %v13296_v57  ;;  %v7101_v47 = vmul.f32 %v26893_v26, %v26893_v26  ;;  %v26920_v14 = vsub.f32 %v26568_v3, %v7071_v15 }
0x12a9   :  { %13234 = vadd.xlane.f32.xlu0 %v13233_v12  ;;  %7126 = vadd.xlane.f32.xlu1 %v7125_v22  ;;  %v7070_v12 = vmul.f32 0.125, %v26754_v32  ;;  %v7131_v32 = vsel %vm373_vm0, %v7101_v47, 0.0 }
0x12ad   :  { %7117 = vadd.xlane.f32.xlu0 %v7116_v41 }
0x12b1   :  { %13294 = vadd.xlane.f32.xlu0 %v13293_v40 }
0x12b5   :  { %7123 = vadd.xlane.f32.xlu0 %v7122_v1  ;;  %v26928_v1 = vsub.f32 %v26608_v24, %v7070_v12  ;;  %v7073_v24 = vmul.f32 0.125, %v26781_v49 }
0x12bd   :  { %v13208_v9 = vpop.xlane.xlu1 %13207 }
0x12be   :  { %v13244_v54 = vmul.f32 0.125, %v13208_v9  ;;  %v13205_v44 = vpop.xlane.xlu0 %13204  ;;  %v7103_v9 = vmul.f32 %v26920_v14, %v26920_v14 }
0x12bf   :  { %v13243_v30 = vmul.f32 0.125, %v13205_v44  ;;  %v7102_v44 = vmul.f32 %v26928_v1, %v26928_v1 }
0x12c0   :  { %v26896_v33 = vsub.f32 %v26716_v20, %v13244_v54 }
0x12c1   :  { %v26902_v31 = vsub.f32 %v26719_v19, %v13243_v30  ;;  %v7061_v57 = vpop.xlane.xlu1 %7060  ;;  %v7137_v30 = vsel %vm373_vm0, %v7103_v9, 0.0 }
0x12c2   :  { %v13211_v2 = vpop.xlane.xlu0 %13210  ;;  %v13276_v43 = vmul.f32 %v26896_v33, %v26896_v33 }
0x12c3   :  { %v13245_v22 = vmul.f32 0.125, %v13211_v2  ;;  %v13275_v37 = vmul.f32 %v26902_v31, %v26902_v31  ;;  %v26947_v2 = vsub.f32 %v26599_v63, %v7073_v24  ;;  %v26987_v24 = vld [vmem:[%s28823_s7 + $0x10] ss:$0 sm:$0xff] }
0x12c4   :  { %v13302_v20 = vsel %vm373_vm0, %v13276_v43, 0.0  ;;  %v7075_v43 = vmul.f32 0.125, %v26792_v7  ;;  %v7077_v7 = vmul.f32 0.125, %v7061_v57 }
0x12c5   :  { %v26914_v19 = vsub.f32 %v26731_v46, %v13245_v22  ;;  %13303 = vadd.xlane.f32.xlu1 %v13302_v20  ;;  %v13214_v34 = vpop.xlane.xlu1 %13213  ;;  %v13299_v41 = vsel %vm373_vm0, %v13275_v37, 0.0  ;;  %v7072_v46 = vmul.f32 0.125, %v26779_v53  ;;  %v7076_v37 = vmul.f32 0.125, %v7058_v17 }
0x12c6   :  { %v13246_v40 = vmul.f32 0.125, %v13214_v34  ;;  %13300 = vadd.xlane.f32.xlu0 %v13299_v41  ;;  %v26954_v22 = vsub.f32 %v26618_v42, %v7075_v43  ;;  %v7105_v20 = vmul.f32 %v26947_v2, %v26947_v2  ;;  %v26966_v42 = vsub.f32 %v26722_v0, %v7077_v7 }
0x12c7   :  { %v13277_v25 = vmul.f32 %v26914_v19, %v26914_v19  ;;  %v26939_v53 = vsub.f32 %v26585_v58, %v7072_v46  ;;  %v7134_v58 = vsel %vm373_vm0, %v7102_v44, 0.0  ;;  %v26960_v63 = vsub.f32 %v26700_v29, %v7076_v37 }
0x12c8   :  { %v26923_v6 = vsub.f32 %v26737_v56, %v13246_v40  ;;  %v7143_v47 = vsel %vm373_vm0, %v7105_v20, 0.0  ;;  %v7107_v12 = vmul.f32 %v26954_v22, %v26954_v22  ;;  %v7109_v29 = vmul.f32 %v26966_v42, %v26966_v42 }
0x12c9   :  { %7132 = vadd.xlane.f32.xlu1 %v7131_v32  ;;  %v13305_v54 = vsel %vm373_vm0, %v13277_v25, 0.0  ;;  %v7104_v49 = vmul.f32 %v26939_v53, %v26939_v53  ;;  %v7108_v34 = vmul.f32 %v26960_v63, %v26960_v63  ;;  %v26977_v0 = vpop.xlane.xlu1 %7114 }
0x12ca   :  { %7129 = vadd.xlane.f32.xlu0 %v7128_v11  ;;  %v13278_v3 = vmul.f32 %v26923_v6, %v26923_v6  ;;  %v7149_v17 = vsel %vm373_vm0, %v7107_v12, 0.0  ;;  %v7155_v57 = vsel %vm373_vm0, %v7109_v29, 0.0 }
0x12cb   :  { %v7140_v15 = vsel %vm373_vm0, %v7104_v49, 0.0  ;;  %v7152_v41 = vsel %vm373_vm0, %v7108_v34, 0.0 }
0x12cc   :  { %v13308_v56 = vsel %vm373_vm0, %v13278_v3, 0.0  ;;  %v7074_v3 = vmul.f32 0.125, %v26785_v27 }
0x12cd   :  { %13309 = vadd.xlane.f32.xlu1 %v13308_v56 }
0x12ce   :  { %13306 = vadd.xlane.f32.xlu0 %v13305_v54  ;;  %v26981_v9 = vsub.f32 %v26613_v8, %v7074_v3  ;;  %v26997_v8 = vld [vmem:[%s28823_s7 + $0x11] ss:$0 sm:$0xff] }
0x12d0   :  { %v7106_v44 = vmul.f32 %v26981_v9, %v26981_v9 }
0x12d1   :  { %7138 = vadd.xlane.f32.xlu1 %v7137_v30 }
0x12d2   :  { %7135 = vadd.xlane.f32.xlu0 %v7134_v58 }
0x12d6   :  { %7141 = vadd.xlane.f32.xlu0 %v7140_v15 }
0x12da   :  { %7144 = vadd.xlane.f32.xlu0 %v7143_v47 }
0x12de   :  { %7150 = vadd.xlane.f32.xlu0 %v7149_v17 }
0x12e2   :  { %7153 = vadd.xlane.f32.xlu0 %v7152_v41  ;;  %13658 = vrot.lane.b32.xlu1 %v26769_v51, %s23908_s18 }
0x12e6   :  { %7156 = vadd.xlane.f32.xlu0 %v7155_v57 }
0x12ee   :  { %v13292_v59 = vpop.xlane.xlu1 %13291 }
0x12ef   :  { %v13336_v40 = vmul.f32 0.125, %v13292_v59 }
0x12f1   :  { %v13352_v32 = vadd.f32 1e-05, %v13336_v40 }
0x12f2   :  { %v13289_v46 = vpop.xlane.xlu0 %13288 }
0x12f3   :  { %23624 = vrsqrt.f32 %v13352_v32  ;;  %v13335_v11 = vmul.f32 0.125, %v13289_v46 }
0x12f5   :  { %v13351_v25 = vadd.f32 1e-05, %v13335_v11 }
0x12f7   :  { %23626 = vrsqrt.f32 %v13351_v25 }
0x12fd   :  { %v23625_v56 = vpop.eup %23624 }
0x12fe   :  { %v13384_v51 = vmul.f32 %v23625_v56, %v26756_v13  ;;  %v7146_v13 = vsel %vm373_vm0, %v7106_v44, 0.0 }
0x1300   :  { %v13405_v43 = vmul.f32 %v26987_v24, %v13384_v51 }
0x1301   :  { %v23627_v54 = vpop.eup %23626 }
0x1302   :  { %v13383_v30 = vmul.f32 %v23627_v54, %v26761_v10  ;;  %v27004_v49 = vadd.f32 %v26997_v8, %v13405_v43 }
0x1304   :  { %v13404_v27 = vmul.f32 %v26987_v24, %v13383_v30  ;;  %29007 = vst [vmem:[#allocation14_spill] sm:$0xff] %v27004_v49 }
0x1306   :  { %7147 = vadd.xlane.f32.xlu1 %v7146_v13  ;;  %v27001_v58 = vadd.f32 %v26997_v8, %v13404_v27 }
0x1308   :  { %29006 = vst [vmem:[#allocation37_spill] sm:$0xff] %v27001_v58  ;;  %22789 = vmatprep.mubr.msk.f32.mxu1 %vm373_vm0, %v27001_v58 }
0x1309   :  { %22790 = vmatmul.mubr.msk.f32.vlgmr.msra.gmra.mrb[192].mxu1 %vm373_vm0, %v27004_v49 }
0x131e   :  { %v13220_v10 = vpop.xlane.xlu0 %13219 }
0x131f   :  { %v13248_v37 = vmul.f32 0.125, %v13220_v10 }
0x1321   :  { %v27011_v15 = vsub.f32 %v26790_v35, %v13248_v37 }
0x1322   :  { %v13217_v20 = vpop.xlane.xlu0 %13216 }
0x1323   :  { %v13247_v7 = vmul.f32 0.125, %v13217_v20  ;;  %v13280_v47 = vmul.f32 %v27011_v15, %v27011_v15 }
0x1325   :  { %v27016_v12 = vsub.f32 %v26795_v61, %v13247_v7  ;;  %v13314_v17 = vsel %vm373_vm0, %v13280_v47, 0.0 }
0x1326   :  { %v13226_v34 = vpop.xlane.xlu0 %13225  ;;  %13315 = vadd.xlane.f32.xlu0 %v13314_v17 }
0x1327   :  { %v13250_v41 = vmul.f32 0.125, %v13226_v34  ;;  %v13279_v29 = vmul.f32 %v27016_v12, %v27016_v12 }
0x1329   :  { %v27022_v57 = vsub.f32 %v26801_v45, %v13250_v41  ;;  %v13311_v35 = vsel %vm373_vm0, %v13279_v29, 0.0 }
0x132a   :  { %v13223_v59 = vpop.xlane.xlu0 %13222  ;;  %13312 = vadd.xlane.f32.xlu0 %v13311_v35  ;;  %v13238_v40 = vpop.xlane.xlu1 %13237 }
0x132b   :  { %v13249_v32 = vmul.f32 0.125, %v13223_v59  ;;  %v13282_v61 = vmul.f32 %v27022_v57, %v27022_v57  ;;  %v13254_v27 = vmul.f32 0.125, %v13238_v40 }
0x132d   :  { %v27028_v46 = vsub.f32 %v26810_v62, %v13249_v32  ;;  %v13320_v11 = vsel %vm373_vm0, %v13282_v61, 0.0  ;;  %v27046_v47 = vsub.f32 %v26823_v60, %v13254_v27  ;;  %v7159_v61 = vmul.f32 0.125, %v26977_v0 }
0x132e   :  { %v13232_v25 = vpop.xlane.xlu0 %13231  ;;  %13321 = vadd.xlane.f32.xlu0 %v13320_v11  ;;  %v7121_v3 = vpop.xlane.xlu1 %7120 }
0x132f   :  { %v13252_v56 = vmul.f32 0.125, %v13232_v25  ;;  %v13281_v45 = vmul.f32 %v27028_v46, %v27028_v46  ;;  %v13286_v59 = vmul.f32 %v27046_v47, %v27046_v47 }
0x1331   :  { %v27034_v51 = vsub.f32 %v26837_v28, %v13252_v56  ;;  %v13317_v54 = vsel %vm373_vm0, %v13281_v45, 0.0  ;;  %v7175_v45 = vadd.f32 1e-05, %v7159_v61 }
0x1332   :  { %v13229_v44 = vpop.xlane.xlu0 %13228  ;;  %13318 = vadd.xlane.f32.xlu0 %v13317_v54  ;;  %v13298_v43 = vpop.xlane.xlu1 %13297  ;;  %v7161_v54 = vmul.f32 0.125, %v7121_v3 }
0x1333   :  { %v13251_v30 = vmul.f32 0.125, %v13229_v44  ;;  %v13284_v62 = vmul.f32 %v27034_v51, %v27034_v51  ;;  %v13338_v37 = vmul.f32 0.125, %v13298_v43 }
0x1335   :  { %v27040_v13 = vsub.f32 %v26852_v48, %v13251_v30  ;;  %v13326_v10 = vsel %vm373_vm0, %v13284_v62, 0.0  ;;  %v13354_v41 = vadd.f32 1e-05, %v13338_v37 }
0x1336   :  { %v13235_v20 = vpop.xlane.xlu0 %13234  ;;  %13327 = vadd.xlane.f32.xlu0 %v13326_v10  ;;  %v7127_v30 = vpop.xlane.xlu1 %7126  ;;  %v7177_v10 = vadd.f32 1e-05, %v7161_v54 }
0x1337   :  { %v13253_v28 = vmul.f32 0.125, %v13235_v20  ;;  %v13283_v7 = vmul.f32 %v27040_v13, %v27040_v13  ;;  %23628 = vrsqrt.f32 %v13354_v41  ;;  %v7163_v37 = vmul.f32 0.125, %v7127_v30 }
0x1339   :  { %v27049_v17 = vsub.f32 %v26866_v39, %v13253_v28  ;;  %v13323_v34 = vsel %vm373_vm0, %v13283_v7, 0.0  ;;  %v13332_v39 = vsel %vm373_vm0, %v13286_v59, 0.0  ;;  %v27076_v59 = vld [vmem:[%s28823_s7 + $0xc] ss:$0 sm:$0xff] }
0x133a   :  { %v7118_v48 = vpop.xlane.xlu0 %7117  ;;  %13324 = vadd.xlane.f32.xlu0 %v13323_v34  ;;  %v7179_v34 = vadd.f32 1e-05, %v7163_v37 }
0x133b   :  { %v13285_v29 = vmul.f32 %v27049_v17, %v27049_v17  ;;  %v7160_v11 = vmul.f32 0.125, %v7118_v48 }
0x133d   :  { %v13329_v35 = vsel %vm373_vm0, %v13285_v29, 0.0  ;;  %v7176_v44 = vadd.f32 1e-05, %v7160_v11 }
0x133e   :  { %v13295_v40 = vpop.xlane.xlu0 %13294  ;;  %13330 = vadd.xlane.f32.xlu0 %v13329_v35 }
0x133f   :  { %v13337_v60 = vmul.f32 0.125, %v13295_v40 }
0x1341   :  { %v13353_v32 = vadd.f32 1e-05, %v13337_v60  ;;  %v23629_v25 = vpop.eup %23628 }
0x1342   :  { %13333 = vadd.xlane.f32.xlu0 %v13332_v39  ;;  %v7124_v56 = vpop.xlane.xlu0 %7123  ;;  %v13386_v62 = vmul.f32 %v23629_v25, %v26831_v18 }
0x1343   :  { %23630 = vrsqrt.f32 %v13353_v32  ;;  %v7162_v43 = vmul.f32 0.125, %v7124_v56 }
0x1344   :  { %23632 = vrsqrt.f32 %v7175_v45  ;;  %v13407_v0 = vmul.f32 %v26987_v24, %v13386_v62 }
0x1345   :  { %23634 = vrsqrt.f32 %v7176_v44  ;;  %v7178_v28 = vadd.f32 1e-05, %v7162_v43 }
0x1346   :  { %23636 = vrsqrt.f32 %v7177_v10  ;;  %v27067_v29 = vadd.f32 %v26997_v8, %v13407_v0 }
0x1347   :  { %23638 = vrsqrt.f32 %v7178_v28 }
0x1348   :  { %29009 = vst [vmem:[#allocation8_spill] sm:$0xff] %v27067_v29  ;;  %23640 = vrsqrt.f32 %v7179_v34 }
0x134d   :  { %v23631_v27 = vpop.eup %23630 }
0x134e   :  { %v13385_v20 = vmul.f32 %v23631_v27, %v26874_v16  ;;  %v23633_v32 = vpop.eup %23632 }
0x134f   :  { %v23635_v11 = vpop.eup %23634  ;;  %v7207_v45 = vmul.f32 %v23633_v32, %v26734_v38 }
0x1350   :  { %v13406_v7 = vmul.f32 %v26987_v24, %v13385_v20  ;;  %v23637_v30 = vpop.eup %23636  ;;  %v7208_v27 = vmul.f32 %v23635_v11, %v26860_v5 }
0x1351   :  { %v23639_v37 = vpop.eup %23638  ;;  %v7228_v28 = vmul.f32 %v26819_v36, %v7207_v45  ;;  %v7209_v34 = vmul.f32 %v23637_v30, %v26807_v4 }
0x1352   :  { %v13304_v3 = vpop.xlane.xlu1 %13303  ;;  %v27064_v41 = vadd.f32 %v26997_v8, %v13406_v7  ;;  %v7210_v5 = vmul.f32 %v23639_v37, %v26881_v21 }
0x1353   :  { %v13340_v18 = vmul.f32 0.125, %v13304_v3  ;;  %v13301_v48 = vpop.xlane.xlu0 %13300  ;;  %v7230_v11 = vmul.f32 %v26819_v36, %v7209_v34 }
0x1354   :  { %29008 = vst [vmem:[#allocation35_spill] sm:$0xff] %v27064_v41  ;;  %v13339_v35 = vmul.f32 0.125, %v13301_v48  ;;  %22792 = vmatprep.mubr.msk.f32.mxu1 %vm373_vm0, %v27064_v41  ;;  %v23641_v48 = vpop.eup %23640  ;;  %v7231_v30 = vmul.f32 %v26819_v36, %v7210_v5 }
0x1355   :  { %v13356_v16 = vadd.f32 1e-05, %v13340_v18  ;;  %22793 = vmatmul.mubr.msk.f32.gmra.mrb[194].mxu1 %vm373_vm0, %v27067_v29  ;;  %v7229_v18 = vmul.f32 %v26819_v36, %v7208_v27  ;;  %v7211_v21 = vmul.f32 %v23641_v48, %v26846_v23  ;;  %v7251_v23 = vadd.f32 %v26828_v52, %v7230_v11 }
0x1356   :  { %v13355_v40 = vadd.f32 1e-05, %v13339_v35  ;;  %v7133_v60 = vpop.xlane.xlu1 %7132  ;;  %v7252_v34 = vadd.f32 %v26828_v52, %v7231_v30 }
0x1357   :  { %23642 = vrsqrt.f32 %v13356_v16  ;;  %v7165_v39 = vmul.f32 0.125, %v7133_v60  ;;  %v7130_v61 = vpop.xlane.xlu0 %7129  ;;  %v7232_v37 = vmul.f32 %v26819_v36, %v7211_v21 }
0x1358   :  { %23644 = vrsqrt.f32 %v13355_v40  ;;  %v7164_v25 = vmul.f32 0.125, %v7130_v61  ;;  %13855 = vrot.lane.b32.xlu0 %v27076_v59, %s23908_s18  ;;  %v7249_v61 = vadd.f32 %v26828_v52, %v7228_v28 }
0x1359   :  { %v7181_v56 = vadd.f32 1e-05, %v7165_v39 }
0x135a   :  { %v7180_v54 = vadd.f32 1e-05, %v7164_v25  ;;  %v13310_v44 = vpop.xlane.xlu1 %13309 }
0x135b   :  { %23646 = vrsqrt.f32 %v7181_v56  ;;  %v13342_v43 = vmul.f32 0.125, %v13310_v44  ;;  %v13307_v62 = vpop.xlane.xlu0 %13306  ;;  %v7250_v56 = vadd.f32 %v26828_v52, %v7229_v18 }
0x135c   :  { %23648 = vrsqrt.f32 %v7180_v54  ;;  %v13341_v10 = vmul.f32 0.125, %v13307_v62 }
0x135d   :  { %v13358_v20 = vadd.f32 1e-05, %v13342_v43 }
0x135e   :  { %v13357_v0 = vadd.f32 1e-05, %v13341_v10  ;;  %v7139_v7 = vpop.xlane.xlu1 %7138 }
0x135f   :  { %23650 = vrsqrt.f32 %v13358_v20  ;;  %v7167_v38 = vmul.f32 0.125, %v7139_v7  ;;  %v7136_v3 = vpop.xlane.xlu0 %7135 }
0x1360   :  { %23652 = vrsqrt.f32 %v13357_v0  ;;  %v7166_v35 = vmul.f32 0.125, %v7136_v3 }
0x1361   :  { %v23643_v16 = vpop.eup %23642  ;;  %v7183_v40 = vadd.f32 1e-05, %v7167_v38 }
0x1362   :  { %v23645_v60 = vpop.eup %23644  ;;  %v7182_v32 = vadd.f32 1e-05, %v7166_v35  ;;  %v13659_v39 = vpop.permute.xlu1 %13658  ;;  %v13388_v4 = vmul.f32 %v23643_v16, %v26896_v33 }
0x1363   :  { %23654 = vrsqrt.f32 %v7183_v40  ;;  %v7142_v25 = vpop.xlane.xlu0 %7141  ;;  %22813 = vmatprep.subr.mxu0 %v13659_v39  ;;  %v13387_v45 = vmul.f32 %v23645_v60, %v26902_v31 }
0x1364   :  { %23656 = vrsqrt.f32 %v7182_v32  ;;  %v7168_v54 = vmul.f32 0.125, %v7142_v25  ;;  %22814 = vmatpush3.msra.mxu0 %v13659_v39  ;;  %v13409_v44 = vmul.f32 %v26987_v24, %v13388_v4 }
0x1365   :  { %v23647_v43 = vpop.eup %23646  ;;  %22816 = vmatmul.mubr.msk.f32.vlgmr.msra.gmra.mrb[160].mxu0 %vm373_vm0, %v7249_v61  ;;  %v13408_v33 = vmul.f32 %v26987_v24, %v13387_v45  ;;  %22879 = vmatprep.subr.mxu0 %v28909_v55 }
0x1366   :  { %v23649_v62 = vpop.eup %23648  ;;  %v7184_v27 = vadd.f32 1e-05, %v7168_v54  ;;  %22818 = vmatprep.mubr.msk.f32.mxu0 %vm373_vm0, %v7250_v56  ;;  %v7213_v28 = vmul.f32 %v23647_v43, %v26893_v26  ;;  %v27106_v7 = vadd.f32 %v26997_v8, %v13409_v44 }
0x1367   :  { %v7145_v31 = vpop.xlane.xlu0 %7144  ;;  %v27100_v10 = vadd.f32 %v26997_v8, %v13408_v33  ;;  %v7212_v20 = vmul.f32 %v23649_v62, %v26899_v50  ;;  %v7253_v50 = vadd.f32 %v26828_v52, %v7232_v37 }
0x1368   :  { %23658 = vrsqrt.f32 %v7184_v27  ;;  %v7169_v0 = vmul.f32 0.125, %v7145_v31  ;;  %29011 = vst [vmem:[#allocation36_spill] sm:$0xff] %v27106_v7  ;;  %v7234_v16 = vmul.f32 %v26819_v36, %v7213_v28 }
0x1369   :  { %29010 = vst [vmem:[#allocation39_spill] sm:$0xff] %v27100_v10  ;;  %v23651_v38 = vpop.eup %23650  ;;  %22795 = vmatprep.mubr.msk.f32.mxu1 %vm373_vm0, %v27100_v10  ;;  %22819 = vmatmul.mubr.msk.f32.gmra.mrb[162].mxu0 %vm373_vm0, %v7251_v23  ;;  %v7233_v3 = vmul.f32 %v26819_v36, %v7212_v20 }
0x136a   :  { %v23653_v18 = vpop.eup %23652  ;;  %v7185_v48 = vadd.f32 1e-05, %v7169_v0  ;;  %22796 = vmatmul.mubr.msk.f32.gmra.mrb[196].mxu1 %vm373_vm0, %v27106_v7  ;;  %22821 = vmatprep.mubr.msk.f32.mxu0 %vm373_vm0, %v7252_v34  ;;  %v13390_v26 = vmul.f32 %v23651_v38, %v26923_v6 }
0x136b   :  { %v7254_v35 = vadd.f32 %v26828_v52, %v7233_v3  ;;  %v13389_v5 = vmul.f32 %v23653_v18, %v26914_v19  ;;  %v7255_v19 = vadd.f32 %v26828_v52, %v7234_v16 }
0x136c   :  { %23660 = vrsqrt.f32 %v7185_v48  ;;  %v13411_v40 = vmul.f32 %v26987_v24, %v13390_v26 }
0x136d   :  { %v23655_v60 = vpop.eup %23654  ;;  %22822 = vmatmul.mubr.msk.f32.gmra.mrb[164].mxu0 %vm373_vm0, %v7253_v50  ;;  %v13410_v32 = vmul.f32 %v26987_v24, %v13389_v5 }
0x136e   :  { %v23657_v39 = vpop.eup %23656  ;;  %22824 = vmatprep.mubr.msk.f32.mxu0 %vm373_vm0, %v7254_v35  ;;  %v7215_v6 = vmul.f32 %v23655_v60, %v26920_v14  ;;  %v27132_v4 = vadd.f32 %v26997_v8, %v13411_v40 }
0x136f   :  { %v27127_v61 = vadd.f32 %v26997_v8, %v13410_v32  ;;  %v7214_v11 = vmul.f32 %v23657_v39, %v26928_v1 }
0x1370   :  { %29013 = vst [vmem:[#allocation12_spill] sm:$0xff] %v27132_v4  ;;  %v7236_v25 = vmul.f32 %v26819_v36, %v7215_v6 }
0x1371   :  { %29012 = vst [vmem:[#allocation16_spill] sm:$0xff] %v27127_v61  ;;  %22798 = vmatprep.mubr.msk.f32.mxu1 %vm373_vm0, %v27127_v61  ;;  %22825 = vmatmul.mubr.msk.f32.gmra.mrb[166].mxu0 %vm373_vm0, %v7255_v19  ;;  %v7235_v56 = vmul.f32 %v26819_v36, %v7214_v11 }
0x1372   :  { %v23659_v14 = vpop.eup %23658  ;;  %22799 = vmatmul.mubr.msk.f32.gmra.mrb[198].mxu1 %vm373_vm0, %v27132_v4  ;;  %v7257_v21 = vadd.f32 %v26828_v52, %v7236_v25 }
0x1373   :  { %v7256_v45 = vadd.f32 %v26828_v52, %v7235_v56  ;;  %v7216_v1 = vmul.f32 %v23659_v14, %v26939_v53  ;;  %v7151_v53 = vpop.xlane.xlu0 %7150 }
0x1374   :  { %v7171_v23 = vmul.f32 0.125, %v7151_v53 }
0x1375   :  { %22827 = vmatprep.mubr.msk.f32.mxu0 %vm373_vm0, %v7256_v45  ;;  %v7237_v54 = vmul.f32 %v26819_v36, %v7216_v1 }
0x1376   :  { %v23661_v44 = vpop.eup %23660  ;;  %22828 = vmatmul.mubr.msk.f32.gmra.mrb[168].mxu0 %vm373_vm0, %v7257_v21  ;;  %v7187_v20 = vadd.f32 1e-05, %v7171_v23 }
0x1377   :  { %v7258_v30 = vadd.f32 %v26828_v52, %v7237_v54  ;;  %v7217_v43 = vmul.f32 %v23661_v44, %v26947_v2  ;;  %v7154_v27 = vpop.xlane.xlu0 %7153 }
0x1378   :  { %v7172_v31 = vmul.f32 0.125, %v7154_v27  ;;  %23662 = vrsqrt.f32 %v7187_v20 }
0x1379   :  { %22830 = vmatprep.mubr.msk.f32.mxu0 %vm373_vm0, %v7258_v30  ;;  %v7238_v33 = vmul.f32 %v26819_v36, %v7217_v43 }
0x137a   :  { %v7188_v0 = vadd.f32 1e-05, %v7172_v31 }
0x137b   :  { %v7259_v62 = vadd.f32 %v26828_v52, %v7238_v33  ;;  %v7157_v37 = vpop.xlane.xlu0 %7156 }
0x137c   :  { %v7173_v28 = vmul.f32 0.125, %v7157_v37  ;;  %23664 = vrsqrt.f32 %v7188_v0 }
0x137d   :  { %22831 = vmatmul.mubr.msk.f32.gmra.mrb[170].mxu0 %vm373_vm0, %v7259_v62 }
0x137e   :  { %v7189_v34 = vadd.f32 1e-05, %v7173_v28 }
0x1380   :  { %23666 = vrsqrt.f32 %v7189_v34 }
0x1382   :  { %v23663_v18 = vpop.eup %23662 }
0x1383   :  { %v7219_v26 = vmul.f32 %v23663_v18, %v26954_v22 }
0x1385   :  { %v7240_v40 = vmul.f32 %v26819_v36, %v7219_v26 }
0x1386   :  { %v23665_v48 = vpop.eup %23664 }
0x1387   :  { %v7220_v35 = vmul.f32 %v23665_v48, %v26960_v63  ;;  %v7261_v19 = vadd.f32 %v26828_v52, %v7240_v40 }
0x1389   :  { %v7241_v39 = vmul.f32 %v26819_v36, %v7220_v35 }
0x138a   :  { %v23667_v50 = vpop.eup %23666 }
0x138b   :  { %v7221_v60 = vmul.f32 %v23667_v50, %v26966_v42  ;;  %v7262_v63 = vadd.f32 %v26828_v52, %v7241_v39 }
0x138d   :  { %v7242_v22 = vmul.f32 %v26819_v36, %v7221_v60 }
0x138f   :  { %v7263_v42 = vadd.f32 %v26828_v52, %v7242_v22 }
0x1393   :  { %v7148_v38 = vpop.xlane.xlu1 %7147 }
0x1394   :  { %v7170_v2 = vmul.f32 0.125, %v7148_v38 }
0x1396   :  { %v7186_v3 = vadd.f32 1e-05, %v7170_v2 }
0x1398   :  { %23668 = vrsqrt.f32 %v7186_v3 }
0x13a2   :  { %v23669_v5 = vpop.eup %23668 }
0x13a3   :  { %v7218_v16 = vmul.f32 %v23669_v5, %v26981_v9 }
0x13a5   :  { %v7239_v32 = vmul.f32 %v26819_v36, %v7218_v16 }
0x13a7   :  { %v7260_v6 = vadd.f32 %v26828_v52, %v7239_v32 }
0x13a9   :  { %22833 = vmatprep.mubr.msk.f32.mxu0 %vm373_vm0, %v7260_v6 }
0x13aa   :  { %22834 = vmatmul.mubr.msk.f32.gmra.mrb[172].mxu0 %vm373_vm0, %v7261_v19 }
0x13ab   :  { %22836 = vmatprep.mubr.msk.f32.mxu0 %vm373_vm0, %v7262_v63 }
0x13ae   :  { %22837 = vmatmul.mubr.msk.f32.gmra.mrb[174].mxu0 %vm373_vm0, %v7263_v42 }
0x13af   :  { %22881 = vmatprep.mubr.msk.f32.mxu0 %vm23907_vm1, %v28909_v55 }
0x13b3   :  { %v13316_v9 = vpop.xlane.xlu0 %13315 }
0x13b4   :  { %v13344_v11 = vmul.f32 0.125, %v13316_v9 }
0x13b6   :  { %v13360_v25 = vadd.f32 1e-05, %v13344_v11 }
0x13b7   :  { %v13313_v56 = vpop.xlane.xlu0 %13312 }
0x13b8   :  { %23670 = vrsqrt.f32 %v13360_v25  ;;  %v13343_v36 = vmul.f32 0.125, %v13313_v56 }
0x13ba   :  { %v13359_v14 = vadd.f32 1e-05, %v13343_v36 }
0x13bb   :  { %v13322_v45 = vpop.xlane.xlu0 %13321 }
0x13bc   :  { %23672 = vrsqrt.f32 %v13359_v14  ;;  %v13346_v1 = vmul.f32 0.125, %v13322_v45 }
0x13be   :  { %v13362_v21 = vadd.f32 1e-05, %v13346_v1 }
0x13bf   :  { %v13319_v54 = vpop.xlane.xlu0 %13318 }
0x13c0   :  { %23674 = vrsqrt.f32 %v13362_v21  ;;  %v13345_v44 = vmul.f32 0.125, %v13319_v54 }
0x13c2   :  { %v23671_v52 = vpop.eup %23670  ;;  %v13361_v30 = vadd.f32 1e-05, %v13345_v44 }
0x13c3   :  { %v13328_v43 = vpop.xlane.xlu0 %13327  ;;  %v13392_v62 = vmul.f32 %v23671_v52, %v27011_v15 }
0x13c4   :  { %23676 = vrsqrt.f32 %v13361_v30  ;;  %v13348_v33 = vmul.f32 0.125, %v13328_v43 }
0x13c5   :  { %v13413_v20 = vmul.f32 %v26987_v24, %v13392_v62 }
0x13c6   :  { %v23673_v53 = vpop.eup %23672  ;;  %v13364_v27 = vadd.f32 1e-05, %v13348_v33 }
0x13c7   :  { %v13325_v23 = vpop.xlane.xlu0 %13324  ;;  %v13391_v31 = vmul.f32 %v23673_v53, %v27016_v12  ;;  %v27179_v15 = vadd.f32 %v26997_v8, %v13413_v20 }
0x13c8   :  { %23678 = vrsqrt.f32 %v13364_v27  ;;  %v13347_v37 = vmul.f32 0.125, %v13325_v23 }
0x13c9   :  { %v13412_v28 = vmul.f32 %v26987_v24, %v13391_v31  ;;  %29015 = vst [vmem:[#allocation15_spill] sm:$0xff] %v27179_v15 }
0x13ca   :  { %v23675_v0 = vpop.eup %23674  ;;  %v13363_v34 = vadd.f32 1e-05, %v13347_v37 }
0x13cb   :  { %v13331_v38 = vpop.xlane.xlu0 %13330  ;;  %v27176_v2 = vadd.f32 %v26997_v8, %v13412_v28  ;;  %v13394_v18 = vmul.f32 %v23675_v0, %v27022_v57 }
0x13cc   :  { %23680 = vrsqrt.f32 %v13363_v34  ;;  %v13349_v3 = vmul.f32 0.125, %v13331_v38 }
0x13cd   :  { %29014 = vst [vmem:[#allocation42_spill] sm:$0xff] %v27176_v2  ;;  %22801 = vmatprep.mubr.msk.f32.mxu1 %vm373_vm0, %v27176_v2  ;;  %v13415_v5 = vmul.f32 %v26987_v24, %v13394_v18 }
0x13ce   :  { %v23677_v12 = vpop.eup %23676  ;;  %v13365_v48 = vadd.f32 1e-05, %v13349_v3  ;;  %22802 = vmatmul.mubr.msk.f32.gmra.mrb[200].mxu1 %vm373_vm0, %v27179_v15 }
0x13cf   :  { %v13334_v26 = vpop.xlane.xlu0 %13333  ;;  %v13393_v50 = vmul.f32 %v23677_v12, %v27028_v46  ;;  %v27193_v32 = vadd.f32 %v26997_v8, %v13415_v5 }
0x13d0   :  { %23682 = vrsqrt.f32 %v13365_v48  ;;  %v13350_v35 = vmul.f32 0.125, %v13334_v26 }
0x13d1   :  { %v13414_v16 = vmul.f32 %v26987_v24, %v13393_v50  ;;  %29017 = vst [vmem:[#allocation41_spill] sm:$0xff] %v27193_v32 }
0x13d2   :  { %v23679_v40 = vpop.eup %23678  ;;  %v13366_v60 = vadd.f32 1e-05, %v13350_v35 }
0x13d3   :  { %v27190_v57 = vadd.f32 %v26997_v8, %v13414_v16  ;;  %v13396_v39 = vmul.f32 %v23679_v40, %v27034_v51  ;;  %v27229_v54 = vpop.permute.xlu0 %13855 }
0x13d4   :  { %23684 = vrsqrt.f32 %v13366_v60 }
0x13d5   :  { %29016 = vst [vmem:[#allocation38_spill] sm:$0xff] %v27190_v57  ;;  %22804 = vmatprep.mubr.msk.f32.mxu1 %vm373_vm0, %v27190_v57  ;;  %v13417_v19 = vmul.f32 %v26987_v24, %v13396_v39 }
0x13d6   :  { %v23681_v46 = vpop.eup %23680  ;;  %22805 = vmatmul.mubr.msk.f32.gmra.mrb[202].mxu1 %vm373_vm0, %v27193_v32 }
0x13d7   :  { %v13395_v6 = vmul.f32 %v23681_v46, %v27040_v13  ;;  %v27208_v11 = vadd.f32 %v26997_v8, %v13417_v19 }
0x13d9   :  { %v13416_v22 = vmul.f32 %v26987_v24, %v13395_v6  ;;  %29019 = vst [vmem:[#allocation6_spill] sm:$0xff] %v27208_v11 }
0x13da   :  { %v23683_v63 = vpop.eup %23682 }
0x13db   :  { %v27204_v42 = vadd.f32 %v26997_v8, %v13416_v22  ;;  %v13397_v9 = vmul.f32 %v23683_v63, %v27049_v17 }
0x13dc   :  { %v22791_v51 = vpop.f32.mrb[192].mxu1 }
0x13dd   :  { %29018 = vst [vmem:[#allocation7_spill] sm:$0xff] %v27204_v42  ;;  %v13558_v25 = vpop.f32.mrb[193].mxu1  ;;  %22807 = vmatprep.mubr.msk.f32.mxu1 %vm373_vm0, %v27204_v42  ;;  %v13418_v13 = vmul.f32 %v26987_v24, %v13397_v9  ;;  %v27254_v27 = vadd.f32 %v22791_v51, %v27076_v59 }
0x13de   :  { %v23685_v56 = vpop.eup %23684  ;;  %22808 = vmatmul.mubr.msk.f32.gmra.mrb[204].mxu1 %vm373_vm0, %v27208_v11  ;;  %v27244_v30 = vadd.f32 %v27076_v59, %v13558_v25 }
0x13df   :  { %v27216_v36 = vadd.f32 %v26997_v8, %v13418_v13  ;;  %v13398_v14 = vmul.f32 %v23685_v56, %v27046_v47 }
0x13e1   :  { %29020 = vst [vmem:[#allocation40_spill] sm:$0xff] %v27216_v36  ;;  %22810 = vmatprep.mubr.msk.f32.mxu1 %vm373_vm0, %v27216_v36  ;;  %v13419_v17 = vmul.f32 %v26987_v24, %v13398_v14 }
0x13e3   :  { %v27223_v45 = vadd.f32 %v26997_v8, %v13419_v17 }
0x13e5   :  { %29021 = vst [vmem:[#allocation9_spill] sm:$0xff] %v27223_v45  ;;  %22811 = vmatmul.mubr.msk.f32.gmra.mrb[206].mxu1 %vm373_vm0, %v27223_v45 }
0x13e6   :  { %22841 = vmatprep.mubr.msk.f32.mxu1 %vm23907_vm1, %v28909_v55 }
0x1428   :  { %v22794_v1 = vpop.f32.mrb[194].mxu1 }
0x1429   :  { %v13568_v21 = vpop.f32.mrb[195].mxu1  ;;  %v27280_v3 = vadd.f32 %v22794_v1, %v27076_v59 }
0x142a   :  { %v27267_v20 = vadd.f32 %v27076_v59, %v13568_v21 }
0x1438   :  { %v22817_v44 = vpop.f32.mrb[160].mxu0 }
0x1439   :  { %v27232_v47 = vadd.f32 %v22817_v44, %v27229_v54  ;;  %v13775_v52 = vpop.f32.mrb[161].mxu0 }
0x143a   :  { %v27235_v24 = vadd.f32 %v27229_v54, %v13775_v52 }
0x143b   :  { %15344 = vrot.lane.b32.xlu1 %v27232_v47, %s23908_s18 }
0x143c   :  { %15268 = vrot.lane.b32.xlu0 %v27235_v24, %s23908_s18  ;;  %v22820_v8 = vpop.f32.mrb[162].mxu0  ;;  %22840 = vmatpush3.xpose.msk.msra.mxu1 %vm591_vm2, %v27235_v24 }
0x143d   :  { %v22797_v43 = vpop.f32.mrb[196].mxu1  ;;  %v13785_v33 = vpop.f32.mrb[163].mxu0  ;;  %22844 = vmatprep.subr.mxu1 %v28909_v55  ;;  %v27271_v34 = vadd.f32 %v22820_v8, %v27229_v54 }
0x143e   :  { %v13578_v62 = vpop.f32.mrb[197].mxu1  ;;  %v27258_v31 = vadd.f32 %v27229_v54, %v13785_v33  ;;  %v27312_v16 = vadd.f32 %v22797_v43, %v27076_v59 }
0x143f   :  { %22842 = vmatmul.mubr.msk.f32.vlgmr.msra.gmra.mrb[208].mxu1 %vm591_vm2, %v27244_v30  ;;  %v27296_v50 = vadd.f32 %v27076_v59, %v13578_v62 }
0x1440   :  { %v22823_v53 = vpop.f32.mrb[164].mxu0  ;;  %22845 = vmatpush3.xpose.msk.msra.mxu1 %vm591_vm2, %v27232_v47  ;;  %22846 = vmatprep.mubr.msk.f32.mxu1 %vm23907_vm1, %v28909_v55 }
0x1441   :  { %v13795_v23 = vpop.f32.mrb[165].mxu0  ;;  %22849 = vmatprep.subr.mxu1 %v28909_v55  ;;  %v27302_v35 = vadd.f32 %v22823_v53, %v27229_v54 }
0x1442   :  { %v27284_v12 = vadd.f32 %v27229_v54, %v13795_v23 }
0x1443   :  { %22847 = vmatmul.mubr.msk.f32.vlgmr.msra.gmra.mrb[210].mxu1 %vm591_vm2, %v27254_v27 }
0x1444   :  { %v22826_v37 = vpop.f32.mrb[166].mxu0  ;;  %22850 = vmatpush3.xpose.msk.msra.mxu1 %vm591_vm2, %v27258_v31  ;;  %22851 = vmatprep.mubr.msk.f32.mxu1 %vm23907_vm1, %v28909_v55 }
0x1445   :  { %v22800_v28 = vpop.f32.mrb[198].mxu1  ;;  %v13805_v0 = vpop.f32.mrb[167].mxu0  ;;  %22854 = vmatprep.subr.mxu1 %v28909_v55  ;;  %v27329_v46 = vadd.f32 %v22826_v37, %v27229_v54 }
0x1446   :  { %v13588_v38 = vpop.f32.mrb[199].mxu1  ;;  %v27316_v60 = vadd.f32 %v27229_v54, %v13805_v0  ;;  %v27338_v6 = vadd.f32 %v22800_v28, %v27076_v59 }
0x1447   :  { %22852 = vmatmul.mubr.msk.f32.vlgmr.msra.gmra.mrb[212].mxu1 %vm591_vm2, %v27267_v20  ;;  %v27325_v39 = vadd.f32 %v27076_v59, %v13588_v38 }
0x1448   :  { %22855 = vmatpush3.xpose.msk.msra.mxu1 %vm591_vm2, %v27271_v34  ;;  %22856 = vmatprep.mubr.msk.f32.mxu1 %vm23907_vm1, %v28909_v55 }
0x1449   :  { %v22829_v18 = vpop.f32.mrb[168].mxu0  ;;  %22859 = vmatprep.subr.mxu1 %v28909_v55 }
0x144a   :  { %v13815_v48 = vpop.f32.mrb[169].mxu0  ;;  %v27342_v19 = vadd.f32 %v22829_v18, %v27229_v54 }
0x144b   :  { %v27287_v26 = vadd.f32 %v27229_v54, %v13815_v48  ;;  %22857 = vmatmul.mubr.msk.f32.vlgmr.msra.gmra.mrb[214].mxu1 %vm591_vm2, %v27280_v3 }
0x144c   :  { %22860 = vmatpush3.xpose.msk.msra.mxu1 %vm591_vm2, %v27284_v12  ;;  %22861 = vmatprep.mubr.msk.f32.mxu1 %vm23907_vm1, %v28909_v55 }
0x144d   :  { %22880 = vmatpush3.xpose.msk.msra.mxu0 %vm591_vm2, %v27287_v26  ;;  %22864 = vmatprep.subr.mxu1 %v28909_v55 }
0x144e   :  { %22889 = vmatprep.subr.mxu0 %v28909_v55 }
0x144f   :  { %22862 = vmatmul.mubr.msk.f32.vlgmr.msra.gmra.mrb[216].mxu1 %vm591_vm2, %v27296_v50 }
0x1450   :  { %v22832_v5 = vpop.f32.mrb[170].mxu0  ;;  %22865 = vmatpush3.xpose.msk.msra.mxu1 %vm591_vm2, %v27302_v35  ;;  %22866 = vmatprep.mubr.msk.f32.mxu1 %vm23907_vm1, %v28909_v55 }
0x1451   :  { %v13825_v40 = vpop.f32.mrb[171].mxu0  ;;  %22869 = vmatprep.subr.mxu1 %v28909_v55  ;;  %v27355_v14 = vadd.f32 %v22832_v5, %v27229_v54 }
0x1452   :  { %v27361_v1 = vadd.f32 %v27229_v54, %v13825_v40 }
0x1453   :  { %22867 = vmatmul.mubr.msk.f32.vlgmr.msra.gmra.mrb[218].mxu1 %vm591_vm2, %v27312_v16 }
0x1454   :  { %22870 = vmatpush3.xpose.msk.msra.mxu1 %vm591_vm2, %v27316_v60  ;;  %22871 = vmatprep.mubr.msk.f32.mxu1 %vm23907_vm1, %v28909_v55 }
0x1455   :  { %22874 = vmatprep.subr.mxu1 %v28909_v55 }
0x1457   :  { %22872 = vmatmul.mubr.msk.f32.vlgmr.msra.gmra.mrb[220].mxu1 %vm591_vm2, %v27325_v39 }
0x1458   :  { %22875 = vmatpush3.xpose.msk.msra.mxu1 %vm591_vm2, %v27329_v46  ;;  %22876 = vmatprep.mubr.msk.f32.mxu1 %vm23907_vm1, %v28909_v55 }
0x1459   :  { %22884 = vmatprep.subr.mxu1 %v28909_v55 }
0x145b   :  { %22877 = vmatmul.mubr.msk.f32.vlgmr.msra.gmra.mrb[222].mxu1 %vm591_vm2, %v27338_v6 }
0x145c   :  { %22885 = vmatpush3.xpose.msk.msra.mxu1 %vm591_vm2, %v27342_v19  ;;  %22886 = vmatprep.mubr.msk.f32.mxu1 %vm23907_vm1, %v28909_v55 }
0x145d   :  { %22894 = vmatprep.subr.mxu1 %v28909_v55 }
0x147d   :  { %v22835_v22 = vpop.f32.mrb[172].mxu0 }
0x147e   :  { %v13835_v63 = vpop.f32.mrb[173].mxu0  ;;  %v27381_v8 = vadd.f32 %v22835_v22, %v27229_v54 }
0x147f   :  { %v27387_v33 = vadd.f32 %v27229_v54, %v13835_v63 }
0x1481   :  { %v22838_v9 = vpop.f32.mrb[174].mxu0 }
0x1482   :  { %v13845_v51 = vpop.f32.mrb[175].mxu0  ;;  %v27407_v37 = vadd.f32 %v22838_v9, %v27229_v54 }
0x1483   :  { %v27413_v0 = vadd.f32 %v27229_v54, %v13845_v51 }
0x14a1   :  { %v22803_v25 = vpop.f32.mrb[200].mxu1 }
0x14a2   :  { %v27352_v13 = vadd.f32 %v22803_v25, %v27076_v59  ;;  %v13598_v56 = vpop.f32.mrb[201].mxu1 }
0x14a3   :  { %v27358_v17 = vadd.f32 %v27076_v59, %v13598_v56 }
0x14a4   :  { %22887 = vmatmul.mubr.msk.f32.vlgmr.msra.gmra.mrb[224].mxu1 %vm591_vm2, %v27352_v13 }
0x14a5   :  { %22895 = vmatpush3.xpose.msk.msra.mxu1 %vm591_vm2, %v27355_v14  ;;  %22882 = vmatmul.mubr.msk.f32.vlgmr.msra.gmra.mrb[176].mxu0 %vm591_vm2, %v27358_v17 }
0x14a6   :  { %22890 = vmatpush3.xpose.msk.msra.mxu0 %vm591_vm2, %v27361_v1  ;;  %22896 = vmatprep.mubr.msk.f32.mxu1 %vm23907_vm1, %v28909_v55 }
0x14a7   :  { %22904 = vmatprep.subr.mxu1 %v28909_v55  ;;  %22891 = vmatprep.mubr.msk.f32.mxu0 %vm23907_vm1, %v28909_v55 }
0x14a8   :  { %22899 = vmatprep.subr.mxu0 %v28909_v55 }
0x14a9   :  { %v22806_v21 = vpop.f32.mrb[202].mxu1 }
0x14aa   :  { %v27378_v44 = vadd.f32 %v22806_v21, %v27076_v59  ;;  %v13608_v52 = vpop.f32.mrb[203].mxu1 }
0x14ab   :  { %v27384_v43 = vadd.f32 %v27076_v59, %v13608_v52 }
0x14ac   :  { %22897 = vmatmul.mubr.msk.f32.vlgmr.msra.gmra.mrb[226].mxu1 %vm591_vm2, %v27378_v44 }
0x14ad   :  { %22905 = vmatpush3.xpose.msk.msra.mxu1 %vm591_vm2, %v27381_v8  ;;  %22892 = vmatmul.mubr.msk.f32.vlgmr.msra.gmra.mrb[178].mxu0 %vm591_vm2, %v27384_v43  ;;  %v15345_v5 = vpop.permute.xlu1 %15344 }
0x14ae   :  { %22900 = vmatpush3.xpose.msk.msra.mxu0 %vm591_vm2, %v27387_v33  ;;  %22906 = vmatprep.mubr.msk.f32.mxu1 %vm23907_vm1, %v28909_v55  ;;  %v15269_v40 = vpop.permute.xlu0 %15268 }
0x14af   :  { %22914 = vmatprep.subr.mxu1 %v28909_v55  ;;  %22901 = vmatprep.mubr.msk.f32.mxu0 %vm23907_vm1, %v28909_v55 }
0x14b0   :  { %22909 = vmatprep.subr.mxu0 %v28909_v55 }
0x14b1   :  { %v22809_v62 = vpop.f32.mrb[204].mxu1 }
0x14b2   :  { %v27404_v53 = vadd.f32 %v22809_v62, %v27076_v59  ;;  %v13618_v23 = vpop.f32.mrb[205].mxu1 }
0x14b3   :  { %v27410_v28 = vadd.f32 %v27076_v59, %v13618_v23 }
0x14b4   :  { %22907 = vmatmul.mubr.msk.f32.vlgmr.msra.gmra.mrb[228].mxu1 %vm591_vm2, %v27404_v53 }
0x14b5   :  { %22915 = vmatpush3.xpose.msk.msra.mxu1 %vm591_vm2, %v27407_v37  ;;  %22902 = vmatmul.mubr.msk.f32.vlgmr.msra.gmra.mrb[180].mxu0 %vm591_vm2, %v27410_v28 }
0x14b6   :  { %22910 = vmatpush3.xpose.msk.msra.mxu0 %vm591_vm2, %v27413_v0  ;;  %22916 = vmatprep.mubr.msk.f32.mxu1 %vm23907_vm1, %v28909_v55 }
0x14b7   :  { %22924 = vmatprep.subr.mxu1 %v28909_v55  ;;  %22911 = vmatprep.mubr.msk.f32.mxu0 %vm23907_vm1, %v28909_v55 }
0x14b8   :  { %v22812_v54 = vpop.f32.mrb[206].mxu1  ;;  %22919 = vmatprep.subr.mxu0 %v28909_v55 }
0x14b9   :  { %v27430_v38 = vadd.f32 %v22812_v54, %v27076_v59  ;;  %v13628_v18 = vpop.f32.mrb[207].mxu1 }
0x14ba   :  { %v27433_v48 = vadd.f32 %v27076_v59, %v13628_v18 }
0x14bb   :  { %29022 = vst [vmem:[#allocation44_spill] sm:$0xff] %v27430_v38  ;;  %22917 = vmatmul.mubr.msk.f32.vlgmr.msra.gmra.mrb[230].mxu1 %vm591_vm2, %v27430_v38 }
0x14bc   :  { %22925 = vmatpush3.msra.mxu1 %v15345_v5  ;;  %22912 = vmatmul.mubr.msk.f32.vlgmr.msra.gmra.mrb[182].mxu0 %vm591_vm2, %v27433_v48 }
0x14bd   :  { %22920 = vmatpush3.msra.mxu0 %v15269_v40  ;;  %22921 = vmatprep.mubr.msk.f32.mxu0 %vm23907_vm1, %v28909_v55 }
0x14be   :  { %22926 = vmatprep.mubr.msk.f32.mxu1 %vm23907_vm1, %v28909_v55  ;;  %22929 = vmatprep.subr.mxu0 %v28909_v55 }
0x14bf   :  { %22934 = vmatprep.subr.mxu1 %v28909_v55 }
0x1512   :  { %v13948_v59 = vpop.f32.mrb[208].mxu1 }
0x1513   :  { %v22843_v22 = vpop.f32.mrb[209].mxu1  ;;  %v15092_v63 = vsel %vm373_vm0, %v13948_v59, -inf }
0x1514   :  { %15093 = vmax.xlane.f32.xlu1 %v15092_v63 }
0x1516   :  { %v14024_v9 = vpop.f32.mrb[210].mxu1 }
0x1517   :  { %v22848_v51 = vpop.f32.mrb[211].mxu1  ;;  %v15095_v25 = vsel %vm373_vm0, %v14024_v9, -inf }
0x1518   :  { %15096 = vmax.xlane.f32.xlu1 %v15095_v25 }
0x151a   :  { %v14100_v56 = vpop.f32.mrb[212].mxu1 }
0x151b   :  { %v22853_v21 = vpop.f32.mrb[213].mxu1  ;;  %v15098_v52 = vsel %vm373_vm0, %v14100_v56, -inf }
0x151c   :  { %15099 = vmax.xlane.f32.xlu1 %v15098_v52 }
0x151e   :  { %v14176_v62 = vpop.f32.mrb[214].mxu1 }
0x151f   :  { %v22858_v23 = vpop.f32.mrb[215].mxu1  ;;  %v15101_v54 = vsel %vm373_vm0, %v14176_v62, -inf }
0x1520   :  { %15102 = vmax.xlane.f32.xlu1 %v15101_v54 }
0x1522   :  { %v14252_v18 = vpop.f32.mrb[216].mxu1 }
0x1523   :  { %v22863_v5 = vpop.f32.mrb[217].mxu1  ;;  %v15104_v40 = vsel %vm373_vm0, %v14252_v18, -inf }
0x1524   :  { %15105 = vmax.xlane.f32.xlu1 %v15104_v40 }
0x1526   :  { %v14328_v22 = vpop.f32.mrb[218].mxu1 }
0x1527   :  { %v22868_v63 = vpop.f32.mrb[219].mxu1  ;;  %v15107_v51 = vsel %vm373_vm0, %v14328_v22, -inf }
0x1528   :  { %15108 = vmax.xlane.f32.xlu0 %v15107_v51 }
0x152a   :  { %v14404_v25 = vpop.f32.mrb[220].mxu1 }
0x152b   :  { %v22873_v21 = vpop.f32.mrb[221].mxu1  ;;  %v15110_v36 = vsel %vm373_vm0, %v14404_v25, -inf }
0x152c   :  { %15111 = vmax.xlane.f32.xlu1 %v15110_v36 }
0x152e   :  { %v27452_v52 = vpop.f32.mrb[222].mxu1 }
0x152f   :  { %v22878_v23 = vpop.f32.mrb[223].mxu1  ;;  %v15113_v54 = vsel %vm373_vm0, %v27452_v52, -inf }
0x1530   :  { %15114 = vmax.xlane.f32.xlu1 %v15113_v54 }
0x1577   :  { %v27456_v5 = vpop.f32.mrb[224].mxu1 }
0x1578   :  { %v27458_v40 = vpop.f32.mrb[176].mxu0  ;;  %v22888_v63 = vpop.f32.mrb[225].mxu1 }
0x1579   :  { %v22883_v45 = vpop.f32.mrb[177].mxu0 }
0x157f   :  { %v27460_v42 = vpop.f32.mrb[226].mxu1 }
0x1580   :  { %v27462_v51 = vpop.f32.mrb[178].mxu0  ;;  %v22898_v21 = vpop.f32.mrb[227].mxu1 }
0x1581   :  { %v22893_v11 = vpop.f32.mrb[179].mxu0 }
0x1587   :  { %v27464_v36 = vpop.f32.mrb[228].mxu1 }
0x1588   :  { %v27466_v57 = vpop.f32.mrb[180].mxu0  ;;  %v22908_v23 = vpop.f32.mrb[229].mxu1 }
0x1589   :  { %v22903_v32 = vpop.f32.mrb[181].mxu0 }
0x158e   :  { %v27468_v2 = vpop.f32.mrb[230].mxu1 }
0x158f   :  { %v27470_v54 = vpop.f32.mrb[182].mxu0  ;;  %v22918_v15 = vpop.f32.mrb[231].mxu1 }
0x1590   :  { %v22913_v61 = vpop.f32.mrb[183].mxu0 }
0x15a1   :  { %v15094_v63 = vpop.xlane.xlu1 %15093 }
0x15a2   :  { %v15140_v45 = vsub.f32 %v13948_v59, %v15094_v63 }
0x15a4   :  { %v15156_v4 = vmul.f32 1.442695, %v15140_v45 }
0x15a5   :  { %v15097_v10 = vpop.xlane.xlu1 %15096 }
0x15a6   :  { %23686 = vpow2.f32 %v15156_v4  ;;  %v15141_v7 = vsub.f32 %v14024_v9, %v15097_v10 }
0x15a8   :  { %v15158_v21 = vmul.f32 1.442695, %v15141_v7 }
0x15a9   :  { %v15100_v11 = vpop.xlane.xlu1 %15099 }
0x15aa   :  { %23688 = vpow2.f32 %v15158_v21  ;;  %v15142_v41 = vsub.f32 %v14100_v56, %v15100_v11 }
0x15ac   :  { %v15160_v29 = vmul.f32 1.442695, %v15142_v41 }
0x15ad   :  { %v15103_v58 = vpop.xlane.xlu1 %15102 }
0x15ae   :  { %23690 = vpow2.f32 %v15160_v29  ;;  %v15143_v32 = vsub.f32 %v14176_v62, %v15103_v58 }
0x15b0   :  { %v27472_v23 = vpop.eup %23686  ;;  %v15162_v49 = vmul.f32 1.442695, %v15143_v32 }
0x15b1   :  { %v15106_v38 = vpop.xlane.xlu1 %15105  ;;  %v15188_v61 = vsel %vm373_vm0, %v27472_v23, 0.0 }
0x15b2   :  { %23692 = vpow2.f32 %v15162_v49  ;;  %v15144_v15 = vsub.f32 %v14252_v18, %v15106_v38  ;;  %15189 = vadd.xlane.f32.xlu0 %v15188_v61 }
0x15b4   :  { %v27476_v4 = vpop.eup %23688  ;;  %v15164_v10 = vmul.f32 1.442695, %v15144_v15 }
0x15b5   :  { %v15109_v7 = vpop.xlane.xlu0 %15108  ;;  %v15191_v41 = vsel %vm373_vm0, %v27476_v4, 0.0 }
0x15b6   :  { %23694 = vpow2.f32 %v15164_v10  ;;  %v15145_v29 = vsub.f32 %v14328_v22, %v15109_v7  ;;  %15192 = vadd.xlane.f32.xlu1 %v15191_v41  ;;  %v15134_v10 = vsel %vm373_vm0, %v27470_v54, -inf  ;;  %v15119_v41 = vsel %vm373_vm0, %v27456_v5, -inf }
0x15b8   :  { %v27480_v58 = vpop.eup %23690  ;;  %v15166_v59 = vmul.f32 1.442695, %v15145_v29  ;;  %v15116_v29 = vsel %vm373_vm0, %v27458_v40, -inf }
0x15b9   :  { %v15112_v9 = vpop.xlane.xlu1 %15111  ;;  %v15194_v56 = vsel %vm373_vm0, %v27480_v58, 0.0 }
0x15ba   :  { %23696 = vpow2.f32 %v15166_v59  ;;  %v15146_v49 = vsub.f32 %v14404_v25, %v15112_v9  ;;  %15195 = vadd.xlane.f32.xlu0 %v15194_v56  ;;  %v15125_v59 = vsel %vm373_vm0, %v27460_v42, -inf  ;;  %v15122_v9 = vsel %vm373_vm0, %v27462_v51, -inf }
0x15bb   :  { %v15131_v56 = vsel %vm373_vm0, %v27464_v36, -inf }
0x15bc   :  { %v27484_v38 = vpop.eup %23692  ;;  %v15168_v62 = vmul.f32 1.442695, %v15146_v49  ;;  %v15128_v49 = vsel %vm373_vm0, %v27466_v57, -inf }
0x15bd   :  { %v15115_v18 = vpop.xlane.xlu1 %15114  ;;  %v15197_v63 = vsel %vm373_vm0, %v27484_v38, 0.0 }
0x15be   :  { %23698 = vpow2.f32 %v15168_v62  ;;  %v15147_v22 = vsub.f32 %v27452_v52, %v15115_v18  ;;  %15198 = vadd.xlane.f32.xlu1 %v15197_v63  ;;  %v15137_v62 = vsel %vm373_vm0, %v27468_v2, -inf }
0x15c0   :  { %v27489_v45 = vpop.eup %23694  ;;  %v15170_v21 = vmul.f32 1.442695, %v15147_v22 }
0x15c1   :  { %v15200_v11 = vsel %vm373_vm0, %v27489_v45, 0.0 }
0x15c2   :  { %23700 = vpow2.f32 %v15170_v21  ;;  %15201 = vadd.xlane.f32.xlu0 %v15200_v11 }
0x15c4   :  { %v27493_v25 = vpop.eup %23696 }
0x15c5   :  { %v15203_v32 = vsel %vm373_vm0, %v27493_v25, 0.0 }
0x15c6   :  { %15204 = vadd.xlane.f32.xlu1 %v15203_v32 }
0x15c8   :  { %v27497_v61 = vpop.eup %23698 }
0x15c9   :  { %v15206_v52 = vsel %vm373_vm0, %v27497_v61, 0.0 }
0x15ca   :  { %15207 = vadd.xlane.f32.xlu0 %v15206_v52 }
0x15cc   :  { %v27501_v15 = vpop.eup %23700 }
0x15cd   :  { %v15209_v7 = vsel %vm373_vm0, %v27501_v15, 0.0 }
0x15ce   :  { %15135 = vmax.xlane.f32.xlu0 %v15134_v10  ;;  %15210 = vadd.xlane.f32.xlu1 %v15209_v7 }
0x15d2   :  { %15120 = vmax.xlane.f32.xlu1 %v15119_v41 }
0x15d6   :  { %15117 = vmax.xlane.f32.xlu1 %v15116_v29 }
0x15da   :  { %15126 = vmax.xlane.f32.xlu1 %v15125_v59 }
0x15de   :  { %15123 = vmax.xlane.f32.xlu1 %v15122_v9 }
0x15e2   :  { %15132 = vmax.xlane.f32.xlu1 %v15131_v56 }
0x15e4   :  { %15420 = vrot.lane.b32.xlu0 %v27258_v31, %s23908_s18 }
0x15e6   :  { %15129 = vmax.xlane.f32.xlu1 %v15128_v49 }
0x15e8   :  { %15648 = vrot.lane.b32.xlu0 %v27302_v35, %s23908_s18 }
0x15ea   :  { %15138 = vmax.xlane.f32.xlu1 %v15137_v62 }
0x15ec   :  { %15800 = vrot.lane.b32.xlu0 %v27329_v46, %s23908_s18 }
0x15f0   :  { %15952 = vrot.lane.b32.xlu0 %v27342_v19, %s23908_s18 }
0x15f4   :  { %16104 = vrot.lane.b32.xlu0 %v27355_v14, %s23908_s18 }
0x15f8   :  { %16256 = vrot.lane.b32.xlu0 %v27381_v8, %s23908_s18 }
0x15fb   :  { %15496 = vrot.lane.b32.xlu1 %v27271_v34, %s23908_s18 }
0x15ff   :  { %15572 = vrot.lane.b32.xlu1 %v27284_v12, %s23908_s18 }
0x1603   :  { %15724 = vrot.lane.b32.xlu1 %v27316_v60, %s23908_s18 }
0x1607   :  { %15876 = vrot.lane.b32.xlu1 %v27287_v26, %s23908_s18 }
0x160b   :  { %16028 = vrot.lane.b32.xlu1 %v27361_v1, %s23908_s18 }
0x160f   :  { %16180 = vrot.lane.b32.xlu1 %v27387_v33, %s23908_s18 }
0x163f   :  { %v15190_v18 = vpop.xlane.xlu0 %15189 }
0x1640   :  { %23702 = vrcp.f32 %v15190_v18 }
0x1643   :  { %v15193_v63 = vpop.xlane.xlu1 %15192 }
0x1644   :  { %23704 = vrcp.f32 %v15193_v63 }
0x1647   :  { %v15196_v32 = vpop.xlane.xlu0 %15195 }
0x1648   :  { %23706 = vrcp.f32 %v15196_v32 }
0x164a   :  { %v23703_v22 = vpop.eup %23702 }
0x164b   :  { %v15252_v21 = vmul.f32 %v23703_v22, %v27472_v23  ;;  %v15199_v10 = vpop.xlane.xlu1 %15198 }
0x164d   :  { %22922 = vmatmul.mubr.msk.f32.vlgmr.msra.gmra.mrb[184].mxu0 %vm373_vm0, %v15252_v21 }
0x164e   :  { %v23705_v11 = vpop.eup %23704  ;;  %22931 = vmatprep.mubr.msk.f32.mxu0 %vm23907_vm1, %v28909_v55 }
0x164f   :  { %v15253_v52 = vmul.f32 %v23705_v11, %v27476_v4  ;;  %v15202_v7 = vpop.xlane.xlu0 %15201 }
0x1651   :  { %22927 = vmatmul.mubr.msk.f32.vlgmr.msra.gmra.mrb[232].mxu1 %vm373_vm0, %v15253_v52 }
0x1652   :  { %22936 = vmatprep.mubr.msk.f32.mxu1 %vm23907_vm1, %v28909_v55  ;;  %v23707_v9 = vpop.eup %23706 }
0x1653   :  { %v15205_v41 = vpop.xlane.xlu1 %15204  ;;  %v15254_v62 = vmul.f32 %v23707_v9, %v27480_v58 }
0x1657   :  { %v15208_v29 = vpop.xlane.xlu0 %15207 }
0x165b   :  { %v15136_v23 = vpop.xlane.xlu0 %15135  ;;  %v15211_v59 = vpop.xlane.xlu1 %15210 }
0x165f   :  { %v15421_v56 = vpop.permute.xlu0 %15420  ;;  %v15121_v49 = vpop.xlane.xlu1 %15120 }
0x1660   :  { %v15149_v18 = vsub.f32 %v27456_v5, %v15121_v49  ;;  %22930 = vmatpush3.msra.mxu0 %v15421_v56  ;;  %v15154_v56 = vsub.f32 %v27470_v54, %v15136_v23 }
0x1661   :  { %22932 = vmatmul.mubr.msk.f32.vlgmr.msra.gmra.mrb[186].mxu0 %vm373_vm0, %v15254_v62  ;;  %22939 = vmatprep.subr.mxu0 %v28909_v55 }
0x1662   :  { %v15174_v4 = vmul.f32 1.442695, %v15149_v18  ;;  %22941 = vmatprep.mubr.msk.f32.mxu0 %vm23907_vm1, %v28909_v55 }
0x1663   :  { %v15118_v63 = vpop.xlane.xlu1 %15117 }
0x1664   :  { %23708 = vpow2.f32 %v15174_v4  ;;  %v15148_v22 = vsub.f32 %v27458_v40, %v15118_v63  ;;  %v15184_v4 = vmul.f32 1.442695, %v15154_v56 }
0x1666   :  { %v15172_v21 = vmul.f32 1.442695, %v15148_v22 }
0x1667   :  { %v15127_v11 = vpop.xlane.xlu1 %15126 }
0x1668   :  { %23710 = vpow2.f32 %v15172_v21  ;;  %v15151_v58 = vsub.f32 %v27460_v42, %v15127_v11 }
0x166a   :  { %v15178_v32 = vmul.f32 1.442695, %v15151_v58  ;;  %v15649_v58 = vpop.permute.xlu0 %15648 }
0x166b   :  { %v15124_v5 = vpop.xlane.xlu1 %15123 }
0x166c   :  { %23712 = vpow2.f32 %v15178_v32  ;;  %v15150_v52 = vsub.f32 %v27462_v51, %v15124_v5 }
0x166d   :  { %23714 = vrcp.f32 %v15199_v10 }
0x166e   :  { %v27562_v9 = vpop.eup %23708  ;;  %v15176_v49 = vmul.f32 1.442695, %v15150_v52 }
0x166f   :  { %v15133_v62 = vpop.xlane.xlu1 %15132  ;;  %v15215_v40 = vsel %vm373_vm0, %v27562_v9, 0.0 }
0x1670   :  { %23716 = vpow2.f32 %v15176_v49  ;;  %v15153_v18 = vsub.f32 %v27464_v36, %v15133_v62  ;;  %15216 = vadd.xlane.f32.xlu1 %v15215_v40 }
0x1671   :  { %23718 = vrcp.f32 %v15202_v7 }
0x1672   :  { %v27568_v42 = vpop.eup %23710  ;;  %23720 = vrcp.f32 %v15205_v41  ;;  %v15182_v51 = vmul.f32 1.442695, %v15153_v18 }
0x1673   :  { %v15130_v63 = vpop.xlane.xlu1 %15129  ;;  %v15212_v10 = vsel %vm373_vm0, %v27568_v42, 0.0 }
0x1674   :  { %23722 = vpow2.f32 %v15182_v51  ;;  %v15152_v54 = vsub.f32 %v27466_v57, %v15130_v63  ;;  %15213 = vadd.xlane.f32.xlu0 %v15212_v10 }
0x1675   :  { %23724 = vrcp.f32 %v15208_v29 }
0x1676   :  { %v27573_v23 = vpop.eup %23712  ;;  %23726 = vpow2.f32 %v15184_v4  ;;  %v15180_v36 = vmul.f32 1.442695, %v15152_v54  ;;  %v15801_v4 = vpop.permute.xlu0 %15800 }
0x1677   :  { %23728 = vrcp.f32 %v15211_v59  ;;  %v15139_v7 = vpop.xlane.xlu1 %15138  ;;  %v15221_v41 = vsel %vm373_vm0, %v27573_v23, 0.0  ;;  %v23715_v22 = vpop.eup %23714 }
0x1678   :  { %23730 = vpow2.f32 %v15180_v36  ;;  %v15155_v21 = vsub.f32 %v27468_v2, %v15139_v7  ;;  %15222 = vadd.xlane.f32.xlu1 %v15221_v41  ;;  %v15255_v59 = vmul.f32 %v23715_v22, %v27484_v38 }
0x167a   :  { %v27578_v11 = vpop.eup %23716  ;;  %v15186_v57 = vmul.f32 1.442695, %v15155_v21  ;;  %v15953_v41 = vpop.permute.xlu0 %15952 }
0x167b   :  { %v23719_v32 = vpop.eup %23718  ;;  %v15497_v29 = vpop.permute.xlu1 %15496  ;;  %v15218_v5 = vsel %vm373_vm0, %v27578_v11, 0.0 }
0x167c   :  { %v23721_v52 = vpop.eup %23720  ;;  %23732 = vpow2.f32 %v15186_v57  ;;  %15219 = vadd.xlane.f32.xlu0 %v15218_v5  ;;  %22935 = vmatpush3.msra.mxu1 %v15497_v29  ;;  %v15256_v38 = vmul.f32 %v23719_v32, %v27489_v45 }
0x167d   :  { %22937 = vmatmul.mubr.msk.f32.vlgmr.msra.gmra.mrb[234].mxu1 %vm373_vm0, %v15255_v59  ;;  %22944 = vmatprep.subr.mxu1 %v28909_v55  ;;  %v15257_v40 = vmul.f32 %v23721_v52, %v27493_v25 }
0x167e   :  { %v27585_v2 = vpop.eup %23722  ;;  %22945 = vmatpush3.msra.mxu1 %v15649_v58  ;;  %22946 = vmatprep.mubr.msk.f32.mxu1 %vm23907_vm1, %v28909_v55 }
0x167f   :  { %v23725_v56 = vpop.eup %23724  ;;  %v15573_v49 = vpop.permute.xlu1 %15572  ;;  %v15227_v62 = vsel %vm373_vm0, %v27585_v2, 0.0  ;;  %22954 = vmatprep.subr.mxu1 %v28909_v55 }
0x1680   :  { %v27594_v18 = vpop.eup %23726  ;;  %15228 = vadd.xlane.f32.xlu1 %v15227_v62  ;;  %22940 = vmatpush3.msra.mxu0 %v15573_v49  ;;  %v15258_v54 = vmul.f32 %v23725_v56, %v27497_v61 }
0x1681   :  { %v23729_v51 = vpop.eup %23728  ;;  %22942 = vmatmul.mubr.msk.f32.vlgmr.msra.gmra.mrb[188].mxu0 %vm373_vm0, %v15256_v38  ;;  %22947 = vmatmul.mubr.msk.f32.vlgmr.msra.gmra.mrb[236].mxu1 %vm373_vm0, %v15257_v40  ;;  %v15230_v45 = vsel %vm373_vm0, %v27594_v18, 0.0 }
0x1682   :  { %v27598_v63 = vpop.eup %23730  ;;  %22955 = vmatpush3.msra.mxu1 %v15801_v4  ;;  %22949 = vmatprep.subr.mxu0 %v28909_v55  ;;  %v15259_v36 = vmul.f32 %v23729_v51, %v27501_v15 }
0x1683   :  { %v15725_v10 = vpop.permute.xlu1 %15724  ;;  %v15224_v25 = vsel %vm373_vm0, %v27598_v63, 0.0  ;;  %22951 = vmatprep.mubr.msk.f32.mxu0 %vm23907_vm1, %v28909_v55  ;;  %22956 = vmatprep.mubr.msk.f32.mxu1 %vm23907_vm1, %v28909_v55 }
0x1684   :  { %15231 = vadd.xlane.f32.xlu1 %v15230_v45  ;;  %15225 = vadd.xlane.f32.xlu0 %v15224_v25 }
0x1685   :  { %22950 = vmatpush3.msra.mxu0 %v15725_v10  ;;  %22964 = vmatprep.subr.mxu1 %v28909_v55 }
0x1686   :  { %v27612_v7 = vpop.eup %23732  ;;  %22952 = vmatmul.mubr.msk.f32.vlgmr.msra.gmra.mrb[190].mxu0 %vm373_vm0, %v15258_v54  ;;  %22957 = vmatmul.mubr.msk.f32.vlgmr.msra.gmra.mrb[238].mxu1 %vm373_vm0, %v15259_v36 }
0x1687   :  { %22965 = vmatpush3.msra.mxu1 %v15953_v41  ;;  %22959 = vmatprep.subr.mxu0 %v28909_v55  ;;  %v15877_v22 = vpop.permute.xlu1 %15876  ;;  %v15233_v21 = vsel %vm373_vm0, %v27612_v7, 0.0 }
0x1688   :  { %15234 = vadd.xlane.f32.xlu0 %v15233_v21  ;;  %22960 = vmatpush3.msra.mxu0 %v15877_v22 }
0x1689   :  { %22966 = vmatprep.mubr.msk.f32.mxu1 %vm23907_vm1, %v28909_v55  ;;  %22974 = vmatprep.subr.mxu1 %v28909_v55 }
0x168a   :  { %22961 = vmatprep.mubr.msk.f32.mxu0 %vm23907_vm1, %v28909_v55  ;;  %22969 = vmatprep.subr.mxu0 %v28909_v55 }
0x1695   :  { %16332 = vrot.lane.b32.xlu1 %v27413_v0, %s23908_s18 }
0x1699   :  { %16682 = vrot.lane.b32.xlu1 %v27235_v24, %s23910_s20 }
0x169d   :  { %16760 = vrot.lane.b32.xlu1 %v27232_v47, %s23910_s20 }
0x169e   :  { %16408 = vrot.lane.b32.xlu0 %v27407_v37, %s23908_s18  ;;  %s23886_s18 = scalar_lea.vmem %s20758_s29, 32 }
0x169f   :  { %p23888_p2 = scmp.lt.s32.totalorder %s23886_s18, %s23882_s2 }
0x16a1   :  { %16838 = vrot.lane.b32.xlu1 %v27258_v31, %s23910_s20  ;;  %p23889_p3 = por %p23888_p2, %p23887_p1 }
0x16a2   :  { %16680 = vrot.lane.b32.xlu0 %v27244_v30, %s23910_s20  ;;  %v29023_v30 = vld [vmem:[#allocation44_spill] sm:$0xff] }
0x16a3   :  { %p23890_p4 = pnand %p23889_p3, %p23883_p0 }
0x16a5   :  { %16916 = vrot.lane.b32.xlu1 %v27271_v34, %s23910_s20 }
0x16a6   :  { %16758 = vrot.lane.b32.xlu0 %v27254_v27, %s23910_s20  ;;  %v16029_v27 = vpop.permute.xlu1 %16028 }
0x16a9   :  { %16994 = vrot.lane.b32.xlu1 %v27284_v12, %s23910_s20 }
0x16aa   :  { %16836 = vrot.lane.b32.xlu0 %v27267_v20, %s23910_s20  ;;  %v16105_v20 = vpop.permute.xlu0 %16104 }
0x16ad   :  { %17072 = vrot.lane.b32.xlu1 %v27302_v35, %s23910_s20 }
0x16ae   :  { %16914 = vrot.lane.b32.xlu0 %v27280_v3, %s23910_s20  ;;  %v16181_v3 = vpop.permute.xlu1 %16180 }
0x16b1   :  { %17150 = vrot.lane.b32.xlu1 %v27316_v60, %s23910_s20 }
0x16b2   :  { %16992 = vrot.lane.b32.xlu0 %v27296_v50, %s23910_s20  ;;  %v16257_v50 = vpop.permute.xlu0 %16256 }
0x16b5   :  { %17228 = vrot.lane.b32.xlu1 %v27329_v46, %s23910_s20 }
0x16b6   :  { %17070 = vrot.lane.b32.xlu0 %v27312_v16, %s23910_s20 }
0x16b9   :  { %17306 = vrot.lane.b32.xlu1 %v27287_v26, %s23910_s20 }
0x16ba   :  { %17148 = vrot.lane.b32.xlu0 %v27325_v39, %s23910_s20 }
0x16bd   :  { %17304 = vrot.lane.b32.xlu1 %v27358_v17, %s23910_s20 }
0x16be   :  { %17226 = vrot.lane.b32.xlu0 %v27338_v6, %s23910_s20 }
0x16c1   :  { %17462 = vrot.lane.b32.xlu1 %v27361_v1, %s23910_s20 }
0x16c2   :  { %17384 = vrot.lane.b32.xlu0 %v27342_v19, %s23910_s20 }
0x16c5   :  { %17460 = vrot.lane.b32.xlu1 %v27384_v43, %s23910_s20 }
0x16c6   :  { %17382 = vrot.lane.b32.xlu0 %v27352_v13, %s23910_s20 }
0x16c9   :  { %17618 = vrot.lane.b32.xlu1 %v27387_v33, %s23910_s20 }
0x16ca   :  { %17540 = vrot.lane.b32.xlu0 %v27355_v14, %s23910_s20 }
0x16cd   :  { %17616 = vrot.lane.b32.xlu1 %v27410_v28, %s23910_s20 }
0x16ce   :  { %17538 = vrot.lane.b32.xlu0 %v27378_v44, %s23910_s20 }
0x16d1   :  { %17774 = vrot.lane.b32.xlu1 %v27413_v0, %s23910_s20 }
0x16d2   :  { %17696 = vrot.lane.b32.xlu0 %v27381_v8, %s23910_s20 }
0x16d5   :  { %17772 = vrot.lane.b32.xlu1 %v27433_v48, %s23910_s20 }
0x16d6   :  { %17694 = vrot.lane.b32.xlu0 %v27404_v53, %s23910_s20 }
0x16d9   :  { %18180 = vrot.lane.b32.xlu1 %v27232_v47, %s23911_s21 }
0x16da   :  { %17852 = vrot.lane.b32.xlu0 %v27407_v37, %s23910_s20 }
0x16de   :  { %17850 = vrot.lane.b32.xlu0 %v29023_v30, %s23910_s20 }
0x16e2   :  { %18104 = vrot.lane.b32.xlu0 %v27235_v24, %s23911_s21 }
0x16fd   :  { %v15217_v16 = vpop.xlane.xlu1 %15216 }
0x16fe   :  { %23734 = vrcp.f32 %v15217_v16 }
0x1701   :  { %v15214_v39 = vpop.xlane.xlu0 %15213 }
0x1702   :  { %23736 = vrcp.f32 %v15214_v39 }
0x1705   :  { %v15223_v6 = vpop.xlane.xlu1 %15222 }
0x1706   :  { %23738 = vrcp.f32 %v15223_v6 }
0x1708   :  { %v23735_v47 = vpop.eup %23734 }
0x1709   :  { %v15220_v13 = vpop.xlane.xlu0 %15219  ;;  %v15261_v17 = vmul.f32 %v23735_v47, %v27562_v9 }
0x170a   :  { %23740 = vrcp.f32 %v15220_v13 }
0x170b   :  { %22967 = vmatmul.mubr.msk.f32.vlgmr.msra.gmra.mrb[240].mxu1 %vm373_vm0, %v15261_v17 }
0x170c   :  { %v23737_v44 = vpop.eup %23736  ;;  %22975 = vmatpush3.msra.mxu1 %v16105_v20  ;;  %22976 = vmatprep.mubr.msk.f32.mxu1 %vm23907_vm1, %v28909_v55 }
0x170d   :  { %v15229_v24 = vpop.xlane.xlu1 %15228  ;;  %v15260_v43 = vmul.f32 %v23737_v44, %v27568_v42  ;;  %22984 = vmatprep.subr.mxu1 %v28909_v55 }
0x170e   :  { %23742 = vrcp.f32 %v15229_v24 }
0x170f   :  { %22962 = vmatmul.mubr.msk.f32.vlgmr.msra.gmra.mrb[192].mxu0 %vm373_vm0, %v15260_v43 }
0x1710   :  { %v23739_v53 = vpop.eup %23738  ;;  %22970 = vmatpush3.msra.mxu0 %v16029_v27  ;;  %22971 = vmatprep.mubr.msk.f32.mxu0 %vm23907_vm1, %v28909_v55 }
0x1711   :  { %v15226_v28 = vpop.xlane.xlu0 %15225  ;;  %v15232_v48 = vpop.xlane.xlu1 %15231  ;;  %v15263_v61 = vmul.f32 %v23739_v53, %v27573_v23  ;;  %22979 = vmatprep.subr.mxu0 %v28909_v55 }
0x1712   :  { %23744 = vrcp.f32 %v15226_v28 }
0x1713   :  { %22977 = vmatmul.mubr.msk.f32.vlgmr.msra.gmra.mrb[242].mxu1 %vm373_vm0, %v15263_v61  ;;  %23746 = vrcp.f32 %v15232_v48 }
0x1714   :  { %v23741_v15 = vpop.eup %23740  ;;  %22985 = vmatpush3.msra.mxu1 %v16257_v50  ;;  %22986 = vmatprep.mubr.msk.f32.mxu1 %vm23907_vm1, %v28909_v55 }
0x1715   :  { %v15235_v9 = vpop.xlane.xlu0 %15234  ;;  %v16333_v42 = vpop.permute.xlu1 %16332  ;;  %v15262_v58 = vmul.f32 %v23741_v15, %v27578_v11  ;;  %22994 = vmatprep.subr.mxu1 %v28909_v55 }
0x1716   :  { %23748 = vrcp.f32 %v15235_v9 }
0x1717   :  { %22972 = vmatmul.mubr.msk.f32.vlgmr.msra.gmra.mrb[194].mxu0 %vm373_vm0, %v15262_v58 }
0x1718   :  { %v23743_v23 = vpop.eup %23742  ;;  %22980 = vmatpush3.msra.mxu0 %v16181_v3  ;;  %22981 = vmatprep.mubr.msk.f32.mxu0 %vm23907_vm1, %v28909_v55 }
0x1719   :  { %v16409_v57 = vpop.permute.xlu0 %16408  ;;  %v16683_v32 = vpop.permute.xlu1 %16682  ;;  %v15265_v29 = vmul.f32 %v23743_v23, %v27585_v2  ;;  %22989 = vmatprep.subr.mxu0 %v28909_v55  ;;  %v27726_v2 = vld [vmem:[%s28820_s4 + $0x10] sm:$0xff] }
0x171b   :  { %22987 = vmatmul.mubr.msk.f32.vlgmr.msra.gmra.mrb[244].mxu1 %vm373_vm0, %v15265_v29 }
0x171c   :  { %v23745_v5 = vpop.eup %23744  ;;  %22995 = vmatpush3.msra.mxu1 %v16409_v57  ;;  %22996 = vmatprep.mubr.msk.f32.mxu1 %vm23907_vm1, %v28909_v55 }
0x171d   :  { %v16681_v11 = vpop.permute.xlu0 %16680  ;;  %v16761_v59 = vpop.permute.xlu1 %16760  ;;  %v15264_v52 = vmul.f32 %v23745_v5, %v27598_v63  ;;  %23025 = vmatprep.subr.mxu1 %v28909_v55 }
0x171e   :  { %v23747_v56 = vpop.eup %23746 }
0x171f   :  { %22982 = vmatmul.mubr.msk.f32.vlgmr.msra.gmra.mrb[196].mxu0 %vm373_vm0, %v15264_v52  ;;  %v15266_v4 = vmul.f32 %v23747_v56, %v27594_v18 }
0x1720   :  { %v23749_v49 = vpop.eup %23748  ;;  %22990 = vmatpush3.msra.mxu0 %v16333_v42  ;;  %v15340_v62 = vpop.f32.mrb[184].mxu0  ;;  %22991 = vmatprep.mubr.msk.f32.mxu0 %vm23907_vm1, %v28909_v55 }
0x1721   :  { %v22923_v38 = vpop.f32.mrb[185].mxu0  ;;  %v16759_v40 = vpop.permute.xlu0 %16758  ;;  %v15267_v51 = vmul.f32 %v23749_v49, %v27612_v7  ;;  %22999 = vmatprep.subr.msk.mxu0 %vm3261_vm3, %v27726_v2 }
0x1722   :  { %v16839_v63 = vpop.permute.xlu1 %16838 }
0x1723   :  { %22992 = vmatmul.mubr.msk.f32.vlgmr.msra.gmra.mrb[198].mxu0 %vm373_vm0, %v15266_v4  ;;  %22997 = vmatmul.mubr.msk.f32.vlgmr.msra.gmra.mrb[246].mxu1 %vm373_vm0, %v15267_v51 }
0x1724   :  { %23026 = vmatpush3.xpose.msk.msra.mxu1 %vm591_vm2, %v16683_v32  ;;  %v15416_v10 = vpop.f32.mrb[232].mxu1  ;;  %23001 = vmatprep.mubr.msk.f32.mxu0 %vm591_vm2, %v15340_v62 }
0x1725   :  { %v22928_v45 = vpop.f32.mrb[233].mxu1  ;;  %v16837_v25 = vpop.permute.xlu0 %16836  ;;  %23000 = vmatpush3.msk.msra.mxu0 %vm3261_vm3, %v27726_v2  ;;  %23027 = vmatprep.mubr.msk.f32.mxu1 %vm23907_vm1, %v28909_v55 }
0x1726   :  { %v16917_v18 = vpop.permute.xlu1 %16916  ;;  %23030 = vmatprep.subr.mxu1 %v28909_v55  ;;  %23065 = vmatprep.subr.mxu0 %v28909_v55 }
0x1727   :  { %23002 = vmatmul.mubr.msk.f32.vlgmr.msra.gmra.mrb[200].mxu0 %vm591_vm2, %v15416_v10  ;;  %23028 = vmatmul.mubr.msk.f32.vlgmr.msra.gmra.mrb[248].mxu1 %vm591_vm2, %v16681_v11 }
0x1728   :  { %23031 = vmatpush3.xpose.msk.msra.mxu1 %vm591_vm2, %v16761_v59  ;;  %23032 = vmatprep.mubr.msk.f32.mxu1 %vm23907_vm1, %v28909_v55 }
0x1729   :  { %v16915_v54 = vpop.permute.xlu0 %16914  ;;  %23035 = vmatprep.subr.mxu1 %v28909_v55 }
0x172a   :  { %v16995_v36 = vpop.permute.xlu1 %16994 }
0x172b   :  { %23033 = vmatmul.mubr.msk.f32.vlgmr.msra.gmra.mrb[250].mxu1 %vm591_vm2, %v16759_v40 }
0x172c   :  { %23036 = vmatpush3.xpose.msk.msra.mxu1 %vm591_vm2, %v16839_v63  ;;  %23037 = vmatprep.mubr.msk.f32.mxu1 %vm23907_vm1, %v28909_v55 }
0x172d   :  { %v16993_v7 = vpop.permute.xlu0 %16992  ;;  %23040 = vmatprep.subr.mxu1 %v28909_v55 }
0x172e   :  { %v17073_v41 = vpop.permute.xlu1 %17072 }
0x172f   :  { %23038 = vmatmul.mubr.msk.f32.vlgmr.msra.gmra.mrb[252].mxu1 %vm591_vm2, %v16837_v25 }
0x1730   :  { %23041 = vmatpush3.xpose.msk.msra.mxu1 %vm591_vm2, %v16917_v18  ;;  %23042 = vmatprep.mubr.msk.f32.mxu1 %vm23907_vm1, %v28909_v55 }
0x1731   :  { %v17071_v22 = vpop.permute.xlu0 %17070  ;;  %23045 = vmatprep.subr.mxu1 %v28909_v55 }
0x1732   :  { %v17151_v21 = vpop.permute.xlu1 %17150 }
0x1733   :  { %23043 = vmatmul.mubr.msk.f32.vlgmr.msra.gmra.mrb[254].mxu1 %vm591_vm2, %v16915_v54 }
0x1734   :  { %23046 = vmatpush3.xpose.msk.msra.mxu1 %vm591_vm2, %v16995_v36  ;;  %v15492_v30 = vpop.f32.mrb[186].mxu0  ;;  %23047 = vmatprep.mubr.msk.f32.mxu1 %vm23907_vm1, %v28909_v55 }
0x1735   :  { %v22933_v27 = vpop.f32.mrb[187].mxu0  ;;  %v17149_v20 = vpop.permute.xlu0 %17148  ;;  %23004 = vmatprep.mubr.msk.f32.mxu0 %vm591_vm2, %v15492_v30  ;;  %23050 = vmatprep.subr.mxu1 %v28909_v55 }
0x1736   :  { %v17229_v3 = vpop.permute.xlu1 %17228 }
0x1737   :  { %23048 = vmatmul.mubr.msk.f32.vlgmr.msra.gmra.mrb[0].mxu1 %vm591_vm2, %v16993_v7 }
0x1738   :  { %23051 = vmatpush3.xpose.msk.msra.mxu1 %vm591_vm2, %v17073_v41  ;;  %23052 = vmatprep.mubr.msk.f32.mxu1 %vm23907_vm1, %v28909_v55 }
0x1739   :  { %v17227_v50 = vpop.permute.xlu0 %17226  ;;  %23055 = vmatprep.subr.mxu1 %v28909_v55 }
0x173a   :  { %v17307_v16 = vpop.permute.xlu1 %17306 }
0x173b   :  { %23066 = vmatpush3.xpose.msk.msra.mxu0 %vm591_vm2, %v17307_v16  ;;  %23053 = vmatmul.mubr.msk.f32.vlgmr.msra.gmra.mrb[2].mxu1 %vm591_vm2, %v17071_v22 }
0x173c   :  { %23056 = vmatpush3.xpose.msk.msra.mxu1 %vm591_vm2, %v17151_v21  ;;  %23057 = vmatprep.mubr.msk.f32.mxu1 %vm23907_vm1, %v28909_v55 }
0x173d   :  { %v17385_v39 = vpop.permute.xlu0 %17384  ;;  %23060 = vmatprep.subr.mxu1 %v28909_v55  ;;  %23075 = vmatprep.subr.mxu0 %v28909_v55 }
0x173e   :  { %v27779_v6 = vpop.permute.xlu1 %17304 }
0x173f   :  { %23058 = vmatmul.mubr.msk.f32.vlgmr.msra.gmra.mrb[4].mxu1 %vm591_vm2, %v17149_v20 }
0x1740   :  { %23061 = vmatpush3.xpose.msk.msra.mxu1 %vm591_vm2, %v17229_v3  ;;  %23062 = vmatprep.mubr.msk.f32.mxu1 %vm23907_vm1, %v28909_v55 }
0x1741   :  { %v17383_v47 = vpop.permute.xlu0 %17382  ;;  %23070 = vmatprep.subr.mxu1 %v28909_v55 }
0x1742   :  { %v27786_v13 = vpop.permute.xlu1 %17462 }
0x1743   :  { %23063 = vmatmul.mubr.msk.f32.vlgmr.msra.gmra.mrb[6].mxu1 %vm591_vm2, %v17227_v50 }
0x1744   :  { %23071 = vmatpush3.xpose.msk.msra.mxu1 %vm591_vm2, %v17385_v39  ;;  %23072 = vmatprep.mubr.msk.f32.mxu1 %vm23907_vm1, %v28909_v55 }
0x1745   :  { %v17541_v17 = vpop.permute.xlu0 %17540  ;;  %23080 = vmatprep.subr.mxu1 %v28909_v55 }
0x1746   :  { %v27793_v44 = vpop.permute.xlu1 %17460 }
0x1747   :  { %23073 = vmatmul.mubr.msk.f32.vlgmr.msra.gmra.mrb[8].mxu1 %vm591_vm2, %v17383_v47 }
0x1748   :  { %23081 = vmatpush3.xpose.msk.msra.mxu1 %vm591_vm2, %v17541_v17  ;;  %23082 = vmatprep.mubr.msk.f32.mxu1 %vm23907_vm1, %v28909_v55 }
0x1749   :  { %v17539_v24 = vpop.permute.xlu0 %17538  ;;  %23090 = vmatprep.subr.mxu1 %v28909_v55 }
0x174a   :  { %v27800_v43 = vpop.permute.xlu1 %17618 }
0x174b   :  { %23083 = vmatmul.mubr.msk.f32.vlgmr.msra.gmra.mrb[10].mxu1 %vm591_vm2, %v17539_v24 }
0x174c   :  { %23092 = vmatprep.mubr.msk.f32.mxu1 %vm23907_vm1, %v28909_v55 }
0x174d   :  { %v17697_v53 = vpop.permute.xlu0 %17696 }
0x174e   :  { %v27805_v28 = vpop.permute.xlu1 %17616  ;;  %23091 = vmatpush3.xpose.msk.msra.mxu1 %vm591_vm2, %v17697_v53 }
0x174f   :  { %23100 = vmatprep.subr.mxu1 %v28909_v55 }
0x1750   :  { %v15568_v48 = vpop.f32.mrb[234].mxu1 }
0x1751   :  { %v17695_v61 = vpop.permute.xlu0 %17694  ;;  %v22938_v15 = vpop.f32.mrb[235].mxu1  ;;  %23005 = vmatmul.mubr.msk.f32.gmra.mrb[202].mxu0 %vm591_vm2, %v15568_v48 }
0x1752   :  { %v27810_v9 = vpop.permute.xlu1 %17774  ;;  %23093 = vmatmul.mubr.msk.f32.vlgmr.msra.gmra.mrb[12].mxu1 %vm591_vm2, %v17695_v61 }
0x1753   :  { %23102 = vmatprep.mubr.msk.f32.mxu1 %vm23907_vm1, %v28909_v55 }
0x1754   :  { %v15644_v42 = vpop.f32.mrb[188].mxu0  ;;  %v15720_v58 = vpop.f32.mrb[236].mxu1 }
0x1755   :  { %v17853_v23 = vpop.permute.xlu0 %17852  ;;  %v22943_v57 = vpop.f32.mrb[189].mxu0  ;;  %23007 = vmatprep.mubr.msk.f32.mxu0 %vm591_vm2, %v15644_v42 }
0x1756   :  { %v22948_v32 = vpop.f32.mrb[237].mxu1  ;;  %v27816_v29 = vpop.permute.xlu1 %17772  ;;  %23008 = vmatmul.mubr.msk.f32.gmra.mrb[204].mxu0 %vm591_vm2, %v15720_v58  ;;  %23101 = vmatpush3.xpose.msk.msra.mxu1 %vm591_vm2, %v17853_v23 }
0x1757   :  { %23110 = vmatprep.subr.mxu1 %v28909_v55 }
0x1759   :  { %v15796_v5 = vpop.f32.mrb[190].mxu0  ;;  %v15872_v11 = vpop.f32.mrb[238].mxu1 }
0x175a   :  { %v17851_v59 = vpop.permute.xlu0 %17850  ;;  %v22953_v52 = vpop.f32.mrb[191].mxu0  ;;  %23010 = vmatprep.mubr.msk.f32.mxu0 %vm591_vm2, %v15796_v5 }
0x175b   :  { %v22958_v56 = vpop.f32.mrb[239].mxu1  ;;  %v18181_v49 = vpop.permute.xlu1 %18180  ;;  %23011 = vmatmul.mubr.msk.f32.gmra.mrb[206].mxu0 %vm591_vm2, %v15872_v11  ;;  %23103 = vmatmul.mubr.msk.f32.vlgmr.msra.gmra.mrb[14].mxu1 %vm591_vm2, %v17851_v59 }
0x175c   :  { %23111 = vmatpush3.msra.mxu1 %v18181_v49  ;;  %23112 = vmatprep.mubr.msk.f32.mxu1 %vm23907_vm1, %v28909_v55 }
0x175d   :  { %23120 = vmatprep.subr.mxu1 %v28909_v55 }
0x175e   :  { %v18105_v24 = vpop.permute.xlu0 %18104 }
0x17de   :  { %v16024_v62 = vpop.f32.mrb[240].mxu1 }
0x17df   :  { %v22968_v38 = vpop.f32.mrb[241].mxu1 }
0x17e2   :  { %v15948_v40 = vpop.f32.mrb[192].mxu0 }
0x17e3   :  { %v22963_v4 = vpop.f32.mrb[193].mxu0  ;;  %23013 = vmatprep.mubr.msk.f32.mxu0 %vm591_vm2, %v15948_v40 }
0x17e4   :  { %23014 = vmatmul.mubr.msk.f32.gmra.mrb[208].mxu0 %vm591_vm2, %v16024_v62 }
0x17e6   :  { %v16176_v51 = vpop.f32.mrb[242].mxu1 }
0x17e7   :  { %v22978_v63 = vpop.f32.mrb[243].mxu1 }
0x17ea   :  { %v16100_v10 = vpop.f32.mrb[194].mxu0 }
0x17eb   :  { %v22973_v45 = vpop.f32.mrb[195].mxu0  ;;  %23016 = vmatprep.mubr.msk.f32.mxu0 %vm591_vm2, %v16100_v10 }
0x17ec   :  { %23017 = vmatmul.mubr.msk.f32.gmra.mrb[210].mxu0 %vm591_vm2, %v16176_v51 }
0x17ee   :  { %v16328_v25 = vpop.f32.mrb[244].mxu1 }
0x17ef   :  { %v22988_v18 = vpop.f32.mrb[245].mxu1 }
0x17f2   :  { %v16252_v54 = vpop.f32.mrb[196].mxu0 }
0x17f3   :  { %v22983_v36 = vpop.f32.mrb[197].mxu0  ;;  %23019 = vmatprep.mubr.msk.f32.mxu0 %vm591_vm2, %v16252_v54 }
0x17f4   :  { %23020 = vmatmul.mubr.msk.f32.gmra.mrb[212].mxu0 %vm591_vm2, %v16328_v25 }
0x17f6   :  { %v16404_v7 = vpop.f32.mrb[198].mxu0  ;;  %v16480_v41 = vpop.f32.mrb[246].mxu1 }
0x17f7   :  { %v22993_v22 = vpop.f32.mrb[199].mxu0  ;;  %v22998_v21 = vpop.f32.mrb[247].mxu1  ;;  %23022 = vmatprep.mubr.msk.f32.mxu0 %vm591_vm2, %v16404_v7 }
0x17f8   :  { %23023 = vmatmul.mubr.msk.f32.gmra.mrb[214].mxu0 %vm591_vm2, %v16480_v41 }
0x17f9   :  { %23067 = vmatprep.mubr.msk.f32.mxu0 %vm23907_vm1, %v28909_v55 }
0x17fa   :  { %v27837_v30 = vpop.f32.mrb[248].mxu1 }
0x17fb   :  { %v23029_v27 = vpop.f32.mrb[249].mxu1  ;;  %v17928_v20 = vsel %vm373_vm0, %v27837_v30, -inf }
0x17fc   :  { %17929 = vmax.xlane.f32.xlu1 %v17928_v20  ;;  %23068 = vmatmul.mubr.msk.f32.vlgmr.msra.gmra.mrb[216].mxu0 %vm591_vm2, %v27779_v6 }
0x17fd   :  { %23076 = vmatpush3.xpose.msk.msra.mxu0 %vm591_vm2, %v27786_v13  ;;  %23077 = vmatprep.mubr.msk.f32.mxu0 %vm23907_vm1, %v28909_v55 }
0x17fe   :  { %v27847_v3 = vpop.f32.mrb[250].mxu1  ;;  %23085 = vmatprep.subr.mxu0 %v28909_v55 }
0x17ff   :  { %v23034_v50 = vpop.f32.mrb[251].mxu1  ;;  %v17931_v16 = vsel %vm373_vm0, %v27847_v3, -inf }
0x1800   :  { %17932 = vmax.xlane.f32.xlu0 %v17931_v16  ;;  %23078 = vmatmul.mubr.msk.f32.vlgmr.msra.gmra.mrb[218].mxu0 %vm591_vm2, %v27793_v44 }
0x1801   :  { %23086 = vmatpush3.xpose.msk.msra.mxu0 %vm591_vm2, %v27800_v43  ;;  %23087 = vmatprep.mubr.msk.f32.mxu0 %vm23907_vm1, %v28909_v55 }
0x1802   :  { %v16910_v39 = vpop.f32.mrb[252].mxu1  ;;  %23095 = vmatprep.subr.mxu0 %v28909_v55 }
0x1803   :  { %v23039_v6 = vpop.f32.mrb[253].mxu1  ;;  %v17934_v47 = vsel %vm373_vm0, %v16910_v39, -inf }
0x1804   :  { %17935 = vmax.xlane.f32.xlu0 %v17934_v47  ;;  %23088 = vmatmul.mubr.msk.f32.vlgmr.msra.gmra.mrb[220].mxu0 %vm591_vm2, %v27805_v28 }
0x1805   :  { %23096 = vmatpush3.xpose.msk.msra.mxu0 %vm591_vm2, %v27810_v9  ;;  %23097 = vmatprep.mubr.msk.f32.mxu0 %vm23907_vm1, %v28909_v55 }
0x1806   :  { %v16988_v13 = vpop.f32.mrb[254].mxu1  ;;  %23105 = vmatprep.subr.mxu0 %v28909_v55 }
0x1807   :  { %v23044_v17 = vpop.f32.mrb[255].mxu1  ;;  %v17937_v44 = vsel %vm373_vm0, %v16988_v13, -inf }
0x1808   :  { %17938 = vmax.xlane.f32.xlu1 %v17937_v44  ;;  %23098 = vmatmul.mubr.msk.f32.vlgmr.msra.gmra.mrb[222].mxu0 %vm591_vm2, %v27816_v29 }
0x1809   :  { %23106 = vmatpush3.msra.mxu0 %v18105_v24  ;;  %23107 = vmatprep.mubr.msk.f32.mxu0 %vm23907_vm1, %v28909_v55 }
0x180a   :  { %v17066_v43 = vpop.f32.mrb[0].mxu1  ;;  %23115 = vmatprep.subr.mxu0 %v28909_v55 }
0x180b   :  { %v23049_v53 = vpop.f32.mrb[1].mxu1  ;;  %v17940_v28 = vsel %vm373_vm0, %v17066_v43, -inf }
0x180c   :  { %17941 = vmax.xlane.f32.xlu0 %v17940_v28 }
0x180e   :  { %v17144_v48 = vpop.f32.mrb[2].mxu1 }
0x180f   :  { %v23054_v61 = vpop.f32.mrb[3].mxu1  ;;  %v17943_v15 = vsel %vm373_vm0, %v17144_v48, -inf }
0x1810   :  { %17944 = vmax.xlane.f32.xlu1 %v17943_v15 }
0x1812   :  { %v17222_v9 = vpop.f32.mrb[4].mxu1 }
0x1813   :  { %v23059_v42 = vpop.f32.mrb[5].mxu1  ;;  %v17946_v58 = vsel %vm373_vm0, %v17222_v9, -inf }
0x1814   :  { %17947 = vmax.xlane.f32.xlu0 %v17946_v58 }
0x1816   :  { %v27876_v23 = vpop.f32.mrb[6].mxu1 }
0x1817   :  { %v23064_v57 = vpop.f32.mrb[7].mxu1  ;;  %v17949_v32 = vsel %vm373_vm0, %v27876_v23, -inf }
0x1818   :  { %17950 = vmax.xlane.f32.xlu1 %v17949_v32 }
0x181a   :  { %v27880_v29 = vpop.f32.mrb[8].mxu1 }
0x181b   :  { %v23074_v5 = vpop.f32.mrb[9].mxu1  ;;  %v17955_v11 = vsel %vm373_vm0, %v27880_v29, -inf }
0x181c   :  { %17956 = vmax.xlane.f32.xlu1 %v17955_v11 }
0x181e   :  { %v27884_v59 = vpop.f32.mrb[10].mxu1 }
0x181f   :  { %v23084_v52 = vpop.f32.mrb[11].mxu1  ;;  %v17961_v56 = vsel %vm373_vm0, %v27884_v59, -inf }
0x1820   :  { %17962 = vmax.xlane.f32.xlu1 %v17961_v56 }
0x1825   :  { %v27888_v49 = vpop.f32.mrb[12].mxu1 }
0x1826   :  { %v23094_v62 = vpop.f32.mrb[13].mxu1  ;;  %v17967_v38 = vsel %vm373_vm0, %v27888_v49, -inf }
0x1827   :  { %17968 = vmax.xlane.f32.xlu1 %v17967_v38 }
0x182e   :  { %v27892_v40 = vpop.f32.mrb[14].mxu1 }
0x182f   :  { %v23104_v4 = vpop.f32.mrb[15].mxu1  ;;  %v17973_v51 = vsel %vm373_vm0, %v27892_v40, -inf }
0x1830   :  { %17974 = vmax.xlane.f32.xlu1 %v17973_v51 }
0x1889   :  { %v17930_v63 = vpop.xlane.xlu1 %17929 }
0x188a   :  { %v17976_v10 = vsub.f32 %v27837_v30, %v17930_v63 }
0x188c   :  { %v17992_v45 = vmul.f32 1.442695, %v17976_v10 }
0x188d   :  { %v17933_v25 = vpop.xlane.xlu0 %17932 }
0x188e   :  { %23750 = vpow2.f32 %v17992_v45  ;;  %v17977_v18 = vsub.f32 %v27847_v3, %v17933_v25 }
0x1890   :  { %v17994_v54 = vmul.f32 1.442695, %v17977_v18 }
0x1891   :  { %v17936_v36 = vpop.xlane.xlu0 %17935 }
0x1892   :  { %23752 = vpow2.f32 %v17994_v54  ;;  %v17978_v7 = vsub.f32 %v16910_v39, %v17936_v36 }
0x1894   :  { %v17996_v41 = vmul.f32 1.442695, %v17978_v7 }
0x1895   :  { %v17939_v22 = vpop.xlane.xlu1 %17938 }
0x1896   :  { %23754 = vpow2.f32 %v17996_v41  ;;  %v17979_v21 = vsub.f32 %v16988_v13, %v17939_v22 }
0x1898   :  { %v27898_v27 = vpop.eup %23750  ;;  %v17998_v20 = vmul.f32 1.442695, %v17979_v21 }
0x1899   :  { %v17942_v50 = vpop.xlane.xlu0 %17941  ;;  %v18024_v30 = vsel %vm373_vm0, %v27898_v27, 0.0 }
0x189a   :  { %23756 = vpow2.f32 %v17998_v20  ;;  %v17980_v16 = vsub.f32 %v17066_v43, %v17942_v50  ;;  %18025 = vadd.xlane.f32.xlu0 %v18024_v30 }
0x189c   :  { %v27902_v6 = vpop.eup %23752  ;;  %v18000_v3 = vmul.f32 1.442695, %v17980_v16 }
0x189d   :  { %v17945_v47 = vpop.xlane.xlu1 %17944  ;;  %v18027_v39 = vsel %vm373_vm0, %v27902_v6, 0.0 }
0x189e   :  { %23758 = vpow2.f32 %v18000_v3  ;;  %v17981_v17 = vsub.f32 %v17144_v48, %v17945_v47  ;;  %18028 = vadd.xlane.f32.xlu1 %v18027_v39 }
0x18a0   :  { %v27906_v13 = vpop.eup %23754  ;;  %v18002_v44 = vmul.f32 1.442695, %v17981_v17 }
0x18a1   :  { %v17948_v24 = vpop.xlane.xlu0 %17947  ;;  %v18030_v53 = vsel %vm373_vm0, %v27906_v13, 0.0 }
0x18a2   :  { %23760 = vpow2.f32 %v18002_v44  ;;  %v17982_v43 = vsub.f32 %v17222_v9, %v17948_v24  ;;  %18031 = vadd.xlane.f32.xlu0 %v18030_v53 }
0x18a4   :  { %v27910_v28 = vpop.eup %23756  ;;  %v18004_v61 = vmul.f32 1.442695, %v17982_v43 }
0x18a5   :  { %v17951_v15 = vpop.xlane.xlu1 %17950  ;;  %v18033_v42 = vsel %vm373_vm0, %v27910_v28, 0.0 }
0x18a6   :  { %23762 = vpow2.f32 %v18004_v61  ;;  %v17983_v48 = vsub.f32 %v27876_v23, %v17951_v15  ;;  %18034 = vadd.xlane.f32.xlu1 %v18033_v42 }
0x18a8   :  { %v27915_v58 = vpop.eup %23758  ;;  %v18006_v57 = vmul.f32 1.442695, %v17983_v48 }
0x18a9   :  { %v17957_v32 = vpop.xlane.xlu1 %17956  ;;  %v18036_v5 = vsel %vm373_vm0, %v27915_v58, 0.0 }
0x18aa   :  { %23764 = vpow2.f32 %v18006_v57  ;;  %v17985_v9 = vsub.f32 %v27880_v29, %v17957_v32  ;;  %18037 = vadd.xlane.f32.xlu0 %v18036_v5 }
0x18ac   :  { %v27920_v11 = vpop.eup %23760  ;;  %v18010_v52 = vmul.f32 1.442695, %v17985_v9 }
0x18ad   :  { %v17963_v56 = vpop.xlane.xlu1 %17962  ;;  %v18039_v62 = vsel %vm373_vm0, %v27920_v11, 0.0 }
0x18ae   :  { %23766 = vpow2.f32 %v18010_v52  ;;  %v17987_v23 = vsub.f32 %v27884_v59, %v17963_v56  ;;  %18040 = vadd.xlane.f32.xlu1 %v18039_v62 }
0x18b0   :  { %v27925_v38 = vpop.eup %23762  ;;  %v18014_v4 = vmul.f32 1.442695, %v17987_v23 }
0x18b1   :  { %v18042_v51 = vsel %vm373_vm0, %v27925_v38, 0.0 }
0x18b2   :  { %23768 = vpow2.f32 %v18014_v4  ;;  %18043 = vadd.xlane.f32.xlu0 %v18042_v51 }
0x18b4   :  { %v27929_v29 = vpop.eup %23764  ;;  %v17969_v63 = vpop.xlane.xlu1 %17968 }
0x18b5   :  { %v17989_v10 = vsub.f32 %v27888_v49, %v17969_v63  ;;  %v18045_v45 = vsel %vm373_vm0, %v27929_v29, 0.0 }
0x18b6   :  { %18046 = vadd.xlane.f32.xlu1 %v18045_v45 }
0x18b7   :  { %v18018_v25 = vmul.f32 1.442695, %v17989_v10 }
0x18b8   :  { %v27934_v59 = vpop.eup %23766 }
0x18b9   :  { %23770 = vpow2.f32 %v18018_v25  ;;  %v18051_v18 = vsel %vm373_vm0, %v27934_v59, 0.0 }
0x18ba   :  { %18052 = vadd.xlane.f32.xlu1 %v18051_v18 }
0x18bc   :  { %v27938_v54 = vpop.eup %23768 }
0x18bd   :  { %v18057_v36 = vsel %vm373_vm0, %v27938_v54, 0.0  ;;  %v17975_v41 = vpop.xlane.xlu1 %17974 }
0x18be   :  { %18058 = vadd.xlane.f32.xlu1 %v18057_v36  ;;  %v17991_v22 = vsub.f32 %v27892_v40, %v17975_v41 }
0x18c0   :  { %v18022_v21 = vmul.f32 1.442695, %v17991_v22 }
0x18c2   :  { %23772 = vpow2.f32 %v18022_v21 }
0x18c3   :  { %v27942_v7 = vpop.eup %23770 }
0x18c4   :  { %v18063_v49 = vsel %vm373_vm0, %v27942_v7, 0.0 }
0x18c5   :  { %18064 = vadd.xlane.f32.xlu1 %v18063_v49 }
0x18cc   :  { %v27967_v43 = vpop.eup %23772 }
0x18cf   :  { %v27947_v20 = vpop.f32.mrb[216].mxu0 }
0x18d0   :  { %v23069_v50 = vpop.f32.mrb[217].mxu0  ;;  %v17952_v30 = vsel %vm373_vm0, %v27947_v20, -inf }
0x18d1   :  { %17953 = vmax.xlane.f32.xlu0 %v17952_v30 }
0x18d3   :  { %v27951_v16 = vpop.f32.mrb[218].mxu0 }
0x18d4   :  { %v23079_v3 = vpop.f32.mrb[219].mxu0  ;;  %v17958_v47 = vsel %vm373_vm0, %v27951_v16, -inf }
0x18d5   :  { %17959 = vmax.xlane.f32.xlu0 %v17958_v47 }
0x18d6   :  { %18332 = vrot.lane.b32.xlu1 %v27271_v34, %s23911_s21  ;;  %v18069_v34 = vsel %vm373_vm0, %v27967_v43, 0.0 }
0x18d7   :  { %v27957_v40 = vpop.f32.mrb[220].mxu0 }
0x18d8   :  { %v23089_v39 = vpop.f32.mrb[221].mxu0  ;;  %v17964_v17 = vsel %vm373_vm0, %v27957_v40, -inf }
0x18d9   :  { %17965 = vmax.xlane.f32.xlu0 %v17964_v17 }
0x18da   :  { %18408 = vrot.lane.b32.xlu1 %v27284_v12, %s23911_s21 }
0x18db   :  { %v27963_v44 = vpop.f32.mrb[222].mxu0 }
0x18dc   :  { %v23099_v24 = vpop.f32.mrb[223].mxu0  ;;  %v17970_v53 = vsel %vm373_vm0, %v27963_v44, -inf }
0x18dd   :  { %17971 = vmax.xlane.f32.xlu0 %v17970_v53 }
0x18de   :  { %18560 = vrot.lane.b32.xlu1 %v27316_v60, %s23911_s21 }
0x18e1   :  { %18070 = vadd.xlane.f32.xlu0 %v18069_v34 }
0x18e2   :  { %18712 = vrot.lane.b32.xlu1 %v27287_v26, %s23911_s21 }
0x18e6   :  { %18864 = vrot.lane.b32.xlu1 %v27361_v1, %s23911_s21 }
0x18ea   :  { %19016 = vrot.lane.b32.xlu1 %v27387_v33, %s23911_s21 }
0x18f7   :  { %18256 = vrot.lane.b32.xlu0 %v27258_v31, %s23911_s21 }
0x18fb   :  { %18484 = vrot.lane.b32.xlu0 %v27302_v35, %s23911_s21 }
0x18ff   :  { %18636 = vrot.lane.b32.xlu0 %v27329_v46, %s23911_s21 }
0x1903   :  { %18788 = vrot.lane.b32.xlu0 %v27342_v19, %s23911_s21 }
0x1907   :  { %18940 = vrot.lane.b32.xlu0 %v27355_v14, %s23911_s21 }
0x190b   :  { %19092 = vrot.lane.b32.xlu0 %v27381_v8, %s23911_s21 }
0x1927   :  { %v18026_v12 = vpop.xlane.xlu0 %18025 }
0x1928   :  { %23774 = vrcp.f32 %v18026_v12 }
0x192b   :  { %v18029_v26 = vpop.xlane.xlu1 %18028 }
0x192c   :  { %23776 = vrcp.f32 %v18029_v26 }
0x1932   :  { %v23775_v31 = vpop.eup %23774 }
0x1933   :  { %v18088_v60 = vmul.f32 %v23775_v31, %v27898_v27  ;;  %v18035_v19 = vpop.xlane.xlu1 %18034  ;;  %v18032_v27 = vpop.xlane.xlu0 %18031 }
0x1934   :  { %23778 = vrcp.f32 %v18035_v19 }
0x1935   :  { %23108 = vmatmul.mubr.msk.f32.vlgmr.msra.gmra.mrb[224].mxu0 %vm373_vm0, %v18088_v60 }
0x1936   :  { %v23777_v35 = vpop.eup %23776  ;;  %23117 = vmatprep.mubr.msk.f32.mxu0 %vm23907_vm1, %v28909_v55 }
0x1937   :  { %v18089_v46 = vmul.f32 %v23777_v35, %v27902_v6  ;;  %v18038_v48 = vpop.xlane.xlu0 %18037 }
0x1939   :  { %23113 = vmatmul.mubr.msk.f32.vlgmr.msra.gmra.mrb[16].mxu1 %vm373_vm0, %v18089_v46 }
0x193a   :  { %23122 = vmatprep.mubr.msk.f32.mxu1 %vm23907_vm1, %v28909_v55 }
0x193b   :  { %v18041_v14 = vpop.xlane.xlu1 %18040 }
0x193e   :  { %v23779_v15 = vpop.eup %23778 }
0x193f   :  { %v18091_v42 = vmul.f32 %v23779_v15, %v27910_v28  ;;  %v18044_v6 = vpop.xlane.xlu0 %18043 }
0x1943   :  { %v18047_v1 = vpop.xlane.xlu1 %18046 }
0x1947   :  { %v18053_v8 = vpop.xlane.xlu1 %18052 }
0x194b   :  { %v18059_v33 = vpop.xlane.xlu1 %18058 }
0x1952   :  { %v27999_v61 = vpop.xlane.xlu1 %18064 }
0x1956   :  { %v18333_v57 = vpop.permute.xlu1 %18332 }
0x1957   :  { %23121 = vmatpush3.msra.mxu1 %v18333_v57 }
0x1958   :  { %23123 = vmatmul.mubr.msk.f32.vlgmr.msra.gmra.mrb[18].mxu1 %vm373_vm0, %v18091_v42  ;;  %23130 = vmatprep.subr.mxu1 %v28909_v55 }
0x1959   :  { %23132 = vmatprep.mubr.msk.f32.mxu1 %vm23907_vm1, %v28909_v55 }
0x195a   :  { %v18409_v49 = vpop.permute.xlu1 %18408 }
0x195e   :  { %v17954_v32 = vpop.xlane.xlu0 %17953  ;;  %v18561_v47 = vpop.permute.xlu1 %18560 }
0x195f   :  { %v17984_v5 = vsub.f32 %v27947_v20, %v17954_v32 }
0x1961   :  { %v18008_v9 = vmul.f32 1.442695, %v17984_v5 }
0x1962   :  { %v17960_v52 = vpop.xlane.xlu0 %17959  ;;  %v18713_v26 = vpop.permute.xlu1 %18712 }
0x1963   :  { %23780 = vpow2.f32 %v18008_v9  ;;  %v17986_v56 = vsub.f32 %v27951_v16, %v17960_v52  ;;  %v19320_v9 = vrot.slane %v27726_v2, 4 }
0x1964   :  { %23782 = vrcp.f32 %v18032_v27 }
0x1965   :  { %v18012_v28 = vmul.f32 1.442695, %v17986_v56 }
0x1966   :  { %v17966_v62 = vpop.xlane.xlu0 %17965 }
0x1967   :  { %23784 = vpow2.f32 %v18012_v28  ;;  %v17988_v23 = vsub.f32 %v27957_v40, %v17966_v62 }
0x1968   :  { %23786 = vrcp.f32 %v18038_v48 }
0x1969   :  { %23788 = vrcp.f32 %v18041_v14  ;;  %v18016_v4 = vmul.f32 1.442695, %v17988_v23  ;;  %v18865_v14 = vpop.permute.xlu1 %18864 }
0x196a   :  { %v17972_v51 = vpop.xlane.xlu0 %17971 }
0x196b   :  { %23790 = vpow2.f32 %v18016_v4  ;;  %v17990_v63 = vsub.f32 %v27963_v44, %v17972_v51 }
0x196c   :  { %23792 = vrcp.f32 %v18044_v6 }
0x196d   :  { %v28010_v10 = vpop.eup %23780  ;;  %v18020_v45 = vmul.f32 1.442695, %v17990_v63  ;;  %23794 = vrcp.f32 %v18047_v1 }
0x196e   :  { %v28012_v25 = vpop.xlane.xlu0 %18070  ;;  %v18048_v18 = vsel %vm373_vm0, %v28010_v10, 0.0  ;;  %v23783_v36 = vpop.eup %23782 }
0x196f   :  { %23796 = vpow2.f32 %v18020_v45  ;;  %18049 = vadd.xlane.f32.xlu0 %v18048_v18  ;;  %v18090_v50 = vmul.f32 %v23783_v36, %v27906_v13 }
0x1970   :  { %23798 = vrcp.f32 %v18053_v8 }
0x1971   :  { %v28016_v41 = vpop.eup %23784  ;;  %23800 = vrcp.f32 %v18059_v33  ;;  %v19017_v33 = vpop.permute.xlu1 %19016 }
0x1972   :  { %v23787_v22 = vpop.eup %23786  ;;  %v18257_v21 = vpop.permute.xlu0 %18256  ;;  %v18054_v20 = vsel %vm373_vm0, %v28016_v41, 0.0  ;;  %23802 = vrcp.f32 %v27999_v61 }
0x1973   :  { %v23789_v30 = vpop.eup %23788  ;;  %18055 = vadd.xlane.f32.xlu0 %v18054_v20  ;;  %23116 = vmatpush3.msra.mxu0 %v18257_v21  ;;  %v18092_v39 = vmul.f32 %v23787_v22, %v27915_v58  ;;  %23804 = vrcp.f32 %v28012_v25 }
0x1974   :  { %23118 = vmatmul.mubr.msk.f32.vlgmr.msra.gmra.mrb[226].mxu0 %vm373_vm0, %v18090_v50  ;;  %23125 = vmatprep.subr.mxu0 %v28909_v55  ;;  %v18093_v3 = vmul.f32 %v23789_v30, %v27920_v11 }
0x1975   :  { %v28023_v16 = vpop.eup %23790  ;;  %23126 = vmatpush3.msra.mxu0 %v18409_v49  ;;  %23127 = vmatprep.mubr.msk.f32.mxu0 %vm23907_vm1, %v28909_v55 }
0x1976   :  { %v18485_v40 = vpop.permute.xlu0 %18484  ;;  %v18060_v13 = vsel %vm373_vm0, %v28023_v16, 0.0  ;;  %23135 = vmatprep.subr.mxu0 %v28909_v55  ;;  %v23793_v17 = vpop.eup %23792 }
0x1977   :  { %18061 = vadd.xlane.f32.xlu0 %v18060_v13  ;;  %23131 = vmatpush3.msra.mxu1 %v18485_v40  ;;  %v23795_v44 = vpop.eup %23794  ;;  %v18094_v58 = vmul.f32 %v23793_v17, %v27925_v38 }
0x1978   :  { %23128 = vmatmul.mubr.msk.f32.vlgmr.msra.gmra.mrb[228].mxu0 %vm373_vm0, %v18092_v39  ;;  %23133 = vmatmul.mubr.msk.f32.vlgmr.msra.gmra.mrb[20].mxu1 %vm373_vm0, %v18093_v3  ;;  %v18095_v34 = vmul.f32 %v23795_v44, %v27929_v29 }
0x1979   :  { %v28034_v24 = vpop.eup %23796  ;;  %23136 = vmatpush3.msra.mxu0 %v18561_v47  ;;  %23140 = vmatprep.subr.mxu1 %v28909_v55 }
0x197a   :  { %v18637_v11 = vpop.permute.xlu0 %18636  ;;  %v18066_v53 = vsel %vm373_vm0, %v28034_v24, 0.0  ;;  %23137 = vmatprep.mubr.msk.f32.mxu0 %vm23907_vm1, %v28909_v55  ;;  %23142 = vmatprep.mubr.msk.f32.mxu1 %vm23907_vm1, %v28909_v55  ;;  %v23799_v12 = vpop.eup %23798 }
0x197b   :  { %18067 = vadd.xlane.f32.xlu1 %v18066_v53  ;;  %23141 = vmatpush3.msra.mxu1 %v18637_v11  ;;  %v18097_v38 = vmul.f32 %v23799_v12, %v27934_v59  ;;  %v23801_v29 = vpop.eup %23800  ;;  %v28115_v53 = vld [vmem:[%s28823_s7 + $0xd] ss:$0 sm:$0xff] }
0x197c   :  { %23145 = vmatprep.subr.mxu0 %v28909_v55  ;;  %23138 = vmatmul.mubr.msk.f32.vlgmr.msra.gmra.mrb[230].mxu0 %vm373_vm0, %v18094_v58  ;;  %v18099_v35 = vmul.f32 %v23801_v29, %v27938_v54  ;;  %v23803_v46 = vpop.eup %23802  ;;  %v29025_v29 = vld [vmem:[#allocation37_spill] sm:$0xff] }
0x197d   :  { %23143 = vmatmul.mubr.msk.f32.vlgmr.msra.gmra.mrb[22].mxu1 %vm373_vm0, %v18095_v34  ;;  %23146 = vmatpush3.msra.mxu0 %v18713_v26  ;;  %v18101_v19 = vmul.f32 %v23803_v46, %v27942_v7  ;;  %v23805_v8 = vpop.eup %23804 }
0x197e   :  { %v18789_v31 = vpop.permute.xlu0 %18788  ;;  %23150 = vmatprep.subr.mxu1 %v28909_v55  ;;  %23152 = vmatprep.mubr.msk.f32.mxu1 %vm23907_vm1, %v28909_v55  ;;  %v18103_v61 = vmul.f32 %v23805_v8, %v27967_v43  ;;  %v29027_v8 = vld [vmem:[#allocation35_spill] sm:$0xff] }
0x197f   :  { %23151 = vmatpush3.msra.mxu1 %v18789_v31  ;;  %23147 = vmatprep.mubr.msk.f32.mxu0 %vm23907_vm1, %v28909_v55  ;;  %v29024_v31 = vld [vmem:[#allocation14_spill] sm:$0xff] }
0x1980   :  { %23160 = vmatprep.subr.mxu1 %v28909_v55  ;;  %23155 = vmatprep.subr.mxu0 %v28909_v55 }
0x1981   :  { %23153 = vmatmul.mubr.msk.f32.vlgmr.msra.gmra.mrb[24].mxu1 %vm373_vm0, %v18097_v38 }
0x1982   :  { %v18941_v60 = vpop.permute.xlu0 %18940  ;;  %23162 = vmatprep.mubr.msk.f32.mxu1 %vm23907_vm1, %v28909_v55 }
0x1983   :  { %23161 = vmatpush3.msra.mxu1 %v18941_v60 }
0x1984   :  { %23170 = vmatprep.subr.mxu1 %v28909_v55 }
0x1985   :  { %23163 = vmatmul.mubr.msk.f32.vlgmr.msra.gmra.mrb[26].mxu1 %vm373_vm0, %v18099_v35 }
0x1986   :  { %v19093_v59 = vpop.permute.xlu0 %19092  ;;  %23172 = vmatprep.mubr.msk.f32.mxu1 %vm23907_vm1, %v28909_v55 }
0x1987   :  { %23171 = vmatpush3.msra.mxu1 %v19093_v59 }
0x1988   :  { %23180 = vmatprep.subr.mxu1 %v28909_v55 }
0x1989   :  { %23173 = vmatmul.mubr.msk.f32.vlgmr.msra.gmra.mrb[28].mxu1 %vm373_vm0, %v18101_v19 }
0x198a   :  { %23182 = vmatprep.mubr.msk.f32.mxu1 %vm23907_vm1, %v28909_v55 }
0x198c   :  { %19168 = vrot.lane.b32.xlu1 %v27413_v0, %s23911_s21 }
0x198d   :  { %19244 = vrot.lane.b32.xlu0 %v27407_v37, %s23911_s21 }
0x19fc   :  { %v18050_v54 = vpop.xlane.xlu0 %18049 }
0x19fd   :  { %23806 = vrcp.f32 %v18050_v54 }
0x1a00   :  { %v18056_v7 = vpop.xlane.xlu0 %18055 }
0x1a01   :  { %23808 = vrcp.f32 %v18056_v7  ;;  %v29026_v7 = vld [vmem:[#allocation8_spill] sm:$0xff] }
0x1a04   :  { %v18062_v1 = vpop.xlane.xlu0 %18061 }
0x1a05   :  { %23810 = vrcp.f32 %v18062_v1 }
0x1a07   :  { %v23807_v27 = vpop.eup %23806 }
0x1a08   :  { %v18096_v15 = vmul.f32 %v23807_v27, %v28010_v10  ;;  %v18176_v0 = vpop.f32.mrb[224].mxu0  ;;  %v19245_v42 = vpop.permute.xlu0 %19244 }
0x1a09   :  { %v18068_v48 = vpop.xlane.xlu1 %18067  ;;  %v23109_v37 = vpop.f32.mrb[225].mxu0  ;;  %23181 = vmatpush3.msra.mxu1 %v19245_v42 }
0x1a0a   :  { %23812 = vrcp.f32 %v18068_v48  ;;  %23148 = vmatmul.mubr.msk.f32.vlgmr.msra.gmra.mrb[232].mxu0 %vm373_vm0, %v18096_v15  ;;  %23183 = vmatmul.mubr.msk.f32.vlgmr.msra.gmra.mrb[30].mxu1 %vm373_vm0, %v18103_v61  ;;  %v29028_v37 = vld [vmem:[#allocation36_spill] sm:$0xff] }
0x1a0b   :  { %v23809_v57 = vpop.eup %23808  ;;  %23156 = vmatpush3.msra.mxu0 %v18865_v14  ;;  %23157 = vmatprep.mubr.msk.f32.mxu0 %vm23907_vm1, %v28909_v55 }
0x1a0c   :  { %v18098_v6 = vmul.f32 %v23809_v57, %v28016_v41  ;;  %v18252_v43 = vpop.f32.mrb[16].mxu1  ;;  %23165 = vmatprep.subr.mxu0 %v28909_v55 }
0x1a0d   :  { %v23114_v32 = vpop.f32.mrb[17].mxu1  ;;  %v19169_v56 = vpop.permute.xlu1 %19168 }
0x1a0e   :  { %23158 = vmatmul.mubr.msk.f32.vlgmr.msra.gmra.mrb[234].mxu0 %vm373_vm0, %v18098_v6  ;;  %v29029_v6 = vld [vmem:[#allocation39_spill] sm:$0xff] }
0x1a0f   :  { %v23811_v5 = vpop.eup %23810  ;;  %23166 = vmatpush3.msra.mxu0 %v19017_v33  ;;  %23167 = vmatprep.mubr.msk.f32.mxu0 %vm23907_vm1, %v28909_v55 }
0x1a10   :  { %v18100_v52 = vmul.f32 %v23811_v5, %v28023_v16  ;;  %23175 = vmatprep.subr.mxu0 %v28909_v55 }
0x1a12   :  { %23168 = vmatmul.mubr.msk.f32.vlgmr.msra.gmra.mrb[236].mxu0 %vm373_vm0, %v18100_v52 }
0x1a13   :  { %23176 = vmatpush3.msra.mxu0 %v19169_v56  ;;  %23177 = vmatprep.mubr.msk.f32.mxu0 %vm23907_vm1, %v28909_v55  ;;  %vm20726_vm1 = vcmask 851712  }
0x1a14   :  { %v23813_v28 = vpop.eup %23812  ;;  %23185 = vmatprep.subr.msk.mxu0 %vm3261_vm3, %v19320_v9 }
0x1a15   :  { %v18102_v62 = vmul.f32 %v23813_v28, %v28034_v24 }
0x1a17   :  { %23178 = vmatmul.mubr.msk.f32.vlgmr.msra.gmra.mrb[238].mxu0 %vm373_vm0, %v18102_v62  ;;  %v29030_v62 = vld [vmem:[#allocation12_spill] sm:$0xff] }
0x1a18   :  { %23187 = vmatprep.mubr.msk.f32.mxu0 %vm591_vm2, %v18176_v0  ;;  %23186 = vmatpush3.msk.msra.mxu0 %vm3261_vm3, %v19320_v9  ;;  %vm20740_vm3 = vcmask 982912  }
0x1a1b   :  { %23188 = vmatmul.mubr.msk.f32.vlgmr.msra.gmra.mrb[200].mxu0 %vm591_vm2, %v18252_v43 }
0x1a2b   :  { %v18404_v2 = vpop.f32.mrb[18].mxu1 }
0x1a2c   :  { %v23124_v23 = vpop.f32.mrb[19].mxu1 }
0x1a2d   :  { %v29031_v23 = vld [vmem:[#allocation16_spill] sm:$0xff] }
0x1a47   :  { %v18328_v4 = vpop.f32.mrb[226].mxu0 }
0x1a48   :  { %v23119_v51 = vpop.f32.mrb[227].mxu0  ;;  %23190 = vmatprep.mubr.msk.f32.mxu0 %vm591_vm2, %v18328_v4 }
0x1a49   :  { %23191 = vmatmul.mubr.msk.f32.gmra.mrb[202].mxu0 %vm591_vm2, %v18404_v2 }
0x1a4b   :  { %v18480_v55 = vpop.f32.mrb[228].mxu0  ;;  %v18556_v63 = vpop.f32.mrb[20].mxu1 }
0x1a4c   :  { %v23129_v10 = vpop.f32.mrb[229].mxu0  ;;  %v23134_v45 = vpop.f32.mrb[21].mxu1  ;;  %23193 = vmatprep.mubr.msk.f32.mxu0 %vm591_vm2, %v18480_v55 }
0x1a4d   :  { %23194 = vmatmul.mubr.msk.f32.gmra.mrb[204].mxu0 %vm591_vm2, %v18556_v63 }
0x1a4f   :  { %v18632_v25 = vpop.f32.mrb[230].mxu0 }
0x1a50   :  { %v18708_v18 = vpop.f32.mrb[22].mxu1  ;;  %v23139_v36 = vpop.f32.mrb[231].mxu0  ;;  %23196 = vmatprep.mubr.msk.f32.mxu0 %vm591_vm2, %v18632_v25 }
0x1a51   :  { %v23144_v49 = vpop.f32.mrb[23].mxu1  ;;  %23197 = vmatmul.mubr.msk.f32.gmra.mrb[206].mxu0 %vm591_vm2, %v18708_v18  ;;  %v29032_v36 = vld [vmem:[#allocation15_spill] sm:$0xff] }
0x1a54   :  { %v18860_v41 = vpop.f32.mrb[24].mxu1 }
0x1a55   :  { %v23154_v22 = vpop.f32.mrb[25].mxu1 }
0x1a56   :  { %v29033_v22 = vld [vmem:[#allocation42_spill] sm:$0xff] }
0x1a58   :  { %v19012_v21 = vpop.f32.mrb[26].mxu1 }
0x1a59   :  { %v23164_v20 = vpop.f32.mrb[27].mxu1 }
0x1a5c   :  { %v19164_v50 = vpop.f32.mrb[28].mxu1 }
0x1a5d   :  { %v23174_v30 = vpop.f32.mrb[29].mxu1 }
0x1add   :  { %v18784_v16 = vpop.f32.mrb[232].mxu0  ;;  %v19316_v3 = vpop.f32.mrb[30].mxu1 }
0x1ade   :  { %v23149_v47 = vpop.f32.mrb[233].mxu0  ;;  %v23184_v40 = vpop.f32.mrb[31].mxu1  ;;  %23199 = vmatprep.mubr.msk.f32.mxu0 %vm591_vm2, %v18784_v16 }
0x1adf   :  { %23200 = vmatmul.mubr.msk.f32.gmra.mrb[208].mxu0 %vm591_vm2, %v18860_v41 }
0x1ae1   :  { %v18936_v13 = vpop.f32.mrb[234].mxu0 }
0x1ae2   :  { %v23159_v39 = vpop.f32.mrb[235].mxu0  ;;  %23202 = vmatprep.mubr.msk.f32.mxu0 %vm591_vm2, %v18936_v13  ;;  %v29034_v13 = vld [vmem:[#allocation41_spill] sm:$0xff] }
0x1ae3   :  { %23203 = vmatmul.mubr.msk.f32.gmra.mrb[210].mxu0 %vm591_vm2, %v19012_v21 }
0x1ae5   :  { %v19088_v17 = vpop.f32.mrb[236].mxu0 }
0x1ae6   :  { %v23169_v44 = vpop.f32.mrb[237].mxu0  ;;  %23205 = vmatprep.mubr.msk.f32.mxu0 %vm591_vm2, %v19088_v17 }
0x1ae7   :  { %23206 = vmatmul.mubr.msk.f32.gmra.mrb[212].mxu0 %vm591_vm2, %v19164_v50  ;;  %v29035_v44 = vld [vmem:[#allocation38_spill] sm:$0xff] }
0x1aea   :  { %v19240_v24 = vpop.f32.mrb[238].mxu0 }
0x1aeb   :  { %v23179_v11 = vpop.f32.mrb[239].mxu0  ;;  %23208 = vmatprep.mubr.msk.f32.mxu0 %vm591_vm2, %v19240_v24 }
0x1aec   :  { %23209 = vmatmul.mubr.msk.f32.gmra.mrb[214].mxu0 %vm591_vm2, %v19316_v3  ;;  %vm20733_vm2 = vcmask 917312  }
0x1aee   :  { %v23189_v58 = vpop.f32.mrb[200].mxu0 }
0x1aef   :  { %v19538_v34 = vadd.f32 %v23189_v58, %v28115_v53  ;;  %v19437_v12 = vpop.f32.mrb[201].mxu0 }
0x1af0   :  { %v19537_v26 = vadd.f32 %v28115_v53, %v19437_v12 }
0x1af1   :  { %v28120_v38 = vadd.f32 %v19538_v34, %v29024_v31 }
0x1af2   :  { %v28123_v60 = vadd.f32 %v19537_v26, %v29025_v29 }
0x1af3   :  { %v19572_v35 = vsel %vm373_vm0, %v28120_v38, 0.0 }
0x1af4   :  { %19573 = vadd.xlane.f32.xlu0 %v19572_v35  ;;  %v19569_v46 = vsel %vm373_vm0, %v28123_v60, 0.0 }
0x1af5   :  { %19570 = vadd.xlane.f32.xlu1 %v19569_v46  ;;  %v29036_v46 = vld [vmem:[#allocation6_spill] sm:$0xff] }
0x1b1c   :  { %v23192_v59 = vpop.f32.mrb[202].mxu0 }
0x1b1d   :  { %v19540_v19 = vadd.f32 %v23192_v59, %v28115_v53  ;;  %v19447_v54 = vpop.f32.mrb[203].mxu0 }
0x1b1e   :  { %v19539_v14 = vadd.f32 %v28115_v53, %v19447_v54 }
0x1b1f   :  { %v28132_v1 = vadd.f32 %v19540_v19, %v29026_v7  ;;  %v29037_v19 = vld [vmem:[#allocation7_spill] sm:$0xff] }
0x1b20   :  { %v28135_v33 = vadd.f32 %v19539_v14, %v29027_v8  ;;  %v23195_v27 = vpop.f32.mrb[204].mxu0 }
0x1b21   :  { %v19542_v61 = vadd.f32 %v23195_v27, %v28115_v53  ;;  %v19457_v15 = vpop.f32.mrb[205].mxu0  ;;  %v19578_v0 = vsel %vm373_vm0, %v28132_v1, 0.0 }
0x1b22   :  { %v19541_v42 = vadd.f32 %v28115_v53, %v19457_v15  ;;  %19579 = vadd.xlane.f32.xlu1 %v19578_v0  ;;  %v19575_v48 = vsel %vm373_vm0, %v28135_v33, 0.0 }
0x1b23   :  { %v28144_v57 = vadd.f32 %v19542_v61, %v29028_v37  ;;  %19576 = vadd.xlane.f32.xlu0 %v19575_v48 }
0x1b24   :  { %v28147_v43 = vadd.f32 %v19541_v42, %v29029_v6  ;;  %v23198_v32 = vpop.f32.mrb[206].mxu0 }
0x1b25   :  { %v19544_v5 = vadd.f32 %v23198_v32, %v28115_v53  ;;  %v19467_v9 = vpop.f32.mrb[207].mxu0  ;;  %v19584_v52 = vsel %vm373_vm0, %v28144_v57, 0.0 }
0x1b26   :  { %v19543_v56 = vadd.f32 %v28115_v53, %v19467_v9  ;;  %19585 = vadd.xlane.f32.xlu1 %v19584_v52  ;;  %v19581_v28 = vsel %vm373_vm0, %v28147_v43, 0.0 }
0x1b27   :  { %v28156_v2 = vadd.f32 %v19544_v5, %v29030_v62  ;;  %19582 = vadd.xlane.f32.xlu0 %v19581_v28  ;;  %v29038_v5 = vld [vmem:[#allocation9_spill] sm:$0xff] }
0x1b28   :  { %v28159_v4 = vadd.f32 %v19543_v56, %v29031_v23 }
0x1b29   :  { %v19590_v51 = vsel %vm373_vm0, %v28156_v2, 0.0 }
0x1b2a   :  { %19591 = vadd.xlane.f32.xlu1 %v19590_v51  ;;  %v19587_v55 = vsel %vm373_vm0, %v28159_v4, 0.0 }
0x1b2b   :  { %19588 = vadd.xlane.f32.xlu0 %v19587_v55 }
0x1b81   :  { %v19574_v41 = vpop.xlane.xlu0 %19573 }
0x1b82   :  { %v19571_v18 = vpop.xlane.xlu1 %19570  ;;  %v19618_v26 = vmul.f32 0.125, %v19574_v41 }
0x1b83   :  { %v19617_v35 = vmul.f32 0.125, %v19571_v18 }
0x1b84   :  { %v28200_v27 = vsub.f32 %v28120_v38, %v19618_v26  ;;  %v29039_v38 = vld [vmem:[#allocation40_spill] sm:$0xff] }
0x1b85   :  { %v28206_v37 = vsub.f32 %v28123_v60, %v19617_v35 }
0x1b86   :  { %v19650_v60 = vmul.f32 %v28200_v27, %v28200_v27 }
0x1baf   :  { %v19580_v40 = vpop.xlane.xlu1 %19579 }
0x1bb0   :  { %v19577_v17 = vpop.xlane.xlu0 %19576  ;;  %v19620_v61 = vmul.f32 0.125, %v19580_v40 }
0x1bb1   :  { %v19619_v6 = vmul.f32 0.125, %v19577_v17  ;;  %v21273_v17 = vld [vmem:[%s28821_s5 + $0x8] sm:$0xff] }
0x1bb2   :  { %v23201_v63 = vpop.f32.mrb[208].mxu0  ;;  %v28216_v56 = vsub.f32 %v28132_v1, %v19620_v61  ;;  %v19649_v1 = vmul.f32 %v28206_v37, %v28206_v37  ;;  %23211 = vmatprep.subr.mxu1 %v21273_v17 }
0x1bb3   :  { %v19546_v10 = vadd.f32 %v23201_v63, %v28115_v53  ;;  %v19477_v45 = vpop.f32.mrb[209].mxu0  ;;  %v19586_v14 = vpop.xlane.xlu1 %19585  ;;  %v28223_v23 = vsub.f32 %v28135_v33, %v19619_v6  ;;  %23212 = vmatpush3.msra.mxu1 %v21273_v17 }
0x1bb4   :  { %v19545_v25 = vadd.f32 %v28115_v53, %v19477_v45  ;;  %v19583_v15 = vpop.xlane.xlu0 %19582  ;;  %v19622_v28 = vmul.f32 0.125, %v19586_v14  ;;  %v19652_v33 = vmul.f32 %v28216_v56, %v28216_v56  ;;  %v19665_v41 = vsel %vm373_vm0, %v19649_v1, 0.0 }
0x1bb5   :  { %v28168_v49 = vadd.f32 %v19546_v10, %v29032_v36 }
0x1bb6   :  { %v28171_v21 = vadd.f32 %v19545_v25, %v29033_v22  ;;  %v23204_v20 = vpop.f32.mrb[210].mxu0  ;;  %v28230_v10 = vsub.f32 %v28144_v57, %v19622_v28  ;;  %v19668_v25 = vsel %vm373_vm0, %v19650_v60, 0.0  ;;  %v19651_v22 = vmul.f32 %v28223_v23, %v28223_v23 }
0x1bb7   :  { %v19548_v50 = vadd.f32 %v23204_v20, %v28115_v53  ;;  %v19487_v30 = vpop.f32.mrb[211].mxu0  ;;  %v19596_v16 = vsel %vm373_vm0, %v28168_v49, 0.0  ;;  %v19592_v51 = vpop.xlane.xlu1 %19591  ;;  %v19674_v20 = vsel %vm373_vm0, %v19652_v33, 0.0 }
0x1bb8   :  { %v19547_v3 = vadd.f32 %v28115_v53, %v19487_v30  ;;  %19597 = vadd.xlane.f32.xlu1 %v19596_v16  ;;  %v19593_v47 = vsel %vm373_vm0, %v28171_v21, 0.0  ;;  %v19589_v63 = vpop.xlane.xlu0 %19588  ;;  %v19624_v45 = vmul.f32 0.125, %v19592_v51 }
0x1bb9   :  { %v28180_v39 = vadd.f32 %v19548_v50, %v29034_v13  ;;  %19594 = vadd.xlane.f32.xlu0 %v19593_v47  ;;  %v19623_v36 = vmul.f32 0.125, %v19589_v63  ;;  %v19654_v50 = vmul.f32 %v28230_v10, %v28230_v10 }
0x1bba   :  { %v28183_v24 = vadd.f32 %v19547_v3, %v29035_v44  ;;  %v23207_v11 = vpop.f32.mrb[212].mxu0  ;;  %v28242_v57 = vsub.f32 %v28156_v2, %v19624_v45 }
0x1bbb   :  { %v19550_v58 = vadd.f32 %v23207_v11, %v28115_v53  ;;  %v19497_v34 = vpop.f32.mrb[213].mxu0  ;;  %v19602_v12 = vsel %vm373_vm0, %v28180_v39, 0.0  ;;  %v28248_v30 = vsub.f32 %v28159_v4, %v19623_v36  ;;  %v19680_v3 = vsel %vm373_vm0, %v19654_v50, 0.0 }
0x1bbc   :  { %v19549_v31 = vadd.f32 %v28115_v53, %v19497_v34  ;;  %19603 = vadd.xlane.f32.xlu1 %v19602_v12  ;;  %v19599_v29 = vsel %vm373_vm0, %v28183_v24, 0.0  ;;  %v19656_v2 = vmul.f32 %v28242_v57, %v28242_v57 }
0x1bbd   :  { %v28192_v59 = vadd.f32 %v19550_v58, %v29036_v46  ;;  %19600 = vadd.xlane.f32.xlu0 %v19599_v29  ;;  %v19655_v40 = vmul.f32 %v28248_v30, %v28248_v30 }
0x1bbe   :  { %v28195_v54 = vadd.f32 %v19549_v31, %v29037_v19  ;;  %v19686_v4 = vsel %vm373_vm0, %v19656_v2, 0.0 }
0x1bbf   :  { %v23210_v7 = vpop.f32.mrb[214].mxu0  ;;  %v19608_v8 = vsel %vm373_vm0, %v28192_v59, 0.0  ;;  %v19683_v13 = vsel %vm373_vm0, %v19655_v40, 0.0 }
0x1bc0   :  { %v19552_v0 = vadd.f32 %v23210_v7, %v28115_v53  ;;  %v19507_v42 = vpop.f32.mrb[215].mxu0  ;;  %19609 = vadd.xlane.f32.xlu1 %v19608_v8  ;;  %v19605_v48 = vsel %vm373_vm0, %v28195_v54, 0.0 }
0x1bc1   :  { %v19551_v32 = vadd.f32 %v28115_v53, %v19507_v42  ;;  %19606 = vadd.xlane.f32.xlu0 %v19605_v48  ;;  %v19621_v53 = vmul.f32 0.125, %v19583_v15 }
0x1bc2   :  { %v28210_v9 = vadd.f32 %v19552_v0, %v29038_v5 }
0x1bc3   :  { %v28213_v52 = vadd.f32 %v19551_v32, %v29039_v38  ;;  %v28236_v18 = vsub.f32 %v28147_v43, %v19621_v53  ;;  %v19671_v43 = vsel %vm373_vm0, %v19651_v22, 0.0 }
0x1bc4   :  { %v19614_v62 = vsel %vm373_vm0, %v28210_v9, 0.0 }
0x1bc5   :  { %19615 = vadd.xlane.f32.xlu1 %v19614_v62  ;;  %v19611_v55 = vsel %vm373_vm0, %v28213_v52, 0.0  ;;  %v19653_v16 = vmul.f32 %v28236_v18, %v28236_v18 }
0x1bc6   :  { %19612 = vadd.xlane.f32.xlu0 %v19611_v55 }
0x1bc7   :  { %v19677_v47 = vsel %vm373_vm0, %v19653_v16, 0.0 }
0x1bc9   :  { %19669 = vadd.xlane.f32.xlu1 %v19668_v25 }
0x1bca   :  { %19666 = vadd.xlane.f32.xlu0 %v19665_v41 }
0x1bcd   :  { %19675 = vadd.xlane.f32.xlu1 %v19674_v20 }
0x1bce   :  { %19672 = vadd.xlane.f32.xlu0 %v19671_v43 }
0x1bd1   :  { %19681 = vadd.xlane.f32.xlu1 %v19680_v3 }
0x1bd2   :  { %19678 = vadd.xlane.f32.xlu0 %v19677_v47 }
0x1bd5   :  { %19687 = vadd.xlane.f32.xlu1 %v19686_v4 }
0x1bd6   :  { %19684 = vadd.xlane.f32.xlu0 %v19683_v13 }
0x1c45   :  { %v19598_v44 = vpop.xlane.xlu1 %19597 }
0x1c46   :  { %v19626_v11 = vmul.f32 0.125, %v19598_v44  ;;  %v19595_v58 = vpop.xlane.xlu0 %19594 }
0x1c47   :  { %v19625_v34 = vmul.f32 0.125, %v19595_v58 }
0x1c48   :  { %v28265_v12 = vsub.f32 %v28168_v49, %v19626_v11 }
0x1c49   :  { %v28268_v26 = vsub.f32 %v28171_v21, %v19625_v34  ;;  %v19604_v31 = vpop.xlane.xlu1 %19603 }
0x1c4a   :  { %v19628_v29 = vmul.f32 0.125, %v19604_v31  ;;  %v19601_v35 = vpop.xlane.xlu0 %19600  ;;  %v19658_v46 = vmul.f32 %v28265_v12, %v28265_v12 }
0x1c4b   :  { %v19627_v19 = vmul.f32 0.125, %v19601_v35  ;;  %v19657_v14 = vmul.f32 %v28268_v26, %v28268_v26 }
0x1c4c   :  { %v28275_v7 = vsub.f32 %v28180_v39, %v19628_v29  ;;  %v19692_v8 = vsel %vm373_vm0, %v19658_v46, 0.0  ;;  %v28315_v46 = vld [vmem:[%s28823_s7 + $0x12] ss:$0 sm:$0xff] }
0x1c4d   :  { %v28279_v49 = vsub.f32 %v28183_v24, %v19627_v19  ;;  %v19610_v21 = vpop.xlane.xlu1 %19609  ;;  %19693 = vadd.xlane.f32.xlu1 %v19692_v8  ;;  %v19689_v61 = vsel %vm373_vm0, %v19657_v14, 0.0 }
0x1c4e   :  { %v19630_v15 = vmul.f32 0.125, %v19610_v21  ;;  %v19607_v0 = vpop.xlane.xlu0 %19606  ;;  %19690 = vadd.xlane.f32.xlu0 %v19689_v61  ;;  %v19660_v42 = vmul.f32 %v28275_v7, %v28275_v7 }
0x1c4f   :  { %v19629_v48 = vmul.f32 0.125, %v19607_v0  ;;  %v19659_v39 = vmul.f32 %v28279_v49, %v28279_v49 }
0x1c50   :  { %v28287_v6 = vsub.f32 %v28192_v59, %v19630_v15  ;;  %v19698_v24 = vsel %vm373_vm0, %v19660_v42, 0.0  ;;  %v28322_v15 = vld [vmem:[%s28823_s7 + $0x13] ss:$0 sm:$0xff] }
0x1c51   :  { %v28291_v32 = vsub.f32 %v28195_v54, %v19629_v48  ;;  %19699 = vadd.xlane.f32.xlu1 %v19698_v24  ;;  %v19695_v5 = vsel %vm373_vm0, %v19659_v39, 0.0 }
0x1c52   :  { %v19616_v38 = vpop.xlane.xlu1 %19615  ;;  %19696 = vadd.xlane.f32.xlu0 %v19695_v5  ;;  %v19662_v28 = vmul.f32 %v28287_v6, %v28287_v6 }
0x1c53   :  { %v19632_v62 = vmul.f32 0.125, %v19616_v38  ;;  %v19613_v60 = vpop.xlane.xlu0 %19612  ;;  %v19661_v53 = vmul.f32 %v28291_v32, %v28291_v32 }
0x1c54   :  { %v19631_v59 = vmul.f32 0.125, %v19613_v60  ;;  %v19704_v51 = vsel %vm373_vm0, %v19662_v28, 0.0 }
0x1c55   :  { %v28300_v55 = vsub.f32 %v28210_v9, %v19632_v62  ;;  %19705 = vadd.xlane.f32.xlu1 %v19704_v51  ;;  %v19701_v54 = vsel %vm373_vm0, %v19661_v53, 0.0 }
0x1c56   :  { %v28304_v1 = vsub.f32 %v28213_v52, %v19631_v59  ;;  %v19670_v63 = vpop.xlane.xlu1 %19669  ;;  %19702 = vadd.xlane.f32.xlu0 %v19701_v54 }
0x1c57   :  { %v19714_v45 = vmul.f32 0.125, %v19670_v63  ;;  %v19667_v25 = vpop.xlane.xlu0 %19666  ;;  %v19664_v33 = vmul.f32 %v28300_v55, %v28300_v55 }
0x1c58   :  { %v19713_v36 = vmul.f32 0.125, %v19667_v25  ;;  %v19663_v41 = vmul.f32 %v28304_v1, %v28304_v1 }
0x1c59   :  { %v19730_v22 = vadd.f32 1e-05, %v19714_v45  ;;  %v19710_v9 = vsel %vm373_vm0, %v19664_v33, 0.0 }
0x1c5a   :  { %v19729_v20 = vadd.f32 1e-05, %v19713_v36  ;;  %19711 = vadd.xlane.f32.xlu1 %v19710_v9  ;;  %v19676_v50 = vpop.xlane.xlu1 %19675  ;;  %v19707_v52 = vsel %vm373_vm0, %v19663_v41, 0.0  ;;  %v21292_v9 = vld [vmem:[%s28822_s6 + $0x18] sm:$0xff] }
0x1c5b   :  { %23814 = vrsqrt.f32 %v19730_v22  ;;  %v19716_v43 = vmul.f32 0.125, %v19676_v50  ;;  %19708 = vadd.xlane.f32.xlu0 %v19707_v52  ;;  %v19673_v16 = vpop.xlane.xlu0 %19672 }
0x1c5c   :  { %23816 = vrsqrt.f32 %v19729_v20  ;;  %v19715_v3 = vmul.f32 0.125, %v19673_v16 }
0x1c5d   :  { %v19732_v2 = vadd.f32 1e-05, %v19716_v43 }
0x1c5e   :  { %v19731_v47 = vadd.f32 1e-05, %v19715_v3  ;;  %v19682_v40 = vpop.xlane.xlu1 %19681 }
0x1c5f   :  { %23818 = vrsqrt.f32 %v19732_v2  ;;  %v19718_v4 = vmul.f32 0.125, %v19682_v40  ;;  %v19679_v13 = vpop.xlane.xlu0 %19678 }
0x1c60   :  { %23820 = vrsqrt.f32 %v19731_v47  ;;  %v19717_v17 = vmul.f32 0.125, %v19679_v13 }
0x1c61   :  { %v19734_v44 = vadd.f32 1e-05, %v19718_v4 }
0x1c62   :  { %v19733_v11 = vadd.f32 1e-05, %v19717_v17  ;;  %v19688_v58 = vpop.xlane.xlu1 %19687 }
0x1c63   :  { %23822 = vrsqrt.f32 %v19734_v44  ;;  %v19720_v34 = vmul.f32 0.125, %v19688_v58  ;;  %v19685_v31 = vpop.xlane.xlu0 %19684 }
0x1c64   :  { %23824 = vrsqrt.f32 %v19733_v11  ;;  %v19719_v29 = vmul.f32 0.125, %v19685_v31 }
0x1c65   :  { %v23815_v35 = vpop.eup %23814  ;;  %v19736_v19 = vadd.f32 1e-05, %v19720_v34 }
0x1c66   :  { %v23817_v14 = vpop.eup %23816  ;;  %v19762_v8 = vmul.f32 %v23815_v35, %v28200_v27  ;;  %v19735_v21 = vadd.f32 1e-05, %v19719_v29 }
0x1c67   :  { %23826 = vrsqrt.f32 %v19736_v19  ;;  %v19761_v61 = vmul.f32 %v23817_v14, %v28206_v37 }
0x1c68   :  { %v19783_v0 = vmul.f32 %v28315_v46, %v19762_v8  ;;  %23828 = vrsqrt.f32 %v19735_v21 }
0x1c69   :  { %v23819_v42 = vpop.eup %23818  ;;  %v19782_v48 = vmul.f32 %v28315_v46, %v19761_v61 }
0x1c6a   :  { %v23821_v39 = vpop.eup %23820  ;;  %v19764_v24 = vmul.f32 %v23819_v42, %v28216_v56  ;;  %v28332_v37 = vadd.f32 %v28322_v15, %v19783_v0 }
0x1c6b   :  { %v28328_v27 = vadd.f32 %v28322_v15, %v19782_v48  ;;  %v19763_v5 = vmul.f32 %v23821_v39, %v28223_v23 }
0x1c6c   :  { %v19785_v38 = vmul.f32 %v28315_v46, %v19764_v24 }
0x1c6d   :  { %v23823_v28 = vpop.eup %23822  ;;  %23213 = vmatprep.mubr.msk.f32.mxu1 %vm373_vm0, %v28328_v27  ;;  %v19784_v62 = vmul.f32 %v28315_v46, %v19763_v5 }
0x1c6e   :  { %v23825_v60 = vpop.eup %23824  ;;  %v19766_v53 = vmul.f32 %v23823_v28, %v28230_v10  ;;  %23214 = vmatmul.mubr.msk.f32.vlgmr.msra.gmra.mrb[32].mxu1 %vm373_vm0, %v28332_v37  ;;  %v28346_v59 = vadd.f32 %v28322_v15, %v19785_v38 }
0x1c6f   :  { %v28342_v56 = vadd.f32 %v28322_v15, %v19784_v62  ;;  %v19765_v23 = vmul.f32 %v23825_v60, %v28236_v18 }
0x1c70   :  { %v19787_v51 = vmul.f32 %v28315_v46, %v19766_v53 }
0x1c71   :  { %v23827_v54 = vpop.eup %23826  ;;  %23216 = vmatprep.mubr.msk.f32.mxu1 %vm373_vm0, %v28342_v56  ;;  %v19786_v63 = vmul.f32 %v28315_v46, %v19765_v23 }
0x1c72   :  { %v23829_v10 = vpop.eup %23828  ;;  %v19768_v45 = vmul.f32 %v23827_v54, %v28242_v57  ;;  %23217 = vmatmul.mubr.msk.f32.gmra.mrb[34].mxu1 %vm373_vm0, %v28346_v59  ;;  %v28360_v33 = vadd.f32 %v28322_v15, %v19787_v51 }
0x1c73   :  { %v28356_v25 = vadd.f32 %v28322_v15, %v19786_v63  ;;  %v19767_v18 = vmul.f32 %v23829_v10, %v28248_v30  ;;  %v21291_v30 = vld [vmem:[%s28822_s6 + $0x10] sm:$0xff] }
0x1c74   :  { %v19789_v36 = vmul.f32 %v28315_v46, %v19768_v45  ;;  %v23269_v20 = vpack.c.bf16 %v21292_v9, %v21291_v30 }
0x1c75   :  { %23219 = vmatprep.mubr.msk.f32.mxu1 %vm373_vm0, %v28356_v25  ;;  %v19788_v41 = vmul.f32 %v28315_v46, %v19767_v18 }
0x1c76   :  { %23220 = vmatmul.mubr.msk.f32.gmra.mrb[36].mxu1 %vm373_vm0, %v28360_v33  ;;  %v28372_v22 = vadd.f32 %v28322_v15, %v19789_v36  ;;  %23270 = vmatprep.subr.bf16.mxu0 %v23269_v20 }
0x1c77   :  { %v28369_v57 = vadd.f32 %v28322_v15, %v19788_v41  ;;  %23272 = vmatpush3.bf16.msra.mxu0 %v23269_v20 }
0x1c79   :  { %23222 = vmatprep.mubr.msk.f32.mxu1 %vm373_vm0, %v28369_v57 }
0x1c7a   :  { %23223 = vmatmul.mubr.msk.f32.gmra.mrb[38].mxu1 %vm373_vm0, %v28372_v22 }
0x1cda   :  { %v19694_v50 = vpop.xlane.xlu1 %19693 }
0x1cdb   :  { %v19722_v52 = vmul.f32 0.125, %v19694_v50  ;;  %v19691_v43 = vpop.xlane.xlu0 %19690 }
0x1cdc   :  { %v19721_v16 = vmul.f32 0.125, %v19691_v43 }
0x1cdd   :  { %v19738_v3 = vadd.f32 1e-05, %v19722_v52 }
0x1cde   :  { %v19737_v2 = vadd.f32 1e-05, %v19721_v16  ;;  %v19700_v47 = vpop.xlane.xlu1 %19699 }
0x1cdf   :  { %23830 = vrsqrt.f32 %v19738_v3  ;;  %v19724_v40 = vmul.f32 0.125, %v19700_v47  ;;  %v19697_v4 = vpop.xlane.xlu0 %19696 }
0x1ce0   :  { %23832 = vrsqrt.f32 %v19737_v2  ;;  %v19723_v13 = vmul.f32 0.125, %v19697_v4 }
0x1ce1   :  { %v19740_v17 = vadd.f32 1e-05, %v19724_v40 }
0x1ce2   :  { %v19739_v44 = vadd.f32 1e-05, %v19723_v13  ;;  %v19706_v11 = vpop.xlane.xlu1 %19705 }
0x1ce3   :  { %23834 = vrsqrt.f32 %v19740_v17  ;;  %v19726_v58 = vmul.f32 0.125, %v19706_v11  ;;  %v19703_v34 = vpop.xlane.xlu0 %19702 }
0x1ce4   :  { %23836 = vrsqrt.f32 %v19739_v44  ;;  %v19725_v31 = vmul.f32 0.125, %v19703_v34 }
0x1ce5   :  { %v19742_v29 = vadd.f32 1e-05, %v19726_v58 }
0x1ce6   :  { %v19741_v35 = vadd.f32 1e-05, %v19725_v31 }
0x1ce7   :  { %23838 = vrsqrt.f32 %v19742_v29  ;;  %v19712_v19 = vpop.xlane.xlu1 %19711 }
0x1ce8   :  { %23840 = vrsqrt.f32 %v19741_v35  ;;  %v19728_v14 = vmul.f32 0.125, %v19712_v19  ;;  %v19709_v8 = vpop.xlane.xlu0 %19708 }
0x1ce9   :  { %v23831_v21 = vpop.eup %23830  ;;  %v19727_v61 = vmul.f32 0.125, %v19709_v8 }
0x1cea   :  { %v23833_v0 = vpop.eup %23832  ;;  %v19770_v42 = vmul.f32 %v23831_v21, %v28265_v12  ;;  %v19744_v48 = vadd.f32 1e-05, %v19728_v14 }
0x1ceb   :  { %v19743_v39 = vadd.f32 1e-05, %v19727_v61  ;;  %v19769_v24 = vmul.f32 %v23833_v0, %v28268_v26 }
0x1cec   :  { %v19791_v5 = vmul.f32 %v28315_v46, %v19770_v42  ;;  %23842 = vrsqrt.f32 %v19744_v48 }
0x1ced   :  { %v23835_v38 = vpop.eup %23834  ;;  %23844 = vrsqrt.f32 %v19743_v39  ;;  %v19790_v28 = vmul.f32 %v28315_v46, %v19769_v24 }
0x1cee   :  { %v23837_v62 = vpop.eup %23836  ;;  %v19772_v60 = vmul.f32 %v23835_v38, %v28275_v7  ;;  %v28394_v12 = vadd.f32 %v28322_v15, %v19791_v5 }
0x1cef   :  { %v28390_v53 = vadd.f32 %v28322_v15, %v19790_v28  ;;  %v19771_v23 = vmul.f32 %v23837_v62, %v28279_v49 }
0x1cf0   :  { %v19793_v26 = vmul.f32 %v28315_v46, %v19772_v60 }
0x1cf1   :  { %v23839_v51 = vpop.eup %23838  ;;  %23225 = vmatprep.mubr.msk.f32.mxu1 %vm373_vm0, %v28390_v53  ;;  %v19792_v54 = vmul.f32 %v28315_v46, %v19771_v23 }
0x1cf2   :  { %v23841_v63 = vpop.eup %23840  ;;  %v19774_v10 = vmul.f32 %v23839_v51, %v28287_v6  ;;  %23226 = vmatmul.mubr.msk.f32.gmra.mrb[40].mxu1 %vm373_vm0, %v28394_v12  ;;  %v28408_v45 = vadd.f32 %v28322_v15, %v19793_v26 }
0x1cf3   :  { %v28404_v7 = vadd.f32 %v28322_v15, %v19792_v54  ;;  %v19773_v49 = vmul.f32 %v23841_v63, %v28291_v32 }
0x1cf4   :  { %v19795_v18 = vmul.f32 %v28315_v46, %v19774_v10 }
0x1cf5   :  { %23228 = vmatprep.mubr.msk.f32.mxu1 %vm373_vm0, %v28404_v7  ;;  %v19794_v36 = vmul.f32 %v28315_v46, %v19773_v49 }
0x1cf6   :  { %v23843_v41 = vpop.eup %23842  ;;  %23229 = vmatmul.mubr.msk.f32.gmra.mrb[42].mxu1 %vm373_vm0, %v28408_v45  ;;  %v28421_v32 = vadd.f32 %v28322_v15, %v19795_v18 }
0x1cf7   :  { %v23845_v6 = vpop.eup %23844  ;;  %v19776_v30 = vmul.f32 %v23843_v41, %v28300_v55  ;;  %v28418_v9 = vadd.f32 %v28322_v15, %v19794_v36 }
0x1cf8   :  { %v19775_v20 = vmul.f32 %v23845_v6, %v28304_v1  ;;  %v21290_v1 = vld [vmem:[%s28823_s7 + $0xe] ss:$0 sm:$0xff] }
0x1cf9   :  { %v19797_v50 = vmul.f32 %v28315_v46, %v19776_v30  ;;  %23231 = vmatprep.mubr.msk.f32.mxu1 %vm373_vm0, %v28418_v9 }
0x1cfa   :  { %23232 = vmatmul.mubr.msk.f32.gmra.mrb[44].mxu1 %vm373_vm0, %v28421_v32  ;;  %v19796_v52 = vmul.f32 %v28315_v46, %v19775_v20 }
0x1cfb   :  { %v28434_v43 = vadd.f32 %v28322_v15, %v19797_v50 }
0x1cfc   :  { %v28431_v55 = vadd.f32 %v28322_v15, %v19796_v52 }
0x1cfe   :  { %23234 = vmatprep.mubr.msk.f32.mxu1 %vm373_vm0, %v28431_v55 }
0x1cff   :  { %23235 = vmatmul.mubr.msk.f32.gmra.mrb[46].mxu1 %vm373_vm0, %v28434_v43 }
0x1d41   :  { %v23215_v16 = vpop.f32.mrb[32].mxu1 }
0x1d42   :  { %v20020_v3 = vadd.f32 %v23215_v16, %v21290_v1  ;;  %v19936_v2 = vpop.f32.mrb[33].mxu1 }
0x1d43   :  { %v20019_v46 = vadd.f32 %v21290_v1, %v19936_v2 }
0x1d44   :  { %v20036_v4 = vmax.f32 %v20020_v3, 0.0  ;;  %v28462_v3 = vld [vmem:[%s28823_s7 + $0xf] ss:$0 sm:$0xff] }
0x1d45   :  { %v20035_v47 = vmax.f32 %v20019_v46, 0.0  ;;  %v23218_v40 = vpop.f32.mrb[34].mxu1 }
0x1d46   :  { %v20022_v13 = vadd.f32 %v23218_v40, %v21290_v1  ;;  %v19946_v15 = vpop.f32.mrb[35].mxu1 }
0x1d47   :  { %v20021_v17 = vadd.f32 %v21290_v1, %v19946_v15  ;;  %23241 = vmatprep.mubr.msk.f32.mxu0 %vm6784_vm4, %v20035_v47 }
0x1d48   :  { %23242 = vmatmul.mubr.msk.f32.vlgmr.msra.gmra.mrb[240].mxu0 %vm6784_vm4, %v20036_v4  ;;  %v20038_v58 = vmax.f32 %v20022_v13, 0.0 }
0x1d49   :  { %v20037_v44 = vmax.f32 %v20021_v17, 0.0  ;;  %v23221_v11 = vpop.f32.mrb[36].mxu1 }
0x1d4a   :  { %v20024_v34 = vadd.f32 %v23221_v11, %v21290_v1  ;;  %v19956_v31 = vpop.f32.mrb[37].mxu1 }
0x1d4b   :  { %v20023_v29 = vadd.f32 %v21290_v1, %v19956_v31  ;;  %23244 = vmatprep.mubr.msk.f32.mxu0 %vm6784_vm4, %v20037_v44 }
0x1d4c   :  { %23245 = vmatmul.mubr.msk.f32.gmra.mrb[242].mxu0 %vm6784_vm4, %v20038_v58  ;;  %v20040_v14 = vmax.f32 %v20024_v34, 0.0 }
0x1d4d   :  { %v20039_v35 = vmax.f32 %v20023_v29, 0.0  ;;  %v23224_v19 = vpop.f32.mrb[38].mxu1 }
0x1d4e   :  { %v20026_v8 = vadd.f32 %v23224_v19, %v21290_v1  ;;  %v19966_v21 = vpop.f32.mrb[39].mxu1 }
0x1d4f   :  { %v20025_v61 = vadd.f32 %v21290_v1, %v19966_v21  ;;  %23247 = vmatprep.mubr.msk.f32.mxu0 %vm6784_vm4, %v20039_v35 }
0x1d50   :  { %23248 = vmatmul.mubr.msk.f32.gmra.mrb[244].mxu0 %vm6784_vm4, %v20040_v14  ;;  %v20042_v42 = vmax.f32 %v20026_v8, 0.0 }
0x1d51   :  { %v20041_v0 = vmax.f32 %v20025_v61, 0.0 }
0x1d53   :  { %23250 = vmatprep.mubr.msk.f32.mxu0 %vm6784_vm4, %v20041_v0 }
0x1d54   :  { %23251 = vmatmul.mubr.msk.f32.gmra.mrb[246].mxu0 %vm6784_vm4, %v20042_v42 }
0x1dc5   :  { %v23227_v48 = vpop.f32.mrb[40].mxu1 }
0x1dc6   :  { %v20028_v39 = vadd.f32 %v23227_v48, %v21290_v1  ;;  %v19976_v24 = vpop.f32.mrb[41].mxu1 }
0x1dc7   :  { %v20027_v5 = vadd.f32 %v21290_v1, %v19976_v24 }
0x1dc8   :  { %v20044_v62 = vmax.f32 %v20028_v39, 0.0 }
0x1dc9   :  { %v20043_v38 = vmax.f32 %v20027_v5, 0.0  ;;  %v23230_v28 = vpop.f32.mrb[42].mxu1 }
0x1dca   :  { %v20030_v60 = vadd.f32 %v23230_v28, %v21290_v1  ;;  %v19986_v23 = vpop.f32.mrb[43].mxu1 }
0x1dcb   :  { %v20029_v26 = vadd.f32 %v21290_v1, %v19986_v23  ;;  %23253 = vmatprep.mubr.msk.f32.mxu0 %vm6784_vm4, %v20043_v38 }
0x1dcc   :  { %23254 = vmatmul.mubr.msk.f32.gmra.mrb[248].mxu0 %vm6784_vm4, %v20044_v62  ;;  %v20046_v63 = vmax.f32 %v20030_v60, 0.0 }
0x1dcd   :  { %v20045_v51 = vmax.f32 %v20029_v26, 0.0  ;;  %v23233_v54 = vpop.f32.mrb[44].mxu1 }
0x1dce   :  { %v20032_v10 = vadd.f32 %v23233_v54, %v21290_v1  ;;  %v19996_v49 = vpop.f32.mrb[45].mxu1 }
0x1dcf   :  { %v20031_v18 = vadd.f32 %v21290_v1, %v19996_v49  ;;  %23256 = vmatprep.mubr.msk.f32.mxu0 %vm6784_vm4, %v20045_v51 }
0x1dd0   :  { %23257 = vmatmul.mubr.msk.f32.gmra.mrb[250].mxu0 %vm6784_vm4, %v20046_v63  ;;  %v20048_v41 = vmax.f32 %v20032_v10, 0.0 }
0x1dd1   :  { %v20047_v36 = vmax.f32 %v20031_v18, 0.0 }
0x1dd2   :  { %v23236_v6 = vpop.f32.mrb[46].mxu1 }
0x1dd3   :  { %v20034_v30 = vadd.f32 %v23236_v6, %v21290_v1  ;;  %v20006_v20 = vpop.f32.mrb[47].mxu1  ;;  %23259 = vmatprep.mubr.msk.f32.mxu0 %vm6784_vm4, %v20047_v36 }
0x1dd4   :  { %v20033_v50 = vadd.f32 %v21290_v1, %v20006_v20  ;;  %23260 = vmatmul.mubr.msk.f32.gmra.mrb[252].mxu0 %vm6784_vm4, %v20048_v41 }
0x1dd5   :  { %v20050_v16 = vmax.f32 %v20034_v30, 0.0 }
0x1dd6   :  { %v20049_v52 = vmax.f32 %v20033_v50, 0.0 }
0x1dd8   :  { %23262 = vmatprep.mubr.msk.f32.mxu0 %vm6784_vm4, %v20049_v52 }
0x1dd9   :  { %23263 = vmatmul.mubr.msk.f32.gmra.mrb[254].mxu0 %vm6784_vm4, %v20050_v16  ;;  %vm20747_vm4 = vcmask 1048512  }
0x1e1b   :  { %v23243_v2 = vpop.f32.mrb[240].mxu0 }
0x1e1c   :  { %v20253_v46 = vadd.f32 %v23243_v2, %v28462_v3  ;;  %v20169_v47 = vpop.f32.mrb[241].mxu0 }
0x1e1d   :  { %v20252_v40 = vadd.f32 %v28462_v3, %v20169_v47 }
0x1e1e   :  { %v28467_v1 = vadd.f32 %v20253_v46, %v28332_v37 }
0x1e1f   :  { %v28470_v4 = vadd.f32 %v20252_v40, %v28328_v27  ;;  %v23246_v13 = vpop.f32.mrb[242].mxu0 }
0x1e20   :  { %v20255_v15 = vadd.f32 %v23246_v13, %v28462_v3  ;;  %v20179_v17 = vpop.f32.mrb[243].mxu0  ;;  %v20287_v44 = vsel %vm373_vm0, %v28467_v1, 0.0 }
0x1e21   :  { %v20254_v11 = vadd.f32 %v28462_v3, %v20179_v17  ;;  %20288 = vadd.xlane.f32.xlu1 %v20287_v44  ;;  %v20284_v58 = vsel %vm373_vm0, %v28470_v4, 0.0 }
0x1e22   :  { %v28479_v34 = vadd.f32 %v20255_v15, %v28346_v59  ;;  %20285 = vadd.xlane.f32.xlu0 %v20284_v58 }
0x1e23   :  { %v28482_v27 = vadd.f32 %v20254_v11, %v28342_v56  ;;  %v23249_v37 = vpop.f32.mrb[244].mxu0 }
0x1e24   :  { %v20257_v31 = vadd.f32 %v23249_v37, %v28462_v3  ;;  %v20189_v29 = vpop.f32.mrb[245].mxu0  ;;  %v20293_v35 = vsel %vm373_vm0, %v28479_v34, 0.0 }
0x1e25   :  { %v20256_v19 = vadd.f32 %v28462_v3, %v20189_v29  ;;  %20294 = vadd.xlane.f32.xlu1 %v20293_v35  ;;  %v20290_v14 = vsel %vm373_vm0, %v28482_v27, 0.0 }
0x1e26   :  { %v28491_v59 = vadd.f32 %v20257_v31, %v28360_v33  ;;  %20291 = vadd.xlane.f32.xlu0 %v20290_v14 }
0x1e27   :  { %v28494_v56 = vadd.f32 %v20256_v19, %v28356_v25  ;;  %v23252_v8 = vpop.f32.mrb[246].mxu0 }
0x1e28   :  { %v20259_v21 = vadd.f32 %v23252_v8, %v28462_v3  ;;  %v20199_v61 = vpop.f32.mrb[247].mxu0  ;;  %v20299_v0 = vsel %vm373_vm0, %v28491_v59, 0.0 }
0x1e29   :  { %v20258_v42 = vadd.f32 %v28462_v3, %v20199_v61  ;;  %20300 = vadd.xlane.f32.xlu1 %v20299_v0  ;;  %v20296_v48 = vsel %vm373_vm0, %v28494_v56, 0.0 }
0x1e2a   :  { %v28503_v33 = vadd.f32 %v20259_v21, %v28372_v22  ;;  %20297 = vadd.xlane.f32.xlu0 %v20296_v48 }
0x1e2b   :  { %v28506_v25 = vadd.f32 %v20258_v42, %v28369_v57 }
0x1e2c   :  { %v20305_v39 = vsel %vm373_vm0, %v28503_v33, 0.0 }
0x1e2d   :  { %20306 = vadd.xlane.f32.xlu1 %v20305_v39  ;;  %v20302_v24 = vsel %vm373_vm0, %v28506_v25, 0.0 }
0x1e2e   :  { %20303 = vadd.xlane.f32.xlu0 %v20302_v24 }
0x1e9f   :  { %v23255_v5 = vpop.f32.mrb[248].mxu0 }
0x1ea0   :  { %v20261_v38 = vadd.f32 %v23255_v5, %v28462_v3  ;;  %v20209_v28 = vpop.f32.mrb[249].mxu0 }
0x1ea1   :  { %v20260_v62 = vadd.f32 %v28462_v3, %v20209_v28 }
0x1ea2   :  { %v28515_v22 = vadd.f32 %v20261_v38, %v28394_v12 }
0x1ea3   :  { %v28518_v57 = vadd.f32 %v20260_v62, %v28390_v53  ;;  %v23258_v60 = vpop.f32.mrb[250].mxu0 }
0x1ea4   :  { %v20263_v23 = vadd.f32 %v23258_v60, %v28462_v3  ;;  %v20219_v26 = vpop.f32.mrb[251].mxu0  ;;  %v20311_v51 = vsel %vm373_vm0, %v28515_v22, 0.0 }
0x1ea5   :  { %v20262_v54 = vadd.f32 %v28462_v3, %v20219_v26  ;;  %20312 = vadd.xlane.f32.xlu1 %v20311_v51  ;;  %v20308_v63 = vsel %vm373_vm0, %v28518_v57, 0.0 }
0x1ea6   :  { %v28527_v10 = vadd.f32 %v20263_v23, %v28408_v45  ;;  %20309 = vadd.xlane.f32.xlu0 %v20308_v63 }
0x1ea7   :  { %v28530_v53 = vadd.f32 %v20262_v54, %v28404_v7  ;;  %v23261_v12 = vpop.f32.mrb[252].mxu0 }
0x1ea8   :  { %v20265_v49 = vadd.f32 %v23261_v12, %v28462_v3  ;;  %v20229_v18 = vpop.f32.mrb[253].mxu0  ;;  %v20317_v36 = vsel %vm373_vm0, %v28527_v10, 0.0 }
0x1ea9   :  { %v20264_v41 = vadd.f32 %v28462_v3, %v20229_v18  ;;  %20318 = vadd.xlane.f32.xlu1 %v20317_v36  ;;  %v20314_v6 = vsel %vm373_vm0, %v28530_v53, 0.0 }
0x1eaa   :  { %v28539_v45 = vadd.f32 %v20265_v49, %v28421_v32  ;;  %20315 = vadd.xlane.f32.xlu0 %v20314_v6 }
0x1eab   :  { %v28542_v7 = vadd.f32 %v20264_v41, %v28418_v9 }
0x1eac   :  { %v23264_v30 = vpop.f32.mrb[254].mxu0  ;;  %v20323_v20 = vsel %vm373_vm0, %v28539_v45, 0.0 }
0x1ead   :  { %v20267_v50 = vadd.f32 %v23264_v30, %v28462_v3  ;;  %v20239_v52 = vpop.f32.mrb[255].mxu0  ;;  %20324 = vadd.xlane.f32.xlu1 %v20323_v20  ;;  %v20320_v16 = vsel %vm373_vm0, %v28542_v7, 0.0 }
0x1eae   :  { %v20266_v2 = vadd.f32 %v28462_v3, %v20239_v52  ;;  %v20289_v46 = vpop.xlane.xlu1 %20288  ;;  %20321 = vadd.xlane.f32.xlu0 %v20320_v16 }
0x1eaf   :  { %v28551_v32 = vadd.f32 %v20267_v50, %v28434_v43  ;;  %v20333_v9 = vmul.f32 0.125, %v20289_v46  ;;  %v20286_v47 = vpop.xlane.xlu0 %20285 }
0x1eb0   :  { %v28554_v40 = vadd.f32 %v20266_v2, %v28431_v55  ;;  %v20332_v13 = vmul.f32 0.125, %v20286_v47 }
0x1eb1   :  { %v28557_v15 = vsub.f32 %v28467_v1, %v20333_v9  ;;  %v20329_v17 = vsel %vm373_vm0, %v28551_v32, 0.0 }
0x1eb2   :  { %v28562_v44 = vsub.f32 %v28470_v4, %v20332_v13  ;;  %v20295_v3 = vpop.xlane.xlu1 %20294  ;;  %20330 = vadd.xlane.f32.xlu1 %v20329_v17  ;;  %v20326_v43 = vsel %vm373_vm0, %v28554_v40, 0.0 }
0x1eb3   :  { %v20335_v11 = vmul.f32 0.125, %v20295_v3  ;;  %20327 = vadd.xlane.f32.xlu0 %v20326_v43  ;;  %v20292_v58 = vpop.xlane.xlu0 %20291  ;;  %v20365_v55 = vmul.f32 %v28557_v15, %v28557_v15 }
0x1eb4   :  { %v20334_v37 = vmul.f32 0.125, %v20292_v58  ;;  %v20364_v1 = vmul.f32 %v28562_v44, %v28562_v44 }
0x1eb5   :  { %v28571_v31 = vsub.f32 %v28479_v34, %v20335_v11  ;;  %v20383_v4 = vsel %vm373_vm0, %v20365_v55, 0.0 }
0x1eb6   :  { %v28575_v29 = vsub.f32 %v28482_v27, %v20334_v37  ;;  %v20301_v35 = vpop.xlane.xlu1 %20300  ;;  %20384 = vadd.xlane.f32.xlu1 %v20383_v4  ;;  %v20380_v19 = vsel %vm373_vm0, %v20364_v1, 0.0 }
0x1eb7   :  { %v20337_v14 = vmul.f32 0.125, %v20301_v35  ;;  %20381 = vadd.xlane.f32.xlu0 %v20380_v19  ;;  %v20298_v8 = vpop.xlane.xlu0 %20297  ;;  %v20367_v21 = vmul.f32 %v28571_v31, %v28571_v31 }
0x1eb8   :  { %v20336_v61 = vmul.f32 0.125, %v20298_v8  ;;  %v20366_v34 = vmul.f32 %v28575_v29, %v28575_v29 }
0x1eb9   :  { %v28583_v0 = vsub.f32 %v28491_v59, %v20337_v14  ;;  %v20389_v27 = vsel %vm373_vm0, %v20367_v21, 0.0 }
0x1eba   :  { %v28587_v42 = vsub.f32 %v28494_v56, %v20336_v61  ;;  %v20307_v48 = vpop.xlane.xlu1 %20306  ;;  %20390 = vadd.xlane.f32.xlu1 %v20389_v27  ;;  %v20386_v39 = vsel %vm373_vm0, %v20366_v34, 0.0 }
0x1ebb   :  { %v20339_v24 = vmul.f32 0.125, %v20307_v48  ;;  %20387 = vadd.xlane.f32.xlu0 %v20386_v39  ;;  %v20304_v5 = vpop.xlane.xlu0 %20303  ;;  %v20369_v38 = vmul.f32 %v28583_v0, %v28583_v0 }
0x1ebc   :  { %v20338_v28 = vmul.f32 0.125, %v20304_v5  ;;  %v20368_v59 = vmul.f32 %v28587_v42, %v28587_v42 }
0x1ebd   :  { %v28595_v62 = vsub.f32 %v28503_v33, %v20339_v24  ;;  %v20395_v56 = vsel %vm373_vm0, %v20369_v38, 0.0 }
0x1ebe   :  { %v28599_v60 = vsub.f32 %v28506_v25, %v20338_v28  ;;  %20396 = vadd.xlane.f32.xlu1 %v20395_v56  ;;  %v20392_v23 = vsel %vm373_vm0, %v20368_v59, 0.0  ;;  %v20603_v25 = vld [vmem:[%s28823_s7 + $0x17] sm:$0x1] }
0x1ebf   :  { %20393 = vadd.xlane.f32.xlu0 %v20392_v23  ;;  %v20371_v26 = vmul.f32 %v28595_v62, %v28595_v62  ;;  %23323 = vpush %v20603_v25 }
0x1ec0   :  { %v20370_v51 = vmul.f32 %v28599_v60, %v28599_v60 }
0x1ec1   :  { %v20401_v54 = vsel %vm373_vm0, %v20371_v26, 0.0 }
0x1ec2   :  { %20402 = vadd.xlane.f32.xlu1 %v20401_v54  ;;  %v20398_v33 = vsel %vm373_vm0, %v20370_v51, 0.0 }
0x1ec3   :  { %20399 = vadd.xlane.f32.xlu0 %v20398_v33 }
0x1f32   :  { %v20313_v63 = vpop.xlane.xlu1 %20312 }
0x1f33   :  { %v20341_v12 = vmul.f32 0.125, %v20313_v63  ;;  %v20310_v49 = vpop.xlane.xlu0 %20309 }
0x1f34   :  { %v20340_v18 = vmul.f32 0.125, %v20310_v49 }
0x1f35   :  { %v28612_v36 = vsub.f32 %v28515_v22, %v20341_v12 }
0x1f36   :  { %v28615_v41 = vsub.f32 %v28518_v57, %v20340_v18  ;;  %v20319_v6 = vpop.xlane.xlu1 %20318 }
0x1f37   :  { %v20343_v30 = vmul.f32 0.125, %v20319_v6  ;;  %v20316_v20 = vpop.xlane.xlu0 %20315  ;;  %v20373_v50 = vmul.f32 %v28612_v36, %v28612_v36 }
0x1f38   :  { %v20342_v52 = vmul.f32 0.125, %v20316_v20  ;;  %v20372_v16 = vmul.f32 %v28615_v41, %v28615_v41 }
0x1f39   :  { %v28622_v2 = vsub.f32 %v28527_v10, %v20343_v30  ;;  %v20407_v46 = vsel %vm373_vm0, %v20373_v50, 0.0 }
0x1f3a   :  { %v28626_v22 = vsub.f32 %v28530_v53, %v20342_v52  ;;  %v20325_v57 = vpop.xlane.xlu1 %20324  ;;  %20408 = vadd.xlane.f32.xlu1 %v20407_v46  ;;  %v20404_v9 = vsel %vm373_vm0, %v20372_v16, 0.0  ;;  %v28662_v52 = vld [vmem:[%s28823_s7 + $0x14] ss:$0 sm:$0xff] }
0x1f3b   :  { %v20345_v47 = vmul.f32 0.125, %v20325_v57  ;;  %20405 = vadd.xlane.f32.xlu0 %v20404_v9  ;;  %v20322_v13 = vpop.xlane.xlu0 %20321  ;;  %v20375_v17 = vmul.f32 %v28622_v2, %v28622_v2  ;;  %v28668_v9 = vld [vmem:[%s28823_s7 + $0x15] ss:$0 sm:$0xff] }
0x1f3c   :  { %v20344_v3 = vmul.f32 0.125, %v20322_v13  ;;  %v20374_v10 = vmul.f32 %v28626_v22, %v28626_v22 }
0x1f3d   :  { %v28634_v43 = vsub.f32 %v28539_v45, %v20345_v47  ;;  %v20413_v53 = vsel %vm373_vm0, %v20375_v17, 0.0 }
0x1f3e   :  { %v28638_v11 = vsub.f32 %v28542_v7, %v20344_v3  ;;  %20414 = vadd.xlane.f32.xlu1 %v20413_v53  ;;  %v20410_v58 = vsel %vm373_vm0, %v20374_v10, 0.0  ;;  %v28675_v3 = vld [vmem:[%s28823_s7 + $0x16] ss:$0 sm:$0xff]  ;;  %s23324_s7 = spop %23323 }
0x1f3f   :  { %v20331_v55 = vpop.xlane.xlu1 %20330  ;;  %20411 = vadd.xlane.f32.xlu0 %v20410_v58  ;;  %v20377_v37 = vmul.f32 %v28634_v43, %v28634_v43 }
0x1f40   :  { %v20347_v1 = vmul.f32 0.125, %v20331_v55  ;;  %v20328_v4 = vpop.xlane.xlu0 %20327  ;;  %v20376_v35 = vmul.f32 %v28638_v11, %v28638_v11 }
0x1f41   :  { %v20346_v45 = vmul.f32 0.125, %v20328_v4  ;;  %v20419_v19 = vsel %vm373_vm0, %v20377_v37, 0.0 }
0x1f42   :  { %v28647_v14 = vsub.f32 %v28551_v32, %v20347_v1  ;;  %20420 = vadd.xlane.f32.xlu1 %v20419_v19  ;;  %v20416_v7 = vsel %vm373_vm0, %v20376_v35, 0.0 }
0x1f43   :  { %v28651_v8 = vsub.f32 %v28554_v40, %v20346_v45  ;;  %v20385_v21 = vpop.xlane.xlu1 %20384  ;;  %20417 = vadd.xlane.f32.xlu0 %v20416_v7 }
0x1f44   :  { %v20429_v61 = vmul.f32 0.125, %v20385_v21  ;;  %v20382_v34 = vpop.xlane.xlu0 %20381  ;;  %v20379_v27 = vmul.f32 %v28647_v14, %v28647_v14 }
0x1f45   :  { %v20428_v48 = vmul.f32 0.125, %v20382_v34  ;;  %v20378_v39 = vmul.f32 %v28651_v8, %v28651_v8 }
0x1f46   :  { %v20445_v24 = vadd.f32 1e-05, %v20429_v61  ;;  %v20425_v32 = vsel %vm373_vm0, %v20379_v27, 0.0 }
0x1f47   :  { %v20444_v5 = vadd.f32 1e-05, %v20428_v48  ;;  %20426 = vadd.xlane.f32.xlu1 %v20425_v32  ;;  %v20391_v38 = vpop.xlane.xlu1 %20390  ;;  %v20422_v40 = vsel %vm373_vm0, %v20378_v39, 0.0 }
0x1f48   :  { %23846 = vrsqrt.f32 %v20445_v24  ;;  %v20431_v28 = vmul.f32 0.125, %v20391_v38  ;;  %20423 = vadd.xlane.f32.xlu0 %v20422_v40  ;;  %v20388_v59 = vpop.xlane.xlu0 %20387 }
0x1f49   :  { %23848 = vrsqrt.f32 %v20444_v5  ;;  %v20430_v56 = vmul.f32 0.125, %v20388_v59 }
0x1f4a   :  { %v20447_v23 = vadd.f32 1e-05, %v20431_v28 }
0x1f4b   :  { %v20446_v26 = vadd.f32 1e-05, %v20430_v56  ;;  %v20397_v51 = vpop.xlane.xlu1 %20396 }
0x1f4c   :  { %23850 = vrsqrt.f32 %v20447_v23  ;;  %v20433_v54 = vmul.f32 0.125, %v20397_v51  ;;  %v20394_v33 = vpop.xlane.xlu0 %20393 }
0x1f4d   :  { %23852 = vrsqrt.f32 %v20446_v26  ;;  %v20432_v25 = vmul.f32 0.125, %v20394_v33 }
0x1f4e   :  { %v20449_v63 = vadd.f32 1e-05, %v20433_v54 }
0x1f4f   :  { %v20448_v12 = vadd.f32 1e-05, %v20432_v25  ;;  %v20403_v49 = vpop.xlane.xlu1 %20402 }
0x1f50   :  { %23854 = vrsqrt.f32 %v20449_v63  ;;  %v20435_v18 = vmul.f32 0.125, %v20403_v49  ;;  %v20400_v6 = vpop.xlane.xlu0 %20399 }
0x1f51   :  { %23856 = vrsqrt.f32 %v20448_v12  ;;  %v20434_v30 = vmul.f32 0.125, %v20400_v6 }
0x1f52   :  { %v23847_v20 = vpop.eup %23846  ;;  %v20451_v50 = vadd.f32 1e-05, %v20435_v18 }
0x1f53   :  { %v23849_v16 = vpop.eup %23848  ;;  %v20450_v46 = vadd.f32 1e-05, %v20434_v30  ;;  %v20477_v57 = vmul.f32 %v23847_v20, %v28557_v15 }
0x1f54   :  { %23858 = vrsqrt.f32 %v20451_v50  ;;  %v20476_v47 = vmul.f32 %v23849_v16, %v28562_v44 }
0x1f55   :  { %23860 = vrsqrt.f32 %v20450_v46  ;;  %v20498_v13 = vmul.f32 %v28662_v52, %v20477_v57 }
0x1f56   :  { %v23851_v17 = vpop.eup %23850  ;;  %v20497_v10 = vmul.f32 %v28662_v52, %v20476_v47 }
0x1f57   :  { %v23853_v15 = vpop.eup %23852  ;;  %v20519_v53 = vadd.f32 %v28668_v9, %v20498_v13  ;;  %v20479_v58 = vmul.f32 %v23851_v17, %v28571_v31 }
0x1f58   :  { %v20518_v55 = vadd.f32 %v28668_v9, %v20497_v10  ;;  %v20478_v44 = vmul.f32 %v23853_v15, %v28575_v29 }
0x1f59   :  { %v20540_v37 = vmul.f32 %v28675_v3, %v20519_v53  ;;  %v20500_v1 = vmul.f32 %v28662_v52, %v20479_v58 }
0x1f5a   :  { %v23855_v4 = vpop.eup %23854  ;;  %v20539_v35 = vmul.f32 %v28675_v3, %v20518_v55  ;;  %v20499_v45 = vmul.f32 %v28662_v52, %v20478_v44 }
0x1f5b   :  { %v23857_v19 = vpop.eup %23856  ;;  %v20558_v7 = vsel %vm373_vm0, %v20540_v37, 0.0  ;;  %v20521_v21 = vadd.f32 %v28668_v9, %v20500_v1  ;;  %v20481_v31 = vmul.f32 %v23855_v4, %v28583_v0 }
0x1f5c   :  { %20559 = vadd.xlane.f32.xlu1 %v20558_v7  ;;  %v20555_v61 = vsel %vm373_vm0, %v20539_v35, 0.0  ;;  %v20520_v29 = vadd.f32 %v28668_v9, %v20499_v45  ;;  %v20480_v34 = vmul.f32 %v23857_v19, %v28587_v42 }
0x1f5d   :  { %20556 = vadd.xlane.f32.xlu0 %v20555_v61  ;;  %v20542_v27 = vmul.f32 %v28675_v3, %v20521_v21  ;;  %v20502_v48 = vmul.f32 %v28662_v52, %v20481_v31 }
0x1f5e   :  { %v23859_v39 = vpop.eup %23858  ;;  %v20541_v24 = vmul.f32 %v28675_v3, %v20520_v29  ;;  %v20501_v32 = vmul.f32 %v28662_v52, %v20480_v34 }
0x1f5f   :  { %v23861_v5 = vpop.eup %23860  ;;  %v20564_v0 = vsel %vm373_vm0, %v20542_v27, 0.0  ;;  %v20523_v38 = vadd.f32 %v28668_v9, %v20502_v48  ;;  %v20483_v40 = vmul.f32 %v23859_v39, %v28595_v62 }
0x1f60   :  { %20565 = vadd.xlane.f32.xlu1 %v20564_v0  ;;  %v20561_v42 = vsel %vm373_vm0, %v20541_v24, 0.0  ;;  %v20522_v28 = vadd.f32 %v28668_v9, %v20501_v32  ;;  %v20482_v59 = vmul.f32 %v23861_v5, %v28599_v60 }
0x1f61   :  { %20562 = vadd.xlane.f32.xlu0 %v20561_v42  ;;  %v20544_v56 = vmul.f32 %v28675_v3, %v20523_v38  ;;  %v20504_v23 = vmul.f32 %v28662_v52, %v20483_v40 }
0x1f62   :  { %v20543_v26 = vmul.f32 %v28675_v3, %v20522_v28  ;;  %v20503_v51 = vmul.f32 %v28662_v52, %v20482_v59 }
0x1f63   :  { %v20570_v54 = vsel %vm373_vm0, %v20544_v56, 0.0  ;;  %v20525_v62 = vadd.f32 %v28668_v9, %v20504_v23 }
0x1f64   :  { %20571 = vadd.xlane.f32.xlu1 %v20570_v54  ;;  %v20567_v33 = vsel %vm373_vm0, %v20543_v26, 0.0  ;;  %v20524_v25 = vadd.f32 %v28668_v9, %v20503_v51 }
0x1f65   :  { %20568 = vadd.xlane.f32.xlu0 %v20567_v33  ;;  %v20546_v60 = vmul.f32 %v28675_v3, %v20525_v62 }
0x1f66   :  { %v20545_v63 = vmul.f32 %v28675_v3, %v20524_v25 }
0x1f67   :  { %v20576_v12 = vsel %vm373_vm0, %v20546_v60, 0.0 }
0x1f68   :  { %20577 = vadd.xlane.f32.xlu1 %v20576_v12  ;;  %v20573_v49 = vsel %vm373_vm0, %v20545_v63, 0.0 }
0x1f69   :  { %20574 = vadd.xlane.f32.xlu0 %v20573_v49 }
0x1fc7   :  { %v20409_v18 = vpop.xlane.xlu1 %20408 }
0x1fc8   :  { %v20437_v6 = vmul.f32 0.125, %v20409_v18  ;;  %v20406_v30 = vpop.xlane.xlu0 %20405 }
0x1fc9   :  { %v20436_v20 = vmul.f32 0.125, %v20406_v30 }
0x1fca   :  { %v20453_v50 = vadd.f32 1e-05, %v20437_v6 }
0x1fcb   :  { %v20452_v16 = vadd.f32 1e-05, %v20436_v20  ;;  %v20415_v46 = vpop.xlane.xlu1 %20414 }
0x1fcc   :  { %23862 = vrsqrt.f32 %v20453_v50  ;;  %v20439_v57 = vmul.f32 0.125, %v20415_v46  ;;  %v20412_v47 = vpop.xlane.xlu0 %20411 }
0x1fcd   :  { %23864 = vrsqrt.f32 %v20452_v16  ;;  %v20438_v13 = vmul.f32 0.125, %v20412_v47 }
0x1fce   :  { %v20455_v17 = vadd.f32 1e-05, %v20439_v57 }
0x1fcf   :  { %v20454_v10 = vadd.f32 1e-05, %v20438_v13  ;;  %v20421_v15 = vpop.xlane.xlu1 %20420 }
0x1fd0   :  { %23866 = vrsqrt.f32 %v20455_v17  ;;  %v20441_v53 = vmul.f32 0.125, %v20421_v15  ;;  %v20418_v58 = vpop.xlane.xlu0 %20417 }
0x1fd1   :  { %23868 = vrsqrt.f32 %v20454_v10  ;;  %v20440_v55 = vmul.f32 0.125, %v20418_v58 }
0x1fd2   :  { %v20457_v44 = vadd.f32 1e-05, %v20441_v53  ;;  %v29040_v53 = vld [vmem:[#allocation47_spill] sm:$0xff] }
0x1fd3   :  { %v20456_v37 = vadd.f32 1e-05, %v20440_v55  ;;  %v20644_v58 = vadd.s32 4294967288, %v29040_v53  ;;  %v28755_v55 = vstv %s23324_s7 }
0x1fd4   :  { %23870 = vrsqrt.f32 %v20457_v44  ;;  %v20427_v1 = vpop.xlane.xlu1 %20426 }
0x1fd5   :  { %23872 = vrsqrt.f32 %v20456_v37  ;;  %v20443_v4 = vmul.f32 0.125, %v20427_v1  ;;  %v20424_v35 = vpop.xlane.xlu0 %20423  ;;  %v29041_v37 = vld [vmem:[#allocation5_spill] sm:$0xff] }
0x1fd6   :  { %v23863_v45 = vpop.eup %23862  ;;  %v20442_v19 = vmul.f32 0.125, %v20424_v35  ;;  %v20647_v1 = vsub.s32 %v20644_v58, %v29041_v37  ;;  %v20728_v58 = vadd.s32 4294967192, %v29040_v53 }
0x1fd7   :  { %v23865_v7 = vpop.eup %23864  ;;  %v20459_v21 = vadd.f32 1e-05, %v20443_v4  ;;  %v20485_v31 = vmul.f32 %v23863_v45, %v28612_v36  ;;  %v20642_v4 = vsub.s32 %v29040_v53, %v29041_v37 }
0x1fd8   :  { %v20458_v61 = vadd.f32 1e-05, %v20442_v19  ;;  %v20484_v29 = vmul.f32 %v23865_v7, %v28615_v41 }
0x1fd9   :  { %23874 = vrsqrt.f32 %v20459_v21  ;;  %v20506_v34 = vmul.f32 %v28662_v52, %v20485_v31  ;;  %v20665_v21 = vadd.s32 4294967264, %v29040_v53  ;;  %v20658_v31 = vadd.s32 4294967272, %v29040_v53 }
0x1fda   :  { %v23867_v27 = vpop.eup %23866  ;;  %23876 = vrsqrt.f32 %v20458_v61  ;;  %v20505_v48 = vmul.f32 %v28662_v52, %v20484_v29 }
0x1fdb   :  { %v23869_v39 = vpop.eup %23868  ;;  %v20527_v24 = vadd.f32 %v28668_v9, %v20506_v34  ;;  %v20487_v32 = vmul.f32 %v23867_v27, %v28622_v2  ;;  %v20672_v34 = vadd.s32 4294967256, %v29040_v53 }
0x1fdc   :  { %v20526_v5 = vadd.f32 %v28668_v9, %v20505_v48  ;;  %v20486_v0 = vmul.f32 %v23869_v39, %v28626_v22  ;;  %v20668_v39 = vsub.s32 %v20665_v21, %v29041_v37  ;;  %v20742_v21 = vadd.s32 4294967176, %v29040_v53 }
0x1fdd   :  { %v20548_v36 = vmul.f32 %v28675_v3, %v20527_v24  ;;  %v20508_v41 = vmul.f32 %v28662_v52, %v20487_v32  ;;  %v20679_v32 = vadd.s32 4294967248, %v29040_v53 }
0x1fde   :  { %v23871_v38 = vpop.eup %23870  ;;  %v20547_v40 = vmul.f32 %v28675_v3, %v20526_v5  ;;  %v20507_v42 = vmul.f32 %v28662_v52, %v20486_v0  ;;  %v20661_v5 = vsub.s32 %v20658_v31, %v29041_v37 }
0x1fdf   :  { %v23873_v28 = vpop.eup %23872  ;;  %v20582_v59 = vsel %vm373_vm0, %v20548_v36, 0.0  ;;  %v20529_v56 = vadd.f32 %v28668_v9, %v20508_v41  ;;  %v20489_v2 = vmul.f32 %v23871_v38, %v28634_v43  ;;  %v20675_v38 = vsub.s32 %v20672_v34, %v29041_v37 }
0x1fe0   :  { %20583 = vadd.xlane.f32.xlu1 %v20582_v59  ;;  %v20579_v23 = vsel %vm373_vm0, %v20547_v40, 0.0  ;;  %v20528_v22 = vadd.f32 %v28668_v9, %v20507_v42  ;;  %v20488_v26 = vmul.f32 %v23873_v28, %v28638_v11  ;;  %v20686_v40 = vadd.s32 4294967240, %v29040_v53 }
0x1fe1   :  { %20580 = vadd.xlane.f32.xlu0 %v20579_v23  ;;  %v20550_v51 = vmul.f32 %v28675_v3, %v20529_v56  ;;  %v20510_v54 = vmul.f32 %v28662_v52, %v20489_v2  ;;  %v20682_v59 = vsub.s32 %v20679_v32, %v29041_v37  ;;  %v20745_v32 = vsub.s32 %v20742_v21, %v29041_v37 }
0x1fe2   :  { %v20549_v62 = vmul.f32 %v28675_v3, %v20528_v22  ;;  %v20509_v33 = vmul.f32 %v28662_v52, %v20488_v26  ;;  %v20693_v26 = vadd.s32 4294967232, %v29040_v53 }
0x1fe3   :  { %v23875_v25 = vpop.eup %23874  ;;  %v20588_v60 = vsel %vm373_vm0, %v20550_v51, 0.0  ;;  %v20531_v43 = vadd.f32 %v28668_v9, %v20510_v54  ;;  %v20689_v54 = vsub.s32 %v20686_v40, %v29041_v37 }
0x1fe4   :  { %v23877_v63 = vpop.eup %23876  ;;  %20589 = vadd.xlane.f32.xlu1 %v20588_v60  ;;  %v20585_v12 = vsel %vm373_vm0, %v20549_v62, 0.0  ;;  %v20530_v11 = vadd.f32 %v28668_v9, %v20509_v33  ;;  %v20491_v49 = vmul.f32 %v23875_v25, %v28647_v14  ;;  %v20700_v25 = vadd.s32 4294967224, %v29040_v53 }
0x1fe5   :  { %20586 = vadd.xlane.f32.xlu0 %v20585_v12  ;;  %v20552_v18 = vmul.f32 %v28675_v3, %v20531_v43  ;;  %v20490_v6 = vmul.f32 %v23877_v63, %v28651_v8  ;;  %v20707_v60 = vadd.s32 4294967216, %v29040_v53 }
0x1fe6   :  { %v20551_v30 = vmul.f32 %v28675_v3, %v20530_v11  ;;  %v20512_v20 = vmul.f32 %v28662_v52, %v20491_v49  ;;  %v20696_v11 = vsub.s32 %v20693_v26, %v29041_v37 }
0x1fe7   :  { %v20594_v50 = vsel %vm373_vm0, %v20552_v18, 0.0  ;;  %v20511_v16 = vmul.f32 %v28662_v52, %v20490_v6 }
0x1fe8   :  { %20595 = vadd.xlane.f32.xlu1 %v20594_v50  ;;  %v20591_v46 = vsel %vm373_vm0, %v20551_v30, 0.0  ;;  %v20533_v57 = vadd.f32 %v28668_v9, %v20512_v20  ;;  %v20714_v30 = vadd.s32 4294967208, %v29040_v53  ;;  %v20703_v50 = vsub.s32 %v20700_v25, %v29041_v37 }
0x1fe9   :  { %20592 = vadd.xlane.f32.xlu0 %v20591_v46  ;;  %v20532_v14 = vadd.f32 %v28668_v9, %v20511_v16  ;;  %v20560_v52 = vpop.xlane.xlu1 %20559  ;;  %v20651_v9 = vadd.s32 4294967280, %v29040_v53  ;;  %v20710_v16 = vsub.s32 %v20707_v60, %v29041_v37 }
0x1fea   :  { %v20554_v47 = vmul.f32 %v28675_v3, %v20533_v57  ;;  %v20557_v10 = vpop.xlane.xlu0 %20556 }
0x1feb   :  { %v20553_v8 = vmul.f32 %v28675_v3, %v20532_v14  ;;  %v20609_v3 = vadd.f32 %v28755_v55, %v20560_v52  ;;  %v20608_v35 = vadd.f32 %v28755_v55, %v20557_v10  ;;  %v20654_v19 = vsub.s32 %v20651_v9, %v29041_v37 }
0x1fec   :  { %v20600_v13 = vsel %vm373_vm0, %v20554_v47, 0.0  ;;  %v20717_v10 = vsub.s32 %v20714_v30, %v29041_v37 }
0x1fed   :  { %20601 = vadd.xlane.f32.xlu1 %v20600_v13  ;;  %v20597_v17 = vsel %vm373_vm0, %v20553_v8, 0.0  ;;  %v20566_v44 = vpop.xlane.xlu1 %20565  ;;  %v20648_v61 = vrot.slane %v20609_v3, %v20647_v1  ;;  %v20643_v29 = vrot.slane %v20608_v35, %v20642_v4  ;;  %v20721_v8 = vadd.s32 4294967200, %v29040_v53 }
0x1fee   :  { %20598 = vadd.xlane.f32.xlu0 %v20597_v17  ;;  %v20563_v15 = vpop.xlane.xlu0 %20562  ;;  %v20611_v0 = vadd.f32 %v28755_v55, %v20566_v44  ;;  %vm20719_vm0 = vcmask 786112  }
0x1fef   :  { %v20610_v7 = vadd.f32 %v28755_v55, %v20563_v15  ;;  %v20650_v41 = vsel %vm20649_vm6, %v20648_v61, %v20643_v29  ;;  %v20724_v4 = vsub.s32 %v20721_v8, %v29041_v37  ;;  %v20731_v61 = vsub.s32 %v20728_v58, %v29041_v37 }
0x1ff0   :  { %v20662_v2 = vrot.slane %v20611_v0, %v20661_v5 }
0x1ff1   :  { %v20572_v27 = vpop.xlane.xlu1 %20571  ;;  %v20655_v48 = vrot.slane %v20610_v7, %v20654_v19 }
0x1ff2   :  { %v20569_v45 = vpop.xlane.xlu0 %20568  ;;  %v20613_v23 = vadd.f32 %v28755_v55, %v20572_v27 }
0x1ff3   :  { %v20612_v24 = vadd.f32 %v28755_v55, %v20569_v45  ;;  %v20657_v42 = vsel %vm20656_vm7, %v20655_v48, %v20650_v41  ;;  %v20735_v45 = vadd.s32 4294967184, %v29040_v53 }
0x1ff4   :  { %v20664_v51 = vsel %vm20663_vm8, %v20662_v2, %v20657_v42  ;;  %v20676_v43 = vrot.slane %v20613_v23, %v20675_v38 }
0x1ff5   :  { %v20669_v28 = vrot.slane %v20612_v24, %v20668_v39  ;;  %v20578_v22 = vpop.xlane.xlu1 %20577  ;;  %v20738_v39 = vsub.s32 %v20735_v45, %v29041_v37 }
0x1ff6   :  { %v20575_v36 = vpop.xlane.xlu0 %20574  ;;  %v20615_v63 = vadd.f32 %v28755_v55, %v20578_v22 }
0x1ff7   :  { %v20614_v56 = vadd.f32 %v28755_v55, %v20575_v36  ;;  %v20671_v62 = vsel %vm20670_vm9, %v20669_v28, %v20664_v51 }
0x1ff8   :  { %v20678_v18 = vsel %vm20677_vm10, %v20676_v43, %v20671_v62  ;;  %v20690_v46 = vrot.slane %v20615_v63, %v20689_v54 }
0x1ff9   :  { %v20683_v33 = vrot.slane %v20614_v56, %v20682_v59 }
0x1ffb   :  { %v20685_v20 = vsel %vm20684_vm11, %v20683_v33, %v20678_v18 }
0x1ffc   :  { %v20692_v17 = vsel %vm20691_vm12, %v20690_v46, %v20685_v20 }
0x206d   :  { %v20584_v12 = vpop.xlane.xlu1 %20583 }
0x206e   :  { %v20581_v49 = vpop.xlane.xlu0 %20580  ;;  %v20617_v57 = vadd.f32 %v28755_v55, %v20584_v12 }
0x206f   :  { %v20616_v6 = vadd.f32 %v28755_v55, %v20581_v49 }
0x2070   :  { %v20704_v9 = vrot.slane %v20617_v57, %v20703_v50 }
0x2071   :  { %v20697_v14 = vrot.slane %v20616_v6, %v20696_v11  ;;  %v20590_v47 = vpop.xlane.xlu1 %20589 }
0x2072   :  { %v20587_v13 = vpop.xlane.xlu0 %20586  ;;  %v20619_v44 = vadd.f32 %v28755_v55, %v20590_v47 }
0x2073   :  { %v20618_v52 = vadd.f32 %v28755_v55, %v20587_v13  ;;  %v20699_v15 = vsel %vm20698_vm13, %v20697_v14, %v20692_v17 }
0x2074   :  { %v20706_v19 = vsel %vm20705_vm14, %v20704_v9, %v20699_v15  ;;  %v20718_v29 = vrot.slane %v20619_v44, %v20717_v10 }
0x2075   :  { %v20711_v1 = vrot.slane %v20618_v52, %v20710_v16  ;;  %v20596_v3 = vpop.xlane.xlu1 %20595 }
0x2076   :  { %v20593_v35 = vpop.xlane.xlu0 %20592  ;;  %v20621_v34 = vadd.f32 %v28755_v55, %v20596_v3 }
0x2077   :  { %v20620_v7 = vadd.f32 %v28755_v55, %v20593_v35  ;;  %v20713_v31 = vsel %vm20712_vm15, %v20711_v1, %v20706_v19 }
0x2078   :  { %v20720_v24 = vsel %vm20719_vm0, %v20718_v29, %v20713_v31  ;;  %v20732_v41 = vrot.slane %v20621_v34, %v20731_v61 }
0x2079   :  { %v20725_v27 = vrot.slane %v20620_v7, %v20724_v4 }
0x207a   :  { %v20602_v48 = vpop.xlane.xlu1 %20601 }
0x207b   :  { %v20623_v5 = vadd.f32 %v28755_v55, %v20602_v48  ;;  %v20599_v0 = vpop.xlane.xlu0 %20598  ;;  %v20727_v36 = vsel %vm20726_vm1, %v20725_v27, %v20720_v24 }
0x207c   :  { %v20622_v53 = vadd.f32 %v28755_v55, %v20599_v0  ;;  %v20734_v42 = vsel %vm20733_vm2, %v20732_v41, %v20727_v36 }
0x207d   :  { %v20746_v40 = vrot.slane %v20623_v5, %v20745_v32 }
0x207e   :  { %v20739_v38 = vrot.slane %v20622_v53, %v20738_v39 }
0x2080   :  { %v20741_v28 = vsel %vm20740_vm3, %v20739_v38, %v20734_v42 }
0x2081   :  { %v20748_v59 = vsel %vm20747_vm4, %v20746_v40, %v20741_v28 }
0x2082   :  { %20750 = vst [vmem:[#allocation2] sm:$0x1] %v20748_v59 }
0x2083   :  { %23893 = shalt.err (!%p23890_p4)
}
0x2084   :  { %s23894_s21 = scalar_lea.hbm %s28824_s8, 16 }
0x2085   :  { %p23895_p5 = scmp.ne.s32.totalorder %s28824_s8, %s23894_s21  ;;  %p23898_p6 = scmp.lt.u32.totalorder %s23894_s21, %s28824_s8 }
0x2087   :  { %p23900_p7 = pnand %p23898_p6, %p23895_p5 }
0x2089   :  { %23903 = shalt.err (!%p23900_p7)
}
0x208a   :  { %20760 = dma.vmem_to_hbm [thread:$0]  %s20758_s29, 16, %s28824_s8, [#allocation3]  }
0x208b   :  { %23904 = dma.done.wait [#allocation3], 16  }
0x208c   :  { %23905 = vsyncadd [#allocation3], 4294967280 }
0x208d   :  { %20764 = vsyncpa [#allocation3], 1 }

</bundles_post_ra>
